<compile_context>
chip_gen: v6e
topology: v6e:2x2x1
jax: 0.10.0
libtpu: 0.0.40
codegen_flags: <defaults>
</compile_context>

<pallas_src>
import functools

import jax
import jax.numpy as jnp
from jax.experimental import pallas as pl
from jax.experimental.pallas import tpu as pltpu

C = 768                # MViT-B embedding dim (hardcoded reshape(..., 768, ...) in torch)
NUM_CLASSES = 101      # default of Classification_model
NUM_CLASSES_PAD = 128  # pad class dim to a full 128-lane group
POOL = 7               # nn.AvgPool2d(7): spatial grid must be exactly 7x7


def _head_kernel(feat_ref, cls_ref, w_ref, b_ref, out_ref, acc_ref, *, inv_count):
    # feat: (Bt, 1, C, H*W) one temporal slice   cls: (Bt, C)
    # w: (C, 128)  b: (1, 128)  out: (Bt, 128)   acc: (Bt, C) f32 scratch
    t = pl.program_id(1)

    @pl.when(t == 0)
    def _init():
        acc_ref[...] = jnp.zeros_like(acc_ref)

    # Fused reduction: one spatial sum per temporal slice, accumulated over t.
    acc_ref[...] += jnp.sum(feat_ref[:, 0, :, :], axis=-1)

    @pl.when(t == pl.num_programs(1) - 1)
    def _finalize():
        # mean over (T,H,W) == accumulated sum * 1/(T*H*W).  The cls-token add commutes
        # with the means (linear), and AvgPool2d(7) == full spatial mean since H == W == 7.
        pooled = acc_ref[...] * inv_count + cls_ref[...]
        # TODO(synk): nn.Dropout(0.3) is inference-mode identity (no torch RNG parity);
        #             a training variant would use pltpu.prng_seed + stateful_bernoulli.
        out_ref[...] = (
            jnp.dot(pooled, w_ref[...], preferred_element_type=jnp.float32) + b_ref[...]
        )


def classification_head(x_tokens, thw, w, b):
    """x_tokens: (B, 1 + T*H*W, 768) float32 backbone features; w: (768, NC); b: (NC,)."""
    B, N, Cx = x_tokens.shape
    T, H, W = thw
    assert Cx == C and N == 1 + T * H * W and H == POOL and W == POOL
    HW = H * W

    # Torch-exact reinterpretation (raw row-major reshape), see layout NOTE above.
    spatial = x_tokens[:, 1:, :].reshape(B, T, C, HW)
    cls_tok = x_tokens[:, 0, :]                                  # (B, C)

    # Zero-pad the class dimension 101 -> 128 for lane-dense matmul N and output stores.
    w_pad = jnp.zeros((C, NUM_CLASSES_PAD), jnp.float32).at[:, :NUM_CLASSES].set(
        w.astype(jnp.float32))
    b_pad = jnp.zeros((1, NUM_CLASSES_PAD), jnp.float32).at[:, :NUM_CLASSES].set(
        b.astype(jnp.float32))

    # Batch tile: >= 8 rows per matmul when possible (sublane-full MXU pushes).
    bt = next(cand for cand in (8, 4, 2, 1) if B % cand == 0)
    grid = (B // bt, T)

    kernel = functools.partial(_head_kernel, inv_count=1.0 / float(T * HW))
    out = pl.pallas_call(
        kernel,
        out_shape=jax.ShapeDtypeStruct((B, NUM_CLASSES_PAD), jnp.float32),
        grid_spec=pltpu.PrefetchScalarGridSpec(
            num_scalar_prefetch=0,
            grid=grid,
            in_specs=[
                pl.BlockSpec((bt, 1, C, HW), lambda i, t: (i, t, 0, 0)),
                pl.BlockSpec((bt, C), lambda i, t: (i, 0)),
                pl.BlockSpec((C, NUM_CLASSES_PAD), lambda i, t: (0, 0)),
                pl.BlockSpec((1, NUM_CLASSES_PAD), lambda i, t: (0, 0)),
            ],
            out_specs=pl.BlockSpec((bt, NUM_CLASSES_PAD), lambda i, t: (i, 0)),
            scratch_shapes=[pltpu.VMEM((bt, C), jnp.float32)],
        ),
        compiler_params=pltpu.CompilerParams(
            dimension_semantics=("parallel", "arbitrary"),
        ),
    )(spatial, cls_tok, w_pad, b_pad)
    return out[:, :NUM_CLASSES]


def _ref(x_tokens, thw, w, b):
    """Pure-JAX reference mirroring the torch head line-by-line."""
    B = x_tokens.shape[0]
    T, H, W = thw
    out = x_tokens[:, 1:, :].reshape(B, T, C, H, W)
    cls = x_tokens[:, 0, :].reshape(B, 1, C, 1, 1)
    out = out + cls
    out = jnp.mean(out, axis=1)                      # mean over T -> (B, C, H, W)
    out = jnp.mean(out, axis=(2, 3))                 # AvgPool2d(7) on 7x7 -> (B, C)
    return out @ w + b                               # dropout is identity in eval


if __name__ == "__main__":
    key = jax.random.PRNGKey(0)
    B, T, H, W = 16, 2, 7, 7          # 16 clips, 2 temporal tokens, 7x7 spatial grid
    thw = (T, H, W)
    k1, k2, k3 = jax.random.split(key, 3)

    # Synthetic backbone features standing in for feature_model(video) -> (x, thw).
    x_tokens = jax.random.normal(k1, (B, 1 + T * H * W, C), dtype=jnp.float32)

    # Deterministic Linear(768, 101) params (PyTorch default-style uniform init).
    bound = 1.0 / float(jnp.sqrt(jnp.float32(C)))
    w = jax.random.uniform(k2, (C, NUM_CLASSES), minval=-bound, maxval=bound,
                           dtype=jnp.float32)
    b = jax.random.uniform(k3, (NUM_CLASSES,), minval=-bound, maxval=bound,
                           dtype=jnp.float32)

    out = classification_head(x_tokens, thw, w, b)
    out = jax.block_until_ready(out)

    ref = _ref(x_tokens, thw, w, b)
    assert out.shape == (B, NUM_CLASSES)
    assert jnp.allclose(out, ref, atol=1e-3, rtol=1e-3), "mismatch vs reference"
    print("KERNEL_OK")
</pallas_src>

<mosaic_0001>
module attributes {stable_mosaic.version = 11 : i64} {
  func.func @_head_kernel(%arg0: i32, %arg1: i32, %arg2: memref<8x1x768x49xf32, #tpu.memory_space<vmem>>, %arg3: memref<8x768xf32, #tpu.memory_space<vmem>>, %arg4: memref<768x128xf32, #tpu.memory_space<vmem>>, %arg5: memref<1x128xf32, #tpu.memory_space<vmem>>, %arg6: memref<8x128xf32, #tpu.memory_space<vmem>>, %arg7: memref<8x768xf32, #tpu.memory_space<vmem>>) attributes {dimension_semantics = [#tpu.dimension_semantics<parallel>, #tpu.dimension_semantics<arbitrary>], iteration_bounds = array<i64: 2, 2>, scalar_prefetch = 0 : i64, scratch_operands = 1 : i64, tpu.core_type = #tpu.core_type<tc>, window_params = [{transform_indices = @transform_0, window_bounds = array<i64: 8, 1, 768, 49>}, {transform_indices = @transform_1, window_bounds = array<i64: 8, 768>}, {pipeline_mode = #tpu.pipeline_mode<synchronous>, transform_indices = @transform_2, window_bounds = array<i64: 768, 128>}, {pipeline_mode = #tpu.pipeline_mode<synchronous>, transform_indices = @transform_3, window_bounds = array<i64: 1, 128>}, {transform_indices = @transform_4, window_bounds = array<i64: 8, 128>}]} {
    %c0_i32 = arith.constant 0 : i32
    %0 = arith.cmpi eq, %arg1, %c0_i32 : i32
    %1 = arith.extui %0 : i1 to i32
    %c0_i32_0 = arith.constant 0 : i32
    %2 = arith.cmpi ne, %1, %c0_i32_0 : i32
    scf.if %2 {
      %cst_9 = arith.constant 0.000000e+00 : f32
      %12 = vector.broadcast %cst_9 : f32 to vector<8x768xf32>
      %c0_10 = arith.constant 0 : index
      %c0_11 = arith.constant 0 : index
      %13 = vector.load %arg7[%c0_10, %c0_11] : memref<8x768xf32, #tpu.memory_space<vmem>>, vector<8x768xf32>
      tpu.vector_store %arg7[%c0_10, %c0_11], %12 {strides = array<i32>} : memref<8x768xf32, #tpu.memory_space<vmem>>, vector<8x768xf32>,
    } else {
    }
    %c0 = arith.constant 0 : index
    %c0_1 = arith.constant 0 : index
    %3 = vector.load %arg7[%c0, %c0_1] : memref<8x768xf32, #tpu.memory_space<vmem>>, vector<8x768xf32>
    %c0_2 = arith.constant 0 : index
    %c0_3 = arith.constant 0 : index
    %c0_4 = arith.constant 0 : index
    %c0_5 = arith.constant 0 : index
    %4 = vector.load %arg2[%c0_2, %c0_3, %c0_4, %c0_5] : memref<8x1x768x49xf32, #tpu.memory_space<vmem>>, vector<8x1x768x49xf32>
    %5 = vector.shape_cast %4 : vector<8x1x768x49xf32> to vector<8x768x49xf32>
    %cst = arith.constant dense<0.000000e+00> : vector<8x768xf32>
    %6 = vector.multi_reduction <add>, %5, %cst [2] : vector<8x768x49xf32> to vector<8x768xf32>
    %7 = arith.addf %3, %6 : vector<8x768xf32>
    %c0_6 = arith.constant 0 : index
    %c0_7 = arith.constant 0 : index
    %8 = vector.load %arg7[%c0_6, %c0_7] : memref<8x768xf32, #tpu.memory_space<vmem>>, vector<8x768xf32>
    tpu.vector_store %arg7[%c0_6, %c0_7], %7 {strides = array<i32>} : memref<8x768xf32, #tpu.memory_space<vmem>>, vector<8x768xf32>,
    %c1_i32 = arith.constant 1 : i32
    %9 = arith.cmpi eq, %arg1, %c1_i32 : i32
    %10 = arith.extui %9 : i1 to i32
    %c0_i32_8 = arith.constant 0 : i32
    %11 = arith.cmpi ne, %10, %c0_i32_8 : i32
    scf.if %11 {
      %c0_9 = arith.constant 0 : index
      %c0_10 = arith.constant 0 : index
      %12 = vector.load %arg7[%c0_9, %c0_10] : memref<8x768xf32, #tpu.memory_space<vmem>>, vector<8x768xf32>
      %cst_11 = arith.constant 0.0102040814 : f32
      %13 = vector.broadcast %cst_11 : f32 to vector<8x768xf32>
      %14 = arith.mulf %12, %13 : vector<8x768xf32>
      %c0_12 = arith.constant 0 : index
      %c0_13 = arith.constant 0 : index
      %15 = vector.load %arg3[%c0_12, %c0_13] : memref<8x768xf32, #tpu.memory_space<vmem>>, vector<8x768xf32>
      %16 = arith.addf %14, %15 : vector<8x768xf32>
      %c0_14 = arith.constant 0 : index
      %c0_15 = arith.constant 0 : index
      %17 = vector.load %arg4[%c0_14, %c0_15] : memref<768x128xf32, #tpu.memory_space<vmem>>, vector<768x128xf32>
      %cst_16 = arith.constant dense<0.000000e+00> : vector<8x128xf32>
      %18 = tpu.matmul %16, %17, %cst_16 {dimension_numbers = #tpu.dot_dimension_numbers<[1], [0], [0], [1], [0, 0, 1, 1], [], []>} : vector<8x768xf32>, vector<768x128xf32>, vector<8x128xf32> -> vector<8x128xf32>
      %c0_17 = arith.constant 0 : index
      %c0_18 = arith.constant 0 : index
      %19 = vector.load %arg5[%c0_17, %c0_18] : memref<1x128xf32, #tpu.memory_space<vmem>>, vector<1x128xf32>
      %20 = vector.broadcast %19 : vector<1x128xf32> to vector<8x128xf32>
      %21 = arith.addf %18, %20 : vector<8x128xf32>
      %c0_19 = arith.constant 0 : index
      %c0_20 = arith.constant 0 : index
      %22 = vector.load %arg6[%c0_19, %c0_20] : memref<8x128xf32, #tpu.memory_space<vmem>>, vector<8x128xf32>
      tpu.vector_store %arg6[%c0_19, %c0_20], %21 {strides = array<i32>} : memref<8x128xf32, #tpu.memory_space<vmem>>, vector<8x128xf32>,
    } else {
    }
    return
  }
  func.func @transform_0(%arg0: i32, %arg1: i32) -> (i32, i32, i32, i32) {
    %c0_i32 = arith.constant 0 : i32
    %c0_i32_0 = arith.constant 0 : i32
    %c0_i32_1 = arith.constant 0 : i32
    return %arg0, %arg1, %c0_i32, %c0_i32_0 : i32, i32, i32, i32
  }
  func.func @transform_1(%arg0: i32, %arg1: i32) -> (i32, i32) {
    %c0_i32 = arith.constant 0 : i32
    %c0_i32_0 = arith.constant 0 : i32
    return %arg0, %c0_i32 : i32, i32
  }
  func.func @transform_2(%arg0: i32, %arg1: i32) -> (i32, i32) {
    %c0_i32 = arith.constant 0 : i32
    %c0_i32_0 = arith.constant 0 : i32
    %c0_i32_1 = arith.constant 0 : i32
    return %c0_i32, %c0_i32_0 : i32, i32
  }
  func.func @transform_3(%arg0: i32, %arg1: i32) -> (i32, i32) {
    %c0_i32 = arith.constant 0 : i32
    %c0_i32_0 = arith.constant 0 : i32
    %c0_i32_1 = arith.constant 0 : i32
    return %c0_i32, %c0_i32_0 : i32, i32
  }
  func.func @transform_4(%arg0: i32, %arg1: i32) -> (i32, i32) {
    %c0_i32 = arith.constant 0 : i32
    %c0_i32_0 = arith.constant 0 : i32
    return %arg0, %c0_i32 : i32, i32
  }
}

</mosaic_0001>

<bundles_post_ra>
// kernel: tpu_custom_call.1
= control target key start
LH: loop header
LB: loop body
LE: loop exit
PB: predicated region body
PF: predicated region fallthrough
CT: control target
= control target key end

     0   :  { %s20317_s0 = inlined_call_operand.vmem [shape: f32[16,2,768,49], index: 0, kind: input, shape index: {}]   ;;  %s20318_s1 = inlined_call_operand.vmem [shape: f32[16,768], index: 1, kind: input, shape index: {}]   ;;  %s20319_s2 = inlined_call_operand.vmem [shape: f32[768,128], index: 2, kind: input, shape index: {}]   ;;  %s20320_s3 = inlined_call_operand.vmem [shape: f32[1,128], index: 3, kind: input, shape index: {}]   ;;  %s20321_s4 = inlined_call_operand.hbm [shape: f32[16,128], index: 4, kind: output, shape index: {}]  }
   0x1   :  { %20325 = sst [smem:[#allocation7_spill]] %s20317_s0 }
   0x2   :  { %9 = vsyncpa [#allocation5], 0 }
   0x3   :  { %11 = vsyncpa [#allocation5 + $0x1], 0  ;;  %s15006_s15 = smov 0   ;;  %s15008_s16 = smov 0  }
   0x4   :  { %s15010_s17 = smov 0   ;;  %s15012_s18 = smov 0  }
   0x5   :  { %s15014_s19 = smov 0   ;;  %s15016_s20 = smov 0  }
   0x6   :  { %s15018_s21 = smov 0   ;;  %s15020_s22 = smov 0  }
   0x7   :  { %s15022_s23 = smov 0   ;;  %s15024_s24 = smov 0  }
   0x8 LB: > { %s14654_s25 = sadd.s32 4294967295, %s14977_s24   ;;  %s14655_s26 = sadd.s32 4294967294, %s14977_s24   ;;  %s14977_s24 = sphi %s15024_s24, %s17_s24   ;;  %s14973_s23 = sphi %s15022_s23, %s20414_s23   ;;  %s14969_s22 = sphi %s15020_s22, %s20413_s22   ;;  %s14965_s21 = sphi %s15018_s21, %s20412_s21   ;;  %s14961_s20 = sphi %s15016_s20, %s20411_s20   ;;  %s14957_s19 = sphi %s15014_s19, %s20410_s19   ;;  %s14953_s18 = sphi %s15012_s18, %s20409_s18   ;;  %s14949_s17 = sphi %s15010_s17, %s20408_s17   ;;  %s14945_s16 = sphi %s15008_s16, %s20407_s16   ;;  %s14941_s15 = sphi %s15006_s15, %s20406_s15  }
   0x9   : > { %s26_s27 = sadd.s32 1, %s14969_s22  ;;  %s29_s28 = sadd.s32 1, %s14973_s23 }
   0xa   : > { %p27_p0 = scmp.ge.s32.totalorder %s26_s27, 2  ;;  %s38_s29 = sadd.s32 1, %s14957_s19 }
   0xb   : > { %p45_p1 = scmp.ne.s32.totalorder %s14957_s19, %s14953_s18  ;;  %p46_p2 = scmp.eq.s32.totalorder %s14977_s24, 0 }
   0xc   : > { %s20416_s27 = smov (%p27_p0, %s26_s27), 0  ;;  %s20418_s28 = smov (!%p27_p0, %s29_s28), %s14973_s23 }
   0xd   : > { %s34_s30 = ssub.s32 %s14969_s22, %s20416_s27  ;;  %p15069_p3 = por %p46_p2, %p45_p1 }
   0xe   : > { %p31_p4 = scmp.ge.s32.totalorder %s20418_s28, 2  ;;  %s132_s6 = sadd.s32 1, %s14949_s17 }
   0xf   : > { %p142_p5 = scmp.ne.s32.totalorder %s14949_s17, %s14945_s16  ;;  %p143_p6 = scmp.eq.s32.totalorder %s14654_s25, 3 }
  0x10   : > { %s20420_s28 = smov (%p31_p4, %s20418_s28), 0  ;;  %p148_p8 = scmp.ne.s32.totalorder %s14945_s16, %s14941_s15 }
  0x11   : > { %p15078_p7 = por %p143_p6, %p142_p5  ;;  %s33_s8 = ssub.s32 %s14973_s23, %s20420_s28 }
  0x12   : > { %p149_p9 = scmp.eq.s32.totalorder %s14655_s26, 3  ;;  %s35_s9 = sor.u32 %s34_s30, %s33_s8 }
  0x13   : > { %p130_p10 = scmp.eq.s32.totalorder %s33_s8, 0  ;;  %p36_p11 = scmp.eq.s32.totalorder %s35_s9, 0 }
  0x14   : > { %p15086_p12 = por %p149_p9, %p148_p8  ;;  %p14657_p13 = scmp.ge.s32.totalorder %s14977_s24, 4 }
  0x15   : > { %s15091_s11 = scalar_select %p130_p10, %s14949_s17, %s132_s6  }
  0x16   : > { %s15094_s12 = scalar_select %p36_p11, %s14957_s19, %s38_s29  }
  0x17   : > { %171 = sbr.rel (%p14657_p13) target bundleno = 421 (0x1a5), region = 24 }
  0x1c   : > { %174 = sbr.rel (!%p15069_p3) target bundleno = 421 (0x1a5), region = 28  ;;  %s176_s13 = sand.u32 (%p15069_p3), 1, %s14957_s19  }
  0x1d   : > { %s14777_s14 = smul.u32 (%p15069_p3), 96, %s14969_s22  ;;  %s20329_s0 = sld [smem:[#allocation7_spill]] (%p15069_p3) }
  0x1e   : > { %s14776_s25 = smul.u32 (%p15069_p3), 6144, %s176_s13 }
  0x1f   : > { %s14778_s26 = smul.u32 (%p15069_p3), 1536, %s14973_s23 }
  0x20   : > { %s15110_s5 = scalar_lea.vmem (%p15069_p3), [#allocation3], %s14776_s25 }
  0x21   : > { %s182_s30 = sadd.s32 %s14778_s26, %s14777_s14 }
  0x22   : > { %s14660_s8 = sshll.u32 %s182_s30, 3 }
  0x23   : > { %s15105_s29 = scalar_lea.vmem %s20329_s0, %s14660_s8 }
  0x24   : > { %v1750_v0 = vld [vmem:[%s15105_s29] sm:$0xff]  ;;  %v1752_v1 = vld [vmem:[%s15105_s29 + $0x8] sm:$0xff]  ;;  %v1754_v2 = vld [vmem:[%s15105_s29 + $0x10] sm:$0xff] }
  0x25   : > { %1751 = vst [vmem:[%s15110_s5] sm:$0xff] %v1750_v0  ;;  %1753 = vst [vmem:[%s15110_s5 + $0x8] sm:$0xff] %v1752_v1  ;;  %v1756_v3 = vld [vmem:[%s15105_s29 + $0x18] sm:$0xff]  ;;  %v1758_v4 = vld [vmem:[%s15105_s29 + $0x20] sm:$0xff] }
  0x26   : > { %1755 = vst [vmem:[%s15110_s5 + $0x10] sm:$0xff] %v1754_v2  ;;  %v1760_v5 = vld [vmem:[%s15105_s29 + $0x28] sm:$0xff]  ;;  %1757 = vst [vmem:[%s15110_s5 + $0x18] sm:$0xff] %v1756_v3  ;;  %v1762_v6 = vld [vmem:[%s15105_s29 + $0x30] sm:$0xff] }
  0x27   : > { %1759 = vst [vmem:[%s15110_s5 + $0x20] sm:$0xff] %v1758_v4  ;;  %1761 = vst [vmem:[%s15110_s5 + $0x28] sm:$0xff] %v1760_v5  ;;  %v1764_v7 = vld [vmem:[%s15105_s29 + $0x38] sm:$0xff]  ;;  %v1766_v8 = vld [vmem:[%s15105_s29 + $0x40] sm:$0xff] }
  0x28   : > { %1763 = vst [vmem:[%s15110_s5 + $0x30] sm:$0xff] %v1762_v6  ;;  %1765 = vst [vmem:[%s15110_s5 + $0x38] sm:$0xff] %v1764_v7  ;;  %v1768_v9 = vld [vmem:[%s15105_s29 + $0x48] sm:$0xff]  ;;  %v1770_v10 = vld [vmem:[%s15105_s29 + $0x50] sm:$0xff] }
  0x29   : > { %1767 = vst [vmem:[%s15110_s5 + $0x40] sm:$0xff] %v1766_v8  ;;  %v1772_v11 = vld [vmem:[%s15105_s29 + $0x58] sm:$0xff]  ;;  %1769 = vst [vmem:[%s15110_s5 + $0x48] sm:$0xff] %v1768_v9  ;;  %v1774_v12 = vld [vmem:[%s15105_s29 + $0x60] sm:$0xff] }
  0x2a   : > { %1771 = vst [vmem:[%s15110_s5 + $0x50] sm:$0xff] %v1770_v10  ;;  %1773 = vst [vmem:[%s15110_s5 + $0x58] sm:$0xff] %v1772_v11  ;;  %v1776_v13 = vld [vmem:[%s15105_s29 + $0x68] sm:$0xff]  ;;  %v1778_v14 = vld [vmem:[%s15105_s29 + $0x70] sm:$0xff] }
  0x2b   : > { %1775 = vst [vmem:[%s15110_s5 + $0x60] sm:$0xff] %v1774_v12  ;;  %1777 = vst [vmem:[%s15110_s5 + $0x68] sm:$0xff] %v1776_v13  ;;  %v1780_v15 = vld [vmem:[%s15105_s29 + $0x78] sm:$0xff]  ;;  %v1782_v16 = vld [vmem:[%s15105_s29 + $0x80] sm:$0xff] }
  0x2c   : > { %1779 = vst [vmem:[%s15110_s5 + $0x70] sm:$0xff] %v1778_v14  ;;  %v1784_v17 = vld [vmem:[%s15105_s29 + $0x88] sm:$0xff]  ;;  %1781 = vst [vmem:[%s15110_s5 + $0x78] sm:$0xff] %v1780_v15  ;;  %v1786_v18 = vld [vmem:[%s15105_s29 + $0x90] sm:$0xff] }
  0x2d   : > { %1783 = vst [vmem:[%s15110_s5 + $0x80] sm:$0xff] %v1782_v16  ;;  %1785 = vst [vmem:[%s15110_s5 + $0x88] sm:$0xff] %v1784_v17  ;;  %v1788_v19 = vld [vmem:[%s15105_s29 + $0x98] sm:$0xff]  ;;  %v1790_v20 = vld [vmem:[%s15105_s29 + $0xa0] sm:$0xff] }
  0x2e   : > { %1787 = vst [vmem:[%s15110_s5 + $0x90] sm:$0xff] %v1786_v18  ;;  %1789 = vst [vmem:[%s15110_s5 + $0x98] sm:$0xff] %v1788_v19  ;;  %v1792_v21 = vld [vmem:[%s15105_s29 + $0xa8] sm:$0xff]  ;;  %v1794_v22 = vld [vmem:[%s15105_s29 + $0xb0] sm:$0xff] }
  0x2f   : > { %1791 = vst [vmem:[%s15110_s5 + $0xa0] sm:$0xff] %v1790_v20  ;;  %v1796_v23 = vld [vmem:[%s15105_s29 + $0xb8] sm:$0xff]  ;;  %1793 = vst [vmem:[%s15110_s5 + $0xa8] sm:$0xff] %v1792_v21  ;;  %v1798_v24 = vld [vmem:[%s15105_s29 + $0xc0] sm:$0xff] }
  0x30   : > { %1795 = vst [vmem:[%s15110_s5 + $0xb0] sm:$0xff] %v1794_v22  ;;  %1797 = vst [vmem:[%s15110_s5 + $0xb8] sm:$0xff] %v1796_v23  ;;  %v1800_v25 = vld [vmem:[%s15105_s29 + $0xc8] sm:$0xff]  ;;  %v1802_v26 = vld [vmem:[%s15105_s29 + $0xd0] sm:$0xff] }
  0x31   : > { %1799 = vst [vmem:[%s15110_s5 + $0xc0] sm:$0xff] %v1798_v24  ;;  %1801 = vst [vmem:[%s15110_s5 + $0xc8] sm:$0xff] %v1800_v25  ;;  %v1804_v27 = vld [vmem:[%s15105_s29 + $0xd8] sm:$0xff]  ;;  %v1806_v28 = vld [vmem:[%s15105_s29 + $0xe0] sm:$0xff] }
  0x32   : > { %1803 = vst [vmem:[%s15110_s5 + $0xd0] sm:$0xff] %v1802_v26  ;;  %v1808_v29 = vld [vmem:[%s15105_s29 + $0xe8] sm:$0xff]  ;;  %1805 = vst [vmem:[%s15110_s5 + $0xd8] sm:$0xff] %v1804_v27  ;;  %v1810_v30 = vld [vmem:[%s15105_s29 + $0xf0] sm:$0xff] }
  0x33   : > { %1807 = vst [vmem:[%s15110_s5 + $0xe0] sm:$0xff] %v1806_v28  ;;  %1809 = vst [vmem:[%s15110_s5 + $0xe8] sm:$0xff] %v1808_v29  ;;  %v1812_v31 = vld [vmem:[%s15105_s29 + $0xf8] sm:$0xff]  ;;  %v1814_v32 = vld [vmem:[%s15105_s29 + $0x100] sm:$0xff] }
  0x34   : > { %1811 = vst [vmem:[%s15110_s5 + $0xf0] sm:$0xff] %v1810_v30  ;;  %1813 = vst [vmem:[%s15110_s5 + $0xf8] sm:$0xff] %v1812_v31  ;;  %v1816_v33 = vld [vmem:[%s15105_s29 + $0x108] sm:$0xff]  ;;  %v1818_v34 = vld [vmem:[%s15105_s29 + $0x110] sm:$0xff] }
  0x35   : > { %1815 = vst [vmem:[%s15110_s5 + $0x100] sm:$0xff] %v1814_v32  ;;  %v1820_v35 = vld [vmem:[%s15105_s29 + $0x118] sm:$0xff]  ;;  %1817 = vst [vmem:[%s15110_s5 + $0x108] sm:$0xff] %v1816_v33  ;;  %v1822_v36 = vld [vmem:[%s15105_s29 + $0x120] sm:$0xff] }
  0x36   : > { %1819 = vst [vmem:[%s15110_s5 + $0x110] sm:$0xff] %v1818_v34  ;;  %1821 = vst [vmem:[%s15110_s5 + $0x118] sm:$0xff] %v1820_v35  ;;  %v1824_v37 = vld [vmem:[%s15105_s29 + $0x128] sm:$0xff]  ;;  %v1826_v38 = vld [vmem:[%s15105_s29 + $0x130] sm:$0xff] }
  0x37   : > { %1823 = vst [vmem:[%s15110_s5 + $0x120] sm:$0xff] %v1822_v36  ;;  %1825 = vst [vmem:[%s15110_s5 + $0x128] sm:$0xff] %v1824_v37  ;;  %v1828_v39 = vld [vmem:[%s15105_s29 + $0x138] sm:$0xff]  ;;  %v1830_v40 = vld [vmem:[%s15105_s29 + $0x140] sm:$0xff] }
  0x38   : > { %1827 = vst [vmem:[%s15110_s5 + $0x130] sm:$0xff] %v1826_v38  ;;  %v1832_v41 = vld [vmem:[%s15105_s29 + $0x148] sm:$0xff]  ;;  %1829 = vst [vmem:[%s15110_s5 + $0x138] sm:$0xff] %v1828_v39  ;;  %v1834_v42 = vld [vmem:[%s15105_s29 + $0x150] sm:$0xff] }
  0x39   : > { %1831 = vst [vmem:[%s15110_s5 + $0x140] sm:$0xff] %v1830_v40  ;;  %1833 = vst [vmem:[%s15110_s5 + $0x148] sm:$0xff] %v1832_v41  ;;  %v1836_v43 = vld [vmem:[%s15105_s29 + $0x158] sm:$0xff]  ;;  %v1838_v44 = vld [vmem:[%s15105_s29 + $0x160] sm:$0xff] }
  0x3a   : > { %1835 = vst [vmem:[%s15110_s5 + $0x150] sm:$0xff] %v1834_v42  ;;  %1837 = vst [vmem:[%s15110_s5 + $0x158] sm:$0xff] %v1836_v43  ;;  %v1840_v45 = vld [vmem:[%s15105_s29 + $0x168] sm:$0xff]  ;;  %v1842_v46 = vld [vmem:[%s15105_s29 + $0x170] sm:$0xff] }
  0x3b   : > { %1839 = vst [vmem:[%s15110_s5 + $0x160] sm:$0xff] %v1838_v44  ;;  %v1844_v47 = vld [vmem:[%s15105_s29 + $0x178] sm:$0xff]  ;;  %1841 = vst [vmem:[%s15110_s5 + $0x168] sm:$0xff] %v1840_v45  ;;  %v1846_v48 = vld [vmem:[%s15105_s29 + $0x180] sm:$0xff] }
  0x3c   : > { %1843 = vst [vmem:[%s15110_s5 + $0x170] sm:$0xff] %v1842_v46  ;;  %1845 = vst [vmem:[%s15110_s5 + $0x178] sm:$0xff] %v1844_v47  ;;  %v1848_v49 = vld [vmem:[%s15105_s29 + $0x188] sm:$0xff]  ;;  %v1850_v50 = vld [vmem:[%s15105_s29 + $0x190] sm:$0xff] }
  0x3d   : > { %1847 = vst [vmem:[%s15110_s5 + $0x180] sm:$0xff] %v1846_v48  ;;  %1849 = vst [vmem:[%s15110_s5 + $0x188] sm:$0xff] %v1848_v49  ;;  %v1852_v51 = vld [vmem:[%s15105_s29 + $0x198] sm:$0xff]  ;;  %v1854_v52 = vld [vmem:[%s15105_s29 + $0x1a0] sm:$0xff] }
  0x3e   : > { %1851 = vst [vmem:[%s15110_s5 + $0x190] sm:$0xff] %v1850_v50  ;;  %v1856_v53 = vld [vmem:[%s15105_s29 + $0x1a8] sm:$0xff]  ;;  %1853 = vst [vmem:[%s15110_s5 + $0x198] sm:$0xff] %v1852_v51  ;;  %v1858_v54 = vld [vmem:[%s15105_s29 + $0x1b0] sm:$0xff] }
  0x3f   : > { %1855 = vst [vmem:[%s15110_s5 + $0x1a0] sm:$0xff] %v1854_v52  ;;  %1857 = vst [vmem:[%s15110_s5 + $0x1a8] sm:$0xff] %v1856_v53  ;;  %v1860_v55 = vld [vmem:[%s15105_s29 + $0x1b8] sm:$0xff]  ;;  %v1862_v56 = vld [vmem:[%s15105_s29 + $0x1c0] sm:$0xff] }
  0x40   : > { %1859 = vst [vmem:[%s15110_s5 + $0x1b0] sm:$0xff] %v1858_v54  ;;  %1861 = vst [vmem:[%s15110_s5 + $0x1b8] sm:$0xff] %v1860_v55  ;;  %v1864_v57 = vld [vmem:[%s15105_s29 + $0x1c8] sm:$0xff]  ;;  %v1866_v58 = vld [vmem:[%s15105_s29 + $0x1d0] sm:$0xff] }
  0x41   : > { %1863 = vst [vmem:[%s15110_s5 + $0x1c0] sm:$0xff] %v1862_v56  ;;  %v1868_v59 = vld [vmem:[%s15105_s29 + $0x1d8] sm:$0xff]  ;;  %1865 = vst [vmem:[%s15110_s5 + $0x1c8] sm:$0xff] %v1864_v57  ;;  %v1870_v60 = vld [vmem:[%s15105_s29 + $0x1e0] sm:$0xff] }
  0x42   : > { %1867 = vst [vmem:[%s15110_s5 + $0x1d0] sm:$0xff] %v1866_v58  ;;  %1869 = vst [vmem:[%s15110_s5 + $0x1d8] sm:$0xff] %v1868_v59  ;;  %v1872_v61 = vld [vmem:[%s15105_s29 + $0x1e8] sm:$0xff]  ;;  %v1874_v62 = vld [vmem:[%s15105_s29 + $0x1f0] sm:$0xff] }
  0x43   : > { %1871 = vst [vmem:[%s15110_s5 + $0x1e0] sm:$0xff] %v1870_v60  ;;  %1873 = vst [vmem:[%s15110_s5 + $0x1e8] sm:$0xff] %v1872_v61  ;;  %v1876_v63 = vld [vmem:[%s15105_s29 + $0x1f8] sm:$0xff]  ;;  %v1878_v0 = vld [vmem:[%s15105_s29 + $0x200] sm:$0xff] }
  0x44   : > { %1875 = vst [vmem:[%s15110_s5 + $0x1f0] sm:$0xff] %v1874_v62  ;;  %v1880_v1 = vld [vmem:[%s15105_s29 + $0x208] sm:$0xff]  ;;  %1877 = vst [vmem:[%s15110_s5 + $0x1f8] sm:$0xff] %v1876_v63  ;;  %v1882_v2 = vld [vmem:[%s15105_s29 + $0x210] sm:$0xff] }
  0x45   : > { %1879 = vst [vmem:[%s15110_s5 + $0x200] sm:$0xff] %v1878_v0  ;;  %1881 = vst [vmem:[%s15110_s5 + $0x208] sm:$0xff] %v1880_v1  ;;  %v1884_v3 = vld [vmem:[%s15105_s29 + $0x218] sm:$0xff]  ;;  %v1886_v4 = vld [vmem:[%s15105_s29 + $0x220] sm:$0xff] }
  0x46   : > { %1883 = vst [vmem:[%s15110_s5 + $0x210] sm:$0xff] %v1882_v2  ;;  %1885 = vst [vmem:[%s15110_s5 + $0x218] sm:$0xff] %v1884_v3  ;;  %v1888_v5 = vld [vmem:[%s15105_s29 + $0x228] sm:$0xff]  ;;  %v1890_v6 = vld [vmem:[%s15105_s29 + $0x230] sm:$0xff] }
  0x47   : > { %1887 = vst [vmem:[%s15110_s5 + $0x220] sm:$0xff] %v1886_v4  ;;  %v1892_v7 = vld [vmem:[%s15105_s29 + $0x238] sm:$0xff]  ;;  %1889 = vst [vmem:[%s15110_s5 + $0x228] sm:$0xff] %v1888_v5  ;;  %v1894_v8 = vld [vmem:[%s15105_s29 + $0x240] sm:$0xff] }
  0x48   : > { %1891 = vst [vmem:[%s15110_s5 + $0x230] sm:$0xff] %v1890_v6  ;;  %1893 = vst [vmem:[%s15110_s5 + $0x238] sm:$0xff] %v1892_v7  ;;  %v1896_v9 = vld [vmem:[%s15105_s29 + $0x248] sm:$0xff]  ;;  %v1898_v10 = vld [vmem:[%s15105_s29 + $0x250] sm:$0xff] }
  0x49   : > { %1895 = vst [vmem:[%s15110_s5 + $0x240] sm:$0xff] %v1894_v8  ;;  %1897 = vst [vmem:[%s15110_s5 + $0x248] sm:$0xff] %v1896_v9  ;;  %v1900_v11 = vld [vmem:[%s15105_s29 + $0x258] sm:$0xff]  ;;  %v1902_v12 = vld [vmem:[%s15105_s29 + $0x260] sm:$0xff] }
  0x4a   : > { %1899 = vst [vmem:[%s15110_s5 + $0x250] sm:$0xff] %v1898_v10  ;;  %v1904_v13 = vld [vmem:[%s15105_s29 + $0x268] sm:$0xff]  ;;  %1901 = vst [vmem:[%s15110_s5 + $0x258] sm:$0xff] %v1900_v11  ;;  %v1906_v14 = vld [vmem:[%s15105_s29 + $0x270] sm:$0xff] }
  0x4b   : > { %1903 = vst [vmem:[%s15110_s5 + $0x260] sm:$0xff] %v1902_v12  ;;  %1905 = vst [vmem:[%s15110_s5 + $0x268] sm:$0xff] %v1904_v13  ;;  %v1908_v15 = vld [vmem:[%s15105_s29 + $0x278] sm:$0xff]  ;;  %v1910_v16 = vld [vmem:[%s15105_s29 + $0x280] sm:$0xff] }
  0x4c   : > { %1907 = vst [vmem:[%s15110_s5 + $0x270] sm:$0xff] %v1906_v14  ;;  %1909 = vst [vmem:[%s15110_s5 + $0x278] sm:$0xff] %v1908_v15  ;;  %v1912_v17 = vld [vmem:[%s15105_s29 + $0x288] sm:$0xff]  ;;  %v1914_v18 = vld [vmem:[%s15105_s29 + $0x290] sm:$0xff] }
  0x4d   : > { %1911 = vst [vmem:[%s15110_s5 + $0x280] sm:$0xff] %v1910_v16  ;;  %v1916_v19 = vld [vmem:[%s15105_s29 + $0x298] sm:$0xff]  ;;  %1913 = vst [vmem:[%s15110_s5 + $0x288] sm:$0xff] %v1912_v17  ;;  %v1918_v20 = vld [vmem:[%s15105_s29 + $0x2a0] sm:$0xff] }
  0x4e   : > { %1915 = vst [vmem:[%s15110_s5 + $0x290] sm:$0xff] %v1914_v18  ;;  %1917 = vst [vmem:[%s15110_s5 + $0x298] sm:$0xff] %v1916_v19  ;;  %v1920_v21 = vld [vmem:[%s15105_s29 + $0x2a8] sm:$0xff]  ;;  %v1922_v22 = vld [vmem:[%s15105_s29 + $0x2b0] sm:$0xff] }
  0x4f   : > { %1919 = vst [vmem:[%s15110_s5 + $0x2a0] sm:$0xff] %v1918_v20  ;;  %1921 = vst [vmem:[%s15110_s5 + $0x2a8] sm:$0xff] %v1920_v21  ;;  %v1924_v23 = vld [vmem:[%s15105_s29 + $0x2b8] sm:$0xff]  ;;  %v1926_v24 = vld [vmem:[%s15105_s29 + $0x2c0] sm:$0xff] }
  0x50   : > { %1923 = vst [vmem:[%s15110_s5 + $0x2b0] sm:$0xff] %v1922_v22  ;;  %v1928_v25 = vld [vmem:[%s15105_s29 + $0x2c8] sm:$0xff]  ;;  %1925 = vst [vmem:[%s15110_s5 + $0x2b8] sm:$0xff] %v1924_v23  ;;  %v1930_v26 = vld [vmem:[%s15105_s29 + $0x2d0] sm:$0xff] }
  0x51   : > { %1927 = vst [vmem:[%s15110_s5 + $0x2c0] sm:$0xff] %v1926_v24  ;;  %1929 = vst [vmem:[%s15110_s5 + $0x2c8] sm:$0xff] %v1928_v25  ;;  %v1932_v27 = vld [vmem:[%s15105_s29 + $0x2d8] sm:$0xff]  ;;  %v1934_v28 = vld [vmem:[%s15105_s29 + $0x2e0] sm:$0xff] }
  0x52   : > { %1931 = vst [vmem:[%s15110_s5 + $0x2d0] sm:$0xff] %v1930_v26  ;;  %1933 = vst [vmem:[%s15110_s5 + $0x2d8] sm:$0xff] %v1932_v27  ;;  %v1936_v29 = vld [vmem:[%s15105_s29 + $0x2e8] sm:$0xff]  ;;  %v1938_v30 = vld [vmem:[%s15105_s29 + $0x2f0] sm:$0xff] }
  0x53   : > { %1935 = vst [vmem:[%s15110_s5 + $0x2e0] sm:$0xff] %v1934_v28  ;;  %v1940_v31 = vld [vmem:[%s15105_s29 + $0x2f8] sm:$0xff]  ;;  %1937 = vst [vmem:[%s15110_s5 + $0x2e8] sm:$0xff] %v1936_v29  ;;  %v1942_v32 = vld [vmem:[%s15105_s29 + $0x600] sm:$0xff] }
  0x54   : > { %1939 = vst [vmem:[%s15110_s5 + $0x2f0] sm:$0xff] %v1938_v30  ;;  %1941 = vst [vmem:[%s15110_s5 + $0x2f8] sm:$0xff] %v1940_v31  ;;  %v1944_v33 = vld [vmem:[%s15105_s29 + $0x608] sm:$0xff]  ;;  %v1946_v34 = vld [vmem:[%s15105_s29 + $0x610] sm:$0xff] }
  0x55   : > { %1943 = vst [vmem:[%s15110_s5 + $0x300] sm:$0xff] %v1942_v32  ;;  %1945 = vst [vmem:[%s15110_s5 + $0x308] sm:$0xff] %v1944_v33  ;;  %v1948_v35 = vld [vmem:[%s15105_s29 + $0x618] sm:$0xff]  ;;  %v1950_v36 = vld [vmem:[%s15105_s29 + $0x620] sm:$0xff] }
  0x56   : > { %1947 = vst [vmem:[%s15110_s5 + $0x310] sm:$0xff] %v1946_v34  ;;  %v1952_v37 = vld [vmem:[%s15105_s29 + $0x628] sm:$0xff]  ;;  %1949 = vst [vmem:[%s15110_s5 + $0x318] sm:$0xff] %v1948_v35  ;;  %v1954_v38 = vld [vmem:[%s15105_s29 + $0x630] sm:$0xff] }
  0x57   : > { %1951 = vst [vmem:[%s15110_s5 + $0x320] sm:$0xff] %v1950_v36  ;;  %1953 = vst [vmem:[%s15110_s5 + $0x328] sm:$0xff] %v1952_v37  ;;  %v1956_v39 = vld [vmem:[%s15105_s29 + $0x638] sm:$0xff]  ;;  %v1958_v40 = vld [vmem:[%s15105_s29 + $0x640] sm:$0xff] }
  0x58   : > { %1955 = vst [vmem:[%s15110_s5 + $0x330] sm:$0xff] %v1954_v38  ;;  %1957 = vst [vmem:[%s15110_s5 + $0x338] sm:$0xff] %v1956_v39  ;;  %v1960_v41 = vld [vmem:[%s15105_s29 + $0x648] sm:$0xff]  ;;  %v1962_v42 = vld [vmem:[%s15105_s29 + $0x650] sm:$0xff] }
  0x59   : > { %1959 = vst [vmem:[%s15110_s5 + $0x340] sm:$0xff] %v1958_v40  ;;  %v1964_v43 = vld [vmem:[%s15105_s29 + $0x658] sm:$0xff]  ;;  %1961 = vst [vmem:[%s15110_s5 + $0x348] sm:$0xff] %v1960_v41  ;;  %v1966_v44 = vld [vmem:[%s15105_s29 + $0x660] sm:$0xff] }
  0x5a   : > { %1963 = vst [vmem:[%s15110_s5 + $0x350] sm:$0xff] %v1962_v42  ;;  %1965 = vst [vmem:[%s15110_s5 + $0x358] sm:$0xff] %v1964_v43  ;;  %v1968_v45 = vld [vmem:[%s15105_s29 + $0x668] sm:$0xff]  ;;  %v1970_v46 = vld [vmem:[%s15105_s29 + $0x670] sm:$0xff] }
  0x5b   : > { %1967 = vst [vmem:[%s15110_s5 + $0x360] sm:$0xff] %v1966_v44  ;;  %1969 = vst [vmem:[%s15110_s5 + $0x368] sm:$0xff] %v1968_v45  ;;  %v1972_v47 = vld [vmem:[%s15105_s29 + $0x678] sm:$0xff]  ;;  %v1974_v48 = vld [vmem:[%s15105_s29 + $0x680] sm:$0xff] }
  0x5c   : > { %1971 = vst [vmem:[%s15110_s5 + $0x370] sm:$0xff] %v1970_v46  ;;  %v1976_v49 = vld [vmem:[%s15105_s29 + $0x688] sm:$0xff]  ;;  %1973 = vst [vmem:[%s15110_s5 + $0x378] sm:$0xff] %v1972_v47  ;;  %v1978_v50 = vld [vmem:[%s15105_s29 + $0x690] sm:$0xff] }
  0x5d   : > { %1975 = vst [vmem:[%s15110_s5 + $0x380] sm:$0xff] %v1974_v48  ;;  %1977 = vst [vmem:[%s15110_s5 + $0x388] sm:$0xff] %v1976_v49  ;;  %v1980_v51 = vld [vmem:[%s15105_s29 + $0x698] sm:$0xff]  ;;  %v1982_v52 = vld [vmem:[%s15105_s29 + $0x6a0] sm:$0xff] }
  0x5e   : > { %1979 = vst [vmem:[%s15110_s5 + $0x390] sm:$0xff] %v1978_v50  ;;  %1981 = vst [vmem:[%s15110_s5 + $0x398] sm:$0xff] %v1980_v51  ;;  %v1984_v53 = vld [vmem:[%s15105_s29 + $0x6a8] sm:$0xff]  ;;  %v1986_v54 = vld [vmem:[%s15105_s29 + $0x6b0] sm:$0xff] }
  0x5f   : > { %1983 = vst [vmem:[%s15110_s5 + $0x3a0] sm:$0xff] %v1982_v52  ;;  %v1988_v55 = vld [vmem:[%s15105_s29 + $0x6b8] sm:$0xff]  ;;  %1985 = vst [vmem:[%s15110_s5 + $0x3a8] sm:$0xff] %v1984_v53  ;;  %v1990_v56 = vld [vmem:[%s15105_s29 + $0x6c0] sm:$0xff] }
  0x60   : > { %1987 = vst [vmem:[%s15110_s5 + $0x3b0] sm:$0xff] %v1986_v54  ;;  %1989 = vst [vmem:[%s15110_s5 + $0x3b8] sm:$0xff] %v1988_v55  ;;  %v1992_v57 = vld [vmem:[%s15105_s29 + $0x6c8] sm:$0xff]  ;;  %v1994_v58 = vld [vmem:[%s15105_s29 + $0x6d0] sm:$0xff] }
  0x61   : > { %1991 = vst [vmem:[%s15110_s5 + $0x3c0] sm:$0xff] %v1990_v56  ;;  %1993 = vst [vmem:[%s15110_s5 + $0x3c8] sm:$0xff] %v1992_v57  ;;  %v1996_v59 = vld [vmem:[%s15105_s29 + $0x6d8] sm:$0xff]  ;;  %v1998_v60 = vld [vmem:[%s15105_s29 + $0x6e0] sm:$0xff] }
  0x62   : > { %1995 = vst [vmem:[%s15110_s5 + $0x3d0] sm:$0xff] %v1994_v58  ;;  %v2000_v61 = vld [vmem:[%s15105_s29 + $0x6e8] sm:$0xff]  ;;  %1997 = vst [vmem:[%s15110_s5 + $0x3d8] sm:$0xff] %v1996_v59  ;;  %v2002_v62 = vld [vmem:[%s15105_s29 + $0x6f0] sm:$0xff] }
  0x63   : > { %1999 = vst [vmem:[%s15110_s5 + $0x3e0] sm:$0xff] %v1998_v60  ;;  %2001 = vst [vmem:[%s15110_s5 + $0x3e8] sm:$0xff] %v2000_v61  ;;  %v2004_v63 = vld [vmem:[%s15105_s29 + $0x6f8] sm:$0xff]  ;;  %v2006_v0 = vld [vmem:[%s15105_s29 + $0x700] sm:$0xff] }
  0x64   : > { %2003 = vst [vmem:[%s15110_s5 + $0x3f0] sm:$0xff] %v2002_v62  ;;  %2005 = vst [vmem:[%s15110_s5 + $0x3f8] sm:$0xff] %v2004_v63  ;;  %v2008_v1 = vld [vmem:[%s15105_s29 + $0x708] sm:$0xff]  ;;  %v2010_v2 = vld [vmem:[%s15105_s29 + $0x710] sm:$0xff] }
  0x65   : > { %2007 = vst [vmem:[%s15110_s5 + $0x400] sm:$0xff] %v2006_v0  ;;  %v2012_v3 = vld [vmem:[%s15105_s29 + $0x718] sm:$0xff]  ;;  %2009 = vst [vmem:[%s15110_s5 + $0x408] sm:$0xff] %v2008_v1  ;;  %v2014_v4 = vld [vmem:[%s15105_s29 + $0x720] sm:$0xff] }
  0x66   : > { %2011 = vst [vmem:[%s15110_s5 + $0x410] sm:$0xff] %v2010_v2  ;;  %2013 = vst [vmem:[%s15110_s5 + $0x418] sm:$0xff] %v2012_v3  ;;  %v2016_v5 = vld [vmem:[%s15105_s29 + $0x728] sm:$0xff]  ;;  %v2018_v6 = vld [vmem:[%s15105_s29 + $0x730] sm:$0xff] }
  0x67   : > { %2015 = vst [vmem:[%s15110_s5 + $0x420] sm:$0xff] %v2014_v4  ;;  %2017 = vst [vmem:[%s15110_s5 + $0x428] sm:$0xff] %v2016_v5  ;;  %v2020_v7 = vld [vmem:[%s15105_s29 + $0x738] sm:$0xff]  ;;  %v2022_v8 = vld [vmem:[%s15105_s29 + $0x740] sm:$0xff] }
  0x68   : > { %2019 = vst [vmem:[%s15110_s5 + $0x430] sm:$0xff] %v2018_v6  ;;  %v2024_v9 = vld [vmem:[%s15105_s29 + $0x748] sm:$0xff]  ;;  %2021 = vst [vmem:[%s15110_s5 + $0x438] sm:$0xff] %v2020_v7  ;;  %v2026_v10 = vld [vmem:[%s15105_s29 + $0x750] sm:$0xff] }
  0x69   : > { %2023 = vst [vmem:[%s15110_s5 + $0x440] sm:$0xff] %v2022_v8  ;;  %2025 = vst [vmem:[%s15110_s5 + $0x448] sm:$0xff] %v2024_v9  ;;  %v2028_v11 = vld [vmem:[%s15105_s29 + $0x758] sm:$0xff]  ;;  %v2030_v12 = vld [vmem:[%s15105_s29 + $0x760] sm:$0xff] }
  0x6a   : > { %2027 = vst [vmem:[%s15110_s5 + $0x450] sm:$0xff] %v2026_v10  ;;  %2029 = vst [vmem:[%s15110_s5 + $0x458] sm:$0xff] %v2028_v11  ;;  %v2032_v13 = vld [vmem:[%s15105_s29 + $0x768] sm:$0xff]  ;;  %v2034_v14 = vld [vmem:[%s15105_s29 + $0x770] sm:$0xff] }
  0x6b   : > { %2031 = vst [vmem:[%s15110_s5 + $0x460] sm:$0xff] %v2030_v12  ;;  %v2036_v15 = vld [vmem:[%s15105_s29 + $0x778] sm:$0xff]  ;;  %2033 = vst [vmem:[%s15110_s5 + $0x468] sm:$0xff] %v2032_v13  ;;  %v2038_v16 = vld [vmem:[%s15105_s29 + $0x780] sm:$0xff] }
  0x6c   : > { %2035 = vst [vmem:[%s15110_s5 + $0x470] sm:$0xff] %v2034_v14  ;;  %2037 = vst [vmem:[%s15110_s5 + $0x478] sm:$0xff] %v2036_v15  ;;  %v2040_v17 = vld [vmem:[%s15105_s29 + $0x788] sm:$0xff]  ;;  %v2042_v18 = vld [vmem:[%s15105_s29 + $0x790] sm:$0xff] }
  0x6d   : > { %2039 = vst [vmem:[%s15110_s5 + $0x480] sm:$0xff] %v2038_v16  ;;  %2041 = vst [vmem:[%s15110_s5 + $0x488] sm:$0xff] %v2040_v17  ;;  %v2044_v19 = vld [vmem:[%s15105_s29 + $0x798] sm:$0xff]  ;;  %v2046_v20 = vld [vmem:[%s15105_s29 + $0x7a0] sm:$0xff] }
  0x6e   : > { %2043 = vst [vmem:[%s15110_s5 + $0x490] sm:$0xff] %v2042_v18  ;;  %v2048_v21 = vld [vmem:[%s15105_s29 + $0x7a8] sm:$0xff]  ;;  %2045 = vst [vmem:[%s15110_s5 + $0x498] sm:$0xff] %v2044_v19  ;;  %v2050_v22 = vld [vmem:[%s15105_s29 + $0x7b0] sm:$0xff] }
  0x6f   : > { %2047 = vst [vmem:[%s15110_s5 + $0x4a0] sm:$0xff] %v2046_v20  ;;  %2049 = vst [vmem:[%s15110_s5 + $0x4a8] sm:$0xff] %v2048_v21  ;;  %v2052_v23 = vld [vmem:[%s15105_s29 + $0x7b8] sm:$0xff]  ;;  %v2054_v24 = vld [vmem:[%s15105_s29 + $0x7c0] sm:$0xff] }
  0x70   : > { %2051 = vst [vmem:[%s15110_s5 + $0x4b0] sm:$0xff] %v2050_v22  ;;  %2053 = vst [vmem:[%s15110_s5 + $0x4b8] sm:$0xff] %v2052_v23  ;;  %v2056_v25 = vld [vmem:[%s15105_s29 + $0x7c8] sm:$0xff]  ;;  %v2058_v26 = vld [vmem:[%s15105_s29 + $0x7d0] sm:$0xff] }
  0x71   : > { %2055 = vst [vmem:[%s15110_s5 + $0x4c0] sm:$0xff] %v2054_v24  ;;  %v2060_v27 = vld [vmem:[%s15105_s29 + $0x7d8] sm:$0xff]  ;;  %2057 = vst [vmem:[%s15110_s5 + $0x4c8] sm:$0xff] %v2056_v25  ;;  %v2062_v28 = vld [vmem:[%s15105_s29 + $0x7e0] sm:$0xff] }
  0x72   : > { %2059 = vst [vmem:[%s15110_s5 + $0x4d0] sm:$0xff] %v2058_v26  ;;  %2061 = vst [vmem:[%s15110_s5 + $0x4d8] sm:$0xff] %v2060_v27  ;;  %v2064_v29 = vld [vmem:[%s15105_s29 + $0x7e8] sm:$0xff]  ;;  %v2066_v30 = vld [vmem:[%s15105_s29 + $0x7f0] sm:$0xff] }
  0x73   : > { %2063 = vst [vmem:[%s15110_s5 + $0x4e0] sm:$0xff] %v2062_v28  ;;  %2065 = vst [vmem:[%s15110_s5 + $0x4e8] sm:$0xff] %v2064_v29  ;;  %v2068_v31 = vld [vmem:[%s15105_s29 + $0x7f8] sm:$0xff]  ;;  %v2070_v32 = vld [vmem:[%s15105_s29 + $0x800] sm:$0xff] }
  0x74   : > { %2067 = vst [vmem:[%s15110_s5 + $0x4f0] sm:$0xff] %v2066_v30  ;;  %v2072_v33 = vld [vmem:[%s15105_s29 + $0x808] sm:$0xff]  ;;  %2069 = vst [vmem:[%s15110_s5 + $0x4f8] sm:$0xff] %v2068_v31  ;;  %v2074_v34 = vld [vmem:[%s15105_s29 + $0x810] sm:$0xff] }
  0x75   : > { %2071 = vst [vmem:[%s15110_s5 + $0x500] sm:$0xff] %v2070_v32  ;;  %2073 = vst [vmem:[%s15110_s5 + $0x508] sm:$0xff] %v2072_v33  ;;  %v2076_v35 = vld [vmem:[%s15105_s29 + $0x818] sm:$0xff]  ;;  %v2078_v36 = vld [vmem:[%s15105_s29 + $0x820] sm:$0xff] }
  0x76   : > { %2075 = vst [vmem:[%s15110_s5 + $0x510] sm:$0xff] %v2074_v34  ;;  %2077 = vst [vmem:[%s15110_s5 + $0x518] sm:$0xff] %v2076_v35  ;;  %v2080_v37 = vld [vmem:[%s15105_s29 + $0x828] sm:$0xff]  ;;  %v2082_v38 = vld [vmem:[%s15105_s29 + $0x830] sm:$0xff] }
  0x77   : > { %2079 = vst [vmem:[%s15110_s5 + $0x520] sm:$0xff] %v2078_v36  ;;  %v2084_v39 = vld [vmem:[%s15105_s29 + $0x838] sm:$0xff]  ;;  %2081 = vst [vmem:[%s15110_s5 + $0x528] sm:$0xff] %v2080_v37  ;;  %v2086_v40 = vld [vmem:[%s15105_s29 + $0x840] sm:$0xff] }
  0x78   : > { %2083 = vst [vmem:[%s15110_s5 + $0x530] sm:$0xff] %v2082_v38  ;;  %2085 = vst [vmem:[%s15110_s5 + $0x538] sm:$0xff] %v2084_v39  ;;  %v2088_v41 = vld [vmem:[%s15105_s29 + $0x848] sm:$0xff]  ;;  %v2090_v42 = vld [vmem:[%s15105_s29 + $0x850] sm:$0xff] }
  0x79   : > { %2087 = vst [vmem:[%s15110_s5 + $0x540] sm:$0xff] %v2086_v40  ;;  %2089 = vst [vmem:[%s15110_s5 + $0x548] sm:$0xff] %v2088_v41  ;;  %v2092_v43 = vld [vmem:[%s15105_s29 + $0x858] sm:$0xff]  ;;  %v2094_v44 = vld [vmem:[%s15105_s29 + $0x860] sm:$0xff] }
  0x7a   : > { %2091 = vst [vmem:[%s15110_s5 + $0x550] sm:$0xff] %v2090_v42  ;;  %v2096_v45 = vld [vmem:[%s15105_s29 + $0x868] sm:$0xff]  ;;  %2093 = vst [vmem:[%s15110_s5 + $0x558] sm:$0xff] %v2092_v43  ;;  %v2098_v46 = vld [vmem:[%s15105_s29 + $0x870] sm:$0xff] }
  0x7b   : > { %2095 = vst [vmem:[%s15110_s5 + $0x560] sm:$0xff] %v2094_v44  ;;  %2097 = vst [vmem:[%s15110_s5 + $0x568] sm:$0xff] %v2096_v45  ;;  %v2100_v47 = vld [vmem:[%s15105_s29 + $0x878] sm:$0xff]  ;;  %v2102_v48 = vld [vmem:[%s15105_s29 + $0x880] sm:$0xff] }
  0x7c   : > { %2099 = vst [vmem:[%s15110_s5 + $0x570] sm:$0xff] %v2098_v46  ;;  %2101 = vst [vmem:[%s15110_s5 + $0x578] sm:$0xff] %v2100_v47  ;;  %v2104_v49 = vld [vmem:[%s15105_s29 + $0x888] sm:$0xff]  ;;  %v2106_v50 = vld [vmem:[%s15105_s29 + $0x890] sm:$0xff] }
  0x7d   : > { %2103 = vst [vmem:[%s15110_s5 + $0x580] sm:$0xff] %v2102_v48  ;;  %v2108_v51 = vld [vmem:[%s15105_s29 + $0x898] sm:$0xff]  ;;  %2105 = vst [vmem:[%s15110_s5 + $0x588] sm:$0xff] %v2104_v49  ;;  %v2110_v52 = vld [vmem:[%s15105_s29 + $0x8a0] sm:$0xff] }
  0x7e   : > { %2107 = vst [vmem:[%s15110_s5 + $0x590] sm:$0xff] %v2106_v50  ;;  %2109 = vst [vmem:[%s15110_s5 + $0x598] sm:$0xff] %v2108_v51  ;;  %v2112_v53 = vld [vmem:[%s15105_s29 + $0x8a8] sm:$0xff]  ;;  %v2114_v54 = vld [vmem:[%s15105_s29 + $0x8b0] sm:$0xff] }
  0x7f   : > { %2111 = vst [vmem:[%s15110_s5 + $0x5a0] sm:$0xff] %v2110_v52  ;;  %2113 = vst [vmem:[%s15110_s5 + $0x5a8] sm:$0xff] %v2112_v53  ;;  %v2116_v55 = vld [vmem:[%s15105_s29 + $0x8b8] sm:$0xff]  ;;  %v2118_v56 = vld [vmem:[%s15105_s29 + $0x8c0] sm:$0xff] }
  0x80   : > { %2115 = vst [vmem:[%s15110_s5 + $0x5b0] sm:$0xff] %v2114_v54  ;;  %v2120_v57 = vld [vmem:[%s15105_s29 + $0x8c8] sm:$0xff]  ;;  %2117 = vst [vmem:[%s15110_s5 + $0x5b8] sm:$0xff] %v2116_v55  ;;  %v2122_v58 = vld [vmem:[%s15105_s29 + $0x8d0] sm:$0xff] }
  0x81   : > { %2119 = vst [vmem:[%s15110_s5 + $0x5c0] sm:$0xff] %v2118_v56  ;;  %2121 = vst [vmem:[%s15110_s5 + $0x5c8] sm:$0xff] %v2120_v57  ;;  %v2124_v59 = vld [vmem:[%s15105_s29 + $0x8d8] sm:$0xff]  ;;  %v2126_v60 = vld [vmem:[%s15105_s29 + $0x8e0] sm:$0xff] }
  0x82   : > { %2123 = vst [vmem:[%s15110_s5 + $0x5d0] sm:$0xff] %v2122_v58  ;;  %2125 = vst [vmem:[%s15110_s5 + $0x5d8] sm:$0xff] %v2124_v59  ;;  %v2128_v61 = vld [vmem:[%s15105_s29 + $0x8e8] sm:$0xff]  ;;  %v2130_v62 = vld [vmem:[%s15105_s29 + $0x8f0] sm:$0xff] }
  0x83   : > { %2127 = vst [vmem:[%s15110_s5 + $0x5e0] sm:$0xff] %v2126_v60  ;;  %v2132_v63 = vld [vmem:[%s15105_s29 + $0x8f8] sm:$0xff]  ;;  %2129 = vst [vmem:[%s15110_s5 + $0x5e8] sm:$0xff] %v2128_v61  ;;  %v2134_v0 = vld [vmem:[%s15105_s29 + $0xc00] sm:$0xff] }
  0x84   : > { %2131 = vst [vmem:[%s15110_s5 + $0x5f0] sm:$0xff] %v2130_v62  ;;  %2133 = vst [vmem:[%s15110_s5 + $0x5f8] sm:$0xff] %v2132_v63  ;;  %v2136_v1 = vld [vmem:[%s15105_s29 + $0xc08] sm:$0xff]  ;;  %v2138_v2 = vld [vmem:[%s15105_s29 + $0xc10] sm:$0xff] }
  0x85   : > { %2135 = vst [vmem:[%s15110_s5 + $0x600] sm:$0xff] %v2134_v0  ;;  %2137 = vst [vmem:[%s15110_s5 + $0x608] sm:$0xff] %v2136_v1  ;;  %v2140_v3 = vld [vmem:[%s15105_s29 + $0xc18] sm:$0xff]  ;;  %v2142_v4 = vld [vmem:[%s15105_s29 + $0xc20] sm:$0xff] }
  0x86   : > { %2139 = vst [vmem:[%s15110_s5 + $0x610] sm:$0xff] %v2138_v2  ;;  %v2144_v5 = vld [vmem:[%s15105_s29 + $0xc28] sm:$0xff]  ;;  %2141 = vst [vmem:[%s15110_s5 + $0x618] sm:$0xff] %v2140_v3  ;;  %v2146_v6 = vld [vmem:[%s15105_s29 + $0xc30] sm:$0xff] }
  0x87   : > { %2143 = vst [vmem:[%s15110_s5 + $0x620] sm:$0xff] %v2142_v4  ;;  %2145 = vst [vmem:[%s15110_s5 + $0x628] sm:$0xff] %v2144_v5  ;;  %v2148_v7 = vld [vmem:[%s15105_s29 + $0xc38] sm:$0xff]  ;;  %v2150_v8 = vld [vmem:[%s15105_s29 + $0xc40] sm:$0xff] }
  0x88   : > { %2147 = vst [vmem:[%s15110_s5 + $0x630] sm:$0xff] %v2146_v6  ;;  %2149 = vst [vmem:[%s15110_s5 + $0x638] sm:$0xff] %v2148_v7  ;;  %v2152_v9 = vld [vmem:[%s15105_s29 + $0xc48] sm:$0xff]  ;;  %v2154_v10 = vld [vmem:[%s15105_s29 + $0xc50] sm:$0xff] }
  0x89   : > { %2151 = vst [vmem:[%s15110_s5 + $0x640] sm:$0xff] %v2150_v8  ;;  %v2156_v11 = vld [vmem:[%s15105_s29 + $0xc58] sm:$0xff]  ;;  %2153 = vst [vmem:[%s15110_s5 + $0x648] sm:$0xff] %v2152_v9  ;;  %v2158_v12 = vld [vmem:[%s15105_s29 + $0xc60] sm:$0xff] }
  0x8a   : > { %2155 = vst [vmem:[%s15110_s5 + $0x650] sm:$0xff] %v2154_v10  ;;  %2157 = vst [vmem:[%s15110_s5 + $0x658] sm:$0xff] %v2156_v11  ;;  %v2160_v13 = vld [vmem:[%s15105_s29 + $0xc68] sm:$0xff]  ;;  %v2162_v14 = vld [vmem:[%s15105_s29 + $0xc70] sm:$0xff] }
  0x8b   : > { %2159 = vst [vmem:[%s15110_s5 + $0x660] sm:$0xff] %v2158_v12  ;;  %2161 = vst [vmem:[%s15110_s5 + $0x668] sm:$0xff] %v2160_v13  ;;  %v2164_v15 = vld [vmem:[%s15105_s29 + $0xc78] sm:$0xff]  ;;  %v2166_v16 = vld [vmem:[%s15105_s29 + $0xc80] sm:$0xff] }
  0x8c   : > { %2163 = vst [vmem:[%s15110_s5 + $0x670] sm:$0xff] %v2162_v14  ;;  %v2168_v17 = vld [vmem:[%s15105_s29 + $0xc88] sm:$0xff]  ;;  %2165 = vst [vmem:[%s15110_s5 + $0x678] sm:$0xff] %v2164_v15  ;;  %v2170_v18 = vld [vmem:[%s15105_s29 + $0xc90] sm:$0xff] }
  0x8d   : > { %2167 = vst [vmem:[%s15110_s5 + $0x680] sm:$0xff] %v2166_v16  ;;  %2169 = vst [vmem:[%s15110_s5 + $0x688] sm:$0xff] %v2168_v17  ;;  %v2172_v19 = vld [vmem:[%s15105_s29 + $0xc98] sm:$0xff]  ;;  %v2174_v20 = vld [vmem:[%s15105_s29 + $0xca0] sm:$0xff] }
  0x8e   : > { %2171 = vst [vmem:[%s15110_s5 + $0x690] sm:$0xff] %v2170_v18  ;;  %2173 = vst [vmem:[%s15110_s5 + $0x698] sm:$0xff] %v2172_v19  ;;  %v2176_v21 = vld [vmem:[%s15105_s29 + $0xca8] sm:$0xff]  ;;  %v2178_v22 = vld [vmem:[%s15105_s29 + $0xcb0] sm:$0xff] }
  0x8f   : > { %2175 = vst [vmem:[%s15110_s5 + $0x6a0] sm:$0xff] %v2174_v20  ;;  %v2180_v23 = vld [vmem:[%s15105_s29 + $0xcb8] sm:$0xff]  ;;  %2177 = vst [vmem:[%s15110_s5 + $0x6a8] sm:$0xff] %v2176_v21  ;;  %v2182_v24 = vld [vmem:[%s15105_s29 + $0xcc0] sm:$0xff] }
  0x90   : > { %2179 = vst [vmem:[%s15110_s5 + $0x6b0] sm:$0xff] %v2178_v22  ;;  %2181 = vst [vmem:[%s15110_s5 + $0x6b8] sm:$0xff] %v2180_v23  ;;  %v2184_v25 = vld [vmem:[%s15105_s29 + $0xcc8] sm:$0xff]  ;;  %v2186_v26 = vld [vmem:[%s15105_s29 + $0xcd0] sm:$0xff] }
  0x91   : > { %2183 = vst [vmem:[%s15110_s5 + $0x6c0] sm:$0xff] %v2182_v24  ;;  %2185 = vst [vmem:[%s15110_s5 + $0x6c8] sm:$0xff] %v2184_v25  ;;  %v2188_v27 = vld [vmem:[%s15105_s29 + $0xcd8] sm:$0xff]  ;;  %v2190_v28 = vld [vmem:[%s15105_s29 + $0xce0] sm:$0xff] }
  0x92   : > { %2187 = vst [vmem:[%s15110_s5 + $0x6d0] sm:$0xff] %v2186_v26  ;;  %v2192_v29 = vld [vmem:[%s15105_s29 + $0xce8] sm:$0xff]  ;;  %2189 = vst [vmem:[%s15110_s5 + $0x6d8] sm:$0xff] %v2188_v27  ;;  %v2194_v30 = vld [vmem:[%s15105_s29 + $0xcf0] sm:$0xff] }
  0x93   : > { %2191 = vst [vmem:[%s15110_s5 + $0x6e0] sm:$0xff] %v2190_v28  ;;  %2193 = vst [vmem:[%s15110_s5 + $0x6e8] sm:$0xff] %v2192_v29  ;;  %v2196_v31 = vld [vmem:[%s15105_s29 + $0xcf8] sm:$0xff]  ;;  %v2198_v32 = vld [vmem:[%s15105_s29 + $0xd00] sm:$0xff] }
  0x94   : > { %2195 = vst [vmem:[%s15110_s5 + $0x6f0] sm:$0xff] %v2194_v30  ;;  %2197 = vst [vmem:[%s15110_s5 + $0x6f8] sm:$0xff] %v2196_v31  ;;  %v2200_v33 = vld [vmem:[%s15105_s29 + $0xd08] sm:$0xff]  ;;  %v2202_v34 = vld [vmem:[%s15105_s29 + $0xd10] sm:$0xff] }
  0x95   : > { %2199 = vst [vmem:[%s15110_s5 + $0x700] sm:$0xff] %v2198_v32  ;;  %v2204_v35 = vld [vmem:[%s15105_s29 + $0xd18] sm:$0xff]  ;;  %2201 = vst [vmem:[%s15110_s5 + $0x708] sm:$0xff] %v2200_v33  ;;  %v2206_v36 = vld [vmem:[%s15105_s29 + $0xd20] sm:$0xff] }
  0x96   : > { %2203 = vst [vmem:[%s15110_s5 + $0x710] sm:$0xff] %v2202_v34  ;;  %2205 = vst [vmem:[%s15110_s5 + $0x718] sm:$0xff] %v2204_v35  ;;  %v2208_v37 = vld [vmem:[%s15105_s29 + $0xd28] sm:$0xff]  ;;  %v2210_v38 = vld [vmem:[%s15105_s29 + $0xd30] sm:$0xff] }
  0x97   : > { %2207 = vst [vmem:[%s15110_s5 + $0x720] sm:$0xff] %v2206_v36  ;;  %2209 = vst [vmem:[%s15110_s5 + $0x728] sm:$0xff] %v2208_v37  ;;  %v2212_v39 = vld [vmem:[%s15105_s29 + $0xd38] sm:$0xff]  ;;  %v2214_v40 = vld [vmem:[%s15105_s29 + $0xd40] sm:$0xff] }
  0x98   : > { %2211 = vst [vmem:[%s15110_s5 + $0x730] sm:$0xff] %v2210_v38  ;;  %v2216_v41 = vld [vmem:[%s15105_s29 + $0xd48] sm:$0xff]  ;;  %2213 = vst [vmem:[%s15110_s5 + $0x738] sm:$0xff] %v2212_v39  ;;  %v2218_v42 = vld [vmem:[%s15105_s29 + $0xd50] sm:$0xff] }
  0x99   : > { %2215 = vst [vmem:[%s15110_s5 + $0x740] sm:$0xff] %v2214_v40  ;;  %2217 = vst [vmem:[%s15110_s5 + $0x748] sm:$0xff] %v2216_v41  ;;  %v2220_v43 = vld [vmem:[%s15105_s29 + $0xd58] sm:$0xff]  ;;  %v2222_v44 = vld [vmem:[%s15105_s29 + $0xd60] sm:$0xff] }
  0x9a   : > { %2219 = vst [vmem:[%s15110_s5 + $0x750] sm:$0xff] %v2218_v42  ;;  %2221 = vst [vmem:[%s15110_s5 + $0x758] sm:$0xff] %v2220_v43  ;;  %v2224_v45 = vld [vmem:[%s15105_s29 + $0xd68] sm:$0xff]  ;;  %v2226_v46 = vld [vmem:[%s15105_s29 + $0xd70] sm:$0xff] }
  0x9b   : > { %2223 = vst [vmem:[%s15110_s5 + $0x760] sm:$0xff] %v2222_v44  ;;  %v2228_v47 = vld [vmem:[%s15105_s29 + $0xd78] sm:$0xff]  ;;  %2225 = vst [vmem:[%s15110_s5 + $0x768] sm:$0xff] %v2224_v45  ;;  %v2230_v48 = vld [vmem:[%s15105_s29 + $0xd80] sm:$0xff] }
  0x9c   : > { %2227 = vst [vmem:[%s15110_s5 + $0x770] sm:$0xff] %v2226_v46  ;;  %2229 = vst [vmem:[%s15110_s5 + $0x778] sm:$0xff] %v2228_v47  ;;  %v2232_v49 = vld [vmem:[%s15105_s29 + $0xd88] sm:$0xff]  ;;  %v2234_v50 = vld [vmem:[%s15105_s29 + $0xd90] sm:$0xff] }
  0x9d   : > { %2231 = vst [vmem:[%s15110_s5 + $0x780] sm:$0xff] %v2230_v48  ;;  %2233 = vst [vmem:[%s15110_s5 + $0x788] sm:$0xff] %v2232_v49  ;;  %v2236_v51 = vld [vmem:[%s15105_s29 + $0xd98] sm:$0xff]  ;;  %v2238_v52 = vld [vmem:[%s15105_s29 + $0xda0] sm:$0xff] }
  0x9e   : > { %2235 = vst [vmem:[%s15110_s5 + $0x790] sm:$0xff] %v2234_v50  ;;  %v2240_v53 = vld [vmem:[%s15105_s29 + $0xda8] sm:$0xff]  ;;  %2237 = vst [vmem:[%s15110_s5 + $0x798] sm:$0xff] %v2236_v51  ;;  %v2242_v54 = vld [vmem:[%s15105_s29 + $0xdb0] sm:$0xff] }
  0x9f   : > { %2239 = vst [vmem:[%s15110_s5 + $0x7a0] sm:$0xff] %v2238_v52  ;;  %2241 = vst [vmem:[%s15110_s5 + $0x7a8] sm:$0xff] %v2240_v53  ;;  %v2244_v55 = vld [vmem:[%s15105_s29 + $0xdb8] sm:$0xff]  ;;  %v2246_v56 = vld [vmem:[%s15105_s29 + $0xdc0] sm:$0xff] }
  0xa0   : > { %2243 = vst [vmem:[%s15110_s5 + $0x7b0] sm:$0xff] %v2242_v54  ;;  %2245 = vst [vmem:[%s15110_s5 + $0x7b8] sm:$0xff] %v2244_v55  ;;  %v2248_v57 = vld [vmem:[%s15105_s29 + $0xdc8] sm:$0xff]  ;;  %v2250_v58 = vld [vmem:[%s15105_s29 + $0xdd0] sm:$0xff] }
  0xa1   : > { %2247 = vst [vmem:[%s15110_s5 + $0x7c0] sm:$0xff] %v2246_v56  ;;  %v2252_v59 = vld [vmem:[%s15105_s29 + $0xdd8] sm:$0xff]  ;;  %2249 = vst [vmem:[%s15110_s5 + $0x7c8] sm:$0xff] %v2248_v57  ;;  %v2254_v60 = vld [vmem:[%s15105_s29 + $0xde0] sm:$0xff] }
  0xa2   : > { %2251 = vst [vmem:[%s15110_s5 + $0x7d0] sm:$0xff] %v2250_v58  ;;  %2253 = vst [vmem:[%s15110_s5 + $0x7d8] sm:$0xff] %v2252_v59  ;;  %v2256_v61 = vld [vmem:[%s15105_s29 + $0xde8] sm:$0xff]  ;;  %v2258_v62 = vld [vmem:[%s15105_s29 + $0xdf0] sm:$0xff] }
  0xa3   : > { %2255 = vst [vmem:[%s15110_s5 + $0x7e0] sm:$0xff] %v2254_v60  ;;  %2257 = vst [vmem:[%s15110_s5 + $0x7e8] sm:$0xff] %v2256_v61  ;;  %v2260_v63 = vld [vmem:[%s15105_s29 + $0xdf8] sm:$0xff]  ;;  %v2262_v0 = vld [vmem:[%s15105_s29 + $0xe00] sm:$0xff] }
  0xa4   : > { %2259 = vst [vmem:[%s15110_s5 + $0x7f0] sm:$0xff] %v2258_v62  ;;  %v2264_v1 = vld [vmem:[%s15105_s29 + $0xe08] sm:$0xff]  ;;  %2261 = vst [vmem:[%s15110_s5 + $0x7f8] sm:$0xff] %v2260_v63  ;;  %v2266_v2 = vld [vmem:[%s15105_s29 + $0xe10] sm:$0xff] }
  0xa5   : > { %2263 = vst [vmem:[%s15110_s5 + $0x800] sm:$0xff] %v2262_v0  ;;  %2265 = vst [vmem:[%s15110_s5 + $0x808] sm:$0xff] %v2264_v1  ;;  %v2268_v3 = vld [vmem:[%s15105_s29 + $0xe18] sm:$0xff]  ;;  %v2270_v4 = vld [vmem:[%s15105_s29 + $0xe20] sm:$0xff] }
  0xa6   : > { %2267 = vst [vmem:[%s15110_s5 + $0x810] sm:$0xff] %v2266_v2  ;;  %2269 = vst [vmem:[%s15110_s5 + $0x818] sm:$0xff] %v2268_v3  ;;  %v2272_v5 = vld [vmem:[%s15105_s29 + $0xe28] sm:$0xff]  ;;  %v2274_v6 = vld [vmem:[%s15105_s29 + $0xe30] sm:$0xff] }
  0xa7   : > { %2271 = vst [vmem:[%s15110_s5 + $0x820] sm:$0xff] %v2270_v4  ;;  %v2276_v7 = vld [vmem:[%s15105_s29 + $0xe38] sm:$0xff]  ;;  %2273 = vst [vmem:[%s15110_s5 + $0x828] sm:$0xff] %v2272_v5  ;;  %v2278_v8 = vld [vmem:[%s15105_s29 + $0xe40] sm:$0xff] }
  0xa8   : > { %2275 = vst [vmem:[%s15110_s5 + $0x830] sm:$0xff] %v2274_v6  ;;  %2277 = vst [vmem:[%s15110_s5 + $0x838] sm:$0xff] %v2276_v7  ;;  %v2280_v9 = vld [vmem:[%s15105_s29 + $0xe48] sm:$0xff]  ;;  %v2282_v10 = vld [vmem:[%s15105_s29 + $0xe50] sm:$0xff] }
  0xa9   : > { %2279 = vst [vmem:[%s15110_s5 + $0x840] sm:$0xff] %v2278_v8  ;;  %2281 = vst [vmem:[%s15110_s5 + $0x848] sm:$0xff] %v2280_v9  ;;  %v2284_v11 = vld [vmem:[%s15105_s29 + $0xe58] sm:$0xff]  ;;  %v2286_v12 = vld [vmem:[%s15105_s29 + $0xe60] sm:$0xff] }
  0xaa   : > { %2283 = vst [vmem:[%s15110_s5 + $0x850] sm:$0xff] %v2282_v10  ;;  %v2288_v13 = vld [vmem:[%s15105_s29 + $0xe68] sm:$0xff]  ;;  %2285 = vst [vmem:[%s15110_s5 + $0x858] sm:$0xff] %v2284_v11  ;;  %v2290_v14 = vld [vmem:[%s15105_s29 + $0xe70] sm:$0xff] }
  0xab   : > { %2287 = vst [vmem:[%s15110_s5 + $0x860] sm:$0xff] %v2286_v12  ;;  %2289 = vst [vmem:[%s15110_s5 + $0x868] sm:$0xff] %v2288_v13  ;;  %v2292_v15 = vld [vmem:[%s15105_s29 + $0xe78] sm:$0xff]  ;;  %v2294_v16 = vld [vmem:[%s15105_s29 + $0xe80] sm:$0xff] }
  0xac   : > { %2291 = vst [vmem:[%s15110_s5 + $0x870] sm:$0xff] %v2290_v14  ;;  %2293 = vst [vmem:[%s15110_s5 + $0x878] sm:$0xff] %v2292_v15  ;;  %v2296_v17 = vld [vmem:[%s15105_s29 + $0xe88] sm:$0xff]  ;;  %v2298_v18 = vld [vmem:[%s15105_s29 + $0xe90] sm:$0xff] }
  0xad   : > { %2295 = vst [vmem:[%s15110_s5 + $0x880] sm:$0xff] %v2294_v16  ;;  %v2300_v19 = vld [vmem:[%s15105_s29 + $0xe98] sm:$0xff]  ;;  %2297 = vst [vmem:[%s15110_s5 + $0x888] sm:$0xff] %v2296_v17  ;;  %v2302_v20 = vld [vmem:[%s15105_s29 + $0xea0] sm:$0xff] }
  0xae   : > { %2299 = vst [vmem:[%s15110_s5 + $0x890] sm:$0xff] %v2298_v18  ;;  %2301 = vst [vmem:[%s15110_s5 + $0x898] sm:$0xff] %v2300_v19  ;;  %v2304_v21 = vld [vmem:[%s15105_s29 + $0xea8] sm:$0xff]  ;;  %v2306_v22 = vld [vmem:[%s15105_s29 + $0xeb0] sm:$0xff] }
  0xaf   : > { %2303 = vst [vmem:[%s15110_s5 + $0x8a0] sm:$0xff] %v2302_v20  ;;  %2305 = vst [vmem:[%s15110_s5 + $0x8a8] sm:$0xff] %v2304_v21  ;;  %v2308_v23 = vld [vmem:[%s15105_s29 + $0xeb8] sm:$0xff]  ;;  %v2310_v24 = vld [vmem:[%s15105_s29 + $0xec0] sm:$0xff] }
  0xb0   : > { %2307 = vst [vmem:[%s15110_s5 + $0x8b0] sm:$0xff] %v2306_v22  ;;  %v2312_v25 = vld [vmem:[%s15105_s29 + $0xec8] sm:$0xff]  ;;  %2309 = vst [vmem:[%s15110_s5 + $0x8b8] sm:$0xff] %v2308_v23  ;;  %v2314_v26 = vld [vmem:[%s15105_s29 + $0xed0] sm:$0xff] }
  0xb1   : > { %2311 = vst [vmem:[%s15110_s5 + $0x8c0] sm:$0xff] %v2310_v24  ;;  %2313 = vst [vmem:[%s15110_s5 + $0x8c8] sm:$0xff] %v2312_v25  ;;  %v2316_v27 = vld [vmem:[%s15105_s29 + $0xed8] sm:$0xff]  ;;  %v2318_v28 = vld [vmem:[%s15105_s29 + $0xee0] sm:$0xff] }
  0xb2   : > { %2315 = vst [vmem:[%s15110_s5 + $0x8d0] sm:$0xff] %v2314_v26  ;;  %2317 = vst [vmem:[%s15110_s5 + $0x8d8] sm:$0xff] %v2316_v27  ;;  %v2320_v29 = vld [vmem:[%s15105_s29 + $0xee8] sm:$0xff]  ;;  %v2322_v30 = vld [vmem:[%s15105_s29 + $0xef0] sm:$0xff] }
  0xb3   : > { %2319 = vst [vmem:[%s15110_s5 + $0x8e0] sm:$0xff] %v2318_v28  ;;  %v2324_v31 = vld [vmem:[%s15105_s29 + $0xef8] sm:$0xff]  ;;  %2321 = vst [vmem:[%s15110_s5 + $0x8e8] sm:$0xff] %v2320_v29  ;;  %v2326_v32 = vld [vmem:[%s15105_s29 + $0x1200] sm:$0xff] }
  0xb4   : > { %2323 = vst [vmem:[%s15110_s5 + $0x8f0] sm:$0xff] %v2322_v30  ;;  %2325 = vst [vmem:[%s15110_s5 + $0x8f8] sm:$0xff] %v2324_v31  ;;  %v2328_v33 = vld [vmem:[%s15105_s29 + $0x1208] sm:$0xff]  ;;  %v2330_v34 = vld [vmem:[%s15105_s29 + $0x1210] sm:$0xff] }
  0xb5   : > { %2327 = vst [vmem:[%s15110_s5 + $0x900] sm:$0xff] %v2326_v32  ;;  %2329 = vst [vmem:[%s15110_s5 + $0x908] sm:$0xff] %v2328_v33  ;;  %v2332_v35 = vld [vmem:[%s15105_s29 + $0x1218] sm:$0xff]  ;;  %v2334_v36 = vld [vmem:[%s15105_s29 + $0x1220] sm:$0xff] }
  0xb6   : > { %2331 = vst [vmem:[%s15110_s5 + $0x910] sm:$0xff] %v2330_v34  ;;  %v2336_v37 = vld [vmem:[%s15105_s29 + $0x1228] sm:$0xff]  ;;  %2333 = vst [vmem:[%s15110_s5 + $0x918] sm:$0xff] %v2332_v35  ;;  %v2338_v38 = vld [vmem:[%s15105_s29 + $0x1230] sm:$0xff] }
  0xb7   : > { %2335 = vst [vmem:[%s15110_s5 + $0x920] sm:$0xff] %v2334_v36  ;;  %2337 = vst [vmem:[%s15110_s5 + $0x928] sm:$0xff] %v2336_v37  ;;  %v2340_v39 = vld [vmem:[%s15105_s29 + $0x1238] sm:$0xff]  ;;  %v2342_v40 = vld [vmem:[%s15105_s29 + $0x1240] sm:$0xff] }
  0xb8   : > { %2339 = vst [vmem:[%s15110_s5 + $0x930] sm:$0xff] %v2338_v38  ;;  %2341 = vst [vmem:[%s15110_s5 + $0x938] sm:$0xff] %v2340_v39  ;;  %v2344_v41 = vld [vmem:[%s15105_s29 + $0x1248] sm:$0xff]  ;;  %v2346_v42 = vld [vmem:[%s15105_s29 + $0x1250] sm:$0xff] }
  0xb9   : > { %2343 = vst [vmem:[%s15110_s5 + $0x940] sm:$0xff] %v2342_v40  ;;  %v2348_v43 = vld [vmem:[%s15105_s29 + $0x1258] sm:$0xff]  ;;  %2345 = vst [vmem:[%s15110_s5 + $0x948] sm:$0xff] %v2344_v41  ;;  %v2350_v44 = vld [vmem:[%s15105_s29 + $0x1260] sm:$0xff] }
  0xba   : > { %2347 = vst [vmem:[%s15110_s5 + $0x950] sm:$0xff] %v2346_v42  ;;  %2349 = vst [vmem:[%s15110_s5 + $0x958] sm:$0xff] %v2348_v43  ;;  %v2352_v45 = vld [vmem:[%s15105_s29 + $0x1268] sm:$0xff]  ;;  %v2354_v46 = vld [vmem:[%s15105_s29 + $0x1270] sm:$0xff] }
  0xbb   : > { %2351 = vst [vmem:[%s15110_s5 + $0x960] sm:$0xff] %v2350_v44  ;;  %2353 = vst [vmem:[%s15110_s5 + $0x968] sm:$0xff] %v2352_v45  ;;  %v2356_v47 = vld [vmem:[%s15105_s29 + $0x1278] sm:$0xff]  ;;  %v2358_v48 = vld [vmem:[%s15105_s29 + $0x1280] sm:$0xff] }
  0xbc   : > { %2355 = vst [vmem:[%s15110_s5 + $0x970] sm:$0xff] %v2354_v46  ;;  %v2360_v49 = vld [vmem:[%s15105_s29 + $0x1288] sm:$0xff]  ;;  %2357 = vst [vmem:[%s15110_s5 + $0x978] sm:$0xff] %v2356_v47  ;;  %v2362_v50 = vld [vmem:[%s15105_s29 + $0x1290] sm:$0xff] }
  0xbd   : > { %2359 = vst [vmem:[%s15110_s5 + $0x980] sm:$0xff] %v2358_v48  ;;  %2361 = vst [vmem:[%s15110_s5 + $0x988] sm:$0xff] %v2360_v49  ;;  %v2364_v51 = vld [vmem:[%s15105_s29 + $0x1298] sm:$0xff]  ;;  %v2366_v52 = vld [vmem:[%s15105_s29 + $0x12a0] sm:$0xff] }
  0xbe   : > { %2363 = vst [vmem:[%s15110_s5 + $0x990] sm:$0xff] %v2362_v50  ;;  %2365 = vst [vmem:[%s15110_s5 + $0x998] sm:$0xff] %v2364_v51  ;;  %v2368_v53 = vld [vmem:[%s15105_s29 + $0x12a8] sm:$0xff]  ;;  %v2370_v54 = vld [vmem:[%s15105_s29 + $0x12b0] sm:$0xff] }
  0xbf   : > { %2367 = vst [vmem:[%s15110_s5 + $0x9a0] sm:$0xff] %v2366_v52  ;;  %v2372_v55 = vld [vmem:[%s15105_s29 + $0x12b8] sm:$0xff]  ;;  %2369 = vst [vmem:[%s15110_s5 + $0x9a8] sm:$0xff] %v2368_v53  ;;  %v2374_v56 = vld [vmem:[%s15105_s29 + $0x12c0] sm:$0xff] }
  0xc0   : > { %2371 = vst [vmem:[%s15110_s5 + $0x9b0] sm:$0xff] %v2370_v54  ;;  %2373 = vst [vmem:[%s15110_s5 + $0x9b8] sm:$0xff] %v2372_v55  ;;  %v2376_v57 = vld [vmem:[%s15105_s29 + $0x12c8] sm:$0xff]  ;;  %v2378_v58 = vld [vmem:[%s15105_s29 + $0x12d0] sm:$0xff] }
  0xc1   : > { %2375 = vst [vmem:[%s15110_s5 + $0x9c0] sm:$0xff] %v2374_v56  ;;  %2377 = vst [vmem:[%s15110_s5 + $0x9c8] sm:$0xff] %v2376_v57  ;;  %v2380_v59 = vld [vmem:[%s15105_s29 + $0x12d8] sm:$0xff]  ;;  %v2382_v60 = vld [vmem:[%s15105_s29 + $0x12e0] sm:$0xff] }
  0xc2   : > { %2379 = vst [vmem:[%s15110_s5 + $0x9d0] sm:$0xff] %v2378_v58  ;;  %v2384_v61 = vld [vmem:[%s15105_s29 + $0x12e8] sm:$0xff]  ;;  %2381 = vst [vmem:[%s15110_s5 + $0x9d8] sm:$0xff] %v2380_v59  ;;  %v2386_v62 = vld [vmem:[%s15105_s29 + $0x12f0] sm:$0xff] }
  0xc3   : > { %2383 = vst [vmem:[%s15110_s5 + $0x9e0] sm:$0xff] %v2382_v60  ;;  %2385 = vst [vmem:[%s15110_s5 + $0x9e8] sm:$0xff] %v2384_v61  ;;  %v2388_v63 = vld [vmem:[%s15105_s29 + $0x12f8] sm:$0xff]  ;;  %v2390_v0 = vld [vmem:[%s15105_s29 + $0x1300] sm:$0xff] }
  0xc4   : > { %2387 = vst [vmem:[%s15110_s5 + $0x9f0] sm:$0xff] %v2386_v62  ;;  %2389 = vst [vmem:[%s15110_s5 + $0x9f8] sm:$0xff] %v2388_v63  ;;  %v2392_v1 = vld [vmem:[%s15105_s29 + $0x1308] sm:$0xff]  ;;  %v2394_v2 = vld [vmem:[%s15105_s29 + $0x1310] sm:$0xff] }
  0xc5   : > { %2391 = vst [vmem:[%s15110_s5 + $0xa00] sm:$0xff] %v2390_v0  ;;  %v2396_v3 = vld [vmem:[%s15105_s29 + $0x1318] sm:$0xff]  ;;  %2393 = vst [vmem:[%s15110_s5 + $0xa08] sm:$0xff] %v2392_v1  ;;  %v2398_v4 = vld [vmem:[%s15105_s29 + $0x1320] sm:$0xff] }
  0xc6   : > { %2395 = vst [vmem:[%s15110_s5 + $0xa10] sm:$0xff] %v2394_v2  ;;  %2397 = vst [vmem:[%s15110_s5 + $0xa18] sm:$0xff] %v2396_v3  ;;  %v2400_v5 = vld [vmem:[%s15105_s29 + $0x1328] sm:$0xff]  ;;  %v2402_v6 = vld [vmem:[%s15105_s29 + $0x1330] sm:$0xff] }
  0xc7   : > { %2399 = vst [vmem:[%s15110_s5 + $0xa20] sm:$0xff] %v2398_v4  ;;  %2401 = vst [vmem:[%s15110_s5 + $0xa28] sm:$0xff] %v2400_v5  ;;  %v2404_v7 = vld [vmem:[%s15105_s29 + $0x1338] sm:$0xff]  ;;  %v2406_v8 = vld [vmem:[%s15105_s29 + $0x1340] sm:$0xff] }
  0xc8   : > { %2403 = vst [vmem:[%s15110_s5 + $0xa30] sm:$0xff] %v2402_v6  ;;  %v2408_v9 = vld [vmem:[%s15105_s29 + $0x1348] sm:$0xff]  ;;  %2405 = vst [vmem:[%s15110_s5 + $0xa38] sm:$0xff] %v2404_v7  ;;  %v2410_v10 = vld [vmem:[%s15105_s29 + $0x1350] sm:$0xff] }
  0xc9   : > { %2407 = vst [vmem:[%s15110_s5 + $0xa40] sm:$0xff] %v2406_v8  ;;  %2409 = vst [vmem:[%s15110_s5 + $0xa48] sm:$0xff] %v2408_v9  ;;  %v2412_v11 = vld [vmem:[%s15105_s29 + $0x1358] sm:$0xff]  ;;  %v2414_v12 = vld [vmem:[%s15105_s29 + $0x1360] sm:$0xff] }
  0xca   : > { %2411 = vst [vmem:[%s15110_s5 + $0xa50] sm:$0xff] %v2410_v10  ;;  %2413 = vst [vmem:[%s15110_s5 + $0xa58] sm:$0xff] %v2412_v11  ;;  %v2416_v13 = vld [vmem:[%s15105_s29 + $0x1368] sm:$0xff]  ;;  %v2418_v14 = vld [vmem:[%s15105_s29 + $0x1370] sm:$0xff] }
  0xcb   : > { %2415 = vst [vmem:[%s15110_s5 + $0xa60] sm:$0xff] %v2414_v12  ;;  %v2420_v15 = vld [vmem:[%s15105_s29 + $0x1378] sm:$0xff]  ;;  %2417 = vst [vmem:[%s15110_s5 + $0xa68] sm:$0xff] %v2416_v13  ;;  %v2422_v16 = vld [vmem:[%s15105_s29 + $0x1380] sm:$0xff] }
  0xcc   : > { %2419 = vst [vmem:[%s15110_s5 + $0xa70] sm:$0xff] %v2418_v14  ;;  %2421 = vst [vmem:[%s15110_s5 + $0xa78] sm:$0xff] %v2420_v15  ;;  %v2424_v17 = vld [vmem:[%s15105_s29 + $0x1388] sm:$0xff]  ;;  %v2426_v18 = vld [vmem:[%s15105_s29 + $0x1390] sm:$0xff] }
  0xcd   : > { %2423 = vst [vmem:[%s15110_s5 + $0xa80] sm:$0xff] %v2422_v16  ;;  %2425 = vst [vmem:[%s15110_s5 + $0xa88] sm:$0xff] %v2424_v17  ;;  %v2428_v19 = vld [vmem:[%s15105_s29 + $0x1398] sm:$0xff]  ;;  %v2430_v20 = vld [vmem:[%s15105_s29 + $0x13a0] sm:$0xff] }
  0xce   : > { %2427 = vst [vmem:[%s15110_s5 + $0xa90] sm:$0xff] %v2426_v18  ;;  %v2432_v21 = vld [vmem:[%s15105_s29 + $0x13a8] sm:$0xff]  ;;  %2429 = vst [vmem:[%s15110_s5 + $0xa98] sm:$0xff] %v2428_v19  ;;  %v2434_v22 = vld [vmem:[%s15105_s29 + $0x13b0] sm:$0xff] }
  0xcf   : > { %2431 = vst [vmem:[%s15110_s5 + $0xaa0] sm:$0xff] %v2430_v20  ;;  %2433 = vst [vmem:[%s15110_s5 + $0xaa8] sm:$0xff] %v2432_v21  ;;  %v2436_v23 = vld [vmem:[%s15105_s29 + $0x13b8] sm:$0xff]  ;;  %v2438_v24 = vld [vmem:[%s15105_s29 + $0x13c0] sm:$0xff] }
  0xd0   : > { %2435 = vst [vmem:[%s15110_s5 + $0xab0] sm:$0xff] %v2434_v22  ;;  %2437 = vst [vmem:[%s15110_s5 + $0xab8] sm:$0xff] %v2436_v23  ;;  %v2440_v25 = vld [vmem:[%s15105_s29 + $0x13c8] sm:$0xff]  ;;  %v2442_v26 = vld [vmem:[%s15105_s29 + $0x13d0] sm:$0xff] }
  0xd1   : > { %2439 = vst [vmem:[%s15110_s5 + $0xac0] sm:$0xff] %v2438_v24  ;;  %v2444_v27 = vld [vmem:[%s15105_s29 + $0x13d8] sm:$0xff]  ;;  %2441 = vst [vmem:[%s15110_s5 + $0xac8] sm:$0xff] %v2440_v25  ;;  %v2446_v28 = vld [vmem:[%s15105_s29 + $0x13e0] sm:$0xff] }
  0xd2   : > { %2443 = vst [vmem:[%s15110_s5 + $0xad0] sm:$0xff] %v2442_v26  ;;  %2445 = vst [vmem:[%s15110_s5 + $0xad8] sm:$0xff] %v2444_v27  ;;  %v2448_v29 = vld [vmem:[%s15105_s29 + $0x13e8] sm:$0xff]  ;;  %v2450_v30 = vld [vmem:[%s15105_s29 + $0x13f0] sm:$0xff] }
  0xd3   : > { %2447 = vst [vmem:[%s15110_s5 + $0xae0] sm:$0xff] %v2446_v28  ;;  %2449 = vst [vmem:[%s15110_s5 + $0xae8] sm:$0xff] %v2448_v29  ;;  %v2452_v31 = vld [vmem:[%s15105_s29 + $0x13f8] sm:$0xff]  ;;  %v2454_v32 = vld [vmem:[%s15105_s29 + $0x1400] sm:$0xff] }
  0xd4   : > { %2451 = vst [vmem:[%s15110_s5 + $0xaf0] sm:$0xff] %v2450_v30  ;;  %v2456_v33 = vld [vmem:[%s15105_s29 + $0x1408] sm:$0xff]  ;;  %2453 = vst [vmem:[%s15110_s5 + $0xaf8] sm:$0xff] %v2452_v31  ;;  %v2458_v34 = vld [vmem:[%s15105_s29 + $0x1410] sm:$0xff] }
  0xd5   : > { %2455 = vst [vmem:[%s15110_s5 + $0xb00] sm:$0xff] %v2454_v32  ;;  %2457 = vst [vmem:[%s15110_s5 + $0xb08] sm:$0xff] %v2456_v33  ;;  %v2460_v35 = vld [vmem:[%s15105_s29 + $0x1418] sm:$0xff]  ;;  %v2462_v36 = vld [vmem:[%s15105_s29 + $0x1420] sm:$0xff] }
  0xd6   : > { %2459 = vst [vmem:[%s15110_s5 + $0xb10] sm:$0xff] %v2458_v34  ;;  %2461 = vst [vmem:[%s15110_s5 + $0xb18] sm:$0xff] %v2460_v35  ;;  %v2464_v37 = vld [vmem:[%s15105_s29 + $0x1428] sm:$0xff]  ;;  %v2466_v38 = vld [vmem:[%s15105_s29 + $0x1430] sm:$0xff] }
  0xd7   : > { %2463 = vst [vmem:[%s15110_s5 + $0xb20] sm:$0xff] %v2462_v36  ;;  %v2468_v39 = vld [vmem:[%s15105_s29 + $0x1438] sm:$0xff]  ;;  %2465 = vst [vmem:[%s15110_s5 + $0xb28] sm:$0xff] %v2464_v37  ;;  %v2470_v40 = vld [vmem:[%s15105_s29 + $0x1440] sm:$0xff] }
  0xd8   : > { %2467 = vst [vmem:[%s15110_s5 + $0xb30] sm:$0xff] %v2466_v38  ;;  %2469 = vst [vmem:[%s15110_s5 + $0xb38] sm:$0xff] %v2468_v39  ;;  %v2472_v41 = vld [vmem:[%s15105_s29 + $0x1448] sm:$0xff]  ;;  %v2474_v42 = vld [vmem:[%s15105_s29 + $0x1450] sm:$0xff] }
  0xd9   : > { %2471 = vst [vmem:[%s15110_s5 + $0xb40] sm:$0xff] %v2470_v40  ;;  %2473 = vst [vmem:[%s15110_s5 + $0xb48] sm:$0xff] %v2472_v41  ;;  %v2476_v43 = vld [vmem:[%s15105_s29 + $0x1458] sm:$0xff]  ;;  %v2478_v44 = vld [vmem:[%s15105_s29 + $0x1460] sm:$0xff] }
  0xda   : > { %2475 = vst [vmem:[%s15110_s5 + $0xb50] sm:$0xff] %v2474_v42  ;;  %v2480_v45 = vld [vmem:[%s15105_s29 + $0x1468] sm:$0xff]  ;;  %2477 = vst [vmem:[%s15110_s5 + $0xb58] sm:$0xff] %v2476_v43  ;;  %v2482_v46 = vld [vmem:[%s15105_s29 + $0x1470] sm:$0xff] }
  0xdb   : > { %2479 = vst [vmem:[%s15110_s5 + $0xb60] sm:$0xff] %v2478_v44  ;;  %2481 = vst [vmem:[%s15110_s5 + $0xb68] sm:$0xff] %v2480_v45  ;;  %v2484_v47 = vld [vmem:[%s15105_s29 + $0x1478] sm:$0xff]  ;;  %v2486_v48 = vld [vmem:[%s15105_s29 + $0x1480] sm:$0xff] }
  0xdc   : > { %2483 = vst [vmem:[%s15110_s5 + $0xb70] sm:$0xff] %v2482_v46  ;;  %2485 = vst [vmem:[%s15110_s5 + $0xb78] sm:$0xff] %v2484_v47  ;;  %v2488_v49 = vld [vmem:[%s15105_s29 + $0x1488] sm:$0xff]  ;;  %v2490_v50 = vld [vmem:[%s15105_s29 + $0x1490] sm:$0xff] }
  0xdd   : > { %2487 = vst [vmem:[%s15110_s5 + $0xb80] sm:$0xff] %v2486_v48  ;;  %v2492_v51 = vld [vmem:[%s15105_s29 + $0x1498] sm:$0xff]  ;;  %2489 = vst [vmem:[%s15110_s5 + $0xb88] sm:$0xff] %v2488_v49  ;;  %v2494_v52 = vld [vmem:[%s15105_s29 + $0x14a0] sm:$0xff] }
  0xde   : > { %2491 = vst [vmem:[%s15110_s5 + $0xb90] sm:$0xff] %v2490_v50  ;;  %2493 = vst [vmem:[%s15110_s5 + $0xb98] sm:$0xff] %v2492_v51  ;;  %v2496_v53 = vld [vmem:[%s15105_s29 + $0x14a8] sm:$0xff]  ;;  %v2498_v54 = vld [vmem:[%s15105_s29 + $0x14b0] sm:$0xff] }
  0xdf   : > { %2495 = vst [vmem:[%s15110_s5 + $0xba0] sm:$0xff] %v2494_v52  ;;  %2497 = vst [vmem:[%s15110_s5 + $0xba8] sm:$0xff] %v2496_v53  ;;  %v2500_v55 = vld [vmem:[%s15105_s29 + $0x14b8] sm:$0xff]  ;;  %v2502_v56 = vld [vmem:[%s15105_s29 + $0x14c0] sm:$0xff] }
  0xe0   : > { %2499 = vst [vmem:[%s15110_s5 + $0xbb0] sm:$0xff] %v2498_v54  ;;  %v2504_v57 = vld [vmem:[%s15105_s29 + $0x14c8] sm:$0xff]  ;;  %2501 = vst [vmem:[%s15110_s5 + $0xbb8] sm:$0xff] %v2500_v55  ;;  %v2506_v58 = vld [vmem:[%s15105_s29 + $0x14d0] sm:$0xff] }
  0xe1   : > { %2503 = vst [vmem:[%s15110_s5 + $0xbc0] sm:$0xff] %v2502_v56  ;;  %2505 = vst [vmem:[%s15110_s5 + $0xbc8] sm:$0xff] %v2504_v57  ;;  %v2508_v59 = vld [vmem:[%s15105_s29 + $0x14d8] sm:$0xff]  ;;  %v2510_v60 = vld [vmem:[%s15105_s29 + $0x14e0] sm:$0xff] }
  0xe2   : > { %2507 = vst [vmem:[%s15110_s5 + $0xbd0] sm:$0xff] %v2506_v58  ;;  %2509 = vst [vmem:[%s15110_s5 + $0xbd8] sm:$0xff] %v2508_v59  ;;  %v2512_v61 = vld [vmem:[%s15105_s29 + $0x14e8] sm:$0xff]  ;;  %v2514_v62 = vld [vmem:[%s15105_s29 + $0x14f0] sm:$0xff] }
  0xe3   : > { %2511 = vst [vmem:[%s15110_s5 + $0xbe0] sm:$0xff] %v2510_v60  ;;  %v2516_v63 = vld [vmem:[%s15105_s29 + $0x14f8] sm:$0xff]  ;;  %2513 = vst [vmem:[%s15110_s5 + $0xbe8] sm:$0xff] %v2512_v61  ;;  %v2518_v0 = vld [vmem:[%s15105_s29 + $0x1800] sm:$0xff] }
  0xe4   : > { %2515 = vst [vmem:[%s15110_s5 + $0xbf0] sm:$0xff] %v2514_v62  ;;  %2517 = vst [vmem:[%s15110_s5 + $0xbf8] sm:$0xff] %v2516_v63  ;;  %v2520_v1 = vld [vmem:[%s15105_s29 + $0x1808] sm:$0xff]  ;;  %v2522_v2 = vld [vmem:[%s15105_s29 + $0x1810] sm:$0xff] }
  0xe5   : > { %2519 = vst [vmem:[%s15110_s5 + $0xc00] sm:$0xff] %v2518_v0  ;;  %2521 = vst [vmem:[%s15110_s5 + $0xc08] sm:$0xff] %v2520_v1  ;;  %v2524_v3 = vld [vmem:[%s15105_s29 + $0x1818] sm:$0xff]  ;;  %v2526_v4 = vld [vmem:[%s15105_s29 + $0x1820] sm:$0xff] }
  0xe6   : > { %2523 = vst [vmem:[%s15110_s5 + $0xc10] sm:$0xff] %v2522_v2  ;;  %v2528_v5 = vld [vmem:[%s15105_s29 + $0x1828] sm:$0xff]  ;;  %2525 = vst [vmem:[%s15110_s5 + $0xc18] sm:$0xff] %v2524_v3  ;;  %v2530_v6 = vld [vmem:[%s15105_s29 + $0x1830] sm:$0xff] }
  0xe7   : > { %2527 = vst [vmem:[%s15110_s5 + $0xc20] sm:$0xff] %v2526_v4  ;;  %2529 = vst [vmem:[%s15110_s5 + $0xc28] sm:$0xff] %v2528_v5  ;;  %v2532_v7 = vld [vmem:[%s15105_s29 + $0x1838] sm:$0xff]  ;;  %v2534_v8 = vld [vmem:[%s15105_s29 + $0x1840] sm:$0xff] }
  0xe8   : > { %2531 = vst [vmem:[%s15110_s5 + $0xc30] sm:$0xff] %v2530_v6  ;;  %2533 = vst [vmem:[%s15110_s5 + $0xc38] sm:$0xff] %v2532_v7  ;;  %v2536_v9 = vld [vmem:[%s15105_s29 + $0x1848] sm:$0xff]  ;;  %v2538_v10 = vld [vmem:[%s15105_s29 + $0x1850] sm:$0xff] }
  0xe9   : > { %2535 = vst [vmem:[%s15110_s5 + $0xc40] sm:$0xff] %v2534_v8  ;;  %v2540_v11 = vld [vmem:[%s15105_s29 + $0x1858] sm:$0xff]  ;;  %2537 = vst [vmem:[%s15110_s5 + $0xc48] sm:$0xff] %v2536_v9  ;;  %v2542_v12 = vld [vmem:[%s15105_s29 + $0x1860] sm:$0xff] }
  0xea   : > { %2539 = vst [vmem:[%s15110_s5 + $0xc50] sm:$0xff] %v2538_v10  ;;  %2541 = vst [vmem:[%s15110_s5 + $0xc58] sm:$0xff] %v2540_v11  ;;  %v2544_v13 = vld [vmem:[%s15105_s29 + $0x1868] sm:$0xff]  ;;  %v2546_v14 = vld [vmem:[%s15105_s29 + $0x1870] sm:$0xff] }
  0xeb   : > { %2543 = vst [vmem:[%s15110_s5 + $0xc60] sm:$0xff] %v2542_v12  ;;  %2545 = vst [vmem:[%s15110_s5 + $0xc68] sm:$0xff] %v2544_v13  ;;  %v2548_v15 = vld [vmem:[%s15105_s29 + $0x1878] sm:$0xff]  ;;  %v2550_v16 = vld [vmem:[%s15105_s29 + $0x1880] sm:$0xff] }
  0xec   : > { %2547 = vst [vmem:[%s15110_s5 + $0xc70] sm:$0xff] %v2546_v14  ;;  %v2552_v17 = vld [vmem:[%s15105_s29 + $0x1888] sm:$0xff]  ;;  %2549 = vst [vmem:[%s15110_s5 + $0xc78] sm:$0xff] %v2548_v15  ;;  %v2554_v18 = vld [vmem:[%s15105_s29 + $0x1890] sm:$0xff] }
  0xed   : > { %2551 = vst [vmem:[%s15110_s5 + $0xc80] sm:$0xff] %v2550_v16  ;;  %2553 = vst [vmem:[%s15110_s5 + $0xc88] sm:$0xff] %v2552_v17  ;;  %v2556_v19 = vld [vmem:[%s15105_s29 + $0x1898] sm:$0xff]  ;;  %v2558_v20 = vld [vmem:[%s15105_s29 + $0x18a0] sm:$0xff] }
  0xee   : > { %2555 = vst [vmem:[%s15110_s5 + $0xc90] sm:$0xff] %v2554_v18  ;;  %2557 = vst [vmem:[%s15110_s5 + $0xc98] sm:$0xff] %v2556_v19  ;;  %v2560_v21 = vld [vmem:[%s15105_s29 + $0x18a8] sm:$0xff]  ;;  %v2562_v22 = vld [vmem:[%s15105_s29 + $0x18b0] sm:$0xff] }
  0xef   : > { %2559 = vst [vmem:[%s15110_s5 + $0xca0] sm:$0xff] %v2558_v20  ;;  %v2564_v23 = vld [vmem:[%s15105_s29 + $0x18b8] sm:$0xff]  ;;  %2561 = vst [vmem:[%s15110_s5 + $0xca8] sm:$0xff] %v2560_v21  ;;  %v2566_v24 = vld [vmem:[%s15105_s29 + $0x18c0] sm:$0xff] }
  0xf0   : > { %2563 = vst [vmem:[%s15110_s5 + $0xcb0] sm:$0xff] %v2562_v22  ;;  %2565 = vst [vmem:[%s15110_s5 + $0xcb8] sm:$0xff] %v2564_v23  ;;  %v2568_v25 = vld [vmem:[%s15105_s29 + $0x18c8] sm:$0xff]  ;;  %v2570_v26 = vld [vmem:[%s15105_s29 + $0x18d0] sm:$0xff] }
  0xf1   : > { %2567 = vst [vmem:[%s15110_s5 + $0xcc0] sm:$0xff] %v2566_v24  ;;  %2569 = vst [vmem:[%s15110_s5 + $0xcc8] sm:$0xff] %v2568_v25  ;;  %v2572_v27 = vld [vmem:[%s15105_s29 + $0x18d8] sm:$0xff]  ;;  %v2574_v28 = vld [vmem:[%s15105_s29 + $0x18e0] sm:$0xff] }
  0xf2   : > { %2571 = vst [vmem:[%s15110_s5 + $0xcd0] sm:$0xff] %v2570_v26  ;;  %v2576_v29 = vld [vmem:[%s15105_s29 + $0x18e8] sm:$0xff]  ;;  %2573 = vst [vmem:[%s15110_s5 + $0xcd8] sm:$0xff] %v2572_v27  ;;  %v2578_v30 = vld [vmem:[%s15105_s29 + $0x18f0] sm:$0xff] }
  0xf3   : > { %2575 = vst [vmem:[%s15110_s5 + $0xce0] sm:$0xff] %v2574_v28  ;;  %2577 = vst [vmem:[%s15110_s5 + $0xce8] sm:$0xff] %v2576_v29  ;;  %v2580_v31 = vld [vmem:[%s15105_s29 + $0x18f8] sm:$0xff]  ;;  %v2582_v32 = vld [vmem:[%s15105_s29 + $0x1900] sm:$0xff] }
  0xf4   : > { %2579 = vst [vmem:[%s15110_s5 + $0xcf0] sm:$0xff] %v2578_v30  ;;  %2581 = vst [vmem:[%s15110_s5 + $0xcf8] sm:$0xff] %v2580_v31  ;;  %v2584_v33 = vld [vmem:[%s15105_s29 + $0x1908] sm:$0xff]  ;;  %v2586_v34 = vld [vmem:[%s15105_s29 + $0x1910] sm:$0xff] }
  0xf5   : > { %2583 = vst [vmem:[%s15110_s5 + $0xd00] sm:$0xff] %v2582_v32  ;;  %v2588_v35 = vld [vmem:[%s15105_s29 + $0x1918] sm:$0xff]  ;;  %2585 = vst [vmem:[%s15110_s5 + $0xd08] sm:$0xff] %v2584_v33  ;;  %v2590_v36 = vld [vmem:[%s15105_s29 + $0x1920] sm:$0xff] }
  0xf6   : > { %2587 = vst [vmem:[%s15110_s5 + $0xd10] sm:$0xff] %v2586_v34  ;;  %2589 = vst [vmem:[%s15110_s5 + $0xd18] sm:$0xff] %v2588_v35  ;;  %v2592_v37 = vld [vmem:[%s15105_s29 + $0x1928] sm:$0xff]  ;;  %v2594_v38 = vld [vmem:[%s15105_s29 + $0x1930] sm:$0xff] }
  0xf7   : > { %2591 = vst [vmem:[%s15110_s5 + $0xd20] sm:$0xff] %v2590_v36  ;;  %2593 = vst [vmem:[%s15110_s5 + $0xd28] sm:$0xff] %v2592_v37  ;;  %v2596_v39 = vld [vmem:[%s15105_s29 + $0x1938] sm:$0xff]  ;;  %v2598_v40 = vld [vmem:[%s15105_s29 + $0x1940] sm:$0xff] }
  0xf8   : > { %2595 = vst [vmem:[%s15110_s5 + $0xd30] sm:$0xff] %v2594_v38  ;;  %v2600_v41 = vld [vmem:[%s15105_s29 + $0x1948] sm:$0xff]  ;;  %2597 = vst [vmem:[%s15110_s5 + $0xd38] sm:$0xff] %v2596_v39  ;;  %v2602_v42 = vld [vmem:[%s15105_s29 + $0x1950] sm:$0xff] }
  0xf9   : > { %2599 = vst [vmem:[%s15110_s5 + $0xd40] sm:$0xff] %v2598_v40  ;;  %2601 = vst [vmem:[%s15110_s5 + $0xd48] sm:$0xff] %v2600_v41  ;;  %v2604_v43 = vld [vmem:[%s15105_s29 + $0x1958] sm:$0xff]  ;;  %v2606_v44 = vld [vmem:[%s15105_s29 + $0x1960] sm:$0xff] }
  0xfa   : > { %2603 = vst [vmem:[%s15110_s5 + $0xd50] sm:$0xff] %v2602_v42  ;;  %2605 = vst [vmem:[%s15110_s5 + $0xd58] sm:$0xff] %v2604_v43  ;;  %v2608_v45 = vld [vmem:[%s15105_s29 + $0x1968] sm:$0xff]  ;;  %v2610_v46 = vld [vmem:[%s15105_s29 + $0x1970] sm:$0xff] }
  0xfb   : > { %2607 = vst [vmem:[%s15110_s5 + $0xd60] sm:$0xff] %v2606_v44  ;;  %v2612_v47 = vld [vmem:[%s15105_s29 + $0x1978] sm:$0xff]  ;;  %2609 = vst [vmem:[%s15110_s5 + $0xd68] sm:$0xff] %v2608_v45  ;;  %v2614_v48 = vld [vmem:[%s15105_s29 + $0x1980] sm:$0xff] }
  0xfc   : > { %2611 = vst [vmem:[%s15110_s5 + $0xd70] sm:$0xff] %v2610_v46  ;;  %2613 = vst [vmem:[%s15110_s5 + $0xd78] sm:$0xff] %v2612_v47  ;;  %v2616_v49 = vld [vmem:[%s15105_s29 + $0x1988] sm:$0xff]  ;;  %v2618_v50 = vld [vmem:[%s15105_s29 + $0x1990] sm:$0xff] }
  0xfd   : > { %2615 = vst [vmem:[%s15110_s5 + $0xd80] sm:$0xff] %v2614_v48  ;;  %2617 = vst [vmem:[%s15110_s5 + $0xd88] sm:$0xff] %v2616_v49  ;;  %v2620_v51 = vld [vmem:[%s15105_s29 + $0x1998] sm:$0xff]  ;;  %v2622_v52 = vld [vmem:[%s15105_s29 + $0x19a0] sm:$0xff] }
  0xfe   : > { %2619 = vst [vmem:[%s15110_s5 + $0xd90] sm:$0xff] %v2618_v50  ;;  %v2624_v53 = vld [vmem:[%s15105_s29 + $0x19a8] sm:$0xff]  ;;  %2621 = vst [vmem:[%s15110_s5 + $0xd98] sm:$0xff] %v2620_v51  ;;  %v2626_v54 = vld [vmem:[%s15105_s29 + $0x19b0] sm:$0xff] }
  0xff   : > { %2623 = vst [vmem:[%s15110_s5 + $0xda0] sm:$0xff] %v2622_v52  ;;  %2625 = vst [vmem:[%s15110_s5 + $0xda8] sm:$0xff] %v2624_v53  ;;  %v2628_v55 = vld [vmem:[%s15105_s29 + $0x19b8] sm:$0xff]  ;;  %v2630_v56 = vld [vmem:[%s15105_s29 + $0x19c0] sm:$0xff] }
 0x100   : > { %2627 = vst [vmem:[%s15110_s5 + $0xdb0] sm:$0xff] %v2626_v54  ;;  %2629 = vst [vmem:[%s15110_s5 + $0xdb8] sm:$0xff] %v2628_v55  ;;  %v2632_v57 = vld [vmem:[%s15105_s29 + $0x19c8] sm:$0xff]  ;;  %v2634_v58 = vld [vmem:[%s15105_s29 + $0x19d0] sm:$0xff] }
 0x101   : > { %2631 = vst [vmem:[%s15110_s5 + $0xdc0] sm:$0xff] %v2630_v56  ;;  %v2636_v59 = vld [vmem:[%s15105_s29 + $0x19d8] sm:$0xff]  ;;  %2633 = vst [vmem:[%s15110_s5 + $0xdc8] sm:$0xff] %v2632_v57  ;;  %v2638_v60 = vld [vmem:[%s15105_s29 + $0x19e0] sm:$0xff] }
 0x102   : > { %2635 = vst [vmem:[%s15110_s5 + $0xdd0] sm:$0xff] %v2634_v58  ;;  %2637 = vst [vmem:[%s15110_s5 + $0xdd8] sm:$0xff] %v2636_v59  ;;  %v2640_v61 = vld [vmem:[%s15105_s29 + $0x19e8] sm:$0xff]  ;;  %v2642_v62 = vld [vmem:[%s15105_s29 + $0x19f0] sm:$0xff] }
 0x103   : > { %2639 = vst [vmem:[%s15110_s5 + $0xde0] sm:$0xff] %v2638_v60  ;;  %2641 = vst [vmem:[%s15110_s5 + $0xde8] sm:$0xff] %v2640_v61  ;;  %v2644_v63 = vld [vmem:[%s15105_s29 + $0x19f8] sm:$0xff]  ;;  %v2646_v0 = vld [vmem:[%s15105_s29 + $0x1a00] sm:$0xff] }
 0x104   : > { %2643 = vst [vmem:[%s15110_s5 + $0xdf0] sm:$0xff] %v2642_v62  ;;  %v2648_v1 = vld [vmem:[%s15105_s29 + $0x1a08] sm:$0xff]  ;;  %2645 = vst [vmem:[%s15110_s5 + $0xdf8] sm:$0xff] %v2644_v63  ;;  %v2650_v2 = vld [vmem:[%s15105_s29 + $0x1a10] sm:$0xff] }
 0x105   : > { %2647 = vst [vmem:[%s15110_s5 + $0xe00] sm:$0xff] %v2646_v0  ;;  %2649 = vst [vmem:[%s15110_s5 + $0xe08] sm:$0xff] %v2648_v1  ;;  %v2652_v3 = vld [vmem:[%s15105_s29 + $0x1a18] sm:$0xff]  ;;  %v2654_v4 = vld [vmem:[%s15105_s29 + $0x1a20] sm:$0xff] }
 0x106   : > { %2651 = vst [vmem:[%s15110_s5 + $0xe10] sm:$0xff] %v2650_v2  ;;  %2653 = vst [vmem:[%s15110_s5 + $0xe18] sm:$0xff] %v2652_v3  ;;  %v2656_v5 = vld [vmem:[%s15105_s29 + $0x1a28] sm:$0xff]  ;;  %v2658_v6 = vld [vmem:[%s15105_s29 + $0x1a30] sm:$0xff] }
 0x107   : > { %2655 = vst [vmem:[%s15110_s5 + $0xe20] sm:$0xff] %v2654_v4  ;;  %v2660_v7 = vld [vmem:[%s15105_s29 + $0x1a38] sm:$0xff]  ;;  %2657 = vst [vmem:[%s15110_s5 + $0xe28] sm:$0xff] %v2656_v5  ;;  %v2662_v8 = vld [vmem:[%s15105_s29 + $0x1a40] sm:$0xff] }
 0x108   : > { %2659 = vst [vmem:[%s15110_s5 + $0xe30] sm:$0xff] %v2658_v6  ;;  %2661 = vst [vmem:[%s15110_s5 + $0xe38] sm:$0xff] %v2660_v7  ;;  %v2664_v9 = vld [vmem:[%s15105_s29 + $0x1a48] sm:$0xff]  ;;  %v2666_v10 = vld [vmem:[%s15105_s29 + $0x1a50] sm:$0xff] }
 0x109   : > { %2663 = vst [vmem:[%s15110_s5 + $0xe40] sm:$0xff] %v2662_v8  ;;  %2665 = vst [vmem:[%s15110_s5 + $0xe48] sm:$0xff] %v2664_v9  ;;  %v2668_v11 = vld [vmem:[%s15105_s29 + $0x1a58] sm:$0xff]  ;;  %v2670_v12 = vld [vmem:[%s15105_s29 + $0x1a60] sm:$0xff] }
 0x10a   : > { %2667 = vst [vmem:[%s15110_s5 + $0xe50] sm:$0xff] %v2666_v10  ;;  %v2672_v13 = vld [vmem:[%s15105_s29 + $0x1a68] sm:$0xff]  ;;  %2669 = vst [vmem:[%s15110_s5 + $0xe58] sm:$0xff] %v2668_v11  ;;  %v2674_v14 = vld [vmem:[%s15105_s29 + $0x1a70] sm:$0xff] }
 0x10b   : > { %2671 = vst [vmem:[%s15110_s5 + $0xe60] sm:$0xff] %v2670_v12  ;;  %2673 = vst [vmem:[%s15110_s5 + $0xe68] sm:$0xff] %v2672_v13  ;;  %v2676_v15 = vld [vmem:[%s15105_s29 + $0x1a78] sm:$0xff]  ;;  %v2678_v16 = vld [vmem:[%s15105_s29 + $0x1a80] sm:$0xff] }
 0x10c   : > { %2675 = vst [vmem:[%s15110_s5 + $0xe70] sm:$0xff] %v2674_v14  ;;  %2677 = vst [vmem:[%s15110_s5 + $0xe78] sm:$0xff] %v2676_v15  ;;  %v2680_v17 = vld [vmem:[%s15105_s29 + $0x1a88] sm:$0xff]  ;;  %v2682_v18 = vld [vmem:[%s15105_s29 + $0x1a90] sm:$0xff] }
 0x10d   : > { %2679 = vst [vmem:[%s15110_s5 + $0xe80] sm:$0xff] %v2678_v16  ;;  %v2684_v19 = vld [vmem:[%s15105_s29 + $0x1a98] sm:$0xff]  ;;  %2681 = vst [vmem:[%s15110_s5 + $0xe88] sm:$0xff] %v2680_v17  ;;  %v2686_v20 = vld [vmem:[%s15105_s29 + $0x1aa0] sm:$0xff] }
 0x10e   : > { %2683 = vst [vmem:[%s15110_s5 + $0xe90] sm:$0xff] %v2682_v18  ;;  %2685 = vst [vmem:[%s15110_s5 + $0xe98] sm:$0xff] %v2684_v19  ;;  %v2688_v21 = vld [vmem:[%s15105_s29 + $0x1aa8] sm:$0xff]  ;;  %v2690_v22 = vld [vmem:[%s15105_s29 + $0x1ab0] sm:$0xff] }
 0x10f   : > { %2687 = vst [vmem:[%s15110_s5 + $0xea0] sm:$0xff] %v2686_v20  ;;  %2689 = vst [vmem:[%s15110_s5 + $0xea8] sm:$0xff] %v2688_v21  ;;  %v2692_v23 = vld [vmem:[%s15105_s29 + $0x1ab8] sm:$0xff]  ;;  %v2694_v24 = vld [vmem:[%s15105_s29 + $0x1ac0] sm:$0xff] }
 0x110   : > { %2691 = vst [vmem:[%s15110_s5 + $0xeb0] sm:$0xff] %v2690_v22  ;;  %v2696_v25 = vld [vmem:[%s15105_s29 + $0x1ac8] sm:$0xff]  ;;  %2693 = vst [vmem:[%s15110_s5 + $0xeb8] sm:$0xff] %v2692_v23  ;;  %v2698_v26 = vld [vmem:[%s15105_s29 + $0x1ad0] sm:$0xff] }
 0x111   : > { %2695 = vst [vmem:[%s15110_s5 + $0xec0] sm:$0xff] %v2694_v24  ;;  %2697 = vst [vmem:[%s15110_s5 + $0xec8] sm:$0xff] %v2696_v25  ;;  %v2700_v27 = vld [vmem:[%s15105_s29 + $0x1ad8] sm:$0xff]  ;;  %v2702_v28 = vld [vmem:[%s15105_s29 + $0x1ae0] sm:$0xff] }
 0x112   : > { %2699 = vst [vmem:[%s15110_s5 + $0xed0] sm:$0xff] %v2698_v26  ;;  %2701 = vst [vmem:[%s15110_s5 + $0xed8] sm:$0xff] %v2700_v27  ;;  %v2704_v29 = vld [vmem:[%s15105_s29 + $0x1ae8] sm:$0xff]  ;;  %v2706_v30 = vld [vmem:[%s15105_s29 + $0x1af0] sm:$0xff] }
 0x113   : > { %2703 = vst [vmem:[%s15110_s5 + $0xee0] sm:$0xff] %v2702_v28  ;;  %v2708_v31 = vld [vmem:[%s15105_s29 + $0x1af8] sm:$0xff]  ;;  %2705 = vst [vmem:[%s15110_s5 + $0xee8] sm:$0xff] %v2704_v29  ;;  %v2710_v32 = vld [vmem:[%s15105_s29 + $0x1e00] sm:$0xff] }
 0x114   : > { %2707 = vst [vmem:[%s15110_s5 + $0xef0] sm:$0xff] %v2706_v30  ;;  %2709 = vst [vmem:[%s15110_s5 + $0xef8] sm:$0xff] %v2708_v31  ;;  %v2712_v33 = vld [vmem:[%s15105_s29 + $0x1e08] sm:$0xff]  ;;  %v2714_v34 = vld [vmem:[%s15105_s29 + $0x1e10] sm:$0xff] }
 0x115   : > { %2711 = vst [vmem:[%s15110_s5 + $0xf00] sm:$0xff] %v2710_v32  ;;  %2713 = vst [vmem:[%s15110_s5 + $0xf08] sm:$0xff] %v2712_v33  ;;  %v2716_v35 = vld [vmem:[%s15105_s29 + $0x1e18] sm:$0xff]  ;;  %v2718_v36 = vld [vmem:[%s15105_s29 + $0x1e20] sm:$0xff] }
 0x116   : > { %2715 = vst [vmem:[%s15110_s5 + $0xf10] sm:$0xff] %v2714_v34  ;;  %v2720_v37 = vld [vmem:[%s15105_s29 + $0x1e28] sm:$0xff]  ;;  %2717 = vst [vmem:[%s15110_s5 + $0xf18] sm:$0xff] %v2716_v35  ;;  %v2722_v38 = vld [vmem:[%s15105_s29 + $0x1e30] sm:$0xff] }
 0x117   : > { %2719 = vst [vmem:[%s15110_s5 + $0xf20] sm:$0xff] %v2718_v36  ;;  %2721 = vst [vmem:[%s15110_s5 + $0xf28] sm:$0xff] %v2720_v37  ;;  %v2724_v39 = vld [vmem:[%s15105_s29 + $0x1e38] sm:$0xff]  ;;  %v2726_v40 = vld [vmem:[%s15105_s29 + $0x1e40] sm:$0xff] }
 0x118   : > { %2723 = vst [vmem:[%s15110_s5 + $0xf30] sm:$0xff] %v2722_v38  ;;  %2725 = vst [vmem:[%s15110_s5 + $0xf38] sm:$0xff] %v2724_v39  ;;  %v2728_v41 = vld [vmem:[%s15105_s29 + $0x1e48] sm:$0xff]  ;;  %v2730_v42 = vld [vmem:[%s15105_s29 + $0x1e50] sm:$0xff] }
 0x119   : > { %2727 = vst [vmem:[%s15110_s5 + $0xf40] sm:$0xff] %v2726_v40  ;;  %v2732_v43 = vld [vmem:[%s15105_s29 + $0x1e58] sm:$0xff]  ;;  %2729 = vst [vmem:[%s15110_s5 + $0xf48] sm:$0xff] %v2728_v41  ;;  %v2734_v44 = vld [vmem:[%s15105_s29 + $0x1e60] sm:$0xff] }
 0x11a   : > { %2731 = vst [vmem:[%s15110_s5 + $0xf50] sm:$0xff] %v2730_v42  ;;  %2733 = vst [vmem:[%s15110_s5 + $0xf58] sm:$0xff] %v2732_v43  ;;  %v2736_v45 = vld [vmem:[%s15105_s29 + $0x1e68] sm:$0xff]  ;;  %v2738_v46 = vld [vmem:[%s15105_s29 + $0x1e70] sm:$0xff] }
 0x11b   : > { %2735 = vst [vmem:[%s15110_s5 + $0xf60] sm:$0xff] %v2734_v44  ;;  %2737 = vst [vmem:[%s15110_s5 + $0xf68] sm:$0xff] %v2736_v45  ;;  %v2740_v47 = vld [vmem:[%s15105_s29 + $0x1e78] sm:$0xff]  ;;  %v2742_v48 = vld [vmem:[%s15105_s29 + $0x1e80] sm:$0xff] }
 0x11c   : > { %2739 = vst [vmem:[%s15110_s5 + $0xf70] sm:$0xff] %v2738_v46  ;;  %v2744_v49 = vld [vmem:[%s15105_s29 + $0x1e88] sm:$0xff]  ;;  %2741 = vst [vmem:[%s15110_s5 + $0xf78] sm:$0xff] %v2740_v47  ;;  %v2746_v50 = vld [vmem:[%s15105_s29 + $0x1e90] sm:$0xff] }
 0x11d   : > { %2743 = vst [vmem:[%s15110_s5 + $0xf80] sm:$0xff] %v2742_v48  ;;  %2745 = vst [vmem:[%s15110_s5 + $0xf88] sm:$0xff] %v2744_v49  ;;  %v2748_v51 = vld [vmem:[%s15105_s29 + $0x1e98] sm:$0xff]  ;;  %v2750_v52 = vld [vmem:[%s15105_s29 + $0x1ea0] sm:$0xff] }
 0x11e   : > { %2747 = vst [vmem:[%s15110_s5 + $0xf90] sm:$0xff] %v2746_v50  ;;  %2749 = vst [vmem:[%s15110_s5 + $0xf98] sm:$0xff] %v2748_v51  ;;  %v2752_v53 = vld [vmem:[%s15105_s29 + $0x1ea8] sm:$0xff]  ;;  %v2754_v54 = vld [vmem:[%s15105_s29 + $0x1eb0] sm:$0xff] }
 0x11f   : > { %2751 = vst [vmem:[%s15110_s5 + $0xfa0] sm:$0xff] %v2750_v52  ;;  %v2756_v55 = vld [vmem:[%s15105_s29 + $0x1eb8] sm:$0xff]  ;;  %2753 = vst [vmem:[%s15110_s5 + $0xfa8] sm:$0xff] %v2752_v53  ;;  %v2758_v56 = vld [vmem:[%s15105_s29 + $0x1ec0] sm:$0xff] }
 0x120   : > { %2755 = vst [vmem:[%s15110_s5 + $0xfb0] sm:$0xff] %v2754_v54  ;;  %2757 = vst [vmem:[%s15110_s5 + $0xfb8] sm:$0xff] %v2756_v55  ;;  %v2760_v57 = vld [vmem:[%s15105_s29 + $0x1ec8] sm:$0xff]  ;;  %v2762_v58 = vld [vmem:[%s15105_s29 + $0x1ed0] sm:$0xff] }
 0x121   : > { %2759 = vst [vmem:[%s15110_s5 + $0xfc0] sm:$0xff] %v2758_v56  ;;  %2761 = vst [vmem:[%s15110_s5 + $0xfc8] sm:$0xff] %v2760_v57  ;;  %v2764_v59 = vld [vmem:[%s15105_s29 + $0x1ed8] sm:$0xff]  ;;  %v2766_v60 = vld [vmem:[%s15105_s29 + $0x1ee0] sm:$0xff] }
 0x122   : > { %2763 = vst [vmem:[%s15110_s5 + $0xfd0] sm:$0xff] %v2762_v58  ;;  %v2768_v61 = vld [vmem:[%s15105_s29 + $0x1ee8] sm:$0xff]  ;;  %2765 = vst [vmem:[%s15110_s5 + $0xfd8] sm:$0xff] %v2764_v59  ;;  %v2770_v62 = vld [vmem:[%s15105_s29 + $0x1ef0] sm:$0xff] }
 0x123   : > { %2767 = vst [vmem:[%s15110_s5 + $0xfe0] sm:$0xff] %v2766_v60  ;;  %2769 = vst [vmem:[%s15110_s5 + $0xfe8] sm:$0xff] %v2768_v61  ;;  %v2772_v63 = vld [vmem:[%s15105_s29 + $0x1ef8] sm:$0xff]  ;;  %v2774_v0 = vld [vmem:[%s15105_s29 + $0x1f00] sm:$0xff] }
 0x124   : > { %2771 = vst [vmem:[%s15110_s5 + $0xff0] sm:$0xff] %v2770_v62  ;;  %2773 = vst [vmem:[%s15110_s5 + $0xff8] sm:$0xff] %v2772_v63  ;;  %v2776_v1 = vld [vmem:[%s15105_s29 + $0x1f08] sm:$0xff]  ;;  %v2778_v2 = vld [vmem:[%s15105_s29 + $0x1f10] sm:$0xff] }
 0x125   : > { %2775 = vst [vmem:[%s15110_s5 + $0x1000] sm:$0xff] %v2774_v0  ;;  %v2780_v3 = vld [vmem:[%s15105_s29 + $0x1f18] sm:$0xff]  ;;  %2777 = vst [vmem:[%s15110_s5 + $0x1008] sm:$0xff] %v2776_v1  ;;  %v2782_v4 = vld [vmem:[%s15105_s29 + $0x1f20] sm:$0xff] }
 0x126   : > { %2779 = vst [vmem:[%s15110_s5 + $0x1010] sm:$0xff] %v2778_v2  ;;  %2781 = vst [vmem:[%s15110_s5 + $0x1018] sm:$0xff] %v2780_v3  ;;  %v2784_v5 = vld [vmem:[%s15105_s29 + $0x1f28] sm:$0xff]  ;;  %v2786_v6 = vld [vmem:[%s15105_s29 + $0x1f30] sm:$0xff] }
 0x127   : > { %2783 = vst [vmem:[%s15110_s5 + $0x1020] sm:$0xff] %v2782_v4  ;;  %2785 = vst [vmem:[%s15110_s5 + $0x1028] sm:$0xff] %v2784_v5  ;;  %v2788_v7 = vld [vmem:[%s15105_s29 + $0x1f38] sm:$0xff]  ;;  %v2790_v8 = vld [vmem:[%s15105_s29 + $0x1f40] sm:$0xff] }
 0x128   : > { %2787 = vst [vmem:[%s15110_s5 + $0x1030] sm:$0xff] %v2786_v6  ;;  %v2792_v9 = vld [vmem:[%s15105_s29 + $0x1f48] sm:$0xff]  ;;  %2789 = vst [vmem:[%s15110_s5 + $0x1038] sm:$0xff] %v2788_v7  ;;  %v2794_v10 = vld [vmem:[%s15105_s29 + $0x1f50] sm:$0xff] }
 0x129   : > { %2791 = vst [vmem:[%s15110_s5 + $0x1040] sm:$0xff] %v2790_v8  ;;  %2793 = vst [vmem:[%s15110_s5 + $0x1048] sm:$0xff] %v2792_v9  ;;  %v2796_v11 = vld [vmem:[%s15105_s29 + $0x1f58] sm:$0xff]  ;;  %v2798_v12 = vld [vmem:[%s15105_s29 + $0x1f60] sm:$0xff] }
 0x12a   : > { %2795 = vst [vmem:[%s15110_s5 + $0x1050] sm:$0xff] %v2794_v10  ;;  %2797 = vst [vmem:[%s15110_s5 + $0x1058] sm:$0xff] %v2796_v11  ;;  %v2800_v13 = vld [vmem:[%s15105_s29 + $0x1f68] sm:$0xff]  ;;  %v2802_v14 = vld [vmem:[%s15105_s29 + $0x1f70] sm:$0xff] }
 0x12b   : > { %2799 = vst [vmem:[%s15110_s5 + $0x1060] sm:$0xff] %v2798_v12  ;;  %v2804_v15 = vld [vmem:[%s15105_s29 + $0x1f78] sm:$0xff]  ;;  %2801 = vst [vmem:[%s15110_s5 + $0x1068] sm:$0xff] %v2800_v13  ;;  %v2806_v16 = vld [vmem:[%s15105_s29 + $0x1f80] sm:$0xff] }
 0x12c   : > { %2803 = vst [vmem:[%s15110_s5 + $0x1070] sm:$0xff] %v2802_v14  ;;  %2805 = vst [vmem:[%s15110_s5 + $0x1078] sm:$0xff] %v2804_v15  ;;  %v2808_v17 = vld [vmem:[%s15105_s29 + $0x1f88] sm:$0xff]  ;;  %v2810_v18 = vld [vmem:[%s15105_s29 + $0x1f90] sm:$0xff] }
 0x12d   : > { %2807 = vst [vmem:[%s15110_s5 + $0x1080] sm:$0xff] %v2806_v16  ;;  %2809 = vst [vmem:[%s15110_s5 + $0x1088] sm:$0xff] %v2808_v17  ;;  %v2812_v19 = vld [vmem:[%s15105_s29 + $0x1f98] sm:$0xff]  ;;  %v2814_v20 = vld [vmem:[%s15105_s29 + $0x1fa0] sm:$0xff] }
 0x12e   : > { %2811 = vst [vmem:[%s15110_s5 + $0x1090] sm:$0xff] %v2810_v18  ;;  %v2816_v21 = vld [vmem:[%s15105_s29 + $0x1fa8] sm:$0xff]  ;;  %2813 = vst [vmem:[%s15110_s5 + $0x1098] sm:$0xff] %v2812_v19  ;;  %v2818_v22 = vld [vmem:[%s15105_s29 + $0x1fb0] sm:$0xff] }
 0x12f   : > { %2815 = vst [vmem:[%s15110_s5 + $0x10a0] sm:$0xff] %v2814_v20  ;;  %2817 = vst [vmem:[%s15110_s5 + $0x10a8] sm:$0xff] %v2816_v21  ;;  %v2820_v23 = vld [vmem:[%s15105_s29 + $0x1fb8] sm:$0xff]  ;;  %v2822_v24 = vld [vmem:[%s15105_s29 + $0x1fc0] sm:$0xff] }
 0x130   : > { %2819 = vst [vmem:[%s15110_s5 + $0x10b0] sm:$0xff] %v2818_v22  ;;  %2821 = vst [vmem:[%s15110_s5 + $0x10b8] sm:$0xff] %v2820_v23  ;;  %v2824_v25 = vld [vmem:[%s15105_s29 + $0x1fc8] sm:$0xff]  ;;  %v2826_v26 = vld [vmem:[%s15105_s29 + $0x1fd0] sm:$0xff] }
 0x131   : > { %2823 = vst [vmem:[%s15110_s5 + $0x10c0] sm:$0xff] %v2822_v24  ;;  %v2828_v27 = vld [vmem:[%s15105_s29 + $0x1fd8] sm:$0xff]  ;;  %2825 = vst [vmem:[%s15110_s5 + $0x10c8] sm:$0xff] %v2824_v25  ;;  %v2830_v28 = vld [vmem:[%s15105_s29 + $0x1fe0] sm:$0xff] }
 0x132   : > { %2827 = vst [vmem:[%s15110_s5 + $0x10d0] sm:$0xff] %v2826_v26  ;;  %2829 = vst [vmem:[%s15110_s5 + $0x10d8] sm:$0xff] %v2828_v27  ;;  %v2832_v29 = vld [vmem:[%s15105_s29 + $0x1fe8] sm:$0xff]  ;;  %v2834_v30 = vld [vmem:[%s15105_s29 + $0x1ff0] sm:$0xff] }
 0x133   : > { %2831 = vst [vmem:[%s15110_s5 + $0x10e0] sm:$0xff] %v2830_v28  ;;  %2833 = vst [vmem:[%s15110_s5 + $0x10e8] sm:$0xff] %v2832_v29  ;;  %v2836_v31 = vld [vmem:[%s15105_s29 + $0x1ff8] sm:$0xff]  ;;  %v2838_v32 = vld [vmem:[%s15105_s29 + $0x2000] sm:$0xff] }
 0x134   : > { %2835 = vst [vmem:[%s15110_s5 + $0x10f0] sm:$0xff] %v2834_v30  ;;  %v2840_v33 = vld [vmem:[%s15105_s29 + $0x2008] sm:$0xff]  ;;  %2837 = vst [vmem:[%s15110_s5 + $0x10f8] sm:$0xff] %v2836_v31  ;;  %v2842_v34 = vld [vmem:[%s15105_s29 + $0x2010] sm:$0xff] }
 0x135   : > { %2839 = vst [vmem:[%s15110_s5 + $0x1100] sm:$0xff] %v2838_v32  ;;  %2841 = vst [vmem:[%s15110_s5 + $0x1108] sm:$0xff] %v2840_v33  ;;  %v2844_v35 = vld [vmem:[%s15105_s29 + $0x2018] sm:$0xff]  ;;  %v2846_v36 = vld [vmem:[%s15105_s29 + $0x2020] sm:$0xff] }
 0x136   : > { %2843 = vst [vmem:[%s15110_s5 + $0x1110] sm:$0xff] %v2842_v34  ;;  %2845 = vst [vmem:[%s15110_s5 + $0x1118] sm:$0xff] %v2844_v35  ;;  %v2848_v37 = vld [vmem:[%s15105_s29 + $0x2028] sm:$0xff]  ;;  %v2850_v38 = vld [vmem:[%s15105_s29 + $0x2030] sm:$0xff] }
 0x137   : > { %2847 = vst [vmem:[%s15110_s5 + $0x1120] sm:$0xff] %v2846_v36  ;;  %v2852_v39 = vld [vmem:[%s15105_s29 + $0x2038] sm:$0xff]  ;;  %2849 = vst [vmem:[%s15110_s5 + $0x1128] sm:$0xff] %v2848_v37  ;;  %v2854_v40 = vld [vmem:[%s15105_s29 + $0x2040] sm:$0xff] }
 0x138   : > { %2851 = vst [vmem:[%s15110_s5 + $0x1130] sm:$0xff] %v2850_v38  ;;  %2853 = vst [vmem:[%s15110_s5 + $0x1138] sm:$0xff] %v2852_v39  ;;  %v2856_v41 = vld [vmem:[%s15105_s29 + $0x2048] sm:$0xff]  ;;  %v2858_v42 = vld [vmem:[%s15105_s29 + $0x2050] sm:$0xff] }
 0x139   : > { %2855 = vst [vmem:[%s15110_s5 + $0x1140] sm:$0xff] %v2854_v40  ;;  %2857 = vst [vmem:[%s15110_s5 + $0x1148] sm:$0xff] %v2856_v41  ;;  %v2860_v43 = vld [vmem:[%s15105_s29 + $0x2058] sm:$0xff]  ;;  %v2862_v44 = vld [vmem:[%s15105_s29 + $0x2060] sm:$0xff] }
 0x13a   : > { %2859 = vst [vmem:[%s15110_s5 + $0x1150] sm:$0xff] %v2858_v42  ;;  %v2864_v45 = vld [vmem:[%s15105_s29 + $0x2068] sm:$0xff]  ;;  %2861 = vst [vmem:[%s15110_s5 + $0x1158] sm:$0xff] %v2860_v43  ;;  %v2866_v46 = vld [vmem:[%s15105_s29 + $0x2070] sm:$0xff] }
 0x13b   : > { %2863 = vst [vmem:[%s15110_s5 + $0x1160] sm:$0xff] %v2862_v44  ;;  %2865 = vst [vmem:[%s15110_s5 + $0x1168] sm:$0xff] %v2864_v45  ;;  %v2868_v47 = vld [vmem:[%s15105_s29 + $0x2078] sm:$0xff]  ;;  %v2870_v48 = vld [vmem:[%s15105_s29 + $0x2080] sm:$0xff] }
 0x13c   : > { %2867 = vst [vmem:[%s15110_s5 + $0x1170] sm:$0xff] %v2866_v46  ;;  %2869 = vst [vmem:[%s15110_s5 + $0x1178] sm:$0xff] %v2868_v47  ;;  %v2872_v49 = vld [vmem:[%s15105_s29 + $0x2088] sm:$0xff]  ;;  %v2874_v50 = vld [vmem:[%s15105_s29 + $0x2090] sm:$0xff] }
 0x13d   : > { %2871 = vst [vmem:[%s15110_s5 + $0x1180] sm:$0xff] %v2870_v48  ;;  %v2876_v51 = vld [vmem:[%s15105_s29 + $0x2098] sm:$0xff]  ;;  %2873 = vst [vmem:[%s15110_s5 + $0x1188] sm:$0xff] %v2872_v49  ;;  %v2878_v52 = vld [vmem:[%s15105_s29 + $0x20a0] sm:$0xff] }
 0x13e   : > { %2875 = vst [vmem:[%s15110_s5 + $0x1190] sm:$0xff] %v2874_v50  ;;  %2877 = vst [vmem:[%s15110_s5 + $0x1198] sm:$0xff] %v2876_v51  ;;  %v2880_v53 = vld [vmem:[%s15105_s29 + $0x20a8] sm:$0xff]  ;;  %v2882_v54 = vld [vmem:[%s15105_s29 + $0x20b0] sm:$0xff] }
 0x13f   : > { %2879 = vst [vmem:[%s15110_s5 + $0x11a0] sm:$0xff] %v2878_v52  ;;  %2881 = vst [vmem:[%s15110_s5 + $0x11a8] sm:$0xff] %v2880_v53  ;;  %v2884_v55 = vld [vmem:[%s15105_s29 + $0x20b8] sm:$0xff]  ;;  %v2886_v56 = vld [vmem:[%s15105_s29 + $0x20c0] sm:$0xff] }
 0x140   : > { %2883 = vst [vmem:[%s15110_s5 + $0x11b0] sm:$0xff] %v2882_v54  ;;  %v2888_v57 = vld [vmem:[%s15105_s29 + $0x20c8] sm:$0xff]  ;;  %2885 = vst [vmem:[%s15110_s5 + $0x11b8] sm:$0xff] %v2884_v55  ;;  %v2890_v58 = vld [vmem:[%s15105_s29 + $0x20d0] sm:$0xff] }
 0x141   : > { %2887 = vst [vmem:[%s15110_s5 + $0x11c0] sm:$0xff] %v2886_v56  ;;  %2889 = vst [vmem:[%s15110_s5 + $0x11c8] sm:$0xff] %v2888_v57  ;;  %v2892_v59 = vld [vmem:[%s15105_s29 + $0x20d8] sm:$0xff]  ;;  %v2894_v60 = vld [vmem:[%s15105_s29 + $0x20e0] sm:$0xff] }
 0x142   : > { %2891 = vst [vmem:[%s15110_s5 + $0x11d0] sm:$0xff] %v2890_v58  ;;  %2893 = vst [vmem:[%s15110_s5 + $0x11d8] sm:$0xff] %v2892_v59  ;;  %v2896_v61 = vld [vmem:[%s15105_s29 + $0x20e8] sm:$0xff]  ;;  %v2898_v62 = vld [vmem:[%s15105_s29 + $0x20f0] sm:$0xff] }
 0x143   : > { %2895 = vst [vmem:[%s15110_s5 + $0x11e0] sm:$0xff] %v2894_v60  ;;  %v2900_v63 = vld [vmem:[%s15105_s29 + $0x20f8] sm:$0xff]  ;;  %2897 = vst [vmem:[%s15110_s5 + $0x11e8] sm:$0xff] %v2896_v61  ;;  %v2902_v0 = vld [vmem:[%s15105_s29 + $0x2400] sm:$0xff] }
 0x144   : > { %2899 = vst [vmem:[%s15110_s5 + $0x11f0] sm:$0xff] %v2898_v62  ;;  %2901 = vst [vmem:[%s15110_s5 + $0x11f8] sm:$0xff] %v2900_v63  ;;  %v2904_v1 = vld [vmem:[%s15105_s29 + $0x2408] sm:$0xff]  ;;  %v2906_v2 = vld [vmem:[%s15105_s29 + $0x2410] sm:$0xff] }
 0x145   : > { %2903 = vst [vmem:[%s15110_s5 + $0x1200] sm:$0xff] %v2902_v0  ;;  %2905 = vst [vmem:[%s15110_s5 + $0x1208] sm:$0xff] %v2904_v1  ;;  %v2908_v3 = vld [vmem:[%s15105_s29 + $0x2418] sm:$0xff]  ;;  %v2910_v4 = vld [vmem:[%s15105_s29 + $0x2420] sm:$0xff] }
 0x146   : > { %2907 = vst [vmem:[%s15110_s5 + $0x1210] sm:$0xff] %v2906_v2  ;;  %v2912_v5 = vld [vmem:[%s15105_s29 + $0x2428] sm:$0xff]  ;;  %2909 = vst [vmem:[%s15110_s5 + $0x1218] sm:$0xff] %v2908_v3  ;;  %v2914_v6 = vld [vmem:[%s15105_s29 + $0x2430] sm:$0xff] }
 0x147   : > { %2911 = vst [vmem:[%s15110_s5 + $0x1220] sm:$0xff] %v2910_v4  ;;  %2913 = vst [vmem:[%s15110_s5 + $0x1228] sm:$0xff] %v2912_v5  ;;  %v2916_v7 = vld [vmem:[%s15105_s29 + $0x2438] sm:$0xff]  ;;  %v2918_v8 = vld [vmem:[%s15105_s29 + $0x2440] sm:$0xff] }
 0x148   : > { %2915 = vst [vmem:[%s15110_s5 + $0x1230] sm:$0xff] %v2914_v6  ;;  %2917 = vst [vmem:[%s15110_s5 + $0x1238] sm:$0xff] %v2916_v7  ;;  %v2920_v9 = vld [vmem:[%s15105_s29 + $0x2448] sm:$0xff]  ;;  %v2922_v10 = vld [vmem:[%s15105_s29 + $0x2450] sm:$0xff] }
 0x149   : > { %2919 = vst [vmem:[%s15110_s5 + $0x1240] sm:$0xff] %v2918_v8  ;;  %v2924_v11 = vld [vmem:[%s15105_s29 + $0x2458] sm:$0xff]  ;;  %2921 = vst [vmem:[%s15110_s5 + $0x1248] sm:$0xff] %v2920_v9  ;;  %v2926_v12 = vld [vmem:[%s15105_s29 + $0x2460] sm:$0xff] }
 0x14a   : > { %2923 = vst [vmem:[%s15110_s5 + $0x1250] sm:$0xff] %v2922_v10  ;;  %2925 = vst [vmem:[%s15110_s5 + $0x1258] sm:$0xff] %v2924_v11  ;;  %v2928_v13 = vld [vmem:[%s15105_s29 + $0x2468] sm:$0xff]  ;;  %v2930_v14 = vld [vmem:[%s15105_s29 + $0x2470] sm:$0xff] }
 0x14b   : > { %2927 = vst [vmem:[%s15110_s5 + $0x1260] sm:$0xff] %v2926_v12  ;;  %2929 = vst [vmem:[%s15110_s5 + $0x1268] sm:$0xff] %v2928_v13  ;;  %v2932_v15 = vld [vmem:[%s15105_s29 + $0x2478] sm:$0xff]  ;;  %v2934_v16 = vld [vmem:[%s15105_s29 + $0x2480] sm:$0xff] }
 0x14c   : > { %2931 = vst [vmem:[%s15110_s5 + $0x1270] sm:$0xff] %v2930_v14  ;;  %v2936_v17 = vld [vmem:[%s15105_s29 + $0x2488] sm:$0xff]  ;;  %2933 = vst [vmem:[%s15110_s5 + $0x1278] sm:$0xff] %v2932_v15  ;;  %v2938_v18 = vld [vmem:[%s15105_s29 + $0x2490] sm:$0xff] }
 0x14d   : > { %2935 = vst [vmem:[%s15110_s5 + $0x1280] sm:$0xff] %v2934_v16  ;;  %2937 = vst [vmem:[%s15110_s5 + $0x1288] sm:$0xff] %v2936_v17  ;;  %v2940_v19 = vld [vmem:[%s15105_s29 + $0x2498] sm:$0xff]  ;;  %v2942_v20 = vld [vmem:[%s15105_s29 + $0x24a0] sm:$0xff] }
 0x14e   : > { %2939 = vst [vmem:[%s15110_s5 + $0x1290] sm:$0xff] %v2938_v18  ;;  %2941 = vst [vmem:[%s15110_s5 + $0x1298] sm:$0xff] %v2940_v19  ;;  %v2944_v21 = vld [vmem:[%s15105_s29 + $0x24a8] sm:$0xff]  ;;  %v2946_v22 = vld [vmem:[%s15105_s29 + $0x24b0] sm:$0xff] }
 0x14f   : > { %2943 = vst [vmem:[%s15110_s5 + $0x12a0] sm:$0xff] %v2942_v20  ;;  %v2948_v23 = vld [vmem:[%s15105_s29 + $0x24b8] sm:$0xff]  ;;  %2945 = vst [vmem:[%s15110_s5 + $0x12a8] sm:$0xff] %v2944_v21  ;;  %v2950_v24 = vld [vmem:[%s15105_s29 + $0x24c0] sm:$0xff] }
 0x150   : > { %2947 = vst [vmem:[%s15110_s5 + $0x12b0] sm:$0xff] %v2946_v22  ;;  %2949 = vst [vmem:[%s15110_s5 + $0x12b8] sm:$0xff] %v2948_v23  ;;  %v2952_v25 = vld [vmem:[%s15105_s29 + $0x24c8] sm:$0xff]  ;;  %v2954_v26 = vld [vmem:[%s15105_s29 + $0x24d0] sm:$0xff] }
 0x151   : > { %2951 = vst [vmem:[%s15110_s5 + $0x12c0] sm:$0xff] %v2950_v24  ;;  %2953 = vst [vmem:[%s15110_s5 + $0x12c8] sm:$0xff] %v2952_v25  ;;  %v2956_v27 = vld [vmem:[%s15105_s29 + $0x24d8] sm:$0xff]  ;;  %v2958_v28 = vld [vmem:[%s15105_s29 + $0x24e0] sm:$0xff] }
 0x152   : > { %2955 = vst [vmem:[%s15110_s5 + $0x12d0] sm:$0xff] %v2954_v26  ;;  %v2960_v29 = vld [vmem:[%s15105_s29 + $0x24e8] sm:$0xff]  ;;  %2957 = vst [vmem:[%s15110_s5 + $0x12d8] sm:$0xff] %v2956_v27  ;;  %v2962_v30 = vld [vmem:[%s15105_s29 + $0x24f0] sm:$0xff] }
 0x153   : > { %2959 = vst [vmem:[%s15110_s5 + $0x12e0] sm:$0xff] %v2958_v28  ;;  %2961 = vst [vmem:[%s15110_s5 + $0x12e8] sm:$0xff] %v2960_v29  ;;  %v2964_v31 = vld [vmem:[%s15105_s29 + $0x24f8] sm:$0xff]  ;;  %v2966_v32 = vld [vmem:[%s15105_s29 + $0x2500] sm:$0xff] }
 0x154   : > { %2963 = vst [vmem:[%s15110_s5 + $0x12f0] sm:$0xff] %v2962_v30  ;;  %2965 = vst [vmem:[%s15110_s5 + $0x12f8] sm:$0xff] %v2964_v31  ;;  %v2968_v33 = vld [vmem:[%s15105_s29 + $0x2508] sm:$0xff]  ;;  %v2970_v34 = vld [vmem:[%s15105_s29 + $0x2510] sm:$0xff] }
 0x155   : > { %2967 = vst [vmem:[%s15110_s5 + $0x1300] sm:$0xff] %v2966_v32  ;;  %v2972_v35 = vld [vmem:[%s15105_s29 + $0x2518] sm:$0xff]  ;;  %2969 = vst [vmem:[%s15110_s5 + $0x1308] sm:$0xff] %v2968_v33  ;;  %v2974_v36 = vld [vmem:[%s15105_s29 + $0x2520] sm:$0xff] }
 0x156   : > { %2971 = vst [vmem:[%s15110_s5 + $0x1310] sm:$0xff] %v2970_v34  ;;  %2973 = vst [vmem:[%s15110_s5 + $0x1318] sm:$0xff] %v2972_v35  ;;  %v2976_v37 = vld [vmem:[%s15105_s29 + $0x2528] sm:$0xff]  ;;  %v2978_v38 = vld [vmem:[%s15105_s29 + $0x2530] sm:$0xff] }
 0x157   : > { %2975 = vst [vmem:[%s15110_s5 + $0x1320] sm:$0xff] %v2974_v36  ;;  %2977 = vst [vmem:[%s15110_s5 + $0x1328] sm:$0xff] %v2976_v37  ;;  %v2980_v39 = vld [vmem:[%s15105_s29 + $0x2538] sm:$0xff]  ;;  %v2982_v40 = vld [vmem:[%s15105_s29 + $0x2540] sm:$0xff] }
 0x158   : > { %2979 = vst [vmem:[%s15110_s5 + $0x1330] sm:$0xff] %v2978_v38  ;;  %v2984_v41 = vld [vmem:[%s15105_s29 + $0x2548] sm:$0xff]  ;;  %2981 = vst [vmem:[%s15110_s5 + $0x1338] sm:$0xff] %v2980_v39  ;;  %v2986_v42 = vld [vmem:[%s15105_s29 + $0x2550] sm:$0xff] }
 0x159   : > { %2983 = vst [vmem:[%s15110_s5 + $0x1340] sm:$0xff] %v2982_v40  ;;  %2985 = vst [vmem:[%s15110_s5 + $0x1348] sm:$0xff] %v2984_v41  ;;  %v2988_v43 = vld [vmem:[%s15105_s29 + $0x2558] sm:$0xff]  ;;  %v2990_v44 = vld [vmem:[%s15105_s29 + $0x2560] sm:$0xff] }
 0x15a   : > { %2987 = vst [vmem:[%s15110_s5 + $0x1350] sm:$0xff] %v2986_v42  ;;  %2989 = vst [vmem:[%s15110_s5 + $0x1358] sm:$0xff] %v2988_v43  ;;  %v2992_v45 = vld [vmem:[%s15105_s29 + $0x2568] sm:$0xff]  ;;  %v2994_v46 = vld [vmem:[%s15105_s29 + $0x2570] sm:$0xff] }
 0x15b   : > { %2991 = vst [vmem:[%s15110_s5 + $0x1360] sm:$0xff] %v2990_v44  ;;  %v2996_v47 = vld [vmem:[%s15105_s29 + $0x2578] sm:$0xff]  ;;  %2993 = vst [vmem:[%s15110_s5 + $0x1368] sm:$0xff] %v2992_v45  ;;  %v2998_v48 = vld [vmem:[%s15105_s29 + $0x2580] sm:$0xff] }
 0x15c   : > { %2995 = vst [vmem:[%s15110_s5 + $0x1370] sm:$0xff] %v2994_v46  ;;  %2997 = vst [vmem:[%s15110_s5 + $0x1378] sm:$0xff] %v2996_v47  ;;  %v3000_v49 = vld [vmem:[%s15105_s29 + $0x2588] sm:$0xff]  ;;  %v3002_v50 = vld [vmem:[%s15105_s29 + $0x2590] sm:$0xff] }
 0x15d   : > { %2999 = vst [vmem:[%s15110_s5 + $0x1380] sm:$0xff] %v2998_v48  ;;  %3001 = vst [vmem:[%s15110_s5 + $0x1388] sm:$0xff] %v3000_v49  ;;  %v3004_v51 = vld [vmem:[%s15105_s29 + $0x2598] sm:$0xff]  ;;  %v3006_v52 = vld [vmem:[%s15105_s29 + $0x25a0] sm:$0xff] }
 0x15e   : > { %3003 = vst [vmem:[%s15110_s5 + $0x1390] sm:$0xff] %v3002_v50  ;;  %v3008_v53 = vld [vmem:[%s15105_s29 + $0x25a8] sm:$0xff]  ;;  %3005 = vst [vmem:[%s15110_s5 + $0x1398] sm:$0xff] %v3004_v51  ;;  %v3010_v54 = vld [vmem:[%s15105_s29 + $0x25b0] sm:$0xff] }
 0x15f   : > { %3007 = vst [vmem:[%s15110_s5 + $0x13a0] sm:$0xff] %v3006_v52  ;;  %3009 = vst [vmem:[%s15110_s5 + $0x13a8] sm:$0xff] %v3008_v53  ;;  %v3012_v55 = vld [vmem:[%s15105_s29 + $0x25b8] sm:$0xff]  ;;  %v3014_v56 = vld [vmem:[%s15105_s29 + $0x25c0] sm:$0xff] }
 0x160   : > { %3011 = vst [vmem:[%s15110_s5 + $0x13b0] sm:$0xff] %v3010_v54  ;;  %3013 = vst [vmem:[%s15110_s5 + $0x13b8] sm:$0xff] %v3012_v55  ;;  %v3016_v57 = vld [vmem:[%s15105_s29 + $0x25c8] sm:$0xff]  ;;  %v3018_v58 = vld [vmem:[%s15105_s29 + $0x25d0] sm:$0xff] }
 0x161   : > { %3015 = vst [vmem:[%s15110_s5 + $0x13c0] sm:$0xff] %v3014_v56  ;;  %v3020_v59 = vld [vmem:[%s15105_s29 + $0x25d8] sm:$0xff]  ;;  %3017 = vst [vmem:[%s15110_s5 + $0x13c8] sm:$0xff] %v3016_v57  ;;  %v3022_v60 = vld [vmem:[%s15105_s29 + $0x25e0] sm:$0xff] }
 0x162   : > { %3019 = vst [vmem:[%s15110_s5 + $0x13d0] sm:$0xff] %v3018_v58  ;;  %3021 = vst [vmem:[%s15110_s5 + $0x13d8] sm:$0xff] %v3020_v59  ;;  %v3024_v61 = vld [vmem:[%s15105_s29 + $0x25e8] sm:$0xff]  ;;  %v3026_v62 = vld [vmem:[%s15105_s29 + $0x25f0] sm:$0xff] }
 0x163   : > { %3023 = vst [vmem:[%s15110_s5 + $0x13e0] sm:$0xff] %v3022_v60  ;;  %3025 = vst [vmem:[%s15110_s5 + $0x13e8] sm:$0xff] %v3024_v61  ;;  %v3028_v63 = vld [vmem:[%s15105_s29 + $0x25f8] sm:$0xff]  ;;  %v3030_v0 = vld [vmem:[%s15105_s29 + $0x2600] sm:$0xff] }
 0x164   : > { %3027 = vst [vmem:[%s15110_s5 + $0x13f0] sm:$0xff] %v3026_v62  ;;  %v3032_v1 = vld [vmem:[%s15105_s29 + $0x2608] sm:$0xff]  ;;  %3029 = vst [vmem:[%s15110_s5 + $0x13f8] sm:$0xff] %v3028_v63  ;;  %v3034_v2 = vld [vmem:[%s15105_s29 + $0x2610] sm:$0xff] }
 0x165   : > { %3031 = vst [vmem:[%s15110_s5 + $0x1400] sm:$0xff] %v3030_v0  ;;  %3033 = vst [vmem:[%s15110_s5 + $0x1408] sm:$0xff] %v3032_v1  ;;  %v3036_v3 = vld [vmem:[%s15105_s29 + $0x2618] sm:$0xff]  ;;  %v3038_v4 = vld [vmem:[%s15105_s29 + $0x2620] sm:$0xff] }
 0x166   : > { %3035 = vst [vmem:[%s15110_s5 + $0x1410] sm:$0xff] %v3034_v2  ;;  %3037 = vst [vmem:[%s15110_s5 + $0x1418] sm:$0xff] %v3036_v3  ;;  %v3040_v5 = vld [vmem:[%s15105_s29 + $0x2628] sm:$0xff]  ;;  %v3042_v6 = vld [vmem:[%s15105_s29 + $0x2630] sm:$0xff] }
 0x167   : > { %3039 = vst [vmem:[%s15110_s5 + $0x1420] sm:$0xff] %v3038_v4  ;;  %v3044_v7 = vld [vmem:[%s15105_s29 + $0x2638] sm:$0xff]  ;;  %3041 = vst [vmem:[%s15110_s5 + $0x1428] sm:$0xff] %v3040_v5  ;;  %v3046_v8 = vld [vmem:[%s15105_s29 + $0x2640] sm:$0xff] }
 0x168   : > { %3043 = vst [vmem:[%s15110_s5 + $0x1430] sm:$0xff] %v3042_v6  ;;  %3045 = vst [vmem:[%s15110_s5 + $0x1438] sm:$0xff] %v3044_v7  ;;  %v3048_v9 = vld [vmem:[%s15105_s29 + $0x2648] sm:$0xff]  ;;  %v3050_v10 = vld [vmem:[%s15105_s29 + $0x2650] sm:$0xff] }
 0x169   : > { %3047 = vst [vmem:[%s15110_s5 + $0x1440] sm:$0xff] %v3046_v8  ;;  %3049 = vst [vmem:[%s15110_s5 + $0x1448] sm:$0xff] %v3048_v9  ;;  %v3052_v11 = vld [vmem:[%s15105_s29 + $0x2658] sm:$0xff]  ;;  %v3054_v12 = vld [vmem:[%s15105_s29 + $0x2660] sm:$0xff] }
 0x16a   : > { %3051 = vst [vmem:[%s15110_s5 + $0x1450] sm:$0xff] %v3050_v10  ;;  %v3056_v13 = vld [vmem:[%s15105_s29 + $0x2668] sm:$0xff]  ;;  %3053 = vst [vmem:[%s15110_s5 + $0x1458] sm:$0xff] %v3052_v11  ;;  %v3058_v14 = vld [vmem:[%s15105_s29 + $0x2670] sm:$0xff] }
 0x16b   : > { %3055 = vst [vmem:[%s15110_s5 + $0x1460] sm:$0xff] %v3054_v12  ;;  %3057 = vst [vmem:[%s15110_s5 + $0x1468] sm:$0xff] %v3056_v13  ;;  %v3060_v15 = vld [vmem:[%s15105_s29 + $0x2678] sm:$0xff]  ;;  %v3062_v16 = vld [vmem:[%s15105_s29 + $0x2680] sm:$0xff] }
 0x16c   : > { %3059 = vst [vmem:[%s15110_s5 + $0x1470] sm:$0xff] %v3058_v14  ;;  %3061 = vst [vmem:[%s15110_s5 + $0x1478] sm:$0xff] %v3060_v15  ;;  %v3064_v17 = vld [vmem:[%s15105_s29 + $0x2688] sm:$0xff]  ;;  %v3066_v18 = vld [vmem:[%s15105_s29 + $0x2690] sm:$0xff] }
 0x16d   : > { %3063 = vst [vmem:[%s15110_s5 + $0x1480] sm:$0xff] %v3062_v16  ;;  %v3068_v19 = vld [vmem:[%s15105_s29 + $0x2698] sm:$0xff]  ;;  %3065 = vst [vmem:[%s15110_s5 + $0x1488] sm:$0xff] %v3064_v17  ;;  %v3070_v20 = vld [vmem:[%s15105_s29 + $0x26a0] sm:$0xff] }
 0x16e   : > { %3067 = vst [vmem:[%s15110_s5 + $0x1490] sm:$0xff] %v3066_v18  ;;  %3069 = vst [vmem:[%s15110_s5 + $0x1498] sm:$0xff] %v3068_v19  ;;  %v3072_v21 = vld [vmem:[%s15105_s29 + $0x26a8] sm:$0xff]  ;;  %v3074_v22 = vld [vmem:[%s15105_s29 + $0x26b0] sm:$0xff] }
 0x16f   : > { %3071 = vst [vmem:[%s15110_s5 + $0x14a0] sm:$0xff] %v3070_v20  ;;  %3073 = vst [vmem:[%s15110_s5 + $0x14a8] sm:$0xff] %v3072_v21  ;;  %v3076_v23 = vld [vmem:[%s15105_s29 + $0x26b8] sm:$0xff]  ;;  %v3078_v24 = vld [vmem:[%s15105_s29 + $0x26c0] sm:$0xff] }
 0x170   : > { %3075 = vst [vmem:[%s15110_s5 + $0x14b0] sm:$0xff] %v3074_v22  ;;  %v3080_v25 = vld [vmem:[%s15105_s29 + $0x26c8] sm:$0xff]  ;;  %3077 = vst [vmem:[%s15110_s5 + $0x14b8] sm:$0xff] %v3076_v23  ;;  %v3082_v26 = vld [vmem:[%s15105_s29 + $0x26d0] sm:$0xff] }
 0x171   : > { %3079 = vst [vmem:[%s15110_s5 + $0x14c0] sm:$0xff] %v3078_v24  ;;  %3081 = vst [vmem:[%s15110_s5 + $0x14c8] sm:$0xff] %v3080_v25  ;;  %v3084_v27 = vld [vmem:[%s15105_s29 + $0x26d8] sm:$0xff]  ;;  %v3086_v28 = vld [vmem:[%s15105_s29 + $0x26e0] sm:$0xff] }
 0x172   : > { %3083 = vst [vmem:[%s15110_s5 + $0x14d0] sm:$0xff] %v3082_v26  ;;  %3085 = vst [vmem:[%s15110_s5 + $0x14d8] sm:$0xff] %v3084_v27  ;;  %v3088_v29 = vld [vmem:[%s15105_s29 + $0x26e8] sm:$0xff]  ;;  %v3090_v30 = vld [vmem:[%s15105_s29 + $0x26f0] sm:$0xff] }
 0x173   : > { %3087 = vst [vmem:[%s15110_s5 + $0x14e0] sm:$0xff] %v3086_v28  ;;  %v3092_v31 = vld [vmem:[%s15105_s29 + $0x26f8] sm:$0xff]  ;;  %3089 = vst [vmem:[%s15110_s5 + $0x14e8] sm:$0xff] %v3088_v29  ;;  %v3094_v32 = vld [vmem:[%s15105_s29 + $0x2a00] sm:$0xff] }
 0x174   : > { %3091 = vst [vmem:[%s15110_s5 + $0x14f0] sm:$0xff] %v3090_v30  ;;  %3093 = vst [vmem:[%s15110_s5 + $0x14f8] sm:$0xff] %v3092_v31  ;;  %v3096_v33 = vld [vmem:[%s15105_s29 + $0x2a08] sm:$0xff]  ;;  %v3098_v34 = vld [vmem:[%s15105_s29 + $0x2a10] sm:$0xff] }
 0x175   : > { %3095 = vst [vmem:[%s15110_s5 + $0x1500] sm:$0xff] %v3094_v32  ;;  %3097 = vst [vmem:[%s15110_s5 + $0x1508] sm:$0xff] %v3096_v33  ;;  %v3100_v35 = vld [vmem:[%s15105_s29 + $0x2a18] sm:$0xff]  ;;  %v3102_v36 = vld [vmem:[%s15105_s29 + $0x2a20] sm:$0xff] }
 0x176   : > { %3099 = vst [vmem:[%s15110_s5 + $0x1510] sm:$0xff] %v3098_v34  ;;  %v3104_v37 = vld [vmem:[%s15105_s29 + $0x2a28] sm:$0xff]  ;;  %3101 = vst [vmem:[%s15110_s5 + $0x1518] sm:$0xff] %v3100_v35  ;;  %v3106_v38 = vld [vmem:[%s15105_s29 + $0x2a30] sm:$0xff] }
 0x177   : > { %3103 = vst [vmem:[%s15110_s5 + $0x1520] sm:$0xff] %v3102_v36  ;;  %3105 = vst [vmem:[%s15110_s5 + $0x1528] sm:$0xff] %v3104_v37  ;;  %v3108_v39 = vld [vmem:[%s15105_s29 + $0x2a38] sm:$0xff]  ;;  %v3110_v40 = vld [vmem:[%s15105_s29 + $0x2a40] sm:$0xff] }
 0x178   : > { %3107 = vst [vmem:[%s15110_s5 + $0x1530] sm:$0xff] %v3106_v38  ;;  %3109 = vst [vmem:[%s15110_s5 + $0x1538] sm:$0xff] %v3108_v39  ;;  %v3112_v41 = vld [vmem:[%s15105_s29 + $0x2a48] sm:$0xff]  ;;  %v3114_v42 = vld [vmem:[%s15105_s29 + $0x2a50] sm:$0xff] }
 0x179   : > { %3111 = vst [vmem:[%s15110_s5 + $0x1540] sm:$0xff] %v3110_v40  ;;  %v3116_v43 = vld [vmem:[%s15105_s29 + $0x2a58] sm:$0xff]  ;;  %3113 = vst [vmem:[%s15110_s5 + $0x1548] sm:$0xff] %v3112_v41  ;;  %v3118_v44 = vld [vmem:[%s15105_s29 + $0x2a60] sm:$0xff] }
 0x17a   : > { %3115 = vst [vmem:[%s15110_s5 + $0x1550] sm:$0xff] %v3114_v42  ;;  %3117 = vst [vmem:[%s15110_s5 + $0x1558] sm:$0xff] %v3116_v43  ;;  %v3120_v45 = vld [vmem:[%s15105_s29 + $0x2a68] sm:$0xff]  ;;  %v3122_v46 = vld [vmem:[%s15105_s29 + $0x2a70] sm:$0xff] }
 0x17b   : > { %3119 = vst [vmem:[%s15110_s5 + $0x1560] sm:$0xff] %v3118_v44  ;;  %3121 = vst [vmem:[%s15110_s5 + $0x1568] sm:$0xff] %v3120_v45  ;;  %v3124_v47 = vld [vmem:[%s15105_s29 + $0x2a78] sm:$0xff]  ;;  %v3126_v48 = vld [vmem:[%s15105_s29 + $0x2a80] sm:$0xff] }
 0x17c   : > { %3123 = vst [vmem:[%s15110_s5 + $0x1570] sm:$0xff] %v3122_v46  ;;  %v3128_v49 = vld [vmem:[%s15105_s29 + $0x2a88] sm:$0xff]  ;;  %3125 = vst [vmem:[%s15110_s5 + $0x1578] sm:$0xff] %v3124_v47  ;;  %v3130_v50 = vld [vmem:[%s15105_s29 + $0x2a90] sm:$0xff] }
 0x17d   : > { %3127 = vst [vmem:[%s15110_s5 + $0x1580] sm:$0xff] %v3126_v48  ;;  %3129 = vst [vmem:[%s15110_s5 + $0x1588] sm:$0xff] %v3128_v49  ;;  %v3132_v51 = vld [vmem:[%s15105_s29 + $0x2a98] sm:$0xff]  ;;  %v3134_v52 = vld [vmem:[%s15105_s29 + $0x2aa0] sm:$0xff] }
 0x17e   : > { %3131 = vst [vmem:[%s15110_s5 + $0x1590] sm:$0xff] %v3130_v50  ;;  %3133 = vst [vmem:[%s15110_s5 + $0x1598] sm:$0xff] %v3132_v51  ;;  %v3136_v53 = vld [vmem:[%s15105_s29 + $0x2aa8] sm:$0xff]  ;;  %v3138_v54 = vld [vmem:[%s15105_s29 + $0x2ab0] sm:$0xff] }
 0x17f   : > { %3135 = vst [vmem:[%s15110_s5 + $0x15a0] sm:$0xff] %v3134_v52  ;;  %v3140_v55 = vld [vmem:[%s15105_s29 + $0x2ab8] sm:$0xff]  ;;  %3137 = vst [vmem:[%s15110_s5 + $0x15a8] sm:$0xff] %v3136_v53  ;;  %v3142_v56 = vld [vmem:[%s15105_s29 + $0x2ac0] sm:$0xff] }
 0x180   : > { %3139 = vst [vmem:[%s15110_s5 + $0x15b0] sm:$0xff] %v3138_v54  ;;  %3141 = vst [vmem:[%s15110_s5 + $0x15b8] sm:$0xff] %v3140_v55  ;;  %v3144_v57 = vld [vmem:[%s15105_s29 + $0x2ac8] sm:$0xff]  ;;  %v3146_v58 = vld [vmem:[%s15105_s29 + $0x2ad0] sm:$0xff] }
 0x181   : > { %3143 = vst [vmem:[%s15110_s5 + $0x15c0] sm:$0xff] %v3142_v56  ;;  %3145 = vst [vmem:[%s15110_s5 + $0x15c8] sm:$0xff] %v3144_v57  ;;  %v3148_v59 = vld [vmem:[%s15105_s29 + $0x2ad8] sm:$0xff]  ;;  %v3150_v60 = vld [vmem:[%s15105_s29 + $0x2ae0] sm:$0xff] }
 0x182   : > { %3147 = vst [vmem:[%s15110_s5 + $0x15d0] sm:$0xff] %v3146_v58  ;;  %v3152_v61 = vld [vmem:[%s15105_s29 + $0x2ae8] sm:$0xff]  ;;  %3149 = vst [vmem:[%s15110_s5 + $0x15d8] sm:$0xff] %v3148_v59  ;;  %v3154_v62 = vld [vmem:[%s15105_s29 + $0x2af0] sm:$0xff] }
 0x183   : > { %3151 = vst [vmem:[%s15110_s5 + $0x15e0] sm:$0xff] %v3150_v60  ;;  %3153 = vst [vmem:[%s15110_s5 + $0x15e8] sm:$0xff] %v3152_v61  ;;  %v3156_v63 = vld [vmem:[%s15105_s29 + $0x2af8] sm:$0xff]  ;;  %v3158_v0 = vld [vmem:[%s15105_s29 + $0x2b00] sm:$0xff] }
 0x184   : > { %3155 = vst [vmem:[%s15110_s5 + $0x15f0] sm:$0xff] %v3154_v62  ;;  %3157 = vst [vmem:[%s15110_s5 + $0x15f8] sm:$0xff] %v3156_v63  ;;  %v3160_v1 = vld [vmem:[%s15105_s29 + $0x2b08] sm:$0xff]  ;;  %v3162_v2 = vld [vmem:[%s15105_s29 + $0x2b10] sm:$0xff] }
 0x185   : > { %3159 = vst [vmem:[%s15110_s5 + $0x1600] sm:$0xff] %v3158_v0  ;;  %v3164_v3 = vld [vmem:[%s15105_s29 + $0x2b18] sm:$0xff]  ;;  %3161 = vst [vmem:[%s15110_s5 + $0x1608] sm:$0xff] %v3160_v1  ;;  %v3166_v4 = vld [vmem:[%s15105_s29 + $0x2b20] sm:$0xff] }
 0x186   : > { %3163 = vst [vmem:[%s15110_s5 + $0x1610] sm:$0xff] %v3162_v2  ;;  %3165 = vst [vmem:[%s15110_s5 + $0x1618] sm:$0xff] %v3164_v3  ;;  %v3168_v5 = vld [vmem:[%s15105_s29 + $0x2b28] sm:$0xff]  ;;  %v3170_v6 = vld [vmem:[%s15105_s29 + $0x2b30] sm:$0xff] }
 0x187   : > { %3167 = vst [vmem:[%s15110_s5 + $0x1620] sm:$0xff] %v3166_v4  ;;  %3169 = vst [vmem:[%s15110_s5 + $0x1628] sm:$0xff] %v3168_v5  ;;  %v3172_v7 = vld [vmem:[%s15105_s29 + $0x2b38] sm:$0xff]  ;;  %v3174_v8 = vld [vmem:[%s15105_s29 + $0x2b40] sm:$0xff] }
 0x188   : > { %3171 = vst [vmem:[%s15110_s5 + $0x1630] sm:$0xff] %v3170_v6  ;;  %v3176_v9 = vld [vmem:[%s15105_s29 + $0x2b48] sm:$0xff]  ;;  %3173 = vst [vmem:[%s15110_s5 + $0x1638] sm:$0xff] %v3172_v7  ;;  %v3178_v10 = vld [vmem:[%s15105_s29 + $0x2b50] sm:$0xff] }
 0x189   : > { %3175 = vst [vmem:[%s15110_s5 + $0x1640] sm:$0xff] %v3174_v8  ;;  %3177 = vst [vmem:[%s15110_s5 + $0x1648] sm:$0xff] %v3176_v9  ;;  %v3180_v11 = vld [vmem:[%s15105_s29 + $0x2b58] sm:$0xff]  ;;  %v3182_v12 = vld [vmem:[%s15105_s29 + $0x2b60] sm:$0xff] }
 0x18a   : > { %3179 = vst [vmem:[%s15110_s5 + $0x1650] sm:$0xff] %v3178_v10  ;;  %3181 = vst [vmem:[%s15110_s5 + $0x1658] sm:$0xff] %v3180_v11  ;;  %v3184_v13 = vld [vmem:[%s15105_s29 + $0x2b68] sm:$0xff]  ;;  %v3186_v14 = vld [vmem:[%s15105_s29 + $0x2b70] sm:$0xff] }
 0x18b   : > { %3183 = vst [vmem:[%s15110_s5 + $0x1660] sm:$0xff] %v3182_v12  ;;  %v3188_v15 = vld [vmem:[%s15105_s29 + $0x2b78] sm:$0xff]  ;;  %3185 = vst [vmem:[%s15110_s5 + $0x1668] sm:$0xff] %v3184_v13  ;;  %v3190_v16 = vld [vmem:[%s15105_s29 + $0x2b80] sm:$0xff] }
 0x18c   : > { %3187 = vst [vmem:[%s15110_s5 + $0x1670] sm:$0xff] %v3186_v14  ;;  %3189 = vst [vmem:[%s15110_s5 + $0x1678] sm:$0xff] %v3188_v15  ;;  %v3192_v17 = vld [vmem:[%s15105_s29 + $0x2b88] sm:$0xff]  ;;  %v3194_v18 = vld [vmem:[%s15105_s29 + $0x2b90] sm:$0xff] }
 0x18d   : > { %3191 = vst [vmem:[%s15110_s5 + $0x1680] sm:$0xff] %v3190_v16  ;;  %3193 = vst [vmem:[%s15110_s5 + $0x1688] sm:$0xff] %v3192_v17  ;;  %v3196_v19 = vld [vmem:[%s15105_s29 + $0x2b98] sm:$0xff]  ;;  %v3198_v20 = vld [vmem:[%s15105_s29 + $0x2ba0] sm:$0xff] }
 0x18e   : > { %3195 = vst [vmem:[%s15110_s5 + $0x1690] sm:$0xff] %v3194_v18  ;;  %v3200_v21 = vld [vmem:[%s15105_s29 + $0x2ba8] sm:$0xff]  ;;  %3197 = vst [vmem:[%s15110_s5 + $0x1698] sm:$0xff] %v3196_v19  ;;  %v3202_v22 = vld [vmem:[%s15105_s29 + $0x2bb0] sm:$0xff] }
 0x18f   : > { %3199 = vst [vmem:[%s15110_s5 + $0x16a0] sm:$0xff] %v3198_v20  ;;  %3201 = vst [vmem:[%s15110_s5 + $0x16a8] sm:$0xff] %v3200_v21  ;;  %v3204_v23 = vld [vmem:[%s15105_s29 + $0x2bb8] sm:$0xff]  ;;  %v3206_v24 = vld [vmem:[%s15105_s29 + $0x2bc0] sm:$0xff] }
 0x190   : > { %3203 = vst [vmem:[%s15110_s5 + $0x16b0] sm:$0xff] %v3202_v22  ;;  %3205 = vst [vmem:[%s15110_s5 + $0x16b8] sm:$0xff] %v3204_v23  ;;  %v3208_v25 = vld [vmem:[%s15105_s29 + $0x2bc8] sm:$0xff]  ;;  %v3210_v26 = vld [vmem:[%s15105_s29 + $0x2bd0] sm:$0xff] }
 0x191   : > { %3207 = vst [vmem:[%s15110_s5 + $0x16c0] sm:$0xff] %v3206_v24  ;;  %v3212_v27 = vld [vmem:[%s15105_s29 + $0x2bd8] sm:$0xff]  ;;  %3209 = vst [vmem:[%s15110_s5 + $0x16c8] sm:$0xff] %v3208_v25  ;;  %v3214_v28 = vld [vmem:[%s15105_s29 + $0x2be0] sm:$0xff] }
 0x192   : > { %3211 = vst [vmem:[%s15110_s5 + $0x16d0] sm:$0xff] %v3210_v26  ;;  %3213 = vst [vmem:[%s15110_s5 + $0x16d8] sm:$0xff] %v3212_v27  ;;  %v3216_v29 = vld [vmem:[%s15105_s29 + $0x2be8] sm:$0xff]  ;;  %v3218_v30 = vld [vmem:[%s15105_s29 + $0x2bf0] sm:$0xff] }
 0x193   : > { %3215 = vst [vmem:[%s15110_s5 + $0x16e0] sm:$0xff] %v3214_v28  ;;  %3217 = vst [vmem:[%s15110_s5 + $0x16e8] sm:$0xff] %v3216_v29  ;;  %v3220_v31 = vld [vmem:[%s15105_s29 + $0x2bf8] sm:$0xff]  ;;  %v3222_v32 = vld [vmem:[%s15105_s29 + $0x2c00] sm:$0xff] }
 0x194   : > { %3219 = vst [vmem:[%s15110_s5 + $0x16f0] sm:$0xff] %v3218_v30  ;;  %v3224_v33 = vld [vmem:[%s15105_s29 + $0x2c08] sm:$0xff]  ;;  %3221 = vst [vmem:[%s15110_s5 + $0x16f8] sm:$0xff] %v3220_v31  ;;  %v3226_v34 = vld [vmem:[%s15105_s29 + $0x2c10] sm:$0xff] }
 0x195   : > { %3223 = vst [vmem:[%s15110_s5 + $0x1700] sm:$0xff] %v3222_v32  ;;  %3225 = vst [vmem:[%s15110_s5 + $0x1708] sm:$0xff] %v3224_v33  ;;  %v3228_v35 = vld [vmem:[%s15105_s29 + $0x2c18] sm:$0xff]  ;;  %v3230_v36 = vld [vmem:[%s15105_s29 + $0x2c20] sm:$0xff] }
 0x196   : > { %3227 = vst [vmem:[%s15110_s5 + $0x1710] sm:$0xff] %v3226_v34  ;;  %3229 = vst [vmem:[%s15110_s5 + $0x1718] sm:$0xff] %v3228_v35  ;;  %v3232_v37 = vld [vmem:[%s15105_s29 + $0x2c28] sm:$0xff]  ;;  %v3234_v38 = vld [vmem:[%s15105_s29 + $0x2c30] sm:$0xff] }
 0x197   : > { %3231 = vst [vmem:[%s15110_s5 + $0x1720] sm:$0xff] %v3230_v36  ;;  %v3236_v39 = vld [vmem:[%s15105_s29 + $0x2c38] sm:$0xff]  ;;  %3233 = vst [vmem:[%s15110_s5 + $0x1728] sm:$0xff] %v3232_v37  ;;  %v3238_v40 = vld [vmem:[%s15105_s29 + $0x2c40] sm:$0xff] }
 0x198   : > { %3235 = vst [vmem:[%s15110_s5 + $0x1730] sm:$0xff] %v3234_v38  ;;  %3237 = vst [vmem:[%s15110_s5 + $0x1738] sm:$0xff] %v3236_v39  ;;  %v3240_v41 = vld [vmem:[%s15105_s29 + $0x2c48] sm:$0xff]  ;;  %v3242_v42 = vld [vmem:[%s15105_s29 + $0x2c50] sm:$0xff] }
 0x199   : > { %3239 = vst [vmem:[%s15110_s5 + $0x1740] sm:$0xff] %v3238_v40  ;;  %3241 = vst [vmem:[%s15110_s5 + $0x1748] sm:$0xff] %v3240_v41  ;;  %v3244_v43 = vld [vmem:[%s15105_s29 + $0x2c58] sm:$0xff]  ;;  %v3246_v44 = vld [vmem:[%s15105_s29 + $0x2c60] sm:$0xff] }
 0x19a   : > { %3243 = vst [vmem:[%s15110_s5 + $0x1750] sm:$0xff] %v3242_v42  ;;  %v3248_v45 = vld [vmem:[%s15105_s29 + $0x2c68] sm:$0xff]  ;;  %3245 = vst [vmem:[%s15110_s5 + $0x1758] sm:$0xff] %v3244_v43  ;;  %v3250_v46 = vld [vmem:[%s15105_s29 + $0x2c70] sm:$0xff] }
 0x19b   : > { %3247 = vst [vmem:[%s15110_s5 + $0x1760] sm:$0xff] %v3246_v44  ;;  %3249 = vst [vmem:[%s15110_s5 + $0x1768] sm:$0xff] %v3248_v45  ;;  %v3252_v47 = vld [vmem:[%s15105_s29 + $0x2c78] sm:$0xff]  ;;  %v3254_v48 = vld [vmem:[%s15105_s29 + $0x2c80] sm:$0xff] }
 0x19c   : > { %3251 = vst [vmem:[%s15110_s5 + $0x1770] sm:$0xff] %v3250_v46  ;;  %3253 = vst [vmem:[%s15110_s5 + $0x1778] sm:$0xff] %v3252_v47  ;;  %v3256_v49 = vld [vmem:[%s15105_s29 + $0x2c88] sm:$0xff]  ;;  %v3258_v50 = vld [vmem:[%s15105_s29 + $0x2c90] sm:$0xff] }
 0x19d   : > { %3255 = vst [vmem:[%s15110_s5 + $0x1780] sm:$0xff] %v3254_v48  ;;  %v3260_v51 = vld [vmem:[%s15105_s29 + $0x2c98] sm:$0xff]  ;;  %3257 = vst [vmem:[%s15110_s5 + $0x1788] sm:$0xff] %v3256_v49  ;;  %v3262_v52 = vld [vmem:[%s15105_s29 + $0x2ca0] sm:$0xff] }
 0x19e   : > { %3259 = vst [vmem:[%s15110_s5 + $0x1790] sm:$0xff] %v3258_v50  ;;  %3261 = vst [vmem:[%s15110_s5 + $0x1798] sm:$0xff] %v3260_v51  ;;  %v3264_v53 = vld [vmem:[%s15105_s29 + $0x2ca8] sm:$0xff]  ;;  %v3266_v54 = vld [vmem:[%s15105_s29 + $0x2cb0] sm:$0xff] }
 0x19f   : > { %3263 = vst [vmem:[%s15110_s5 + $0x17a0] sm:$0xff] %v3262_v52  ;;  %3265 = vst [vmem:[%s15110_s5 + $0x17a8] sm:$0xff] %v3264_v53  ;;  %v3268_v55 = vld [vmem:[%s15105_s29 + $0x2cb8] sm:$0xff]  ;;  %v3270_v56 = vld [vmem:[%s15105_s29 + $0x2cc0] sm:$0xff] }
 0x1a0   : > { %3267 = vst [vmem:[%s15110_s5 + $0x17b0] sm:$0xff] %v3266_v54  ;;  %v3272_v57 = vld [vmem:[%s15105_s29 + $0x2cc8] sm:$0xff]  ;;  %3269 = vst [vmem:[%s15110_s5 + $0x17b8] sm:$0xff] %v3268_v55  ;;  %v3274_v58 = vld [vmem:[%s15105_s29 + $0x2cd0] sm:$0xff] }
 0x1a1   : > { %3271 = vst [vmem:[%s15110_s5 + $0x17c0] sm:$0xff] %v3270_v56  ;;  %3273 = vst [vmem:[%s15110_s5 + $0x17c8] sm:$0xff] %v3272_v57  ;;  %v3276_v59 = vld [vmem:[%s15105_s29 + $0x2cd8] sm:$0xff]  ;;  %v3278_v60 = vld [vmem:[%s15105_s29 + $0x2ce0] sm:$0xff] }
 0x1a2   : > { %3275 = vst [vmem:[%s15110_s5 + $0x17d0] sm:$0xff] %v3274_v58  ;;  %3277 = vst [vmem:[%s15110_s5 + $0x17d8] sm:$0xff] %v3276_v59  ;;  %v3280_v61 = vld [vmem:[%s15105_s29 + $0x2ce8] sm:$0xff]  ;;  %v3282_v62 = vld [vmem:[%s15105_s29 + $0x2cf0] sm:$0xff] }
 0x1a3   : > { %3279 = vst [vmem:[%s15110_s5 + $0x17e0] sm:$0xff] %v3278_v60  ;;  %v3284_v63 = vld [vmem:[%s15105_s29 + $0x2cf8] sm:$0xff]  ;;  %3281 = vst [vmem:[%s15110_s5 + $0x17e8] sm:$0xff] %v3280_v61 }
 0x1a4   : > { %3283 = vst [vmem:[%s15110_s5 + $0x17f0] sm:$0xff] %v3282_v62  ;;  %3285 = vst [vmem:[%s15110_s5 + $0x17f8] sm:$0xff] %v3284_v63 }
 0x1a5 PF: > { %p14661_p0 = scmp.ge.s32.totalorder %s14977_s24, 1  ;;  %p6407_p1 = scmp.lt.s32.totalorder %s14977_s24, 5 }
 0x1a7   : > { %p6408_p2 = pnand %p14661_p0, %p6407_p1 }
 0x1a8   : > { %s6414_s13 = sand.u32 (!%p6408_p2), 1, %s14953_s18   ;;  %s20324_s14 = sand.u32 (!%p6408_p2), 1, %s14945_s16  }
 0x1a9   : > { %6411 = sbr.rel (%p6408_p2) target bundleno = 2411 (0x96b), region = 84  ;;  %s16651_s26 = sshll.u32 (!%p6408_p2), %s20324_s14, 3 }
 0x1aa   : > { %s14779_s25 = smul.u32 (!%p6408_p2), 6144, %s6414_s13  ;;  %p6445_p3 = scmp.lt.s32.totalorder (!%p6408_p2), %s14965_s21, 1 }
 0x1ab   : > { %p14664_p4 = scmp.ne.s32.totalorder (!%p6408_p2), %s14961_s20, 0 }
 0x1ac   : > { %s16660_s5 = scalar_lea.vmem (!%p6408_p2), [#allocation3], %s14779_s25 }
 0x1ae   : > { %s6446_s30 = scalar_select %p6445_p3, %s14965_s21, 1 }
 0x1af   : > { %6453 = sbr.rel (%p14664_p4) target bundleno = 440 (0x1b8), region = 92 }
 0x1b0   : > { %s14780_s8 = smul.u32 48, %s6446_s30 }
 0x1b2   : > { %s16658_s29 = scalar_lea.vmem %s20318_s1, %s14780_s8 }
 0x1b4   : > { %v14979_v0 = vmov 0.0  }
 0x1b5   : > { %6454 = vst [vmem:[#allocation2 + $0x28] sm:$0xff] %v14979_v0  ;;  %6455 = vst [vmem:[#allocation2 + $0x10] sm:$0xff] %v14979_v0 }
 0x1b6   : > { %6456 = vst [vmem:[#allocation2 + $0x8] sm:$0xff] %v14979_v0  ;;  %6457 = vst [vmem:[#allocation2] sm:$0xff] %v14979_v0 }
 0x1b7   : > { %6458 = vst [vmem:[#allocation2 + $0x18] sm:$0xff] %v14979_v0  ;;  %6459 = vst [vmem:[#allocation2 + $0x20] sm:$0xff] %v14979_v0 }
 0x1b8 PF: > { %v6468_v1 = vld [vmem:[%s16660_s5 + $0x10] sm:$0xff]  ;;  %vm7234_vm0 = vcmask 400384   ;;  %v6466_v2 = vld [vmem:[%s16660_s5] sm:$0xff]  ;;  %v6469_v3 = vld [vmem:[%s16660_s5 + $0x18] sm:$0xff]  ;;  %vm10318_vm1 = vcmask 130112   ;;  %vm10325_vm2 = vcmask 195712  }
 0x1b9   : > { %v7241_v4 = vsel %vm7234_vm0, %v6468_v1, 0.0  ;;  %v7235_v5 = vsel %vm7234_vm0, %v6466_v2, 0.0  ;;  %v6467_v6 = vld [vmem:[%s16660_s5 + $0x8] sm:$0xff]  ;;  %v7244_v7 = vsel %vm7234_vm0, %v6469_v3, 0.0  ;;  %v6470_v10 = vld [vmem:[%s16660_s5 + $0x20] sm:$0xff]  ;;  %v6473_v13 = vld [vmem:[%s16660_s5 + $0x38] sm:$0xff] }
 0x1ba   : > { %7242 = vadd.xlane.f32.xlu1 %v7241_v4  ;;  %7236 = vadd.xlane.f32.xlu0 %v7235_v5  ;;  %v7238_v8 = vsel %vm7234_vm0, %v6467_v6, 0.0  ;;  %v6471_v9 = vld [vmem:[%s16660_s5 + $0x28] sm:$0xff]  ;;  %v7247_v12 = vsel %vm7234_vm0, %v6470_v10, 0.0  ;;  %v6472_v14 = vld [vmem:[%s16660_s5 + $0x30] sm:$0xff]  ;;  %v7256_v15 = vsel %vm7234_vm0, %v6473_v13, 0.0  ;;  %v6474_v18 = vld [vmem:[%s16660_s5 + $0x40] sm:$0xff] }
 0x1bb   : > { %v7250_v11 = vsel %vm7234_vm0, %v6471_v9, 0.0  ;;  %v7253_v16 = vsel %vm7234_vm0, %v6472_v14, 0.0  ;;  %v6475_v17 = vld [vmem:[%s16660_s5 + $0x48] sm:$0xff]  ;;  %v7259_v20 = vsel %vm7234_vm0, %v6474_v18, 0.0  ;;  %v6477_v21 = vld [vmem:[%s16660_s5 + $0x58] sm:$0xff]  ;;  %v6476_v22 = vld [vmem:[%s16660_s5 + $0x50] sm:$0xff] }
 0x1bc   : > { %v7262_v19 = vsel %vm7234_vm0, %v6475_v17, 0.0  ;;  %v7268_v23 = vsel %vm7234_vm0, %v6477_v21, 0.0  ;;  %v7265_v24 = vsel %vm7234_vm0, %v6476_v22, 0.0  ;;  %v6479_v25 = vld [vmem:[%s16660_s5 + $0x68] sm:$0xff]  ;;  %v6478_v26 = vld [vmem:[%s16660_s5 + $0x60] sm:$0xff]  ;;  %v6481_v29 = vld [vmem:[%s16660_s5 + $0x78] sm:$0xff] }
 0x1bd   : > { %v7274_v27 = vsel %vm7234_vm0, %v6479_v25, 0.0  ;;  %v7271_v28 = vsel %vm7234_vm0, %v6478_v26, 0.0  ;;  %v6480_v30 = vld [vmem:[%s16660_s5 + $0x70] sm:$0xff]  ;;  %v7280_v31 = vsel %vm7234_vm0, %v6481_v29, 0.0  ;;  %v6483_v33 = vld [vmem:[%s16660_s5 + $0x88] sm:$0xff]  ;;  %v6482_v34 = vld [vmem:[%s16660_s5 + $0x80] sm:$0xff] }
 0x1be   : > { %7245 = vadd.xlane.f32.xlu1 %v7244_v7  ;;  %7239 = vadd.xlane.f32.xlu0 %v7238_v8  ;;  %v7277_v32 = vsel %vm7234_vm0, %v6480_v30, 0.0  ;;  %v7286_v35 = vsel %vm7234_vm0, %v6483_v33, 0.0  ;;  %v7283_v36 = vsel %vm7234_vm0, %v6482_v34, 0.0  ;;  %v6485_v37 = vld [vmem:[%s16660_s5 + $0x98] sm:$0xff]  ;;  %v6484_v38 = vld [vmem:[%s16660_s5 + $0x90] sm:$0xff]  ;;  %v6487_v41 = vld [vmem:[%s16660_s5 + $0xa8] sm:$0xff] }
 0x1bf   : > { %v7292_v39 = vsel %vm7234_vm0, %v6485_v37, 0.0  ;;  %v7289_v40 = vsel %vm7234_vm0, %v6484_v38, 0.0  ;;  %v6486_v42 = vld [vmem:[%s16660_s5 + $0xa0] sm:$0xff]  ;;  %v7298_v43 = vsel %vm7234_vm0, %v6487_v41, 0.0  ;;  %v6489_v45 = vld [vmem:[%s16660_s5 + $0xb8] sm:$0xff]  ;;  %v6488_v46 = vld [vmem:[%s16660_s5 + $0xb0] sm:$0xff] }
 0x1c0   : > { %v7295_v44 = vsel %vm7234_vm0, %v6486_v42, 0.0  ;;  %v7304_v47 = vsel %vm7234_vm0, %v6489_v45, 0.0  ;;  %v7301_v48 = vsel %vm7234_vm0, %v6488_v46, 0.0  ;;  %v6491_v49 = vld [vmem:[%s16660_s5 + $0xc8] sm:$0xff]  ;;  %v6490_v50 = vld [vmem:[%s16660_s5 + $0xc0] sm:$0xff]  ;;  %v6493_v53 = vld [vmem:[%s16660_s5 + $0xd8] sm:$0xff] }
 0x1c1   : > { %v7310_v51 = vsel %vm7234_vm0, %v6491_v49, 0.0  ;;  %v7307_v52 = vsel %vm7234_vm0, %v6490_v50, 0.0  ;;  %v6492_v54 = vld [vmem:[%s16660_s5 + $0xd0] sm:$0xff]  ;;  %v7316_v55 = vsel %vm7234_vm0, %v6493_v53, 0.0  ;;  %v6495_v57 = vld [vmem:[%s16660_s5 + $0xe8] sm:$0xff]  ;;  %v6494_v58 = vld [vmem:[%s16660_s5 + $0xe0] sm:$0xff] }
 0x1c2   : > { %7251 = vadd.xlane.f32.xlu1 %v7250_v11  ;;  %7248 = vadd.xlane.f32.xlu0 %v7247_v12  ;;  %v7313_v56 = vsel %vm7234_vm0, %v6492_v54, 0.0  ;;  %v7322_v59 = vsel %vm7234_vm0, %v6495_v57, 0.0  ;;  %v7319_v60 = vsel %vm7234_vm0, %v6494_v58, 0.0  ;;  %v6497_v61 = vld [vmem:[%s16660_s5 + $0xf8] sm:$0xff]  ;;  %v6496_v62 = vld [vmem:[%s16660_s5 + $0xf0] sm:$0xff]  ;;  %v6499_v1 = vld [vmem:[%s16660_s5 + $0x108] sm:$0xff] }
 0x1c3   : > { %v7328_v63 = vsel %vm7234_vm0, %v6497_v61, 0.0  ;;  %v7325_v0 = vsel %vm7234_vm0, %v6496_v62, 0.0  ;;  %v6498_v2 = vld [vmem:[%s16660_s5 + $0x100] sm:$0xff]  ;;  %v7334_v3 = vsel %vm7234_vm0, %v6499_v1, 0.0  ;;  %v6501_v5 = vld [vmem:[%s16660_s5 + $0x118] sm:$0xff]  ;;  %v6500_v6 = vld [vmem:[%s16660_s5 + $0x110] sm:$0xff] }
 0x1c4   : > { %v7331_v4 = vsel %vm7234_vm0, %v6498_v2, 0.0  ;;  %v7340_v7 = vsel %vm7234_vm0, %v6501_v5, 0.0  ;;  %v7337_v8 = vsel %vm7234_vm0, %v6500_v6, 0.0  ;;  %v6503_v9 = vld [vmem:[%s16660_s5 + $0x128] sm:$0xff]  ;;  %v6502_v10 = vld [vmem:[%s16660_s5 + $0x120] sm:$0xff]  ;;  %v6505_v13 = vld [vmem:[%s16660_s5 + $0x138] sm:$0xff] }
 0x1c5   : > { %v7346_v11 = vsel %vm7234_vm0, %v6503_v9, 0.0  ;;  %v7343_v12 = vsel %vm7234_vm0, %v6502_v10, 0.0  ;;  %v6504_v14 = vld [vmem:[%s16660_s5 + $0x130] sm:$0xff]  ;;  %v6507_v17 = vld [vmem:[%s16660_s5 + $0x148] sm:$0xff]  ;;  %v6506_v18 = vld [vmem:[%s16660_s5 + $0x140] sm:$0xff]  ;;  %vm10332_vm3 = vcmask 261312  }
 0x1c6   : > { %7257 = vadd.xlane.f32.xlu1 %v7256_v15  ;;  %7254 = vadd.xlane.f32.xlu0 %v7253_v16  ;;  %v7352_v15 = vsel %vm7234_vm0, %v6505_v13, 0.0  ;;  %v7349_v16 = vsel %vm7234_vm0, %v6504_v14, 0.0  ;;  %v6509_v21 = vld [vmem:[%s16660_s5 + $0x158] sm:$0xff]  ;;  %v6508_v22 = vld [vmem:[%s16660_s5 + $0x150] sm:$0xff]  ;;  %v6511_v25 = vld [vmem:[%s16660_s5 + $0x168] sm:$0xff]  ;;  %vm10339_vm4 = vcmask 326912  }
 0x1c7   : > { %v6510_v26 = vld [vmem:[%s16660_s5 + $0x160] sm:$0xff]  ;;  %v6513_v29 = vld [vmem:[%s16660_s5 + $0x178] sm:$0xff]  ;;  %v6512_v30 = vld [vmem:[%s16660_s5 + $0x170] sm:$0xff]  ;;  %vm10346_vm5 = vcmask 392512   ;;  %vm10353_vm6 = vcmask 458112   ;;  %vm10360_vm7 = vcmask 523712  }
 0x1c8   : > { %v6515_v33 = vld [vmem:[%s16660_s5 + $0x188] sm:$0xff]  ;;  %v6514_v34 = vld [vmem:[%s16660_s5 + $0x180] sm:$0xff]  ;;  %v6517_v37 = vld [vmem:[%s16660_s5 + $0x198] sm:$0xff]  ;;  %vm20323_vm8 = vcmask 589312   ;;  %vm10374_vm9 = vcmask 654912   ;;  %vm10381_vm10 = vcmask 720512  }
 0x1c9   : > { %v6516_v38 = vld [vmem:[%s16660_s5 + $0x190] sm:$0xff]  ;;  %v6519_v41 = vld [vmem:[%s16660_s5 + $0x1a8] sm:$0xff]  ;;  %v6518_v42 = vld [vmem:[%s16660_s5 + $0x1a0] sm:$0xff]  ;;  %vm20322_vm11 = vcmask 786112   ;;  %vm10395_vm12 = vcmask 851712   ;;  %vm10402_vm13 = vcmask 917312  }
 0x1ca   : > { %7263 = vadd.xlane.f32.xlu1 %v7262_v19  ;;  %7260 = vadd.xlane.f32.xlu0 %v7259_v20  ;;  %v7358_v19 = vsel %vm7234_vm0, %v6507_v17, 0.0  ;;  %v7355_v20 = vsel %vm7234_vm0, %v6506_v18, 0.0  ;;  %v6521_v45 = vld [vmem:[%s16660_s5 + $0x1b8] sm:$0xff]  ;;  %v6520_v46 = vld [vmem:[%s16660_s5 + $0x1b0] sm:$0xff]  ;;  %v6523_v49 = vld [vmem:[%s16660_s5 + $0x1c8] sm:$0xff]  ;;  %vm10409_vm14 = vcmask 982912  }
 0x1cb   : > { %v6522_v50 = vld [vmem:[%s16660_s5 + $0x1c0] sm:$0xff]  ;;  %v6525_v53 = vld [vmem:[%s16660_s5 + $0x1d8] sm:$0xff]  ;;  %v6524_v54 = vld [vmem:[%s16660_s5 + $0x1d0] sm:$0xff]  ;;  %vm10416_vm15 = vcmask 1048512   ;;  %p14665_p5 = scmp.ne.s32.totalorder %s14961_s20, 1 }
 0x1cc   : > { %v6527_v57 = vld [vmem:[%s16660_s5 + $0x1e8] sm:$0xff]  ;;  %v6526_v58 = vld [vmem:[%s16660_s5 + $0x1e0] sm:$0xff]  ;;  %v6529_v61 = vld [vmem:[%s16660_s5 + $0x1f8] sm:$0xff]  ;;  %s20403_s6 = scalar_lea.vmem (!%p14665_p5), [#allocation4], %s16651_s26 }
 0x1cd   : > { %v6528_v62 = vld [vmem:[%s16660_s5 + $0x1f0] sm:$0xff]  ;;  %v6531_v1 = vld [vmem:[%s16660_s5 + $0x208] sm:$0xff]  ;;  %v6530_v2 = vld [vmem:[%s16660_s5 + $0x200] sm:$0xff] }
 0x1ce   : > { %7269 = vadd.xlane.f32.xlu1 %v7268_v23  ;;  %7266 = vadd.xlane.f32.xlu0 %v7265_v24  ;;  %v7364_v23 = vsel %vm7234_vm0, %v6509_v21, 0.0  ;;  %v7361_v24 = vsel %vm7234_vm0, %v6508_v22, 0.0  ;;  %v6533_v5 = vld [vmem:[%s16660_s5 + $0x218] sm:$0xff]  ;;  %v6532_v6 = vld [vmem:[%s16660_s5 + $0x210] sm:$0xff]  ;;  %v6535_v10 = vld [vmem:[%s16660_s5 + $0x228] sm:$0xff] }
 0x1cf   : > { %v7433_v9 = vsel %vm7234_vm0, %v6532_v6, 0.0  ;;  %v7442_v13 = vsel %vm7234_vm0, %v6535_v10, 0.0  ;;  %v6536_v17 = vld [vmem:[%s16660_s5 + $0x230] sm:$0xff] }
 0x1d0   : > { %v6544_v6 = vld [vmem:[%s16660_s5 + $0x270] sm:$0xff] }
 0x1d2   : > { %7275 = vadd.xlane.f32.xlu1 %v7274_v27  ;;  %7272 = vadd.xlane.f32.xlu0 %v7271_v28  ;;  %v7370_v27 = vsel %vm7234_vm0, %v6511_v25, 0.0  ;;  %v7367_v28 = vsel %vm7234_vm0, %v6510_v26, 0.0 }
 0x1d6   : > { %7281 = vadd.xlane.f32.xlu1 %v7280_v31  ;;  %7278 = vadd.xlane.f32.xlu0 %v7277_v32  ;;  %v7376_v31 = vsel %vm7234_vm0, %v6513_v29, 0.0  ;;  %v7373_v32 = vsel %vm7234_vm0, %v6512_v30, 0.0 }
 0x1da   : > { %7287 = vadd.xlane.f32.xlu1 %v7286_v35  ;;  %7284 = vadd.xlane.f32.xlu0 %v7283_v36  ;;  %v7382_v35 = vsel %vm7234_vm0, %v6515_v33, 0.0  ;;  %v7379_v36 = vsel %vm7234_vm0, %v6514_v34, 0.0  ;;  %v6541_v33 = vld [vmem:[%s16660_s5 + $0x258] sm:$0xff] }
 0x1de   : > { %7293 = vadd.xlane.f32.xlu1 %v7292_v39  ;;  %7290 = vadd.xlane.f32.xlu0 %v7289_v40  ;;  %v7388_v39 = vsel %vm7234_vm0, %v6517_v37, 0.0  ;;  %v7385_v40 = vsel %vm7234_vm0, %v6516_v38, 0.0  ;;  %v6540_v38 = vld [vmem:[%s16660_s5 + $0x250] sm:$0xff] }
 0x1e2   : > { %7299 = vadd.xlane.f32.xlu1 %v7298_v43  ;;  %7296 = vadd.xlane.f32.xlu0 %v7295_v44  ;;  %v7394_v43 = vsel %vm7234_vm0, %v6519_v41, 0.0  ;;  %v7391_v44 = vsel %vm7234_vm0, %v6518_v42, 0.0 }
 0x1e6   : > { %7305 = vadd.xlane.f32.xlu1 %v7304_v47  ;;  %7302 = vadd.xlane.f32.xlu0 %v7301_v48  ;;  %v7400_v47 = vsel %vm7234_vm0, %v6521_v45, 0.0  ;;  %v7397_v48 = vsel %vm7234_vm0, %v6520_v46, 0.0  ;;  %v7460_v46 = vsel %vm7234_vm0, %v6541_v33, 0.0 }
 0x1ea   : > { %7311 = vadd.xlane.f32.xlu1 %v7310_v51  ;;  %7308 = vadd.xlane.f32.xlu0 %v7307_v52  ;;  %v7406_v51 = vsel %vm7234_vm0, %v6523_v49, 0.0  ;;  %v7403_v52 = vsel %vm7234_vm0, %v6522_v50, 0.0  ;;  %v7457_v49 = vsel %vm7234_vm0, %v6540_v38, 0.0 }
 0x1ee   : > { %7317 = vadd.xlane.f32.xlu1 %v7316_v55  ;;  %7314 = vadd.xlane.f32.xlu0 %v7313_v56  ;;  %v7412_v55 = vsel %vm7234_vm0, %v6525_v53, 0.0  ;;  %v7409_v56 = vsel %vm7234_vm0, %v6524_v54, 0.0 }
 0x1f2   : > { %7323 = vadd.xlane.f32.xlu1 %v7322_v59  ;;  %7320 = vadd.xlane.f32.xlu0 %v7319_v60  ;;  %v7418_v59 = vsel %vm7234_vm0, %v6527_v57, 0.0  ;;  %v7415_v60 = vsel %vm7234_vm0, %v6526_v58, 0.0 }
 0x1f6   : > { %7329 = vadd.xlane.f32.xlu1 %v7328_v63  ;;  %7326 = vadd.xlane.f32.xlu0 %v7325_v0  ;;  %v7424_v63 = vsel %vm7234_vm0, %v6529_v61, 0.0  ;;  %v7421_v0 = vsel %vm7234_vm0, %v6528_v62, 0.0 }
 0x1fa   : > { %7335 = vadd.xlane.f32.xlu1 %v7334_v3  ;;  %7332 = vadd.xlane.f32.xlu0 %v7331_v4  ;;  %v7430_v3 = vsel %vm7234_vm0, %v6531_v1, 0.0  ;;  %v7427_v4 = vsel %vm7234_vm0, %v6530_v2, 0.0 }
 0x1fe   : > { %7341 = vadd.xlane.f32.xlu1 %v7340_v7  ;;  %7338 = vadd.xlane.f32.xlu0 %v7337_v8  ;;  %v10307_v7 = vlaneseq  ;;  %v7436_v8 = vsel %vm7234_vm0, %v6533_v5, 0.0  ;;  %v6545_v5 = vld [vmem:[%s16660_s5 + $0x278] sm:$0xff] }
 0x202   : > { %7347 = vadd.xlane.f32.xlu1 %v7346_v11  ;;  %7344 = vadd.xlane.f32.xlu0 %v7343_v12  ;;  %v6534_v11 = vld [vmem:[%s16660_s5 + $0x220] sm:$0xff]  ;;  %v16802_v12 = vand.u32 127, %v10307_v7 }
 0x203   : > { %v7439_v14 = vsel %vm7234_vm0, %v6534_v11, 0.0 }
 0x204   : > { %v10313_v18 = vadd.s32 4294967288, %v16802_v12  ;;  %v10341_v29 = vadd.s32 4294967256, %v16802_v12  ;;  %v10334_v30 = vadd.s32 4294967264, %v16802_v12  ;;  %v10369_v57 = vadd.s32 4294967224, %v16802_v12 }
 0x205   : > { %v10362_v61 = vadd.s32 4294967232, %v16802_v12  ;;  %v10376_v11 = vadd.s32 4294967216, %v16802_v12 }
 0x206   : > { %7353 = vadd.xlane.f32.xlu1 %v7352_v15  ;;  %7350 = vadd.xlane.f32.xlu0 %v7349_v16  ;;  %v16806_v15 = vshrl.u32 %v10307_v7, 7  ;;  %v6537_v16 = vld [vmem:[%s16660_s5 + $0x238] sm:$0xff]  ;;  %v10383_v7 = vadd.s32 4294967208, %v16802_v12 }
 0x208   : > { %v16817_v25 = vsub.s32 %v16802_v12, %v16806_v15  ;;  %v16820_v26 = vsub.s32 %v10313_v18, %v16806_v15  ;;  %v16878_v10 = vsub.s32 %v10362_v61, %v16806_v15 }
 0x20a   : > { %7359 = vadd.xlane.f32.xlu1 %v7358_v19  ;;  %7356 = vadd.xlane.f32.xlu0 %v7355_v20  ;;  %v10320_v19 = vadd.s32 4294967280, %v16802_v12  ;;  %v10327_v20 = vadd.s32 4294967272, %v16802_v12 }
 0x20e   : > { %7365 = vadd.xlane.f32.xlu1 %v7364_v23  ;;  %7362 = vadd.xlane.f32.xlu0 %v7361_v24  ;;  %v7448_v23 = vsel %vm7234_vm0, %v6537_v16, 0.0  ;;  %v7445_v24 = vsel %vm7234_vm0, %v6536_v17, 0.0  ;;  %v7469_v16 = vsel %vm7234_vm0, %v6544_v6, 0.0  ;;  %v6552_v6 = vld [vmem:[%s16660_s5 + $0x2b0] sm:$0xff] }
 0x212   : > { %7371 = vadd.xlane.f32.xlu1 %v7370_v27  ;;  %7368 = vadd.xlane.f32.xlu0 %v7367_v28  ;;  %v6539_v27 = vld [vmem:[%s16660_s5 + $0x248] sm:$0xff]  ;;  %v6538_v28 = vld [vmem:[%s16660_s5 + $0x240] sm:$0xff] }
 0x213   : > { %v7451_v37 = vsel %vm7234_vm0, %v6538_v28, 0.0  ;;  %v16894_v28 = vsub.s32 %v10376_v11, %v16806_v15 }
 0x216   : > { %7377 = vadd.xlane.f32.xlu1 %v7376_v31  ;;  %7374 = vadd.xlane.f32.xlu0 %v7373_v32  ;;  %v16827_v31 = vsub.s32 %v10320_v19, %v16806_v15  ;;  %v16830_v32 = vsub.s32 %v10327_v20, %v16806_v15  ;;  %v16886_v20 = vsub.s32 %v10383_v7, %v16806_v15 }
 0x21a   : > { %7383 = vadd.xlane.f32.xlu1 %v7382_v35  ;;  %7380 = vadd.xlane.f32.xlu0 %v7379_v36  ;;  %v7454_v36 = vsel %vm7234_vm0, %v6539_v27, 0.0 }
 0x21e   : > { %7389 = vadd.xlane.f32.xlu1 %v7388_v39  ;;  %7386 = vadd.xlane.f32.xlu0 %v7385_v40  ;;  %v10355_v39 = vadd.s32 4294967240, %v16802_v12  ;;  %v10348_v40 = vadd.s32 4294967248, %v16802_v12 }
 0x220   : > { %v16853_v53 = vsub.s32 %v10355_v39, %v16806_v15  ;;  %v16856_v54 = vsub.s32 %v10348_v40, %v16806_v15  ;;  %v10411_v39 = vadd.s32 4294967176, %v16802_v12 }
 0x222   : > { %7395 = vadd.xlane.f32.xlu1 %v7394_v43  ;;  %7392 = vadd.xlane.f32.xlu0 %v7391_v44  ;;  %v16841_v43 = vsub.s32 %v10341_v29, %v16806_v15  ;;  %v16844_v44 = vsub.s32 %v10334_v30, %v16806_v15  ;;  %v10390_v29 = vadd.s32 4294967200, %v16802_v12 }
 0x226   : > { %7401 = vadd.xlane.f32.xlu1 %v7400_v47  ;;  %7398 = vadd.xlane.f32.xlu0 %v7397_v48 }
 0x22a   : > { %7407 = vadd.xlane.f32.xlu1 %v7406_v51  ;;  %7404 = vadd.xlane.f32.xlu0 %v7403_v52 }
 0x22e   : > { %7413 = vadd.xlane.f32.xlu1 %v7412_v55  ;;  %7410 = vadd.xlane.f32.xlu0 %v7409_v56  ;;  %v6543_v55 = vld [vmem:[%s16660_s5 + $0x268] sm:$0xff]  ;;  %v6542_v56 = vld [vmem:[%s16660_s5 + $0x260] sm:$0xff] }
 0x232   : > { %7419 = vadd.xlane.f32.xlu1 %v7418_v59  ;;  %7416 = vadd.xlane.f32.xlu0 %v7415_v60 }
 0x236   : > { %7425 = vadd.xlane.f32.xlu1 %v7424_v63  ;;  %7422 = vadd.xlane.f32.xlu0 %v7421_v0  ;;  %v7466_v63 = vsel %vm7234_vm0, %v6543_v55, 0.0  ;;  %v7463_v0 = vsel %vm7234_vm0, %v6542_v56, 0.0  ;;  %v16918_v56 = vsub.s32 %v10411_v39, %v16806_v15 }
 0x23a   : > { %7431 = vadd.xlane.f32.xlu1 %v7430_v3  ;;  %7428 = vadd.xlane.f32.xlu0 %v7427_v4  ;;  %v16870_v4 = vsub.s32 %v10369_v57, %v16806_v15 }
 0x23e   : > { %7437 = vadd.xlane.f32.xlu1 %v7436_v8  ;;  %7434 = vadd.xlane.f32.xlu0 %v7433_v9 }
 0x242   : > { %7443 = vadd.xlane.f32.xlu1 %v7442_v13  ;;  %7440 = vadd.xlane.f32.xlu0 %v7439_v14  ;;  %v7472_v14 = vsel %vm7234_vm0, %v6545_v5, 0.0  ;;  %v6553_v5 = vld [vmem:[%s16660_s5 + $0x2b8] sm:$0xff] }
 0x243   : > { %v7243_v21 = vpop.xlane.xlu1 %7242  ;;  %v7237_v22 = vpop.xlane.xlu0 %7236 }
 0x244   : > { %v10312_v41 = vrot.slane %v7237_v22, %v16817_v25  ;;  %v10324_v45 = vrot.slane %v7243_v21, %v16827_v31  ;;  %v6547_v21 = vld [vmem:[%s16660_s5 + $0x288] sm:$0xff]  ;;  %v6546_v22 = vld [vmem:[%s16660_s5 + $0x280] sm:$0xff] }
 0x245   : > { %v7478_v33 = vsel %vm7234_vm0, %v6547_v21, 0.0 }
 0x246   : > { %7449 = vadd.xlane.f32.xlu1 %v7448_v23  ;;  %7446 = vadd.xlane.f32.xlu0 %v7445_v24  ;;  %v10397_v23 = vadd.s32 4294967192, %v16802_v12 }
 0x247   : > { %v7246_v34 = vpop.xlane.xlu1 %7245  ;;  %v7240_v35 = vpop.xlane.xlu0 %7239 }
 0x248   : > { %v10317_v42 = vrot.slane %v7240_v35, %v16820_v26  ;;  %v10331_v47 = vrot.slane %v7246_v34, %v16830_v32  ;;  %v7475_v34 = vsel %vm7234_vm0, %v6546_v22, 0.0  ;;  %v16902_v38 = vsub.s32 %v10397_v23, %v16806_v15 }
 0x24a   : > { %v10319_v48 = vsel %vm10318_vm1, %v10317_v42, %v10312_v41  ;;  %7455 = vadd.xlane.f32.xlu1 %v7454_v36  ;;  %7452 = vadd.xlane.f32.xlu0 %v7451_v37  ;;  %v16908_v42 = vsub.s32 %v10390_v29, %v16806_v15 }
 0x24b   : > { %v10326_v50 = vsel %vm10325_vm2, %v10324_v45, %v10319_v48  ;;  %v7252_v51 = vpop.xlane.xlu1 %7251  ;;  %v7249_v52 = vpop.xlane.xlu0 %7248  ;;  %v6549_v45 = vld [vmem:[%s16660_s5 + $0x298] sm:$0xff] }
 0x24c   : > { %v10345_v58 = vrot.slane %v7252_v51, %v16841_v43  ;;  %v10333_v59 = vsel %vm10332_vm3, %v10331_v47, %v10326_v50  ;;  %v10338_v60 = vrot.slane %v7249_v52, %v16844_v44  ;;  %v10404_v47 = vadd.s32 4294967184, %v16802_v12 }
 0x24d   : > { %v7484_v52 = vsel %vm7234_vm0, %v6549_v45, 0.0 }
 0x24e   : > { %v10340_v62 = vsel %vm10339_vm4, %v10338_v60, %v10333_v59  ;;  %7461 = vadd.xlane.f32.xlu1 %v7460_v46  ;;  %7458 = vadd.xlane.f32.xlu0 %v7457_v49  ;;  %v6548_v46 = vld [vmem:[%s16660_s5 + $0x290] sm:$0xff]  ;;  %v6551_v59 = vld [vmem:[%s16660_s5 + $0x2a8] sm:$0xff]  ;;  %v6550_v60 = vld [vmem:[%s16660_s5 + $0x2a0] sm:$0xff] }
 0x24f   : > { %v7258_v1 = vpop.xlane.xlu1 %7257  ;;  %v10347_v2 = vsel %vm10346_vm5, %v10345_v58, %v10340_v62  ;;  %v7255_v3 = vpop.xlane.xlu0 %7254  ;;  %v7481_v55 = vsel %vm7234_vm0, %v6548_v46, 0.0  ;;  %v16923_v58 = vsub.s32 %v10404_v47, %v16806_v15  ;;  %v6559_v47 = vld [vmem:[%s16660_s5 + $0x2e8] sm:$0xff] }
 0x250   : > { %v10359_v8 = vrot.slane %v7258_v1, %v16853_v53  ;;  %v10352_v9 = vrot.slane %v7255_v3, %v16856_v54  ;;  %v7490_v1 = vsel %vm7234_vm0, %v6551_v59, 0.0 }
 0x252   : > { %v10354_v13 = vsel %vm10353_vm6, %v10352_v9, %v10347_v2  ;;  %7467 = vadd.xlane.f32.xlu1 %v7466_v63  ;;  %7464 = vadd.xlane.f32.xlu0 %v7463_v0  ;;  %v7487_v2 = vsel %vm7234_vm0, %v6550_v60, 0.0  ;;  %v6561_v60 = vld [vmem:[%s16660_s5 + $0x2f8] sm:$0xff] }
 0x253   : > { %v7264_v17 = vpop.xlane.xlu1 %7263  ;;  %v10361_v18 = vsel %vm10360_vm7, %v10359_v8, %v10354_v13  ;;  %v7261_v19 = vpop.xlane.xlu0 %7260  ;;  %v7496_v13 = vsel %vm7234_vm0, %v6553_v5, 0.0 }
 0x254   : > { %v10373_v24 = vrot.slane %v7264_v17, %v16870_v4  ;;  %v10366_v27 = vrot.slane %v7261_v19, %v16878_v10  ;;  %v6554_v19 = vld [vmem:[%s16660_s5 + $0x2c0] sm:$0xff] }
 0x256   : > { %v10368_v30 = vsel %vm20323_vm8, %v10366_v27, %v10361_v18  ;;  %7473 = vadd.xlane.f32.xlu1 %v7472_v14  ;;  %7470 = vadd.xlane.f32.xlu0 %v7469_v16  ;;  %v7493_v14 = vsel %vm7234_vm0, %v6552_v6, 0.0  ;;  %v6555_v18 = vld [vmem:[%s16660_s5 + $0x2c8] sm:$0xff]  ;;  %v7499_v27 = vsel %vm7234_vm0, %v6554_v19, 0.0 }
 0x257   : > { %v7270_v35 = vpop.xlane.xlu1 %7269  ;;  %v10375_v36 = vsel %vm10374_vm9, %v10373_v24, %v10368_v30  ;;  %v7267_v37 = vpop.xlane.xlu0 %7266  ;;  %v7502_v24 = vsel %vm7234_vm0, %v6555_v18, 0.0  ;;  %v6563_v6 = vld [vmem:[%s16660_s5 + $0x308] sm:$0xff] }
 0x258   : > { %v10387_v40 = vrot.slane %v7270_v35, %v16886_v20  ;;  %v10380_v41 = vrot.slane %v7267_v37, %v16894_v28 }
 0x25a   : > { %v10382_v48 = vsel %vm10381_vm10, %v10380_v41, %v10375_v36  ;;  %7479 = vadd.xlane.f32.xlu1 %v7478_v33  ;;  %7476 = vadd.xlane.f32.xlu0 %v7475_v34  ;;  %v6557_v33 = vld [vmem:[%s16660_s5 + $0x2d8] sm:$0xff]  ;;  %v6556_v34 = vld [vmem:[%s16660_s5 + $0x2d0] sm:$0xff] }
 0x25b   : > { %v7276_v49 = vpop.xlane.xlu1 %7275  ;;  %v10389_v50 = vsel %vm20322_vm11, %v10387_v40, %v10382_v48  ;;  %v7273_v51 = vpop.xlane.xlu0 %7272  ;;  %v7508_v40 = vsel %vm7234_vm0, %v6557_v33, 0.0  ;;  %v7505_v41 = vsel %vm7234_vm0, %v6556_v34, 0.0  ;;  %v6558_v48 = vld [vmem:[%s16660_s5 + $0x2e0] sm:$0xff] }
 0x25c   : > { %v10401_v57 = vrot.slane %v7276_v49, %v16902_v38  ;;  %v10394_v12 = vrot.slane %v7273_v51, %v16908_v42 }
 0x25e   : > { %v10396_v61 = vsel %vm10395_vm12, %v10394_v12, %v10389_v50  ;;  %7485 = vadd.xlane.f32.xlu1 %v7484_v52  ;;  %7482 = vadd.xlane.f32.xlu0 %v7481_v55  ;;  %v7514_v55 = vsel %vm7234_vm0, %v6559_v47, 0.0 }
 0x25f   : > { %v7282_v62 = vpop.xlane.xlu1 %7281  ;;  %v10403_v63 = vsel %vm10402_vm13, %v10401_v57, %v10396_v61  ;;  %v7279_v0 = vpop.xlane.xlu0 %7278  ;;  %v7511_v57 = vsel %vm7234_vm0, %v6558_v48, 0.0  ;;  %v6560_v61 = vld [vmem:[%s16660_s5 + $0x2f0] sm:$0xff] }
 0x260   : > { %v10415_v15 = vrot.slane %v7282_v62, %v16918_v56  ;;  %v10408_v3 = vrot.slane %v7279_v0, %v16923_v58 }
 0x262   : > { %v10410_v7 = vsel %vm10409_vm14, %v10408_v3, %v10403_v63  ;;  %7491 = vadd.xlane.f32.xlu1 %v7490_v1  ;;  %7488 = vadd.xlane.f32.xlu0 %v7487_v2  ;;  %v7520_v2 = vsel %vm7234_vm0, %v6561_v60, 0.0 }
 0x263   : > { %v16937_v8 = vsel %vm10416_vm15, %v10415_v15, %v10410_v7  ;;  %v7288_v9 = vpop.xlane.xlu1 %7287  ;;  %v7285_v11 = vpop.xlane.xlu0 %7284  ;;  %v7517_v15 = vsel %vm7234_vm0, %v6560_v61, 0.0  ;;  %v6562_v7 = vld [vmem:[%s16660_s5 + $0x300] sm:$0xff] }
 0x264   : > { %v10425_v16 = vrot.slane %v7288_v9, %v16820_v26  ;;  %v10421_v17 = vrot.slane %v7285_v11, %v16817_v25 }
 0x266   : > { %v10426_v21 = vsel %vm10318_vm1, %v10425_v16, %v10421_v17  ;;  %7497 = vadd.xlane.f32.xlu1 %v7496_v13  ;;  %7494 = vadd.xlane.f32.xlu0 %v7493_v14  ;;  %v7526_v16 = vsel %vm7234_vm0, %v6563_v6, 0.0  ;;  %v7523_v17 = vsel %vm7234_vm0, %v6562_v7, 0.0 }
 0x267   : > { %v7294_v22 = vpop.xlane.xlu1 %7293  ;;  %v7291_v23 = vpop.xlane.xlu0 %7290 }
 0x268   : > { %v10435_v29 = vrot.slane %v7294_v22, %v16830_v32  ;;  %v10430_v30 = vrot.slane %v7291_v23, %v16827_v31  ;;  %v6564_v22 = vld [vmem:[%s16660_s5 + $0x310] sm:$0xff] }
 0x269   : > { %v7529_v33 = vsel %vm7234_vm0, %v6564_v22, 0.0 }
 0x26a   : > { %v10431_v35 = vsel %vm10325_vm2, %v10430_v30, %v10426_v21  ;;  %7503 = vadd.xlane.f32.xlu1 %v7502_v24  ;;  %7500 = vadd.xlane.f32.xlu0 %v7499_v27  ;;  %v6565_v21 = vld [vmem:[%s16660_s5 + $0x318] sm:$0xff] }
 0x26b   : > { %v7300_v36 = vpop.xlane.xlu1 %7299  ;;  %v10436_v37 = vsel %vm10332_vm3, %v10435_v29, %v10431_v35  ;;  %v7297_v39 = vpop.xlane.xlu0 %7296  ;;  %v7532_v30 = vsel %vm7234_vm0, %v6565_v21, 0.0 }
 0x26c   : > { %v10445_v45 = vrot.slane %v7300_v36, %v16841_v43  ;;  %v10440_v46 = vrot.slane %v7297_v39, %v16844_v44  ;;  %v6567_v36 = vld [vmem:[%s16660_s5 + $0x328] sm:$0xff] }
 0x26e   : > { %v10441_v49 = vsel %vm10339_vm4, %v10440_v46, %v10436_v37  ;;  %7509 = vadd.xlane.f32.xlu1 %v7508_v40  ;;  %7506 = vadd.xlane.f32.xlu0 %v7505_v41  ;;  %v6566_v37 = vld [vmem:[%s16660_s5 + $0x320] sm:$0xff]  ;;  %v7538_v46 = vsel %vm7234_vm0, %v6567_v36, 0.0 }
 0x26f   : > { %v7306_v50 = vpop.xlane.xlu1 %7305  ;;  %v10446_v51 = vsel %vm10346_vm5, %v10445_v45, %v10441_v49  ;;  %v7303_v52 = vpop.xlane.xlu0 %7302  ;;  %v7535_v47 = vsel %vm7234_vm0, %v6566_v37, 0.0 }
 0x270   : > { %v10455_v12 = vrot.slane %v7306_v50, %v16853_v53  ;;  %v10450_v59 = vrot.slane %v7303_v52, %v16856_v54  ;;  %v6569_v50 = vld [vmem:[%s16660_s5 + $0x338] sm:$0xff] }
 0x272   : > { %v10451_v62 = vsel %vm10353_vm6, %v10450_v59, %v10446_v51  ;;  %7515 = vadd.xlane.f32.xlu1 %v7514_v55  ;;  %7512 = vadd.xlane.f32.xlu0 %v7511_v57  ;;  %v6568_v51 = vld [vmem:[%s16660_s5 + $0x330] sm:$0xff]  ;;  %v7544_v59 = vsel %vm7234_vm0, %v6569_v50, 0.0 }
 0x273   : > { %v7312_v63 = vpop.xlane.xlu1 %7311  ;;  %v10456_v0 = vsel %vm10360_vm7, %v10455_v12, %v10451_v62  ;;  %v7309_v1 = vpop.xlane.xlu0 %7308  ;;  %v7541_v60 = vsel %vm7234_vm0, %v6568_v51, 0.0 }
 0x274   : > { %v10465_v3 = vrot.slane %v7312_v63, %v16870_v4  ;;  %v10460_v5 = vrot.slane %v7309_v1, %v16878_v10  ;;  %v6571_v63 = vld [vmem:[%s16660_s5 + $0x348] sm:$0xff] }
 0x276   : > { %v10461_v9 = vsel %vm20323_vm8, %v10460_v5, %v10456_v0  ;;  %7521 = vadd.xlane.f32.xlu1 %v7520_v2  ;;  %7518 = vadd.xlane.f32.xlu0 %v7517_v15  ;;  %v6570_v0 = vld [vmem:[%s16660_s5 + $0x340] sm:$0xff] }
 0x277   : > { %v7318_v11 = vpop.xlane.xlu1 %7317  ;;  %v10466_v13 = vsel %vm10374_vm9, %v10465_v3, %v10461_v9  ;;  %v7315_v14 = vpop.xlane.xlu0 %7314  ;;  %v7550_v3 = vsel %vm7234_vm0, %v6571_v63, 0.0  ;;  %v7547_v5 = vsel %vm7234_vm0, %v6570_v0, 0.0  ;;  %v6573_v9 = vld [vmem:[%s16660_s5 + $0x358] sm:$0xff] }
 0x278   : > { %v10475_v18 = vrot.slane %v7318_v11, %v16886_v20  ;;  %v10470_v19 = vrot.slane %v7315_v14, %v16894_v28  ;;  %v6572_v11 = vld [vmem:[%s16660_s5 + $0x350] sm:$0xff] }
 0x27a   : > { %v10471_v23 = vsel %vm10381_vm10, %v10470_v19, %v10466_v13  ;;  %7527 = vadd.xlane.f32.xlu1 %v7526_v16  ;;  %7524 = vadd.xlane.f32.xlu0 %v7523_v17  ;;  %v7553_v19 = vsel %vm7234_vm0, %v6572_v11, 0.0 }
 0x27b   : > { %v7324_v24 = vpop.xlane.xlu1 %7323  ;;  %v10476_v27 = vsel %vm20322_vm11, %v10475_v18, %v10471_v23  ;;  %v7321_v29 = vpop.xlane.xlu0 %7320  ;;  %v7556_v18 = vsel %vm7234_vm0, %v6573_v9, 0.0  ;;  %v6575_v23 = vld [vmem:[%s16660_s5 + $0x368] sm:$0xff] }
 0x27c   : > { %v10485_v34 = vrot.slane %v7324_v24, %v16902_v38  ;;  %v10480_v35 = vrot.slane %v7321_v29, %v16908_v42  ;;  %v6574_v24 = vld [vmem:[%s16660_s5 + $0x360] sm:$0xff] }
 0x27e   : > { %v10481_v39 = vsel %vm10395_vm12, %v10480_v35, %v10476_v27  ;;  %7533 = vadd.xlane.f32.xlu1 %v7532_v30  ;;  %7530 = vadd.xlane.f32.xlu0 %v7529_v33  ;;  %v7559_v35 = vsel %vm7234_vm0, %v6574_v24, 0.0 }
 0x27f   : > { %v7330_v40 = vpop.xlane.xlu1 %7329  ;;  %v10486_v41 = vsel %vm10402_vm13, %v10485_v34, %v10481_v39  ;;  %v7327_v45 = vpop.xlane.xlu0 %7326  ;;  %v7562_v34 = vsel %vm7234_vm0, %v6575_v23, 0.0  ;;  %v6577_v39 = vld [vmem:[%s16660_s5 + $0x378] sm:$0xff] }
 0x280   : > { %v10495_v48 = vrot.slane %v7330_v40, %v16918_v56  ;;  %v10490_v49 = vrot.slane %v7327_v45, %v16923_v58  ;;  %v6576_v40 = vld [vmem:[%s16660_s5 + $0x370] sm:$0xff] }
 0x282   : > { %v10491_v52 = vsel %vm10409_vm14, %v10490_v49, %v10486_v41  ;;  %7539 = vadd.xlane.f32.xlu1 %v7538_v46  ;;  %7536 = vadd.xlane.f32.xlu0 %v7535_v47  ;;  %v7565_v49 = vsel %vm7234_vm0, %v6576_v40, 0.0 }
 0x283   : > { %v17002_v55 = vsel %vm10416_vm15, %v10495_v48, %v10491_v52  ;;  %v7336_v57 = vpop.xlane.xlu1 %7335  ;;  %v7333_v12 = vpop.xlane.xlu0 %7332  ;;  %v7568_v48 = vsel %vm7234_vm0, %v6577_v39, 0.0  ;;  %v6579_v52 = vld [vmem:[%s16660_s5 + $0x388] sm:$0xff] }
 0x284   : > { %v10504_v61 = vrot.slane %v7336_v57, %v16820_v26  ;;  %v10500_v62 = vrot.slane %v7333_v12, %v16817_v25  ;;  %v6578_v57 = vld [vmem:[%s16660_s5 + $0x380] sm:$0xff] }
 0x285   : > { %v7571_v63 = vsel %vm7234_vm0, %v6578_v57, 0.0 }
 0x286   : > { %v10505_v1 = vsel %vm10318_vm1, %v10504_v61, %v10500_v62  ;;  %7545 = vadd.xlane.f32.xlu1 %v7544_v59  ;;  %7542 = vadd.xlane.f32.xlu0 %v7541_v60  ;;  %v7574_v62 = vsel %vm7234_vm0, %v6579_v52, 0.0 }
 0x287   : > { %v7342_v2 = vpop.xlane.xlu1 %7341  ;;  %v7339_v15 = vpop.xlane.xlu0 %7338 }
 0x288   : > { %v10514_v6 = vrot.slane %v7342_v2, %v16830_v32  ;;  %v10509_v7 = vrot.slane %v7339_v15, %v16827_v31  ;;  %v6581_v2 = vld [vmem:[%s16660_s5 + $0x398] sm:$0xff]  ;;  %v6580_v15 = vld [vmem:[%s16660_s5 + $0x390] sm:$0xff] }
 0x289   : > { %v7580_v9 = vsel %vm7234_vm0, %v6581_v2, 0.0  ;;  %v7577_v11 = vsel %vm7234_vm0, %v6580_v15, 0.0 }
 0x28a   : > { %v10510_v13 = vsel %vm10325_vm2, %v10509_v7, %v10505_v1  ;;  %7551 = vadd.xlane.f32.xlu1 %v7550_v3  ;;  %7548 = vadd.xlane.f32.xlu0 %v7547_v5 }
 0x28b   : > { %v7348_v14 = vpop.xlane.xlu1 %7347  ;;  %v10515_v16 = vsel %vm10332_vm3, %v10514_v6, %v10510_v13  ;;  %v7345_v17 = vpop.xlane.xlu0 %7344 }
 0x28c   : > { %v10524_v21 = vrot.slane %v7348_v14, %v16841_v43  ;;  %v10519_v22 = vrot.slane %v7345_v17, %v16844_v44  ;;  %v6582_v17 = vld [vmem:[%s16660_s5 + $0x3a0] sm:$0xff] }
 0x28d   : > { %v7583_v24 = vsel %vm7234_vm0, %v6582_v17, 0.0 }
 0x28e   : > { %v10520_v27 = vsel %vm10339_vm4, %v10519_v22, %v10515_v16  ;;  %7557 = vadd.xlane.f32.xlu1 %v7556_v18  ;;  %7554 = vadd.xlane.f32.xlu0 %v7553_v19  ;;  %v6583_v16 = vld [vmem:[%s16660_s5 + $0x3a8] sm:$0xff] }
 0x28f   : > { %v7354_v29 = vpop.xlane.xlu1 %7353  ;;  %v10525_v30 = vsel %vm10346_vm5, %v10524_v21, %v10520_v27  ;;  %v7351_v33 = vpop.xlane.xlu0 %7350  ;;  %v7586_v23 = vsel %vm7234_vm0, %v6583_v16, 0.0 }
 0x290   : > { %v10534_v36 = vrot.slane %v7354_v29, %v16853_v53  ;;  %v10529_v37 = vrot.slane %v7351_v33, %v16856_v54  ;;  %v6584_v33 = vld [vmem:[%s16660_s5 + $0x3b0] sm:$0xff] }
 0x291   : > { %v7589_v40 = vsel %vm7234_vm0, %v6584_v33, 0.0 }
 0x292   : > { %v10530_v41 = vsel %vm10353_vm6, %v10529_v37, %v10525_v30  ;;  %7563 = vadd.xlane.f32.xlu1 %v7562_v34  ;;  %7560 = vadd.xlane.f32.xlu0 %v7559_v35  ;;  %v6585_v30 = vld [vmem:[%s16660_s5 + $0x3b8] sm:$0xff] }
 0x293   : > { %v7360_v45 = vpop.xlane.xlu1 %7359  ;;  %v10535_v46 = vsel %vm10360_vm7, %v10534_v36, %v10530_v41  ;;  %v7357_v47 = vpop.xlane.xlu0 %7356  ;;  %v7592_v39 = vsel %vm7234_vm0, %v6585_v30, 0.0 }
 0x294   : > { %v10544_v50 = vrot.slane %v7360_v45, %v16870_v4  ;;  %v10539_v51 = vrot.slane %v7357_v47, %v16878_v10  ;;  %v6586_v47 = vld [vmem:[%s16660_s5 + $0x3c0] sm:$0xff] }
 0x295   : > { %v7595_v52 = vsel %vm7234_vm0, %v6586_v47, 0.0 }
 0x296   : > { %v10540_v12 = vsel %vm20323_vm8, %v10539_v51, %v10535_v46  ;;  %7569 = vadd.xlane.f32.xlu1 %v7568_v48  ;;  %7566 = vadd.xlane.f32.xlu0 %v7565_v49  ;;  %v6587_v46 = vld [vmem:[%s16660_s5 + $0x3c8] sm:$0xff] }
 0x297   : > { %v7366_v59 = vpop.xlane.xlu1 %7365  ;;  %v10545_v60 = vsel %vm10374_vm9, %v10544_v50, %v10540_v12  ;;  %v7363_v61 = vpop.xlane.xlu0 %7362  ;;  %v7598_v51 = vsel %vm7234_vm0, %v6587_v46, 0.0 }
 0x298   : > { %v10554_v0 = vrot.slane %v7366_v59, %v16886_v20  ;;  %v10549_v1 = vrot.slane %v7363_v61, %v16894_v28  ;;  %v6589_v59 = vld [vmem:[%s16660_s5 + $0x3d8] sm:$0xff] }
 0x29a   : > { %v10550_v3 = vsel %vm10381_vm10, %v10549_v1, %v10545_v60  ;;  %7575 = vadd.xlane.f32.xlu1 %v7574_v62  ;;  %7572 = vadd.xlane.f32.xlu0 %v7571_v63  ;;  %v6588_v60 = vld [vmem:[%s16660_s5 + $0x3d0] sm:$0xff]  ;;  %v7604_v1 = vsel %vm7234_vm0, %v6589_v59, 0.0 }
 0x29b   : > { %v7372_v5 = vpop.xlane.xlu1 %7371  ;;  %v10555_v6 = vsel %vm20322_vm11, %v10554_v0, %v10550_v3  ;;  %v7369_v7 = vpop.xlane.xlu0 %7368  ;;  %v7601_v2 = vsel %vm7234_vm0, %v6588_v60, 0.0 }
 0x29c   : > { %v10564_v13 = vrot.slane %v7372_v5, %v16902_v38  ;;  %v10559_v14 = vrot.slane %v7369_v7, %v16908_v42  ;;  %v6591_v5 = vld [vmem:[%s16660_s5 + $0x3e8] sm:$0xff] }
 0x29e   : > { %v10560_v18 = vsel %vm10395_vm12, %v10559_v14, %v10555_v6  ;;  %7581 = vadd.xlane.f32.xlu1 %v7580_v9  ;;  %7578 = vadd.xlane.f32.xlu0 %v7577_v11  ;;  %v6590_v6 = vld [vmem:[%s16660_s5 + $0x3e0] sm:$0xff]  ;;  %v7610_v14 = vsel %vm7234_vm0, %v6591_v5, 0.0 }
 0x29f   : > { %v7378_v19 = vpop.xlane.xlu1 %7377  ;;  %v10565_v21 = vsel %vm10402_vm13, %v10564_v13, %v10560_v18  ;;  %v7375_v22 = vpop.xlane.xlu0 %7374  ;;  %v7607_v16 = vsel %vm7234_vm0, %v6590_v6, 0.0 }
 0x2a0   : > { %v10574_v27 = vrot.slane %v7378_v19, %v16918_v56  ;;  %v10569_v29 = vrot.slane %v7375_v22, %v16923_v58  ;;  %v6593_v19 = vld [vmem:[%s16660_s5 + $0x3f8] sm:$0xff] }
 0x2a2   : > { %v10570_v34 = vsel %vm10409_vm14, %v10569_v29, %v10565_v21  ;;  %7587 = vadd.xlane.f32.xlu1 %v7586_v23  ;;  %7584 = vadd.xlane.f32.xlu0 %v7583_v24  ;;  %v6592_v21 = vld [vmem:[%s16660_s5 + $0x3f0] sm:$0xff]  ;;  %v7616_v29 = vsel %vm7234_vm0, %v6593_v19, 0.0 }
 0x2a3   : > { %v17067_v35 = vsel %vm10416_vm15, %v10574_v27, %v10570_v34  ;;  %v7384_v36 = vpop.xlane.xlu1 %7383  ;;  %v7381_v37 = vpop.xlane.xlu0 %7380  ;;  %v7613_v30 = vsel %vm7234_vm0, %v6592_v21, 0.0 }
 0x2a4   : > { %v10583_v41 = vrot.slane %v7384_v36, %v16820_v26  ;;  %v10579_v45 = vrot.slane %v7381_v37, %v16817_v25  ;;  %v6595_v36 = vld [vmem:[%s16660_s5 + $0x408] sm:$0xff]  ;;  %v6594_v37 = vld [vmem:[%s16660_s5 + $0x400] sm:$0xff] }
 0x2a5   : > { %v7622_v46 = vsel %vm7234_vm0, %v6595_v36, 0.0  ;;  %v7619_v47 = vsel %vm7234_vm0, %v6594_v37, 0.0 }
 0x2a6   : > { %v10584_v48 = vsel %vm10318_vm1, %v10583_v41, %v10579_v45  ;;  %7593 = vadd.xlane.f32.xlu1 %v7592_v39  ;;  %7590 = vadd.xlane.f32.xlu0 %v7589_v40 }
 0x2a7   : > { %v7390_v49 = vpop.xlane.xlu1 %7389  ;;  %v7387_v50 = vpop.xlane.xlu0 %7386 }
 0x2a8   : > { %v10593_v57 = vrot.slane %v7390_v49, %v16830_v32  ;;  %v10588_v12 = vrot.slane %v7387_v50, %v16827_v31  ;;  %v6597_v50 = vld [vmem:[%s16660_s5 + $0x418] sm:$0xff] }
 0x2a9   : > { %v7628_v60 = vsel %vm7234_vm0, %v6597_v50, 0.0 }
 0x2aa   : > { %v10589_v61 = vsel %vm10325_vm2, %v10588_v12, %v10584_v48  ;;  %7599 = vadd.xlane.f32.xlu1 %v7598_v51  ;;  %7596 = vadd.xlane.f32.xlu0 %v7595_v52  ;;  %v6596_v51 = vld [vmem:[%s16660_s5 + $0x410] sm:$0xff] }
 0x2ab   : > { %v7396_v62 = vpop.xlane.xlu1 %7395  ;;  %v10594_v63 = vsel %vm10332_vm3, %v10593_v57, %v10589_v61  ;;  %v7393_v0 = vpop.xlane.xlu0 %7392  ;;  %v7625_v61 = vsel %vm7234_vm0, %v6596_v51, 0.0 }
 0x2ac   : > { %v10603_v15 = vrot.slane %v7396_v62, %v16841_v43  ;;  %v10598_v3 = vrot.slane %v7393_v0, %v16844_v44  ;;  %v6599_v0 = vld [vmem:[%s16660_s5 + $0x428] sm:$0xff] }
 0x2ad   : > { %v7634_v6 = vsel %vm7234_vm0, %v6599_v0, 0.0 }
 0x2ae   : > { %v10599_v7 = vsel %vm10339_vm4, %v10598_v3, %v10594_v63  ;;  %7605 = vadd.xlane.f32.xlu1 %v7604_v1  ;;  %7602 = vadd.xlane.f32.xlu0 %v7601_v2  ;;  %v6598_v1 = vld [vmem:[%s16660_s5 + $0x420] sm:$0xff] }
 0x2af   : > { %v7402_v9 = vpop.xlane.xlu1 %7401  ;;  %v10604_v11 = vsel %vm10346_vm5, %v10603_v15, %v10599_v7  ;;  %v7399_v13 = vpop.xlane.xlu0 %7398  ;;  %v7631_v7 = vsel %vm7234_vm0, %v6598_v1, 0.0 }
 0x2b0   : > { %v10613_v17 = vrot.slane %v7402_v9, %v16853_v53  ;;  %v10608_v18 = vrot.slane %v7399_v13, %v16856_v54  ;;  %v6601_v13 = vld [vmem:[%s16660_s5 + $0x438] sm:$0xff] }
 0x2b1   : > { %v7640_v21 = vsel %vm7234_vm0, %v6601_v13, 0.0 }
 0x2b2   : > { %v10609_v22 = vsel %vm10353_vm6, %v10608_v18, %v10604_v11  ;;  %7611 = vadd.xlane.f32.xlu1 %v7610_v14  ;;  %7608 = vadd.xlane.f32.xlu0 %v7607_v16  ;;  %v6600_v14 = vld [vmem:[%s16660_s5 + $0x430] sm:$0xff] }
 0x2b3   : > { %v7408_v23 = vpop.xlane.xlu1 %7407  ;;  %v10614_v24 = vsel %vm10360_vm7, %v10613_v17, %v10609_v22  ;;  %v7405_v27 = vpop.xlane.xlu0 %7404  ;;  %v7637_v22 = vsel %vm7234_vm0, %v6600_v14, 0.0 }
 0x2b4   : > { %v10623_v33 = vrot.slane %v7408_v23, %v16870_v4  ;;  %v10618_v34 = vrot.slane %v7405_v27, %v16878_v10  ;;  %v6603_v27 = vld [vmem:[%s16660_s5 + $0x448] sm:$0xff] }
 0x2b5   : > { %v7646_v36 = vsel %vm7234_vm0, %v6603_v27, 0.0 }
 0x2b6   : > { %v10619_v39 = vsel %vm20323_vm8, %v10618_v34, %v10614_v24  ;;  %7617 = vadd.xlane.f32.xlu1 %v7616_v29  ;;  %7614 = vadd.xlane.f32.xlu0 %v7613_v30  ;;  %v6602_v29 = vld [vmem:[%s16660_s5 + $0x440] sm:$0xff] }
 0x2b7   : > { %v7414_v40 = vpop.xlane.xlu1 %7413  ;;  %v10624_v41 = vsel %vm10374_vm9, %v10623_v33, %v10619_v39  ;;  %v7411_v45 = vpop.xlane.xlu0 %7410  ;;  %v7643_v37 = vsel %vm7234_vm0, %v6602_v29, 0.0 }
 0x2b8   : > { %v10633_v48 = vrot.slane %v7414_v40, %v16886_v20  ;;  %v10628_v49 = vrot.slane %v7411_v45, %v16894_v28  ;;  %v6604_v45 = vld [vmem:[%s16660_s5 + $0x450] sm:$0xff] }
 0x2b9   : > { %v7649_v51 = vsel %vm7234_vm0, %v6604_v45, 0.0 }
 0x2ba   : > { %v10629_v52 = vsel %vm10381_vm10, %v10628_v49, %v10624_v41  ;;  %7623 = vadd.xlane.f32.xlu1 %v7622_v46  ;;  %7620 = vadd.xlane.f32.xlu0 %v7619_v47  ;;  %v6605_v41 = vld [vmem:[%s16660_s5 + $0x458] sm:$0xff] }
 0x2bb   : > { %v7420_v57 = vpop.xlane.xlu1 %7419  ;;  %v10634_v12 = vsel %vm20322_vm11, %v10633_v48, %v10629_v52  ;;  %v7417_v59 = vpop.xlane.xlu0 %7416  ;;  %v7652_v50 = vsel %vm7234_vm0, %v6605_v41, 0.0 }
 0x2bc   : > { %v10643_v62 = vrot.slane %v7420_v57, %v16902_v38  ;;  %v10638_v63 = vrot.slane %v7417_v59, %v16908_v42  ;;  %v6606_v59 = vld [vmem:[%s16660_s5 + $0x460] sm:$0xff] }
 0x2bd   : > { %v7655_v1 = vsel %vm7234_vm0, %v6606_v59, 0.0 }
 0x2be   : > { %v10639_v2 = vsel %vm10395_vm12, %v10638_v63, %v10634_v12  ;;  %7629 = vadd.xlane.f32.xlu1 %v7628_v60  ;;  %7626 = vadd.xlane.f32.xlu0 %v7625_v61  ;;  %v6607_v12 = vld [vmem:[%s16660_s5 + $0x468] sm:$0xff] }
 0x2bf   : > { %v7426_v15 = vpop.xlane.xlu1 %7425  ;;  %v10644_v3 = vsel %vm10402_vm13, %v10643_v62, %v10639_v2  ;;  %v7423_v5 = vpop.xlane.xlu0 %7422  ;;  %v7658_v0 = vsel %vm7234_vm0, %v6607_v12, 0.0 }
 0x2c0   : > { %v10653_v9 = vrot.slane %v7426_v15, %v16918_v56  ;;  %v10648_v11 = vrot.slane %v7423_v5, %v16923_v58  ;;  %v6608_v5 = vld [vmem:[%s16660_s5 + $0x470] sm:$0xff] }
 0x2c1   : > { %v7661_v14 = vsel %vm7234_vm0, %v6608_v5, 0.0 }
 0x2c2   : > { %v10649_v16 = vsel %vm10409_vm14, %v10648_v11, %v10644_v3  ;;  %7635 = vadd.xlane.f32.xlu1 %v7634_v6  ;;  %7632 = vadd.xlane.f32.xlu0 %v7631_v7  ;;  %v6609_v3 = vld [vmem:[%s16660_s5 + $0x478] sm:$0xff] }
 0x2c3   : > { %v17132_v17 = vsel %vm10416_vm15, %v10653_v9, %v10649_v16  ;;  %v7432_v18 = vpop.xlane.xlu1 %7431  ;;  %v7429_v19 = vpop.xlane.xlu0 %7428  ;;  %v7664_v13 = vsel %vm7234_vm0, %v6609_v3, 0.0 }
 0x2c4   : > { %v10662_v23 = vrot.slane %v7432_v18, %v16820_v26  ;;  %v10658_v24 = vrot.slane %v7429_v19, %v16817_v25  ;;  %v6611_v19 = vld [vmem:[%s16660_s5 + $0x488] sm:$0xff] }
 0x2c5   : > { %v7670_v29 = vsel %vm7234_vm0, %v6611_v19, 0.0 }
 0x2c6   : > { %v10663_v30 = vsel %vm10318_vm1, %v10662_v23, %v10658_v24  ;;  %7641 = vadd.xlane.f32.xlu1 %v7640_v21  ;;  %7638 = vadd.xlane.f32.xlu0 %v7637_v22  ;;  %v6610_v21 = vld [vmem:[%s16660_s5 + $0x480] sm:$0xff] }
 0x2c7   : > { %v7438_v33 = vpop.xlane.xlu1 %7437  ;;  %v7435_v34 = vpop.xlane.xlu0 %7434 }
 0x2c8   : > { %v10672_v39 = vrot.slane %v7438_v33, %v16830_v32  ;;  %v10667_v40 = vrot.slane %v7435_v34, %v16827_v31 }
 0x2ca   : > { %v10668_v46 = vsel %vm10325_vm2, %v10667_v40, %v10663_v30  ;;  %7647 = vadd.xlane.f32.xlu1 %v7646_v36  ;;  %7644 = vadd.xlane.f32.xlu0 %v7643_v37  ;;  %v7667_v30 = vsel %vm7234_vm0, %v6610_v21, 0.0  ;;  %v6613_v36 = vld [vmem:[%s16660_s5 + $0x498] sm:$0xff]  ;;  %v6612_v37 = vld [vmem:[%s16660_s5 + $0x490] sm:$0xff] }
 0x2cb   : > { %v7444_v47 = vpop.xlane.xlu1 %7443  ;;  %v10673_v48 = vsel %vm10332_vm3, %v10672_v39, %v10668_v46  ;;  %v7441_v49 = vpop.xlane.xlu0 %7440  ;;  %v7676_v46 = vsel %vm7234_vm0, %v6613_v36, 0.0 }
 0x2cc   : > { %v10682_v52 = vrot.slane %v7444_v47, %v16841_v43  ;;  %v10677_v57 = vrot.slane %v7441_v49, %v16844_v44  ;;  %v7673_v47 = vsel %vm7234_vm0, %v6612_v37, 0.0 }
 0x2ce   : > { %v10678_v60 = vsel %vm10339_vm4, %v10677_v57, %v10673_v48  ;;  %7653 = vadd.xlane.f32.xlu1 %v7652_v50  ;;  %7650 = vadd.xlane.f32.xlu0 %v7649_v51  ;;  %v6615_v50 = vld [vmem:[%s16660_s5 + $0x4a8] sm:$0xff]  ;;  %v6614_v51 = vld [vmem:[%s16660_s5 + $0x4a0] sm:$0xff] }
 0x2cf   : > { %v7450_v61 = vpop.xlane.xlu1 %7449  ;;  %v10683_v62 = vsel %vm10346_vm5, %v10682_v52, %v10678_v60  ;;  %v7447_v63 = vpop.xlane.xlu0 %7446  ;;  %v7682_v60 = vsel %vm7234_vm0, %v6615_v50, 0.0 }
 0x2d0   : > { %v10692_v2 = vrot.slane %v7450_v61, %v16853_v53  ;;  %v10687_v15 = vrot.slane %v7447_v63, %v16856_v54  ;;  %v7679_v61 = vsel %vm7234_vm0, %v6614_v51, 0.0 }
 0x2d2   : > { %v10688_v6 = vsel %vm10353_vm6, %v10687_v15, %v10683_v62  ;;  %7659 = vadd.xlane.f32.xlu1 %v7658_v0  ;;  %7656 = vadd.xlane.f32.xlu0 %v7655_v1  ;;  %v6617_v0 = vld [vmem:[%s16660_s5 + $0x4b8] sm:$0xff]  ;;  %v6616_v1 = vld [vmem:[%s16660_s5 + $0x4b0] sm:$0xff] }
 0x2d3   : > { %v7456_v7 = vpop.xlane.xlu1 %7455  ;;  %v10693_v9 = vsel %vm10360_vm7, %v10692_v2, %v10688_v6  ;;  %v7453_v11 = vpop.xlane.xlu0 %7452  ;;  %v7688_v6 = vsel %vm7234_vm0, %v6617_v0, 0.0 }
 0x2d4   : > { %v10702_v16 = vrot.slane %v7456_v7, %v16870_v4  ;;  %v10697_v18 = vrot.slane %v7453_v11, %v16878_v10  ;;  %v7685_v7 = vsel %vm7234_vm0, %v6616_v1, 0.0 }
 0x2d6   : > { %v10698_v22 = vsel %vm20323_vm8, %v10697_v18, %v10693_v9  ;;  %7665 = vadd.xlane.f32.xlu1 %v7664_v13  ;;  %7662 = vadd.xlane.f32.xlu0 %v7661_v14  ;;  %v6619_v13 = vld [vmem:[%s16660_s5 + $0x4c8] sm:$0xff]  ;;  %v6618_v14 = vld [vmem:[%s16660_s5 + $0x4c0] sm:$0xff] }
 0x2d7   : > { %v7462_v23 = vpop.xlane.xlu1 %7461  ;;  %v10703_v24 = vsel %vm10374_vm9, %v10702_v16, %v10698_v22  ;;  %v7459_v27 = vpop.xlane.xlu0 %7458  ;;  %v7694_v21 = vsel %vm7234_vm0, %v6619_v13, 0.0  ;;  %v7691_v22 = vsel %vm7234_vm0, %v6618_v14, 0.0 }
 0x2d8   : > { %v10712_v33 = vrot.slane %v7462_v23, %v16886_v20  ;;  %v10707_v34 = vrot.slane %v7459_v27, %v16894_v28  ;;  %v6621_v27 = vld [vmem:[%s16660_s5 + $0x4d8] sm:$0xff] }
 0x2d9   : > { %v7700_v37 = vsel %vm7234_vm0, %v6621_v27, 0.0 }
 0x2da   : > { %v10708_v39 = vsel %vm10381_vm10, %v10707_v34, %v10703_v24  ;;  %7671 = vadd.xlane.f32.xlu1 %v7670_v29  ;;  %7668 = vadd.xlane.f32.xlu0 %v7667_v30  ;;  %v6620_v29 = vld [vmem:[%s16660_s5 + $0x4d0] sm:$0xff] }
 0x2db   : > { %v7468_v40 = vpop.xlane.xlu1 %7467  ;;  %v10713_v41 = vsel %vm20322_vm11, %v10712_v33, %v10708_v39  ;;  %v7465_v45 = vpop.xlane.xlu0 %7464  ;;  %v7697_v39 = vsel %vm7234_vm0, %v6620_v29, 0.0 }
 0x2dc   : > { %v10722_v48 = vrot.slane %v7468_v40, %v16902_v38  ;;  %v10717_v49 = vrot.slane %v7465_v45, %v16908_v42  ;;  %v6623_v45 = vld [vmem:[%s16660_s5 + $0x4e8] sm:$0xff] }
 0x2dd   : > { %v7706_v51 = vsel %vm7234_vm0, %v6623_v45, 0.0 }
 0x2de   : > { %v10718_v52 = vsel %vm10395_vm12, %v10717_v49, %v10713_v41  ;;  %7677 = vadd.xlane.f32.xlu1 %v7676_v46  ;;  %7674 = vadd.xlane.f32.xlu0 %v7673_v47  ;;  %v6622_v46 = vld [vmem:[%s16660_s5 + $0x4e0] sm:$0xff] }
 0x2df   : > { %v7474_v57 = vpop.xlane.xlu1 %7473  ;;  %v10723_v12 = vsel %vm10402_vm13, %v10722_v48, %v10718_v52  ;;  %v7471_v59 = vpop.xlane.xlu0 %7470  ;;  %v7703_v52 = vsel %vm7234_vm0, %v6622_v46, 0.0 }
 0x2e0   : > { %v10732_v62 = vrot.slane %v7474_v57, %v16918_v56  ;;  %v10727_v63 = vrot.slane %v7471_v59, %v16923_v58  ;;  %v6625_v59 = vld [vmem:[%s16660_s5 + $0x4f8] sm:$0xff] }
 0x2e1   : > { %v7712_v1 = vsel %vm7234_vm0, %v6625_v59, 0.0 }
 0x2e2   : > { %v10728_v2 = vsel %vm10409_vm14, %v10727_v63, %v10723_v12  ;;  %7683 = vadd.xlane.f32.xlu1 %v7682_v60  ;;  %7680 = vadd.xlane.f32.xlu0 %v7679_v61  ;;  %v6624_v60 = vld [vmem:[%s16660_s5 + $0x4f0] sm:$0xff] }
 0x2e3   : > { %v17197_v15 = vsel %vm10416_vm15, %v10732_v62, %v10728_v2  ;;  %v7480_v3 = vpop.xlane.xlu1 %7479  ;;  %v7477_v5 = vpop.xlane.xlu0 %7476  ;;  %v7709_v2 = vsel %vm7234_vm0, %v6624_v60, 0.0 }
 0x2e4   : > { %v10741_v9 = vrot.slane %v7480_v3, %v16820_v26  ;;  %v10737_v11 = vrot.slane %v7477_v5, %v16817_v25 }
 0x2e6   : > { %v10742_v16 = vsel %vm10318_vm1, %v10741_v9, %v10737_v11  ;;  %7689 = vadd.xlane.f32.xlu1 %v7688_v6  ;;  %7686 = vadd.xlane.f32.xlu0 %v7685_v7  ;;  %v6627_v6 = vld [vmem:[%s16660_s5 + $0x508] sm:$0xff]  ;;  %v6626_v7 = vld [vmem:[%s16660_s5 + $0x500] sm:$0xff] }
 0x2e7   : > { %v7486_v18 = vpop.xlane.xlu1 %7485  ;;  %v7483_v19 = vpop.xlane.xlu0 %7482 }
 0x2e8   : > { %v10751_v23 = vrot.slane %v7486_v18, %v16830_v32  ;;  %v10746_v24 = vrot.slane %v7483_v19, %v16827_v31  ;;  %v7715_v18 = vsel %vm7234_vm0, %v6626_v7, 0.0 }
 0x2ea   : > { %v10747_v30 = vsel %vm10325_vm2, %v10746_v24, %v10742_v16  ;;  %7695 = vadd.xlane.f32.xlu1 %v7694_v21  ;;  %7692 = vadd.xlane.f32.xlu0 %v7691_v22  ;;  %v7718_v16 = vsel %vm7234_vm0, %v6627_v6, 0.0  ;;  %v6629_v22 = vld [vmem:[%s16660_s5 + $0x518] sm:$0xff] }
 0x2eb   : > { %v7492_v33 = vpop.xlane.xlu1 %7491  ;;  %v10752_v34 = vsel %vm10332_vm3, %v10751_v23, %v10747_v30  ;;  %v7489_v36 = vpop.xlane.xlu0 %7488  ;;  %v6628_v23 = vld [vmem:[%s16660_s5 + $0x510] sm:$0xff] }
 0x2ec   : > { %v10761_v40 = vrot.slane %v7492_v33, %v16841_v43  ;;  %v10756_v41 = vrot.slane %v7489_v36, %v16844_v44  ;;  %v7724_v33 = vsel %vm7234_vm0, %v6629_v22, 0.0 }
 0x2ee   : > { %v10757_v47 = vsel %vm10339_vm4, %v10756_v41, %v10752_v34  ;;  %7701 = vadd.xlane.f32.xlu1 %v7700_v37  ;;  %7698 = vadd.xlane.f32.xlu0 %v7697_v39  ;;  %v7721_v34 = vsel %vm7234_vm0, %v6628_v23, 0.0  ;;  %v6631_v39 = vld [vmem:[%s16660_s5 + $0x528] sm:$0xff] }
 0x2ef   : > { %v7498_v48 = vpop.xlane.xlu1 %7497  ;;  %v10762_v49 = vsel %vm10346_vm5, %v10761_v40, %v10757_v47  ;;  %v7495_v50 = vpop.xlane.xlu0 %7494  ;;  %v6630_v40 = vld [vmem:[%s16660_s5 + $0x520] sm:$0xff] }
 0x2f0   : > { %v10771_v57 = vrot.slane %v7498_v48, %v16853_v53  ;;  %v10766_v12 = vrot.slane %v7495_v50, %v16856_v54  ;;  %v7730_v48 = vsel %vm7234_vm0, %v6631_v39, 0.0 }
 0x2f2   : > { %v10767_v61 = vsel %vm10353_vm6, %v10766_v12, %v10762_v49  ;;  %7707 = vadd.xlane.f32.xlu1 %v7706_v51  ;;  %7704 = vadd.xlane.f32.xlu0 %v7703_v52  ;;  %v7727_v49 = vsel %vm7234_vm0, %v6630_v40, 0.0  ;;  %v6633_v52 = vld [vmem:[%s16660_s5 + $0x538] sm:$0xff] }
 0x2f3   : > { %v7504_v62 = vpop.xlane.xlu1 %7503  ;;  %v10772_v63 = vsel %vm10360_vm7, %v10771_v57, %v10767_v61  ;;  %v7501_v0 = vpop.xlane.xlu0 %7500  ;;  %v6632_v57 = vld [vmem:[%s16660_s5 + $0x530] sm:$0xff] }
 0x2f4   : > { %v10781_v3 = vrot.slane %v7504_v62, %v16870_v4  ;;  %v10776_v5 = vrot.slane %v7501_v0, %v16878_v10  ;;  %v7736_v62 = vsel %vm7234_vm0, %v6633_v52, 0.0 }
 0x2f6   : > { %v10777_v9 = vsel %vm20323_vm8, %v10776_v5, %v10772_v63  ;;  %7713 = vadd.xlane.f32.xlu1 %v7712_v1  ;;  %7710 = vadd.xlane.f32.xlu0 %v7709_v2  ;;  %v7733_v63 = vsel %vm7234_vm0, %v6632_v57, 0.0  ;;  %v6635_v2 = vld [vmem:[%s16660_s5 + $0x548] sm:$0xff] }
 0x2f7   : > { %v7510_v11 = vpop.xlane.xlu1 %7509  ;;  %v10782_v13 = vsel %vm10374_vm9, %v10781_v3, %v10777_v9  ;;  %v7507_v14 = vpop.xlane.xlu0 %7506  ;;  %v6634_v3 = vld [vmem:[%s16660_s5 + $0x540] sm:$0xff]  ;;  %v7742_v9 = vsel %vm7234_vm0, %v6635_v2, 0.0 }
 0x2f8   : > { %v10791_v19 = vrot.slane %v7510_v11, %v16886_v20  ;;  %v10786_v21 = vrot.slane %v7507_v14, %v16894_v28  ;;  %v7739_v11 = vsel %vm7234_vm0, %v6634_v3, 0.0 }
 0x2fa   : > { %v10787_v24 = vsel %vm10381_vm10, %v10786_v21, %v10782_v13  ;;  %7719 = vadd.xlane.f32.xlu1 %v7718_v16  ;;  %7716 = vadd.xlane.f32.xlu0 %v7715_v18  ;;  %v6637_v16 = vld [vmem:[%s16660_s5 + $0x558] sm:$0xff]  ;;  %v6636_v18 = vld [vmem:[%s16660_s5 + $0x550] sm:$0xff] }
 0x2fb   : > { %v7516_v27 = vpop.xlane.xlu1 %7515  ;;  %v10792_v29 = vsel %vm20322_vm11, %v10791_v19, %v10787_v24  ;;  %v7513_v30 = vpop.xlane.xlu0 %7512  ;;  %v7748_v24 = vsel %vm7234_vm0, %v6637_v16, 0.0 }
 0x2fc   : > { %v10801_v36 = vrot.slane %v7516_v27, %v16902_v38  ;;  %v10796_v37 = vrot.slane %v7513_v30, %v16908_v42  ;;  %v7745_v27 = vsel %vm7234_vm0, %v6636_v18, 0.0 }
 0x2fe   : > { %v10797_v41 = vsel %vm10395_vm12, %v10796_v37, %v10792_v29  ;;  %7725 = vadd.xlane.f32.xlu1 %v7724_v33  ;;  %7722 = vadd.xlane.f32.xlu0 %v7721_v34  ;;  %v6639_v33 = vld [vmem:[%s16660_s5 + $0x568] sm:$0xff]  ;;  %v6638_v34 = vld [vmem:[%s16660_s5 + $0x560] sm:$0xff] }
 0x2ff   : > { %v7522_v45 = vpop.xlane.xlu1 %7521  ;;  %v10802_v46 = vsel %vm10402_vm13, %v10801_v36, %v10797_v41  ;;  %v7519_v47 = vpop.xlane.xlu0 %7518  ;;  %v7754_v41 = vsel %vm7234_vm0, %v6639_v33, 0.0 }
 0x300   : > { %v10811_v50 = vrot.slane %v7522_v45, %v16918_v56  ;;  %v10806_v51 = vrot.slane %v7519_v47, %v16923_v58  ;;  %v7751_v45 = vsel %vm7234_vm0, %v6638_v34, 0.0 }
 0x302   : > { %v10807_v12 = vsel %vm10409_vm14, %v10806_v51, %v10802_v46  ;;  %7731 = vadd.xlane.f32.xlu1 %v7730_v48  ;;  %7728 = vadd.xlane.f32.xlu0 %v7727_v49  ;;  %v6641_v48 = vld [vmem:[%s16660_s5 + $0x578] sm:$0xff]  ;;  %v6640_v49 = vld [vmem:[%s16660_s5 + $0x570] sm:$0xff] }
 0x303   : > { %v17262_v59 = vsel %vm10416_vm15, %v10811_v50, %v10807_v12  ;;  %v7528_v60 = vpop.xlane.xlu1 %7527  ;;  %v7525_v61 = vpop.xlane.xlu0 %7524  ;;  %v7760_v12 = vsel %vm7234_vm0, %v6641_v48, 0.0 }
 0x304   : > { %v10820_v0 = vrot.slane %v7528_v60, %v16820_v26  ;;  %v10816_v1 = vrot.slane %v7525_v61, %v16817_v25  ;;  %v7757_v60 = vsel %vm7234_vm0, %v6640_v49, 0.0 }
 0x306   : > { %v10821_v5 = vsel %vm10318_vm1, %v10820_v0, %v10816_v1  ;;  %7737 = vadd.xlane.f32.xlu1 %v7736_v62  ;;  %7734 = vadd.xlane.f32.xlu0 %v7733_v63  ;;  %v6643_v63 = vld [vmem:[%s16660_s5 + $0x588] sm:$0xff]  ;;  %v6642_v0 = vld [vmem:[%s16660_s5 + $0x580] sm:$0xff] }
 0x307   : > { %v7534_v6 = vpop.xlane.xlu1 %7533  ;;  %v7531_v7 = vpop.xlane.xlu0 %7530 }
 0x308   : > { %v10830_v13 = vrot.slane %v7534_v6, %v16830_v32  ;;  %v10825_v14 = vrot.slane %v7531_v7, %v16827_v31  ;;  %v7766_v6 = vsel %vm7234_vm0, %v6643_v63, 0.0  ;;  %v7763_v7 = vsel %vm7234_vm0, %v6642_v0, 0.0  ;;  %v6650_v63 = vld [vmem:[%s16660_s5 + $0x5c0] sm:$0xff] }
 0x30a   : > { %v10826_v19 = vsel %vm10325_vm2, %v10825_v14, %v10821_v5  ;;  %7743 = vadd.xlane.f32.xlu1 %v7742_v9  ;;  %7740 = vadd.xlane.f32.xlu0 %v7739_v11  ;;  %v6644_v14 = vld [vmem:[%s16660_s5 + $0x590] sm:$0xff] }
 0x30b   : > { %v7540_v21 = vpop.xlane.xlu1 %7539  ;;  %v10831_v22 = vsel %vm10332_vm3, %v10830_v13, %v10826_v19  ;;  %v7537_v23 = vpop.xlane.xlu0 %7536  ;;  %v6645_v13 = vld [vmem:[%s16660_s5 + $0x598] sm:$0xff] }
 0x30c   : > { %v10840_v29 = vrot.slane %v7540_v21, %v16841_v43  ;;  %v10835_v30 = vrot.slane %v7537_v23, %v16844_v44  ;;  %v7769_v23 = vsel %vm7234_vm0, %v6644_v14, 0.0 }
 0x30e   : > { %v10836_v36 = vsel %vm10339_vm4, %v10835_v30, %v10831_v22  ;;  %7749 = vadd.xlane.f32.xlu1 %v7748_v24  ;;  %7746 = vadd.xlane.f32.xlu0 %v7745_v27  ;;  %v7772_v22 = vsel %vm7234_vm0, %v6645_v13, 0.0  ;;  %v6646_v30 = vld [vmem:[%s16660_s5 + $0x5a0] sm:$0xff] }
 0x30f   : > { %v7546_v37 = vpop.xlane.xlu1 %7545  ;;  %v10841_v39 = vsel %vm10346_vm5, %v10840_v29, %v10836_v36  ;;  %v7543_v40 = vpop.xlane.xlu0 %7542  ;;  %v6647_v29 = vld [vmem:[%s16660_s5 + $0x5a8] sm:$0xff] }
 0x310   : > { %v10850_v46 = vrot.slane %v7546_v37, %v16853_v53  ;;  %v10845_v47 = vrot.slane %v7543_v40, %v16856_v54  ;;  %v7775_v40 = vsel %vm7234_vm0, %v6646_v30, 0.0 }
 0x312   : > { %v10846_v50 = vsel %vm10353_vm6, %v10845_v47, %v10841_v39  ;;  %7755 = vadd.xlane.f32.xlu1 %v7754_v41  ;;  %7752 = vadd.xlane.f32.xlu0 %v7751_v45  ;;  %v7778_v39 = vsel %vm7234_vm0, %v6647_v29, 0.0  ;;  %v6648_v47 = vld [vmem:[%s16660_s5 + $0x5b0] sm:$0xff] }
 0x313   : > { %v7552_v51 = vpop.xlane.xlu1 %7551  ;;  %v10851_v52 = vsel %vm10360_vm7, %v10850_v46, %v10846_v50  ;;  %v7549_v57 = vpop.xlane.xlu0 %7548  ;;  %v6649_v46 = vld [vmem:[%s16660_s5 + $0x5b8] sm:$0xff] }
 0x314   : > { %v10860_v61 = vrot.slane %v7552_v51, %v16870_v4  ;;  %v10855_v62 = vrot.slane %v7549_v57, %v16878_v10  ;;  %v7781_v57 = vsel %vm7234_vm0, %v6648_v47, 0.0 }
 0x316   : > { %v10856_v1 = vsel %vm20323_vm8, %v10855_v62, %v10851_v52  ;;  %7761 = vadd.xlane.f32.xlu1 %v7760_v12  ;;  %7758 = vadd.xlane.f32.xlu0 %v7757_v60  ;;  %v7784_v52 = vsel %vm7234_vm0, %v6649_v46, 0.0  ;;  %v6651_v62 = vld [vmem:[%s16660_s5 + $0x5c8] sm:$0xff] }
 0x317   : > { %v7558_v2 = vpop.xlane.xlu1 %7557  ;;  %v10861_v3 = vsel %vm10374_vm9, %v10860_v61, %v10856_v1  ;;  %v7555_v5 = vpop.xlane.xlu0 %7554 }
 0x318   : > { %v10870_v9 = vrot.slane %v7558_v2, %v16886_v20  ;;  %v10865_v11 = vrot.slane %v7555_v5, %v16894_v28  ;;  %v7787_v5 = vsel %vm7234_vm0, %v6650_v63, 0.0 }
 0x31a   : > { %v10866_v16 = vsel %vm10381_vm10, %v10865_v11, %v10861_v3  ;;  %7767 = vadd.xlane.f32.xlu1 %v7766_v6  ;;  %7764 = vadd.xlane.f32.xlu0 %v7763_v7  ;;  %v7790_v3 = vsel %vm7234_vm0, %v6651_v62, 0.0  ;;  %v6653_v7 = vld [vmem:[%s16660_s5 + $0x5d8] sm:$0xff] }
 0x31b   : > { %v7564_v18 = vpop.xlane.xlu1 %7563  ;;  %v10871_v19 = vsel %vm20322_vm11, %v10870_v9, %v10866_v16  ;;  %v7561_v21 = vpop.xlane.xlu0 %7560  ;;  %vm14131_vm11 = vcmask 1041409   ;;  %v6652_v9 = vld [vmem:[%s16660_s5 + $0x5d0] sm:$0xff] }
 0x31c   : > { %v10880_v24 = vrot.slane %v7564_v18, %v16902_v38  ;;  %v10875_v27 = vrot.slane %v7561_v21, %v16908_v42  ;;  %v7796_v18 = vsel %vm7234_vm0, %v6653_v7, 0.0 }
 0x31e   : > { %v10876_v33 = vsel %vm10395_vm12, %v10875_v27, %v10871_v19  ;;  %7773 = vadd.xlane.f32.xlu1 %v7772_v22  ;;  %7770 = vadd.xlane.f32.xlu0 %v7769_v23  ;;  %v7793_v19 = vsel %vm7234_vm0, %v6652_v9, 0.0  ;;  %v6655_v23 = vld [vmem:[%s16660_s5 + $0x5e8] sm:$0xff] }
 0x31f   : > { %v7570_v34 = vpop.xlane.xlu1 %7569  ;;  %v10881_v36 = vsel %vm10402_vm13, %v10880_v24, %v10876_v33  ;;  %v7567_v37 = vpop.xlane.xlu0 %7566  ;;  %v6654_v24 = vld [vmem:[%s16660_s5 + $0x5e0] sm:$0xff] }
 0x320   : > { %v10890_v41 = vrot.slane %v7570_v34, %v16918_v56  ;;  %v10885_v45 = vrot.slane %v7567_v37, %v16923_v58  ;;  %v7802_v34 = vsel %vm7234_vm0, %v6655_v23, 0.0 }
 0x322   : > { %v10886_v48 = vsel %vm10409_vm14, %v10885_v45, %v10881_v36  ;;  %7779 = vadd.xlane.f32.xlu1 %v7778_v39  ;;  %7776 = vadd.xlane.f32.xlu0 %v7775_v40  ;;  %v7799_v36 = vsel %vm7234_vm0, %v6654_v24, 0.0  ;;  %v6657_v40 = vld [vmem:[%s16660_s5 + $0x5f8] sm:$0xff] }
 0x323   : > { %v10891_v49 = vsel %vm10416_vm15, %v10890_v41, %v10886_v48  ;;  %v7576_v50 = vpop.xlane.xlu1 %7575  ;;  %v7573_v51 = vpop.xlane.xlu0 %7572  ;;  %v6656_v41 = vld [vmem:[%s16660_s5 + $0x5f0] sm:$0xff] }
 0x324   : > { %v17331_v12 = vsel %vm14131_vm11, %v10891_v49, %v16937_v8  ;;  %v10899_v60 = vrot.slane %v7576_v50, %v16820_v26  ;;  %v10895_v61 = vrot.slane %v7573_v51, %v16817_v25  ;;  %v7808_v49 = vsel %vm7234_vm0, %v6657_v40, 0.0 }
 0x325   : > { %v7805_v50 = vsel %vm7234_vm0, %v6656_v41, 0.0 }
 0x326   : > { %v10900_v0 = vsel %vm10318_vm1, %v10899_v60, %v10895_v61  ;;  %7785 = vadd.xlane.f32.xlu1 %v7784_v52  ;;  %7782 = vadd.xlane.f32.xlu0 %v7781_v57  ;;  %v6659_v57 = vld [vmem:[%s16660_s5 + $0x608] sm:$0xff]  ;;  %v6658_v60 = vld [vmem:[%s16660_s5 + $0x600] sm:$0xff] }
 0x327   : > { %v7582_v1 = vpop.xlane.xlu1 %7581  ;;  %v7579_v2 = vpop.xlane.xlu0 %7578 }
 0x328   : > { %v10909_v8 = vrot.slane %v7582_v1, %v16830_v32  ;;  %v10904_v6 = vrot.slane %v7579_v2, %v16827_v31  ;;  %v7814_v1 = vsel %vm7234_vm0, %v6659_v57, 0.0  ;;  %v7811_v2 = vsel %vm7234_vm0, %v6658_v60, 0.0  ;;  %v6666_v57 = vld [vmem:[%s16660_s5 + $0x640] sm:$0xff] }
 0x32a   : > { %v10905_v11 = vsel %vm10325_vm2, %v10904_v6, %v10900_v0  ;;  %7791 = vadd.xlane.f32.xlu1 %v7790_v3  ;;  %7788 = vadd.xlane.f32.xlu0 %v7787_v5  ;;  %v6660_v6 = vld [vmem:[%s16660_s5 + $0x610] sm:$0xff] }
 0x32b   : > { %v7588_v13 = vpop.xlane.xlu1 %7587  ;;  %v10910_v14 = vsel %vm10332_vm3, %v10909_v8, %v10905_v11  ;;  %v7585_v16 = vpop.xlane.xlu0 %7584  ;;  %v6661_v8 = vld [vmem:[%s16660_s5 + $0x618] sm:$0xff] }
 0x32c   : > { %v10919_v21 = vrot.slane %v7588_v13, %v16841_v43  ;;  %v10914_v22 = vrot.slane %v7585_v16, %v16844_v44  ;;  %v7817_v16 = vsel %vm7234_vm0, %v6660_v6, 0.0 }
 0x32e   : > { %v10915_v27 = vsel %vm10339_vm4, %v10914_v22, %v10910_v14  ;;  %7797 = vadd.xlane.f32.xlu1 %v7796_v18  ;;  %7794 = vadd.xlane.f32.xlu0 %v7793_v19  ;;  %v7820_v14 = vsel %vm7234_vm0, %v6661_v8, 0.0  ;;  %v6662_v22 = vld [vmem:[%s16660_s5 + $0x620] sm:$0xff] }
 0x32f   : > { %v7594_v29 = vpop.xlane.xlu1 %7593  ;;  %v10920_v30 = vsel %vm10346_vm5, %v10919_v21, %v10915_v27  ;;  %v7591_v33 = vpop.xlane.xlu0 %7590  ;;  %v6663_v21 = vld [vmem:[%s16660_s5 + $0x628] sm:$0xff] }
 0x330   : > { %v10929_v37 = vrot.slane %v7594_v29, %v16853_v53  ;;  %v10924_v39 = vrot.slane %v7591_v33, %v16856_v54  ;;  %v7823_v33 = vsel %vm7234_vm0, %v6662_v22, 0.0 }
 0x332   : > { %v10925_v45 = vsel %vm10353_vm6, %v10924_v39, %v10920_v30  ;;  %7803 = vadd.xlane.f32.xlu1 %v7802_v34  ;;  %7800 = vadd.xlane.f32.xlu0 %v7799_v36  ;;  %v7826_v30 = vsel %vm7234_vm0, %v6663_v21, 0.0  ;;  %v6664_v39 = vld [vmem:[%s16660_s5 + $0x630] sm:$0xff] }
 0x333   : > { %v7600_v46 = vpop.xlane.xlu1 %7599  ;;  %v10930_v47 = vsel %vm10360_vm7, %v10929_v37, %v10925_v45  ;;  %v7597_v48 = vpop.xlane.xlu0 %7596  ;;  %v6665_v37 = vld [vmem:[%s16660_s5 + $0x638] sm:$0xff] }
 0x334   : > { %v10939_v51 = vrot.slane %v7600_v46, %v16870_v4  ;;  %v10934_v52 = vrot.slane %v7597_v48, %v16878_v10  ;;  %v7829_v48 = vsel %vm7234_vm0, %v6664_v39, 0.0 }
 0x336   : > { %v10935_v61 = vsel %vm20323_vm8, %v10934_v52, %v10930_v47  ;;  %7809 = vadd.xlane.f32.xlu1 %v7808_v49  ;;  %7806 = vadd.xlane.f32.xlu0 %v7805_v50  ;;  %vm20330_vm8 = vcmask 786112   ;;  %v7832_v47 = vsel %vm7234_vm0, %v6665_v37, 0.0  ;;  %v6667_v52 = vld [vmem:[%s16660_s5 + $0x648] sm:$0xff] }
 0x337   : > { %v7606_v62 = vpop.xlane.xlu1 %7605  ;;  %v10940_v63 = vsel %vm10374_vm9, %v10939_v51, %v10935_v61  ;;  %v7603_v0 = vpop.xlane.xlu0 %7602 }
 0x338   : > { %v10949_v3 = vrot.slane %v7606_v62, %v16886_v20  ;;  %v10944_v5 = vrot.slane %v7603_v0, %v16894_v28  ;;  %v7835_v0 = vsel %vm7234_vm0, %v6666_v57, 0.0 }
 0x33a   : > { %v10945_v7 = vsel %vm10381_vm10, %v10944_v5, %v10940_v63  ;;  %7815 = vadd.xlane.f32.xlu1 %v7814_v1  ;;  %7812 = vadd.xlane.f32.xlu0 %v7811_v2  ;;  %v7838_v63 = vsel %vm7234_vm0, %v6667_v52, 0.0  ;;  %v6669_v2 = vld [vmem:[%s16660_s5 + $0x658] sm:$0xff] }
 0x33b   : > { %v7612_v9 = vpop.xlane.xlu1 %7611  ;;  %v10950_v11 = vsel %vm20330_vm8, %v10949_v3, %v10945_v7  ;;  %v7609_v13 = vpop.xlane.xlu0 %7608  ;;  %v6668_v3 = vld [vmem:[%s16660_s5 + $0x650] sm:$0xff]  ;;  %vm20331_vm8 = vcmask 589312  }
 0x33c   : > { %v10959_v18 = vrot.slane %v7612_v9, %v16902_v38  ;;  %v10954_v19 = vrot.slane %v7609_v13, %v16908_v42  ;;  %v7844_v9 = vsel %vm7234_vm0, %v6669_v2, 0.0 }
 0x33e   : > { %v10955_v23 = vsel %vm10395_vm12, %v10954_v19, %v10950_v11  ;;  %7821 = vadd.xlane.f32.xlu1 %v7820_v14  ;;  %7818 = vadd.xlane.f32.xlu0 %v7817_v16  ;;  %v7841_v11 = vsel %vm7234_vm0, %v6668_v3, 0.0  ;;  %v6671_v16 = vld [vmem:[%s16660_s5 + $0x668] sm:$0xff] }
 0x33f   : > { %v7618_v24 = vpop.xlane.xlu1 %7617  ;;  %v10960_v27 = vsel %vm10402_vm13, %v10959_v18, %v10955_v23  ;;  %v7615_v29 = vpop.xlane.xlu0 %7614  ;;  %v6670_v18 = vld [vmem:[%s16660_s5 + $0x660] sm:$0xff] }
 0x340   : > { %v10969_v34 = vrot.slane %v7618_v24, %v16918_v56  ;;  %v10964_v36 = vrot.slane %v7615_v29, %v16923_v58  ;;  %v7850_v24 = vsel %vm7234_vm0, %v6671_v16, 0.0 }
 0x342   : > { %v10965_v40 = vsel %vm10409_vm14, %v10964_v36, %v10960_v27  ;;  %7827 = vadd.xlane.f32.xlu1 %v7826_v30  ;;  %7824 = vadd.xlane.f32.xlu0 %v7823_v33  ;;  %v7847_v27 = vsel %vm7234_vm0, %v6670_v18, 0.0  ;;  %v6673_v33 = vld [vmem:[%s16660_s5 + $0x678] sm:$0xff] }
 0x343   : > { %v10970_v41 = vsel %vm10416_vm15, %v10969_v34, %v10965_v40  ;;  %v7624_v45 = vpop.xlane.xlu1 %7623  ;;  %v7621_v46 = vpop.xlane.xlu0 %7620  ;;  %v6672_v34 = vld [vmem:[%s16660_s5 + $0x670] sm:$0xff] }
 0x344   : > { %v17398_v49 = vsel %vm14131_vm11, %v10970_v41, %v17002_v55  ;;  %v10978_v50 = vrot.slane %v7624_v45, %v16820_v26  ;;  %v10974_v51 = vrot.slane %v7621_v46, %v16817_v25  ;;  %v7856_v41 = vsel %vm7234_vm0, %v6673_v33, 0.0 }
 0x345   : > { %v7853_v45 = vsel %vm7234_vm0, %v6672_v34, 0.0 }
 0x346   : > { %v10979_v60 = vsel %vm10318_vm1, %v10978_v50, %v10974_v51  ;;  %7833 = vadd.xlane.f32.xlu1 %v7832_v47  ;;  %7830 = vadd.xlane.f32.xlu0 %v7829_v48  ;;  %v6675_v48 = vld [vmem:[%s16660_s5 + $0x688] sm:$0xff]  ;;  %v6674_v50 = vld [vmem:[%s16660_s5 + $0x680] sm:$0xff] }
 0x347   : > { %v7630_v61 = vpop.xlane.xlu1 %7629  ;;  %v7627_v62 = vpop.xlane.xlu0 %7626 }
 0x348   : > { %v10988_v55 = vrot.slane %v7630_v61, %v16830_v32  ;;  %v10983_v1 = vrot.slane %v7627_v62, %v16827_v31  ;;  %v7862_v61 = vsel %vm7234_vm0, %v6675_v48, 0.0  ;;  %v7859_v62 = vsel %vm7234_vm0, %v6674_v50, 0.0  ;;  %v6682_v48 = vld [vmem:[%s16660_s5 + $0x6c0] sm:$0xff] }
 0x34a   : > { %v10984_v5 = vsel %vm10325_vm2, %v10983_v1, %v10979_v60  ;;  %7839 = vadd.xlane.f32.xlu1 %v7838_v63  ;;  %7836 = vadd.xlane.f32.xlu0 %v7835_v0  ;;  %v6676_v1 = vld [vmem:[%s16660_s5 + $0x690] sm:$0xff] }
 0x34b   : > { %v7636_v8 = vpop.xlane.xlu1 %7635  ;;  %v10989_v6 = vsel %vm10332_vm3, %v10988_v55, %v10984_v5  ;;  %v7633_v7 = vpop.xlane.xlu0 %7632  ;;  %v6677_v55 = vld [vmem:[%s16660_s5 + $0x698] sm:$0xff] }
 0x34c   : > { %v10998_v13 = vrot.slane %v7636_v8, %v16841_v43  ;;  %v10993_v14 = vrot.slane %v7633_v7, %v16844_v44  ;;  %v7865_v7 = vsel %vm7234_vm0, %v6676_v1, 0.0 }
 0x34e   : > { %v10994_v19 = vsel %vm10339_vm4, %v10993_v14, %v10989_v6  ;;  %7845 = vadd.xlane.f32.xlu1 %v7844_v9  ;;  %7842 = vadd.xlane.f32.xlu0 %v7841_v11  ;;  %v7868_v6 = vsel %vm7234_vm0, %v6677_v55, 0.0  ;;  %v6678_v14 = vld [vmem:[%s16660_s5 + $0x6a0] sm:$0xff] }
 0x34f   : > { %v7642_v21 = vpop.xlane.xlu1 %7641  ;;  %v10999_v22 = vsel %vm10346_vm5, %v10998_v13, %v10994_v19  ;;  %v7639_v23 = vpop.xlane.xlu0 %7638  ;;  %v6679_v13 = vld [vmem:[%s16660_s5 + $0x6a8] sm:$0xff] }
 0x350   : > { %v11008_v29 = vrot.slane %v7642_v21, %v16853_v53  ;;  %v11003_v30 = vrot.slane %v7639_v23, %v16856_v54  ;;  %v7871_v23 = vsel %vm7234_vm0, %v6678_v14, 0.0 }
 0x352   : > { %v11004_v36 = vsel %vm10353_vm6, %v11003_v30, %v10999_v22  ;;  %7851 = vadd.xlane.f32.xlu1 %v7850_v24  ;;  %7848 = vadd.xlane.f32.xlu0 %v7847_v27  ;;  %v7874_v22 = vsel %vm7234_vm0, %v6679_v13, 0.0  ;;  %v6680_v30 = vld [vmem:[%s16660_s5 + $0x6b0] sm:$0xff] }
 0x353   : > { %v7648_v37 = vpop.xlane.xlu1 %7647  ;;  %v11009_v39 = vsel %vm10360_vm7, %v11008_v29, %v11004_v36  ;;  %v7645_v40 = vpop.xlane.xlu0 %7644  ;;  %v6681_v29 = vld [vmem:[%s16660_s5 + $0x6b8] sm:$0xff] }
 0x354   : > { %v11018_v46 = vrot.slane %v7648_v37, %v16870_v4  ;;  %v11013_v47 = vrot.slane %v7645_v40, %v16878_v10  ;;  %v7877_v40 = vsel %vm7234_vm0, %v6680_v30, 0.0 }
 0x356   : > { %v11014_v51 = vsel %vm20331_vm8, %v11013_v47, %v11009_v39  ;;  %7857 = vadd.xlane.f32.xlu1 %v7856_v41  ;;  %7854 = vadd.xlane.f32.xlu0 %v7853_v45  ;;  %vm20332_vm8 = vcmask 786112   ;;  %v7880_v39 = vsel %vm7234_vm0, %v6681_v29, 0.0  ;;  %v6683_v47 = vld [vmem:[%s16660_s5 + $0x6c8] sm:$0xff] }
 0x357   : > { %v7654_v52 = vpop.xlane.xlu1 %7653  ;;  %v11019_v57 = vsel %vm10374_vm9, %v11018_v46, %v11014_v51  ;;  %v7651_v60 = vpop.xlane.xlu0 %7650 }
 0x358   : > { %v11028_v63 = vrot.slane %v7654_v52, %v16886_v20  ;;  %v11023_v0 = vrot.slane %v7651_v60, %v16894_v28  ;;  %v7883_v60 = vsel %vm7234_vm0, %v6682_v48, 0.0 }
 0x35a   : > { %v11024_v2 = vsel %vm10381_vm10, %v11023_v0, %v11019_v57  ;;  %7863 = vadd.xlane.f32.xlu1 %v7862_v61  ;;  %7860 = vadd.xlane.f32.xlu0 %v7859_v62  ;;  %v7886_v57 = vsel %vm7234_vm0, %v6683_v47, 0.0  ;;  %v6685_v62 = vld [vmem:[%s16660_s5 + $0x6d8] sm:$0xff] }
 0x35b   : > { %v7660_v3 = vpop.xlane.xlu1 %7659  ;;  %v11029_v5 = vsel %vm20332_vm8, %v11028_v63, %v11024_v2  ;;  %v7657_v8 = vpop.xlane.xlu0 %7656  ;;  %v6684_v63 = vld [vmem:[%s16660_s5 + $0x6d0] sm:$0xff]  ;;  %vm20333_vm8 = vcmask 589312  }
 0x35c   : > { %v11038_v9 = vrot.slane %v7660_v3, %v16902_v38  ;;  %v11033_v11 = vrot.slane %v7657_v8, %v16908_v42  ;;  %v7892_v3 = vsel %vm7234_vm0, %v6685_v62, 0.0 }
 0x35e   : > { %v11034_v16 = vsel %vm10395_vm12, %v11033_v11, %v11029_v5  ;;  %7869 = vadd.xlane.f32.xlu1 %v7868_v6  ;;  %7866 = vadd.xlane.f32.xlu0 %v7865_v7  ;;  %v7889_v5 = vsel %vm7234_vm0, %v6684_v63, 0.0  ;;  %v6687_v7 = vld [vmem:[%s16660_s5 + $0x6e8] sm:$0xff] }
 0x35f   : > { %v7666_v18 = vpop.xlane.xlu1 %7665  ;;  %v11039_v19 = vsel %vm10402_vm13, %v11038_v9, %v11034_v16  ;;  %v7663_v21 = vpop.xlane.xlu0 %7662  ;;  %v6686_v9 = vld [vmem:[%s16660_s5 + $0x6e0] sm:$0xff] }
 0x360   : > { %v11048_v24 = vrot.slane %v7666_v18, %v16918_v56  ;;  %v11043_v27 = vrot.slane %v7663_v21, %v16923_v58  ;;  %v7898_v18 = vsel %vm7234_vm0, %v6687_v7, 0.0 }
 0x362   : > { %v11044_v33 = vsel %vm10409_vm14, %v11043_v27, %v11039_v19  ;;  %7875 = vadd.xlane.f32.xlu1 %v7874_v22  ;;  %7872 = vadd.xlane.f32.xlu0 %v7871_v23  ;;  %v7895_v19 = vsel %vm7234_vm0, %v6686_v9, 0.0  ;;  %v6689_v23 = vld [vmem:[%s16660_s5 + $0x6f8] sm:$0xff] }
 0x363   : > { %v11049_v34 = vsel %vm10416_vm15, %v11048_v24, %v11044_v33  ;;  %v7672_v36 = vpop.xlane.xlu1 %7671  ;;  %v7669_v37 = vpop.xlane.xlu0 %7668  ;;  %v6688_v24 = vld [vmem:[%s16660_s5 + $0x6f0] sm:$0xff] }
 0x364   : > { %v17465_v41 = vsel %vm14131_vm11, %v11049_v34, %v17067_v35  ;;  %v11057_v45 = vrot.slane %v7672_v36, %v16820_v26  ;;  %v11053_v46 = vrot.slane %v7669_v37, %v16817_v25  ;;  %v7904_v34 = vsel %vm7234_vm0, %v6689_v23, 0.0 }
 0x365   : > { %v7901_v36 = vsel %vm7234_vm0, %v6688_v24, 0.0 }
 0x366   : > { %v11058_v50 = vsel %vm10318_vm1, %v11057_v45, %v11053_v46  ;;  %7881 = vadd.xlane.f32.xlu1 %v7880_v39  ;;  %7878 = vadd.xlane.f32.xlu0 %v7877_v40  ;;  %v6691_v40 = vld [vmem:[%s16660_s5 + $0x708] sm:$0xff]  ;;  %v6690_v45 = vld [vmem:[%s16660_s5 + $0x700] sm:$0xff] }
 0x367   : > { %v7678_v51 = vpop.xlane.xlu1 %7677  ;;  %v7675_v52 = vpop.xlane.xlu0 %7674 }
 0x368   : > { %v11067_v35 = vrot.slane %v7678_v51, %v16830_v32  ;;  %v11062_v61 = vrot.slane %v7675_v52, %v16827_v31  ;;  %v7910_v51 = vsel %vm7234_vm0, %v6691_v40, 0.0  ;;  %v7907_v52 = vsel %vm7234_vm0, %v6690_v45, 0.0  ;;  %v6698_v40 = vld [vmem:[%s16660_s5 + $0x740] sm:$0xff] }
 0x36a   : > { %v11063_v0 = vsel %vm10325_vm2, %v11062_v61, %v11058_v50  ;;  %7887 = vadd.xlane.f32.xlu1 %v7886_v57  ;;  %7884 = vadd.xlane.f32.xlu0 %v7883_v60  ;;  %v6692_v61 = vld [vmem:[%s16660_s5 + $0x710] sm:$0xff] }
 0x36b   : > { %v7684_v55 = vpop.xlane.xlu1 %7683  ;;  %v11068_v1 = vsel %vm10332_vm3, %v11067_v35, %v11063_v0  ;;  %v7681_v2 = vpop.xlane.xlu0 %7680  ;;  %v6693_v35 = vld [vmem:[%s16660_s5 + $0x718] sm:$0xff] }
 0x36c   : > { %v11077_v8 = vrot.slane %v7684_v55, %v16841_v43  ;;  %v11072_v6 = vrot.slane %v7681_v2, %v16844_v44  ;;  %v7913_v2 = vsel %vm7234_vm0, %v6692_v61, 0.0 }
 0x36e   : > { %v11073_v11 = vsel %vm10339_vm4, %v11072_v6, %v11068_v1  ;;  %7893 = vadd.xlane.f32.xlu1 %v7892_v3  ;;  %7890 = vadd.xlane.f32.xlu0 %v7889_v5  ;;  %v7916_v1 = vsel %vm7234_vm0, %v6693_v35, 0.0  ;;  %v6694_v6 = vld [vmem:[%s16660_s5 + $0x720] sm:$0xff] }
 0x36f   : > { %v7690_v13 = vpop.xlane.xlu1 %7689  ;;  %v11078_v14 = vsel %vm10346_vm5, %v11077_v8, %v11073_v11  ;;  %v7687_v16 = vpop.xlane.xlu0 %7686  ;;  %v6695_v8 = vld [vmem:[%s16660_s5 + $0x728] sm:$0xff] }
 0x370   : > { %v11087_v21 = vrot.slane %v7690_v13, %v16853_v53  ;;  %v11082_v22 = vrot.slane %v7687_v16, %v16856_v54  ;;  %v7919_v16 = vsel %vm7234_vm0, %v6694_v6, 0.0 }
 0x372   : > { %v11083_v27 = vsel %vm10353_vm6, %v11082_v22, %v11078_v14  ;;  %7899 = vadd.xlane.f32.xlu1 %v7898_v18  ;;  %7896 = vadd.xlane.f32.xlu0 %v7895_v19  ;;  %v7922_v14 = vsel %vm7234_vm0, %v6695_v8, 0.0  ;;  %v6696_v22 = vld [vmem:[%s16660_s5 + $0x730] sm:$0xff] }
 0x373   : > { %v7696_v29 = vpop.xlane.xlu1 %7695  ;;  %v11088_v30 = vsel %vm10360_vm7, %v11087_v21, %v11083_v27  ;;  %v7693_v33 = vpop.xlane.xlu0 %7692  ;;  %v6697_v21 = vld [vmem:[%s16660_s5 + $0x738] sm:$0xff] }
 0x374   : > { %v11097_v37 = vrot.slane %v7696_v29, %v16870_v4  ;;  %v11092_v39 = vrot.slane %v7693_v33, %v16878_v10  ;;  %v7925_v33 = vsel %vm7234_vm0, %v6696_v22, 0.0 }
 0x376   : > { %v11093_v46 = vsel %vm20333_vm8, %v11092_v39, %v11088_v30  ;;  %7905 = vadd.xlane.f32.xlu1 %v7904_v34  ;;  %7902 = vadd.xlane.f32.xlu0 %v7901_v36  ;;  %vm20334_vm8 = vcmask 786112   ;;  %v7928_v30 = vsel %vm7234_vm0, %v6697_v21, 0.0  ;;  %v6699_v39 = vld [vmem:[%s16660_s5 + $0x748] sm:$0xff] }
 0x377   : > { %v7702_v47 = vpop.xlane.xlu1 %7701  ;;  %v11098_v48 = vsel %vm10374_vm9, %v11097_v37, %v11093_v46  ;;  %v7699_v50 = vpop.xlane.xlu0 %7698 }
 0x378   : > { %v11107_v57 = vrot.slane %v7702_v47, %v16886_v20  ;;  %v11102_v60 = vrot.slane %v7699_v50, %v16894_v28  ;;  %v7931_v50 = vsel %vm7234_vm0, %v6698_v40, 0.0 }
 0x37a   : > { %v11103_v62 = vsel %vm10381_vm10, %v11102_v60, %v11098_v48  ;;  %7911 = vadd.xlane.f32.xlu1 %v7910_v51  ;;  %7908 = vadd.xlane.f32.xlu0 %v7907_v52  ;;  %v7934_v48 = vsel %vm7234_vm0, %v6699_v39, 0.0  ;;  %v6701_v52 = vld [vmem:[%s16660_s5 + $0x758] sm:$0xff] }
 0x37b   : > { %v7708_v63 = vpop.xlane.xlu1 %7707  ;;  %v11108_v0 = vsel %vm20334_vm8, %v11107_v57, %v11103_v62  ;;  %v7705_v55 = vpop.xlane.xlu0 %7704  ;;  %v6700_v57 = vld [vmem:[%s16660_s5 + $0x750] sm:$0xff]  ;;  %vm20335_vm8 = vcmask 589312  }
 0x37c   : > { %v11117_v3 = vrot.slane %v7708_v63, %v16902_v38  ;;  %v11112_v5 = vrot.slane %v7705_v55, %v16908_v42  ;;  %v7940_v63 = vsel %vm7234_vm0, %v6701_v52, 0.0 }
 0x37e   : > { %v11113_v7 = vsel %vm10395_vm12, %v11112_v5, %v11108_v0  ;;  %7917 = vadd.xlane.f32.xlu1 %v7916_v1  ;;  %7914 = vadd.xlane.f32.xlu0 %v7913_v2  ;;  %v7937_v0 = vsel %vm7234_vm0, %v6700_v57, 0.0  ;;  %v6703_v2 = vld [vmem:[%s16660_s5 + $0x768] sm:$0xff] }
 0x37f   : > { %v7714_v9 = vpop.xlane.xlu1 %7713  ;;  %v11118_v11 = vsel %vm10402_vm13, %v11117_v3, %v11113_v7  ;;  %v7711_v13 = vpop.xlane.xlu0 %7710  ;;  %v6702_v3 = vld [vmem:[%s16660_s5 + $0x760] sm:$0xff] }
 0x380   : > { %v11127_v18 = vrot.slane %v7714_v9, %v16918_v56  ;;  %v11122_v19 = vrot.slane %v7711_v13, %v16923_v58  ;;  %v7946_v9 = vsel %vm7234_vm0, %v6703_v2, 0.0 }
 0x382   : > { %v11123_v23 = vsel %vm10409_vm14, %v11122_v19, %v11118_v11  ;;  %7923 = vadd.xlane.f32.xlu1 %v7922_v14  ;;  %7920 = vadd.xlane.f32.xlu0 %v7919_v16  ;;  %v7943_v11 = vsel %vm7234_vm0, %v6702_v3, 0.0  ;;  %v6705_v16 = vld [vmem:[%s16660_s5 + $0x778] sm:$0xff] }
 0x383   : > { %v11128_v24 = vsel %vm10416_vm15, %v11127_v18, %v11123_v23  ;;  %v7720_v27 = vpop.xlane.xlu1 %7719  ;;  %v7717_v29 = vpop.xlane.xlu0 %7716  ;;  %v6704_v18 = vld [vmem:[%s16660_s5 + $0x770] sm:$0xff] }
 0x384   : > { %v17532_v34 = vsel %vm14131_vm11, %v11128_v24, %v17132_v17  ;;  %v11136_v36 = vrot.slane %v7720_v27, %v16820_v26  ;;  %v11132_v37 = vrot.slane %v7717_v29, %v16817_v25  ;;  %v7952_v24 = vsel %vm7234_vm0, %v6705_v16, 0.0 }
 0x385   : > { %v7949_v27 = vsel %vm7234_vm0, %v6704_v18, 0.0 }
 0x386   : > { %v11137_v45 = vsel %vm10318_vm1, %v11136_v36, %v11132_v37  ;;  %7929 = vadd.xlane.f32.xlu1 %v7928_v30  ;;  %7926 = vadd.xlane.f32.xlu0 %v7925_v33  ;;  %v6707_v33 = vld [vmem:[%s16660_s5 + $0x788] sm:$0xff]  ;;  %v6706_v36 = vld [vmem:[%s16660_s5 + $0x780] sm:$0xff] }
 0x387   : > { %v7726_v46 = vpop.xlane.xlu1 %7725  ;;  %v7723_v47 = vpop.xlane.xlu0 %7722 }
 0x388   : > { %v11146_v17 = vrot.slane %v7726_v46, %v16830_v32  ;;  %v11141_v51 = vrot.slane %v7723_v47, %v16827_v31  ;;  %v7958_v46 = vsel %vm7234_vm0, %v6707_v33, 0.0  ;;  %v7955_v47 = vsel %vm7234_vm0, %v6706_v36, 0.0  ;;  %v6714_v33 = vld [vmem:[%s16660_s5 + $0x7c0] sm:$0xff] }
 0x38a   : > { %v11142_v60 = vsel %vm10325_vm2, %v11141_v51, %v11137_v45  ;;  %7935 = vadd.xlane.f32.xlu1 %v7934_v48  ;;  %7932 = vadd.xlane.f32.xlu0 %v7931_v50  ;;  %v6708_v51 = vld [vmem:[%s16660_s5 + $0x790] sm:$0xff] }
 0x38b   : > { %v7732_v35 = vpop.xlane.xlu1 %7731  ;;  %v11147_v61 = vsel %vm10332_vm3, %v11146_v17, %v11142_v60  ;;  %v7729_v62 = vpop.xlane.xlu0 %7728  ;;  %v6709_v17 = vld [vmem:[%s16660_s5 + $0x798] sm:$0xff] }
 0x38c   : > { %v11156_v55 = vrot.slane %v7732_v35, %v16841_v43  ;;  %v11151_v1 = vrot.slane %v7729_v62, %v16844_v44  ;;  %v7961_v62 = vsel %vm7234_vm0, %v6708_v51, 0.0 }
 0x38e   : > { %v11152_v5 = vsel %vm10339_vm4, %v11151_v1, %v11147_v61  ;;  %7941 = vadd.xlane.f32.xlu1 %v7940_v63  ;;  %7938 = vadd.xlane.f32.xlu0 %v7937_v0  ;;  %v7964_v61 = vsel %vm7234_vm0, %v6709_v17, 0.0  ;;  %v6710_v1 = vld [vmem:[%s16660_s5 + $0x7a0] sm:$0xff] }
 0x38f   : > { %v7738_v8 = vpop.xlane.xlu1 %7737  ;;  %v11157_v6 = vsel %vm10346_vm5, %v11156_v55, %v11152_v5  ;;  %v7735_v7 = vpop.xlane.xlu0 %7734  ;;  %v6711_v55 = vld [vmem:[%s16660_s5 + $0x7a8] sm:$0xff] }
 0x390   : > { %v11166_v13 = vrot.slane %v7738_v8, %v16853_v53  ;;  %v11161_v14 = vrot.slane %v7735_v7, %v16856_v54  ;;  %v7967_v7 = vsel %vm7234_vm0, %v6710_v1, 0.0 }
 0x392   : > { %v11162_v19 = vsel %vm10353_vm6, %v11161_v14, %v11157_v6  ;;  %7947 = vadd.xlane.f32.xlu1 %v7946_v9  ;;  %7944 = vadd.xlane.f32.xlu0 %v7943_v11  ;;  %v7970_v6 = vsel %vm7234_vm0, %v6711_v55, 0.0  ;;  %v6712_v14 = vld [vmem:[%s16660_s5 + $0x7b0] sm:$0xff] }
 0x393   : > { %v7744_v21 = vpop.xlane.xlu1 %7743  ;;  %v11167_v22 = vsel %vm10360_vm7, %v11166_v13, %v11162_v19  ;;  %v7741_v23 = vpop.xlane.xlu0 %7740  ;;  %v6713_v13 = vld [vmem:[%s16660_s5 + $0x7b8] sm:$0xff] }
 0x394   : > { %v11176_v29 = vrot.slane %v7744_v21, %v16870_v4  ;;  %v11171_v30 = vrot.slane %v7741_v23, %v16878_v10  ;;  %v7973_v23 = vsel %vm7234_vm0, %v6712_v14, 0.0 }
 0x396   : > { %v11172_v37 = vsel %vm20335_vm8, %v11171_v30, %v11167_v22  ;;  %7953 = vadd.xlane.f32.xlu1 %v7952_v24  ;;  %7950 = vadd.xlane.f32.xlu0 %v7949_v27  ;;  %vm20336_vm8 = vcmask 786112   ;;  %v7976_v22 = vsel %vm7234_vm0, %v6713_v13, 0.0  ;;  %v6715_v30 = vld [vmem:[%s16660_s5 + $0x7c8] sm:$0xff] }
 0x397   : > { %v7750_v39 = vpop.xlane.xlu1 %7749  ;;  %v11177_v40 = vsel %vm10374_vm9, %v11176_v29, %v11172_v37  ;;  %v7747_v45 = vpop.xlane.xlu0 %7746 }
 0x398   : > { %v11186_v48 = vrot.slane %v7750_v39, %v16886_v20  ;;  %v11181_v50 = vrot.slane %v7747_v45, %v16894_v28  ;;  %v7979_v45 = vsel %vm7234_vm0, %v6714_v33, 0.0 }
 0x39a   : > { %v11182_v52 = vsel %vm10381_vm10, %v11181_v50, %v11177_v40  ;;  %7959 = vadd.xlane.f32.xlu1 %v7958_v46  ;;  %7956 = vadd.xlane.f32.xlu0 %v7955_v47  ;;  %v7982_v40 = vsel %vm7234_vm0, %v6715_v30, 0.0  ;;  %v6717_v47 = vld [vmem:[%s16660_s5 + $0x7d8] sm:$0xff] }
 0x39b   : > { %v7756_v57 = vpop.xlane.xlu1 %7755  ;;  %v11187_v60 = vsel %vm20336_vm8, %v11186_v48, %v11182_v52  ;;  %v7753_v35 = vpop.xlane.xlu0 %7752  ;;  %v6716_v48 = vld [vmem:[%s16660_s5 + $0x7d0] sm:$0xff]  ;;  %vm20337_vm8 = vcmask 589312  }
 0x39c   : > { %v11196_v63 = vrot.slane %v7756_v57, %v16902_v38  ;;  %v11191_v0 = vrot.slane %v7753_v35, %v16908_v42  ;;  %v7988_v57 = vsel %vm7234_vm0, %v6717_v47, 0.0 }
 0x39e   : > { %v11192_v2 = vsel %vm10395_vm12, %v11191_v0, %v11187_v60  ;;  %7965 = vadd.xlane.f32.xlu1 %v7964_v61  ;;  %7962 = vadd.xlane.f32.xlu0 %v7961_v62  ;;  %v7985_v60 = vsel %vm7234_vm0, %v6716_v48, 0.0  ;;  %v6719_v62 = vld [vmem:[%s16660_s5 + $0x7e8] sm:$0xff] }
 0x39f   : > { %v7762_v3 = vpop.xlane.xlu1 %7761  ;;  %v11197_v5 = vsel %vm10402_vm13, %v11196_v63, %v11192_v2  ;;  %v7759_v8 = vpop.xlane.xlu0 %7758  ;;  %v6718_v63 = vld [vmem:[%s16660_s5 + $0x7e0] sm:$0xff] }
 0x3a0   : > { %v11206_v9 = vrot.slane %v7762_v3, %v16918_v56  ;;  %v11201_v11 = vrot.slane %v7759_v8, %v16923_v58  ;;  %v7994_v3 = vsel %vm7234_vm0, %v6719_v62, 0.0 }
 0x3a2   : > { %v11202_v16 = vsel %vm10409_vm14, %v11201_v11, %v11197_v5  ;;  %7971 = vadd.xlane.f32.xlu1 %v7970_v6  ;;  %7968 = vadd.xlane.f32.xlu0 %v7967_v7  ;;  %v7991_v5 = vsel %vm7234_vm0, %v6718_v63, 0.0  ;;  %v6721_v7 = vld [vmem:[%s16660_s5 + $0x7f8] sm:$0xff] }
 0x3a3   : > { %v11207_v18 = vsel %vm10416_vm15, %v11206_v9, %v11202_v16  ;;  %v7768_v19 = vpop.xlane.xlu1 %7767  ;;  %v7765_v21 = vpop.xlane.xlu0 %7764  ;;  %v6720_v9 = vld [vmem:[%s16660_s5 + $0x7f0] sm:$0xff] }
 0x3a4   : > { %v17599_v24 = vsel %vm14131_vm11, %v11207_v18, %v17197_v15  ;;  %v11215_v27 = vrot.slane %v7768_v19, %v16820_v26  ;;  %v11211_v29 = vrot.slane %v7765_v21, %v16817_v25  ;;  %v8000_v18 = vsel %vm7234_vm0, %v6721_v7, 0.0 }
 0x3a5   : > { %v7997_v19 = vsel %vm7234_vm0, %v6720_v9, 0.0 }
 0x3a6   : > { %v11216_v36 = vsel %vm10318_vm1, %v11215_v27, %v11211_v29  ;;  %7977 = vadd.xlane.f32.xlu1 %v7976_v22  ;;  %7974 = vadd.xlane.f32.xlu0 %v7973_v23  ;;  %v6723_v23 = vld [vmem:[%s16660_s5 + $0x808] sm:$0xff]  ;;  %v6722_v27 = vld [vmem:[%s16660_s5 + $0x800] sm:$0xff] }
 0x3a7   : > { %v7774_v37 = vpop.xlane.xlu1 %7773  ;;  %v7771_v39 = vpop.xlane.xlu0 %7770 }
 0x3a8   : > { %v11225_v15 = vrot.slane %v7774_v37, %v16830_v32  ;;  %v11220_v46 = vrot.slane %v7771_v39, %v16827_v31  ;;  %v8006_v37 = vsel %vm7234_vm0, %v6723_v23, 0.0  ;;  %v8003_v39 = vsel %vm7234_vm0, %v6722_v27, 0.0  ;;  %v6730_v23 = vld [vmem:[%s16660_s5 + $0x840] sm:$0xff] }
 0x3aa   : > { %v11221_v50 = vsel %vm10325_vm2, %v11220_v46, %v11216_v36  ;;  %7983 = vadd.xlane.f32.xlu1 %v7982_v40  ;;  %7980 = vadd.xlane.f32.xlu0 %v7979_v45  ;;  %v6724_v46 = vld [vmem:[%s16660_s5 + $0x810] sm:$0xff] }
 0x3ab   : > { %v7780_v17 = vpop.xlane.xlu1 %7779  ;;  %v11226_v51 = vsel %vm10332_vm3, %v11225_v15, %v11221_v50  ;;  %v7777_v52 = vpop.xlane.xlu0 %7776  ;;  %v6725_v15 = vld [vmem:[%s16660_s5 + $0x818] sm:$0xff] }
 0x3ac   : > { %v11235_v35 = vrot.slane %v7780_v17, %v16841_v43  ;;  %v11230_v61 = vrot.slane %v7777_v52, %v16844_v44  ;;  %v8009_v52 = vsel %vm7234_vm0, %v6724_v46, 0.0 }
 0x3ae   : > { %v11231_v0 = vsel %vm10339_vm4, %v11230_v61, %v11226_v51  ;;  %7989 = vadd.xlane.f32.xlu1 %v7988_v57  ;;  %7986 = vadd.xlane.f32.xlu0 %v7985_v60  ;;  %v8012_v51 = vsel %vm7234_vm0, %v6725_v15, 0.0  ;;  %v6726_v61 = vld [vmem:[%s16660_s5 + $0x820] sm:$0xff] }
 0x3af   : > { %v7786_v55 = vpop.xlane.xlu1 %7785  ;;  %v11236_v1 = vsel %vm10346_vm5, %v11235_v35, %v11231_v0  ;;  %v7783_v2 = vpop.xlane.xlu0 %7782  ;;  %v6727_v35 = vld [vmem:[%s16660_s5 + $0x828] sm:$0xff] }
 0x3b0   : > { %v11245_v8 = vrot.slane %v7786_v55, %v16853_v53  ;;  %v11240_v6 = vrot.slane %v7783_v2, %v16856_v54  ;;  %v8015_v2 = vsel %vm7234_vm0, %v6726_v61, 0.0 }
 0x3b2   : > { %v11241_v11 = vsel %vm10353_vm6, %v11240_v6, %v11236_v1  ;;  %7995 = vadd.xlane.f32.xlu1 %v7994_v3  ;;  %7992 = vadd.xlane.f32.xlu0 %v7991_v5  ;;  %v8018_v1 = vsel %vm7234_vm0, %v6727_v35, 0.0  ;;  %v6728_v6 = vld [vmem:[%s16660_s5 + $0x830] sm:$0xff] }
 0x3b3   : > { %v7792_v13 = vpop.xlane.xlu1 %7791  ;;  %v11246_v14 = vsel %vm10360_vm7, %v11245_v8, %v11241_v11  ;;  %v7789_v16 = vpop.xlane.xlu0 %7788  ;;  %v6729_v8 = vld [vmem:[%s16660_s5 + $0x838] sm:$0xff] }
 0x3b4   : > { %v11255_v21 = vrot.slane %v7792_v13, %v16870_v4  ;;  %v11250_v22 = vrot.slane %v7789_v16, %v16878_v10  ;;  %v8021_v16 = vsel %vm7234_vm0, %v6728_v6, 0.0 }
 0x3b6   : > { %v11251_v29 = vsel %vm20337_vm8, %v11250_v22, %v11246_v14  ;;  %8001 = vadd.xlane.f32.xlu1 %v8000_v18  ;;  %7998 = vadd.xlane.f32.xlu0 %v7997_v19  ;;  %vm20338_vm8 = vcmask 786112   ;;  %v8024_v14 = vsel %vm7234_vm0, %v6729_v8, 0.0  ;;  %v6731_v22 = vld [vmem:[%s16660_s5 + $0x848] sm:$0xff] }
 0x3b7   : > { %v7798_v30 = vpop.xlane.xlu1 %7797  ;;  %v11256_v33 = vsel %vm10374_vm9, %v11255_v21, %v11251_v29  ;;  %v7795_v36 = vpop.xlane.xlu0 %7794 }
 0x3b8   : > { %v11265_v40 = vrot.slane %v7798_v30, %v16886_v20  ;;  %v11260_v45 = vrot.slane %v7795_v36, %v16894_v28  ;;  %v8027_v36 = vsel %vm7234_vm0, %v6730_v23, 0.0 }
 0x3ba   : > { %v11261_v47 = vsel %vm10381_vm10, %v11260_v45, %v11256_v33  ;;  %8007 = vadd.xlane.f32.xlu1 %v8006_v37  ;;  %8004 = vadd.xlane.f32.xlu0 %v8003_v39  ;;  %v8030_v33 = vsel %vm7234_vm0, %v6731_v22, 0.0  ;;  %v6733_v39 = vld [vmem:[%s16660_s5 + $0x858] sm:$0xff] }
 0x3bb   : > { %v7804_v48 = vpop.xlane.xlu1 %7803  ;;  %v11266_v50 = vsel %vm20338_vm8, %v11265_v40, %v11261_v47  ;;  %v7801_v17 = vpop.xlane.xlu0 %7800  ;;  %v6732_v40 = vld [vmem:[%s16660_s5 + $0x850] sm:$0xff] }
 0x3bc   : > { %v11275_v57 = vrot.slane %v7804_v48, %v16902_v38  ;;  %v11270_v60 = vrot.slane %v7801_v17, %v16908_v42  ;;  %v8036_v48 = vsel %vm7234_vm0, %v6733_v39, 0.0 }
 0x3be   : > { %v11271_v62 = vsel %vm10395_vm12, %v11270_v60, %v11266_v50  ;;  %8013 = vadd.xlane.f32.xlu1 %v8012_v51  ;;  %8010 = vadd.xlane.f32.xlu0 %v8009_v52  ;;  %v8033_v50 = vsel %vm7234_vm0, %v6732_v40, 0.0  ;;  %v6735_v52 = vld [vmem:[%s16660_s5 + $0x868] sm:$0xff] }
 0x3bf   : > { %v7810_v63 = vpop.xlane.xlu1 %7809  ;;  %v11276_v0 = vsel %vm10402_vm13, %v11275_v57, %v11271_v62  ;;  %v7807_v55 = vpop.xlane.xlu0 %7806  ;;  %v6734_v57 = vld [vmem:[%s16660_s5 + $0x860] sm:$0xff] }
 0x3c0   : > { %v11285_v3 = vrot.slane %v7810_v63, %v16918_v56  ;;  %v11280_v5 = vrot.slane %v7807_v55, %v16923_v58  ;;  %v8042_v63 = vsel %vm7234_vm0, %v6735_v52, 0.0 }
 0x3c2   : > { %v11281_v7 = vsel %vm10409_vm14, %v11280_v5, %v11276_v0  ;;  %8019 = vadd.xlane.f32.xlu1 %v8018_v1  ;;  %8016 = vadd.xlane.f32.xlu0 %v8015_v2  ;;  %v8039_v0 = vsel %vm7234_vm0, %v6734_v57, 0.0  ;;  %v6737_v2 = vld [vmem:[%s16660_s5 + $0x878] sm:$0xff] }
 0x3c3   : > { %v11286_v9 = vsel %vm10416_vm15, %v11285_v3, %v11281_v7  ;;  %v7816_v11 = vpop.xlane.xlu1 %7815  ;;  %v7813_v13 = vpop.xlane.xlu0 %7812  ;;  %v6736_v3 = vld [vmem:[%s16660_s5 + $0x870] sm:$0xff] }
 0x3c4   : > { %v17666_v18 = vsel %vm14131_vm11, %v11286_v9, %v17262_v59  ;;  %v11294_v19 = vrot.slane %v7816_v11, %v16820_v26  ;;  %v11290_v21 = vrot.slane %v7813_v13, %v16817_v25  ;;  %v8048_v9 = vsel %vm7234_vm0, %v6737_v2, 0.0 }
 0x3c5   : > { %v8045_v11 = vsel %vm7234_vm0, %v6736_v3, 0.0  ;;  %vm20339_vm11 = vcmask 589312  }
 0x3c6   : > { %v11295_v27 = vsel %vm10318_vm1, %v11294_v19, %v11290_v21  ;;  %8025 = vadd.xlane.f32.xlu1 %v8024_v14  ;;  %8022 = vadd.xlane.f32.xlu0 %v8021_v16  ;;  %v6739_v16 = vld [vmem:[%s16660_s5 + $0x888] sm:$0xff]  ;;  %v6738_v19 = vld [vmem:[%s16660_s5 + $0x880] sm:$0xff] }
 0x3c7   : > { %v7822_v29 = vpop.xlane.xlu1 %7821  ;;  %v7819_v30 = vpop.xlane.xlu0 %7818 }
 0x3c8   : > { %v11304_v59 = vrot.slane %v7822_v29, %v16830_v32  ;;  %v11299_v37 = vrot.slane %v7819_v30, %v16827_v31  ;;  %v8054_v29 = vsel %vm7234_vm0, %v6739_v16, 0.0  ;;  %v8051_v30 = vsel %vm7234_vm0, %v6738_v19, 0.0  ;;  %v6746_v16 = vld [vmem:[%s16660_s5 + $0x8c0] sm:$0xff] }
 0x3ca   : > { %v11300_v45 = vsel %vm10325_vm2, %v11299_v37, %v11295_v27  ;;  %8031 = vadd.xlane.f32.xlu1 %v8030_v33  ;;  %8028 = vadd.xlane.f32.xlu0 %v8027_v36  ;;  %v6740_v37 = vld [vmem:[%s16660_s5 + $0x890] sm:$0xff] }
 0x3cb   : > { %v7828_v15 = vpop.xlane.xlu1 %7827  ;;  %v11305_v46 = vsel %vm10332_vm3, %v11304_v59, %v11300_v45  ;;  %v7825_v47 = vpop.xlane.xlu0 %7824  ;;  %v6741_v59 = vld [vmem:[%s16660_s5 + $0x898] sm:$0xff] }
 0x3cc   : > { %v11314_v17 = vrot.slane %v7828_v15, %v16841_v43  ;;  %v11309_v51 = vrot.slane %v7825_v47, %v16844_v44  ;;  %v8057_v47 = vsel %vm7234_vm0, %v6740_v37, 0.0 }
 0x3ce   : > { %v11310_v60 = vsel %vm10339_vm4, %v11309_v51, %v11305_v46  ;;  %8037 = vadd.xlane.f32.xlu1 %v8036_v48  ;;  %8034 = vadd.xlane.f32.xlu0 %v8033_v50  ;;  %v8060_v46 = vsel %vm7234_vm0, %v6741_v59, 0.0  ;;  %v6742_v51 = vld [vmem:[%s16660_s5 + $0x8a0] sm:$0xff] }
 0x3cf   : > { %v7834_v35 = vpop.xlane.xlu1 %7833  ;;  %v11315_v61 = vsel %vm10346_vm5, %v11314_v17, %v11310_v60  ;;  %v7831_v62 = vpop.xlane.xlu0 %7830  ;;  %v6743_v17 = vld [vmem:[%s16660_s5 + $0x8a8] sm:$0xff] }
 0x3d0   : > { %v11324_v55 = vrot.slane %v7834_v35, %v16853_v53  ;;  %v11319_v1 = vrot.slane %v7831_v62, %v16856_v54  ;;  %v8063_v62 = vsel %vm7234_vm0, %v6742_v51, 0.0 }
 0x3d2   : > { %v11320_v5 = vsel %vm10353_vm6, %v11319_v1, %v11315_v61  ;;  %8043 = vadd.xlane.f32.xlu1 %v8042_v63  ;;  %8040 = vadd.xlane.f32.xlu0 %v8039_v0  ;;  %v8066_v61 = vsel %vm7234_vm0, %v6743_v17, 0.0  ;;  %v6744_v1 = vld [vmem:[%s16660_s5 + $0x8b0] sm:$0xff] }
 0x3d3   : > { %v7840_v8 = vpop.xlane.xlu1 %7839  ;;  %v11325_v6 = vsel %vm10360_vm7, %v11324_v55, %v11320_v5  ;;  %v7837_v7 = vpop.xlane.xlu0 %7836  ;;  %v6745_v55 = vld [vmem:[%s16660_s5 + $0x8b8] sm:$0xff] }
 0x3d4   : > { %v11334_v13 = vrot.slane %v7840_v8, %v16870_v4  ;;  %v11329_v14 = vrot.slane %v7837_v7, %v16878_v10  ;;  %v8069_v7 = vsel %vm7234_vm0, %v6744_v1, 0.0 }
 0x3d6   : > { %v11330_v21 = vsel %vm20339_vm11, %v11329_v14, %v11325_v6  ;;  %8049 = vadd.xlane.f32.xlu1 %v8048_v9  ;;  %8046 = vadd.xlane.f32.xlu0 %v8045_v11  ;;  %vm14133_vm11 = vcmask 1042434   ;;  %v8072_v6 = vsel %vm7234_vm0, %v6745_v55, 0.0  ;;  %v6747_v14 = vld [vmem:[%s16660_s5 + $0x8c8] sm:$0xff] }
 0x3d7   : > { %v7846_v22 = vpop.xlane.xlu1 %7845  ;;  %v11335_v23 = vsel %vm10374_vm9, %v11334_v13, %v11330_v21  ;;  %v7843_v27 = vpop.xlane.xlu0 %7842 }
 0x3d8   : > { %v11344_v33 = vrot.slane %v7846_v22, %v16886_v20  ;;  %v11339_v36 = vrot.slane %v7843_v27, %v16894_v28  ;;  %v8075_v27 = vsel %vm7234_vm0, %v6746_v16, 0.0 }
 0x3da   : > { %v11340_v39 = vsel %vm10381_vm10, %v11339_v36, %v11335_v23  ;;  %8055 = vadd.xlane.f32.xlu1 %v8054_v29  ;;  %8052 = vadd.xlane.f32.xlu0 %v8051_v30  ;;  %v8078_v23 = vsel %vm7234_vm0, %v6747_v14, 0.0  ;;  %v6749_v30 = vld [vmem:[%s16660_s5 + $0x8d8] sm:$0xff] }
 0x3db   : > { %v7852_v40 = vpop.xlane.xlu1 %7851  ;;  %v11345_v45 = vsel %vm20338_vm8, %v11344_v33, %v11340_v39  ;;  %v7849_v15 = vpop.xlane.xlu0 %7848  ;;  %v6748_v33 = vld [vmem:[%s16660_s5 + $0x8d0] sm:$0xff]  ;;  %vm20340_vm8 = vcmask 589312  }
 0x3dc   : > { %v11354_v48 = vrot.slane %v7852_v40, %v16902_v38  ;;  %v11349_v50 = vrot.slane %v7849_v15, %v16908_v42  ;;  %v8084_v40 = vsel %vm7234_vm0, %v6749_v30, 0.0 }
 0x3de   : > { %v11350_v52 = vsel %vm10395_vm12, %v11349_v50, %v11345_v45  ;;  %8061 = vadd.xlane.f32.xlu1 %v8060_v46  ;;  %8058 = vadd.xlane.f32.xlu0 %v8057_v47  ;;  %v8081_v45 = vsel %vm7234_vm0, %v6748_v33, 0.0  ;;  %v6751_v47 = vld [vmem:[%s16660_s5 + $0x8e8] sm:$0xff] }
 0x3df   : > { %v7858_v57 = vpop.xlane.xlu1 %7857  ;;  %v11355_v60 = vsel %vm10402_vm13, %v11354_v48, %v11350_v52  ;;  %v7855_v35 = vpop.xlane.xlu0 %7854  ;;  %v6750_v48 = vld [vmem:[%s16660_s5 + $0x8e0] sm:$0xff] }
 0x3e0   : > { %v11364_v63 = vrot.slane %v7858_v57, %v16918_v56  ;;  %v11359_v0 = vrot.slane %v7855_v35, %v16923_v58  ;;  %v8090_v57 = vsel %vm7234_vm0, %v6751_v47, 0.0 }
 0x3e2   : > { %v11360_v2 = vsel %vm10409_vm14, %v11359_v0, %v11355_v60  ;;  %8067 = vadd.xlane.f32.xlu1 %v8066_v61  ;;  %8064 = vadd.xlane.f32.xlu0 %v8063_v62  ;;  %v8087_v60 = vsel %vm7234_vm0, %v6750_v48, 0.0  ;;  %v6753_v62 = vld [vmem:[%s16660_s5 + $0x8f8] sm:$0xff] }
 0x3e3   : > { %v11365_v3 = vsel %vm10416_vm15, %v11364_v63, %v11360_v2  ;;  %v7864_v5 = vpop.xlane.xlu1 %7863  ;;  %v7861_v8 = vpop.xlane.xlu0 %7860  ;;  %v6752_v63 = vld [vmem:[%s16660_s5 + $0x8f0] sm:$0xff] }
 0x3e4   : > { %v17733_v9 = vsel %vm14133_vm11, %v11365_v3, %v17331_v12  ;;  %v11373_v11 = vrot.slane %v7864_v5, %v16820_v26  ;;  %v11369_v13 = vrot.slane %v7861_v8, %v16817_v25  ;;  %v8096_v3 = vsel %vm7234_vm0, %v6753_v62, 0.0 }
 0x3e5   : > { %v8093_v5 = vsel %vm7234_vm0, %v6752_v63, 0.0 }
 0x3e6   : > { %v11374_v19 = vsel %vm10318_vm1, %v11373_v11, %v11369_v13  ;;  %8073 = vadd.xlane.f32.xlu1 %v8072_v6  ;;  %8070 = vadd.xlane.f32.xlu0 %v8069_v7  ;;  %v6755_v7 = vld [vmem:[%s16660_s5 + $0x908] sm:$0xff]  ;;  %v6754_v11 = vld [vmem:[%s16660_s5 + $0x900] sm:$0xff] }
 0x3e7   : > { %v7870_v21 = vpop.xlane.xlu1 %7869  ;;  %v7867_v22 = vpop.xlane.xlu0 %7866 }
 0x3e8   : > { %v11383_v12 = vrot.slane %v7870_v21, %v16830_v32  ;;  %v11378_v29 = vrot.slane %v7867_v22, %v16827_v31  ;;  %v8102_v21 = vsel %vm7234_vm0, %v6755_v7, 0.0  ;;  %v8099_v22 = vsel %vm7234_vm0, %v6754_v11, 0.0  ;;  %v6762_v7 = vld [vmem:[%s16660_s5 + $0x940] sm:$0xff] }
 0x3ea   : > { %v11379_v36 = vsel %vm10325_vm2, %v11378_v29, %v11374_v19  ;;  %8079 = vadd.xlane.f32.xlu1 %v8078_v23  ;;  %8076 = vadd.xlane.f32.xlu0 %v8075_v27  ;;  %v6756_v29 = vld [vmem:[%s16660_s5 + $0x910] sm:$0xff] }
 0x3eb   : > { %v7876_v59 = vpop.xlane.xlu1 %7875  ;;  %v11384_v37 = vsel %vm10332_vm3, %v11383_v12, %v11379_v36  ;;  %v7873_v39 = vpop.xlane.xlu0 %7872  ;;  %v6757_v12 = vld [vmem:[%s16660_s5 + $0x918] sm:$0xff] }
 0x3ec   : > { %v11393_v15 = vrot.slane %v7876_v59, %v16841_v43  ;;  %v11388_v46 = vrot.slane %v7873_v39, %v16844_v44  ;;  %v8105_v39 = vsel %vm7234_vm0, %v6756_v29, 0.0 }
 0x3ee   : > { %v11389_v50 = vsel %vm10339_vm4, %v11388_v46, %v11384_v37  ;;  %8085 = vadd.xlane.f32.xlu1 %v8084_v40  ;;  %8082 = vadd.xlane.f32.xlu0 %v8081_v45  ;;  %v8108_v37 = vsel %vm7234_vm0, %v6757_v12, 0.0  ;;  %v6758_v46 = vld [vmem:[%s16660_s5 + $0x920] sm:$0xff] }
 0x3ef   : > { %v7882_v17 = vpop.xlane.xlu1 %7881  ;;  %v11394_v51 = vsel %vm10346_vm5, %v11393_v15, %v11389_v50  ;;  %v7879_v52 = vpop.xlane.xlu0 %7878  ;;  %v6759_v15 = vld [vmem:[%s16660_s5 + $0x928] sm:$0xff] }
 0x3f0   : > { %v11403_v35 = vrot.slane %v7882_v17, %v16853_v53  ;;  %v11398_v61 = vrot.slane %v7879_v52, %v16856_v54  ;;  %v8111_v52 = vsel %vm7234_vm0, %v6758_v46, 0.0 }
 0x3f2   : > { %v11399_v0 = vsel %vm10353_vm6, %v11398_v61, %v11394_v51  ;;  %8091 = vadd.xlane.f32.xlu1 %v8090_v57  ;;  %8088 = vadd.xlane.f32.xlu0 %v8087_v60  ;;  %v8114_v51 = vsel %vm7234_vm0, %v6759_v15, 0.0  ;;  %v6760_v61 = vld [vmem:[%s16660_s5 + $0x930] sm:$0xff] }
 0x3f3   : > { %v7888_v55 = vpop.xlane.xlu1 %7887  ;;  %v11404_v1 = vsel %vm10360_vm7, %v11403_v35, %v11399_v0  ;;  %v7885_v2 = vpop.xlane.xlu0 %7884  ;;  %v6761_v35 = vld [vmem:[%s16660_s5 + $0x938] sm:$0xff] }
 0x3f4   : > { %v11413_v8 = vrot.slane %v7888_v55, %v16870_v4  ;;  %v11408_v6 = vrot.slane %v7885_v2, %v16878_v10  ;;  %v8117_v2 = vsel %vm7234_vm0, %v6760_v61, 0.0 }
 0x3f6   : > { %v11409_v13 = vsel %vm20340_vm8, %v11408_v6, %v11404_v1  ;;  %8097 = vadd.xlane.f32.xlu1 %v8096_v3  ;;  %8094 = vadd.xlane.f32.xlu0 %v8093_v5  ;;  %vm20341_vm8 = vcmask 786112   ;;  %v8120_v1 = vsel %vm7234_vm0, %v6761_v35, 0.0  ;;  %v6763_v6 = vld [vmem:[%s16660_s5 + $0x948] sm:$0xff] }
 0x3f7   : > { %v7894_v14 = vpop.xlane.xlu1 %7893  ;;  %v11414_v16 = vsel %vm10374_vm9, %v11413_v8, %v11409_v13  ;;  %v7891_v19 = vpop.xlane.xlu0 %7890 }
 0x3f8   : > { %v11423_v23 = vrot.slane %v7894_v14, %v16886_v20  ;;  %v11418_v27 = vrot.slane %v7891_v19, %v16894_v28  ;;  %v8123_v19 = vsel %vm7234_vm0, %v6762_v7, 0.0 }
 0x3fa   : > { %v11419_v30 = vsel %vm10381_vm10, %v11418_v27, %v11414_v16  ;;  %8103 = vadd.xlane.f32.xlu1 %v8102_v21  ;;  %8100 = vadd.xlane.f32.xlu0 %v8099_v22  ;;  %v8126_v16 = vsel %vm7234_vm0, %v6763_v6, 0.0  ;;  %v6765_v22 = vld [vmem:[%s16660_s5 + $0x958] sm:$0xff] }
 0x3fb   : > { %v7900_v33 = vpop.xlane.xlu1 %7899  ;;  %v11424_v36 = vsel %vm20341_vm8, %v11423_v23, %v11419_v30  ;;  %v7897_v59 = vpop.xlane.xlu0 %7896  ;;  %v6764_v23 = vld [vmem:[%s16660_s5 + $0x950] sm:$0xff]  ;;  %vm20342_vm8 = vcmask 589312  }
 0x3fc   : > { %v11433_v40 = vrot.slane %v7900_v33, %v16902_v38  ;;  %v11428_v45 = vrot.slane %v7897_v59, %v16908_v42  ;;  %v8132_v33 = vsel %vm7234_vm0, %v6765_v22, 0.0 }
 0x3fe   : > { %v11429_v47 = vsel %vm10395_vm12, %v11428_v45, %v11424_v36  ;;  %8109 = vadd.xlane.f32.xlu1 %v8108_v37  ;;  %8106 = vadd.xlane.f32.xlu0 %v8105_v39  ;;  %v8129_v36 = vsel %vm7234_vm0, %v6764_v23, 0.0  ;;  %v6767_v39 = vld [vmem:[%s16660_s5 + $0x968] sm:$0xff] }
 0x3ff   : > { %v7906_v48 = vpop.xlane.xlu1 %7905  ;;  %v11434_v50 = vsel %vm10402_vm13, %v11433_v40, %v11429_v47  ;;  %v7903_v17 = vpop.xlane.xlu0 %7902  ;;  %v6766_v40 = vld [vmem:[%s16660_s5 + $0x960] sm:$0xff] }
 0x400   : > { %v11443_v57 = vrot.slane %v7906_v48, %v16918_v56  ;;  %v11438_v60 = vrot.slane %v7903_v17, %v16923_v58  ;;  %v8138_v48 = vsel %vm7234_vm0, %v6767_v39, 0.0 }
 0x402   : > { %v11439_v62 = vsel %vm10409_vm14, %v11438_v60, %v11434_v50  ;;  %8115 = vadd.xlane.f32.xlu1 %v8114_v51  ;;  %8112 = vadd.xlane.f32.xlu0 %v8111_v52  ;;  %v8135_v50 = vsel %vm7234_vm0, %v6766_v40, 0.0  ;;  %v6769_v52 = vld [vmem:[%s16660_s5 + $0x978] sm:$0xff] }
 0x403   : > { %v11444_v63 = vsel %vm10416_vm15, %v11443_v57, %v11439_v62  ;;  %v7912_v0 = vpop.xlane.xlu1 %7911  ;;  %v7909_v55 = vpop.xlane.xlu0 %7908  ;;  %v6768_v57 = vld [vmem:[%s16660_s5 + $0x970] sm:$0xff] }
 0x404   : > { %v17800_v3 = vsel %vm14133_vm11, %v11444_v63, %v17398_v49  ;;  %v11452_v5 = vrot.slane %v7912_v0, %v16820_v26  ;;  %v11448_v8 = vrot.slane %v7909_v55, %v16817_v25  ;;  %v8144_v63 = vsel %vm7234_vm0, %v6769_v52, 0.0 }
 0x405   : > { %v8141_v0 = vsel %vm7234_vm0, %v6768_v57, 0.0 }
 0x406   : > { %v11453_v11 = vsel %vm10318_vm1, %v11452_v5, %v11448_v8  ;;  %8121 = vadd.xlane.f32.xlu1 %v8120_v1  ;;  %8118 = vadd.xlane.f32.xlu0 %v8117_v2  ;;  %v6771_v2 = vld [vmem:[%s16660_s5 + $0x988] sm:$0xff]  ;;  %v6770_v5 = vld [vmem:[%s16660_s5 + $0x980] sm:$0xff] }
 0x407   : > { %v7918_v13 = vpop.xlane.xlu1 %7917  ;;  %v7915_v14 = vpop.xlane.xlu0 %7914 }
 0x408   : > { %v11462_v49 = vrot.slane %v7918_v13, %v16830_v32  ;;  %v11457_v21 = vrot.slane %v7915_v14, %v16827_v31  ;;  %v8150_v13 = vsel %vm7234_vm0, %v6771_v2, 0.0  ;;  %v8147_v14 = vsel %vm7234_vm0, %v6770_v5, 0.0  ;;  %v6778_v2 = vld [vmem:[%s16660_s5 + $0x9c0] sm:$0xff] }
 0x40a   : > { %v11458_v27 = vsel %vm10325_vm2, %v11457_v21, %v11453_v11  ;;  %8127 = vadd.xlane.f32.xlu1 %v8126_v16  ;;  %8124 = vadd.xlane.f32.xlu0 %v8123_v19  ;;  %v6772_v21 = vld [vmem:[%s16660_s5 + $0x990] sm:$0xff] }
 0x40b   : > { %v7924_v12 = vpop.xlane.xlu1 %7923  ;;  %v11463_v29 = vsel %vm10332_vm3, %v11462_v49, %v11458_v27  ;;  %v7921_v30 = vpop.xlane.xlu0 %7920  ;;  %v6773_v49 = vld [vmem:[%s16660_s5 + $0x998] sm:$0xff] }
 0x40c   : > { %v11472_v59 = vrot.slane %v7924_v12, %v16841_v43  ;;  %v11467_v37 = vrot.slane %v7921_v30, %v16844_v44  ;;  %v8153_v30 = vsel %vm7234_vm0, %v6772_v21, 0.0 }
 0x40e   : > { %v11468_v45 = vsel %vm10339_vm4, %v11467_v37, %v11463_v29  ;;  %8133 = vadd.xlane.f32.xlu1 %v8132_v33  ;;  %8130 = vadd.xlane.f32.xlu0 %v8129_v36  ;;  %v8156_v29 = vsel %vm7234_vm0, %v6773_v49, 0.0  ;;  %v6774_v37 = vld [vmem:[%s16660_s5 + $0x9a0] sm:$0xff] }
 0x40f   : > { %v7930_v15 = vpop.xlane.xlu1 %7929  ;;  %v11473_v46 = vsel %vm10346_vm5, %v11472_v59, %v11468_v45  ;;  %v7927_v47 = vpop.xlane.xlu0 %7926  ;;  %v6775_v59 = vld [vmem:[%s16660_s5 + $0x9a8] sm:$0xff] }
 0x410   : > { %v11482_v17 = vrot.slane %v7930_v15, %v16853_v53  ;;  %v11477_v51 = vrot.slane %v7927_v47, %v16856_v54  ;;  %v8159_v47 = vsel %vm7234_vm0, %v6774_v37, 0.0 }
 0x412   : > { %v11478_v60 = vsel %vm10353_vm6, %v11477_v51, %v11473_v46  ;;  %8139 = vadd.xlane.f32.xlu1 %v8138_v48  ;;  %8136 = vadd.xlane.f32.xlu0 %v8135_v50  ;;  %v8162_v46 = vsel %vm7234_vm0, %v6775_v59, 0.0  ;;  %v6776_v51 = vld [vmem:[%s16660_s5 + $0x9b0] sm:$0xff] }
 0x413   : > { %v7936_v35 = vpop.xlane.xlu1 %7935  ;;  %v11483_v61 = vsel %vm10360_vm7, %v11482_v17, %v11478_v60  ;;  %v7933_v62 = vpop.xlane.xlu0 %7932  ;;  %v6777_v17 = vld [vmem:[%s16660_s5 + $0x9b8] sm:$0xff] }
 0x414   : > { %v11492_v55 = vrot.slane %v7936_v35, %v16870_v4  ;;  %v11487_v1 = vrot.slane %v7933_v62, %v16878_v10  ;;  %v8165_v62 = vsel %vm7234_vm0, %v6776_v51, 0.0 }
 0x416   : > { %v11488_v8 = vsel %vm20342_vm8, %v11487_v1, %v11483_v61  ;;  %8145 = vadd.xlane.f32.xlu1 %v8144_v63  ;;  %8142 = vadd.xlane.f32.xlu0 %v8141_v0  ;;  %vm20343_vm8 = vcmask 786112   ;;  %v8168_v61 = vsel %vm7234_vm0, %v6777_v17, 0.0  ;;  %v6779_v1 = vld [vmem:[%s16660_s5 + $0x9c8] sm:$0xff] }
 0x417   : > { %v7942_v6 = vpop.xlane.xlu1 %7941  ;;  %v11493_v7 = vsel %vm10374_vm9, %v11492_v55, %v11488_v8  ;;  %v7939_v11 = vpop.xlane.xlu0 %7938 }
 0x418   : > { %v11502_v16 = vrot.slane %v7942_v6, %v16886_v20  ;;  %v11497_v19 = vrot.slane %v7939_v11, %v16894_v28  ;;  %v8171_v11 = vsel %vm7234_vm0, %v6778_v2, 0.0 }
 0x41a   : > { %v11498_v22 = vsel %vm10381_vm10, %v11497_v19, %v11493_v7  ;;  %8151 = vadd.xlane.f32.xlu1 %v8150_v13  ;;  %8148 = vadd.xlane.f32.xlu0 %v8147_v14  ;;  %v8174_v7 = vsel %vm7234_vm0, %v6779_v1, 0.0  ;;  %v6781_v14 = vld [vmem:[%s16660_s5 + $0x9d8] sm:$0xff] }
 0x41b   : > { %v7948_v23 = vpop.xlane.xlu1 %7947  ;;  %v11503_v27 = vsel %vm20343_vm8, %v11502_v16, %v11498_v22  ;;  %v7945_v12 = vpop.xlane.xlu0 %7944  ;;  %v6780_v16 = vld [vmem:[%s16660_s5 + $0x9d0] sm:$0xff]  ;;  %vm20344_vm8 = vcmask 589312  }
 0x41c   : > { %v11512_v33 = vrot.slane %v7948_v23, %v16902_v38  ;;  %v11507_v36 = vrot.slane %v7945_v12, %v16908_v42  ;;  %v8180_v23 = vsel %vm7234_vm0, %v6781_v14, 0.0 }
 0x41e   : > { %v11508_v39 = vsel %vm10395_vm12, %v11507_v36, %v11503_v27  ;;  %8157 = vadd.xlane.f32.xlu1 %v8156_v29  ;;  %8154 = vadd.xlane.f32.xlu0 %v8153_v30  ;;  %v8177_v27 = vsel %vm7234_vm0, %v6780_v16, 0.0  ;;  %v6783_v30 = vld [vmem:[%s16660_s5 + $0x9e8] sm:$0xff] }
 0x41f   : > { %v7954_v40 = vpop.xlane.xlu1 %7953  ;;  %v11513_v45 = vsel %vm10402_vm13, %v11512_v33, %v11508_v39  ;;  %v7951_v15 = vpop.xlane.xlu0 %7950  ;;  %v6782_v33 = vld [vmem:[%s16660_s5 + $0x9e0] sm:$0xff] }
 0x420   : > { %v11522_v48 = vrot.slane %v7954_v40, %v16918_v56  ;;  %v11517_v50 = vrot.slane %v7951_v15, %v16923_v58  ;;  %v8186_v40 = vsel %vm7234_vm0, %v6783_v30, 0.0 }
 0x422   : > { %v11518_v52 = vsel %vm10409_vm14, %v11517_v50, %v11513_v45  ;;  %8163 = vadd.xlane.f32.xlu1 %v8162_v46  ;;  %8160 = vadd.xlane.f32.xlu0 %v8159_v47  ;;  %v8183_v45 = vsel %vm7234_vm0, %v6782_v33, 0.0  ;;  %v6785_v47 = vld [vmem:[%s16660_s5 + $0x9f8] sm:$0xff] }
 0x423   : > { %v11523_v57 = vsel %vm10416_vm15, %v11522_v48, %v11518_v52  ;;  %v7960_v60 = vpop.xlane.xlu1 %7959  ;;  %v7957_v35 = vpop.xlane.xlu0 %7956  ;;  %v6784_v48 = vld [vmem:[%s16660_s5 + $0x9f0] sm:$0xff] }
 0x424   : > { %v17867_v63 = vsel %vm14133_vm11, %v11523_v57, %v17465_v41  ;;  %v11531_v0 = vrot.slane %v7960_v60, %v16820_v26  ;;  %v11527_v55 = vrot.slane %v7957_v35, %v16817_v25  ;;  %v8192_v57 = vsel %vm7234_vm0, %v6785_v47, 0.0 }
 0x425   : > { %v8189_v60 = vsel %vm7234_vm0, %v6784_v48, 0.0 }
 0x426   : > { %v11532_v5 = vsel %vm10318_vm1, %v11531_v0, %v11527_v55  ;;  %8169 = vadd.xlane.f32.xlu1 %v8168_v61  ;;  %8166 = vadd.xlane.f32.xlu0 %v8165_v62  ;;  %v6787_v62 = vld [vmem:[%s16660_s5 + $0xa08] sm:$0xff]  ;;  %v6786_v0 = vld [vmem:[%s16660_s5 + $0xa00] sm:$0xff] }
 0x427   : > { %v7966_v8 = vpop.xlane.xlu1 %7965  ;;  %v7963_v6 = vpop.xlane.xlu0 %7962 }
 0x428   : > { %v11541_v41 = vrot.slane %v7966_v8, %v16830_v32  ;;  %v11536_v13 = vrot.slane %v7963_v6, %v16827_v31  ;;  %v8198_v8 = vsel %vm7234_vm0, %v6787_v62, 0.0  ;;  %v8195_v6 = vsel %vm7234_vm0, %v6786_v0, 0.0  ;;  %v6794_v62 = vld [vmem:[%s16660_s5 + $0xa40] sm:$0xff] }
 0x42a   : > { %v11537_v19 = vsel %vm10325_vm2, %v11536_v13, %v11532_v5  ;;  %8175 = vadd.xlane.f32.xlu1 %v8174_v7  ;;  %8172 = vadd.xlane.f32.xlu0 %v8171_v11  ;;  %v6788_v13 = vld [vmem:[%s16660_s5 + $0xa10] sm:$0xff] }
 0x42b   : > { %v7972_v49 = vpop.xlane.xlu1 %7971  ;;  %v11542_v21 = vsel %vm10332_vm3, %v11541_v41, %v11537_v19  ;;  %v7969_v22 = vpop.xlane.xlu0 %7968  ;;  %v6789_v41 = vld [vmem:[%s16660_s5 + $0xa18] sm:$0xff] }
 0x42c   : > { %v11551_v12 = vrot.slane %v7972_v49, %v16841_v43  ;;  %v11546_v29 = vrot.slane %v7969_v22, %v16844_v44  ;;  %v8201_v22 = vsel %vm7234_vm0, %v6788_v13, 0.0 }
 0x42e   : > { %v11547_v36 = vsel %vm10339_vm4, %v11546_v29, %v11542_v21  ;;  %8181 = vadd.xlane.f32.xlu1 %v8180_v23  ;;  %8178 = vadd.xlane.f32.xlu0 %v8177_v27  ;;  %v8204_v21 = vsel %vm7234_vm0, %v6789_v41, 0.0  ;;  %v6790_v29 = vld [vmem:[%s16660_s5 + $0xa20] sm:$0xff] }
 0x42f   : > { %v7978_v59 = vpop.xlane.xlu1 %7977  ;;  %v11552_v37 = vsel %vm10346_vm5, %v11551_v12, %v11547_v36  ;;  %v7975_v39 = vpop.xlane.xlu0 %7974  ;;  %v6791_v12 = vld [vmem:[%s16660_s5 + $0xa28] sm:$0xff] }
 0x430   : > { %v11561_v15 = vrot.slane %v7978_v59, %v16853_v53  ;;  %v11556_v46 = vrot.slane %v7975_v39, %v16856_v54  ;;  %v8207_v39 = vsel %vm7234_vm0, %v6790_v29, 0.0 }
 0x432   : > { %v11557_v50 = vsel %vm10353_vm6, %v11556_v46, %v11552_v37  ;;  %8187 = vadd.xlane.f32.xlu1 %v8186_v40  ;;  %8184 = vadd.xlane.f32.xlu0 %v8183_v45  ;;  %v8210_v37 = vsel %vm7234_vm0, %v6791_v12, 0.0  ;;  %v6792_v46 = vld [vmem:[%s16660_s5 + $0xa30] sm:$0xff] }
 0x433   : > { %v7984_v17 = vpop.xlane.xlu1 %7983  ;;  %v11562_v51 = vsel %vm10360_vm7, %v11561_v15, %v11557_v50  ;;  %v7981_v52 = vpop.xlane.xlu0 %7980  ;;  %v6793_v15 = vld [vmem:[%s16660_s5 + $0xa38] sm:$0xff] }
 0x434   : > { %v11571_v35 = vrot.slane %v7984_v17, %v16870_v4  ;;  %v11566_v61 = vrot.slane %v7981_v52, %v16878_v10  ;;  %v8213_v52 = vsel %vm7234_vm0, %v6792_v46, 0.0 }
 0x436   : > { %v11567_v55 = vsel %vm20344_vm8, %v11566_v61, %v11562_v51  ;;  %8193 = vadd.xlane.f32.xlu1 %v8192_v57  ;;  %8190 = vadd.xlane.f32.xlu0 %v8189_v60  ;;  %vm20345_vm8 = vcmask 786112   ;;  %v8216_v51 = vsel %vm7234_vm0, %v6793_v15, 0.0  ;;  %v6795_v61 = vld [vmem:[%s16660_s5 + $0xa48] sm:$0xff] }
 0x437   : > { %v7990_v1 = vpop.xlane.xlu1 %7989  ;;  %v11572_v2 = vsel %vm10374_vm9, %v11571_v35, %v11567_v55  ;;  %v7987_v5 = vpop.xlane.xlu0 %7986 }
 0x438   : > { %v11581_v7 = vrot.slane %v7990_v1, %v16886_v20  ;;  %v11576_v11 = vrot.slane %v7987_v5, %v16894_v28  ;;  %v8219_v5 = vsel %vm7234_vm0, %v6794_v62, 0.0 }
 0x43a   : > { %v11577_v14 = vsel %vm10381_vm10, %v11576_v11, %v11572_v2  ;;  %8199 = vadd.xlane.f32.xlu1 %v8198_v8  ;;  %8196 = vadd.xlane.f32.xlu0 %v8195_v6  ;;  %v8222_v2 = vsel %vm7234_vm0, %v6795_v61, 0.0  ;;  %v6797_v6 = vld [vmem:[%s16660_s5 + $0xa58] sm:$0xff] }
 0x43b   : > { %v7996_v16 = vpop.xlane.xlu1 %7995  ;;  %v11582_v19 = vsel %vm20345_vm8, %v11581_v7, %v11577_v14  ;;  %v7993_v49 = vpop.xlane.xlu0 %7992  ;;  %v6796_v7 = vld [vmem:[%s16660_s5 + $0xa50] sm:$0xff]  ;;  %vm20346_vm8 = vcmask 589312  }
 0x43c   : > { %v11591_v23 = vrot.slane %v7996_v16, %v16902_v38  ;;  %v11586_v27 = vrot.slane %v7993_v49, %v16908_v42  ;;  %v8228_v16 = vsel %vm7234_vm0, %v6797_v6, 0.0 }
 0x43e   : > { %v11587_v30 = vsel %vm10395_vm12, %v11586_v27, %v11582_v19  ;;  %8205 = vadd.xlane.f32.xlu1 %v8204_v21  ;;  %8202 = vadd.xlane.f32.xlu0 %v8201_v22  ;;  %v8225_v19 = vsel %vm7234_vm0, %v6796_v7, 0.0  ;;  %v6799_v22 = vld [vmem:[%s16660_s5 + $0xa68] sm:$0xff] }
 0x43f   : > { %v8002_v33 = vpop.xlane.xlu1 %8001  ;;  %v11592_v36 = vsel %vm10402_vm13, %v11591_v23, %v11587_v30  ;;  %v7999_v59 = vpop.xlane.xlu0 %7998  ;;  %v6798_v23 = vld [vmem:[%s16660_s5 + $0xa60] sm:$0xff] }
 0x440   : > { %v11601_v40 = vrot.slane %v8002_v33, %v16918_v56  ;;  %v11596_v45 = vrot.slane %v7999_v59, %v16923_v58  ;;  %v8234_v33 = vsel %vm7234_vm0, %v6799_v22, 0.0 }
 0x442   : > { %v11597_v47 = vsel %vm10409_vm14, %v11596_v45, %v11592_v36  ;;  %8211 = vadd.xlane.f32.xlu1 %v8210_v37  ;;  %8208 = vadd.xlane.f32.xlu0 %v8207_v39  ;;  %v8231_v36 = vsel %vm7234_vm0, %v6798_v23, 0.0  ;;  %v6801_v39 = vld [vmem:[%s16660_s5 + $0xa78] sm:$0xff] }
 0x443   : > { %v11602_v48 = vsel %vm10416_vm15, %v11601_v40, %v11597_v47  ;;  %v8008_v50 = vpop.xlane.xlu1 %8007  ;;  %v8005_v17 = vpop.xlane.xlu0 %8004  ;;  %v6800_v40 = vld [vmem:[%s16660_s5 + $0xa70] sm:$0xff] }
 0x444   : > { %v17934_v57 = vsel %vm14133_vm11, %v11602_v48, %v17532_v34  ;;  %v11610_v60 = vrot.slane %v8008_v50, %v16820_v26  ;;  %v11606_v35 = vrot.slane %v8005_v17, %v16817_v25  ;;  %v8240_v48 = vsel %vm7234_vm0, %v6801_v39, 0.0 }
 0x445   : > { %v8237_v50 = vsel %vm7234_vm0, %v6800_v40, 0.0 }
 0x446   : > { %v11611_v0 = vsel %vm10318_vm1, %v11610_v60, %v11606_v35  ;;  %8217 = vadd.xlane.f32.xlu1 %v8216_v51  ;;  %8214 = vadd.xlane.f32.xlu0 %v8213_v52  ;;  %v6803_v52 = vld [vmem:[%s16660_s5 + $0xa88] sm:$0xff]  ;;  %v6802_v60 = vld [vmem:[%s16660_s5 + $0xa80] sm:$0xff] }
 0x447   : > { %v8014_v55 = vpop.xlane.xlu1 %8013  ;;  %v8011_v1 = vpop.xlane.xlu0 %8010 }
 0x448   : > { %v11620_v34 = vrot.slane %v8014_v55, %v16830_v32  ;;  %v11615_v8 = vrot.slane %v8011_v1, %v16827_v31  ;;  %v8246_v55 = vsel %vm7234_vm0, %v6803_v52, 0.0  ;;  %v8243_v1 = vsel %vm7234_vm0, %v6802_v60, 0.0  ;;  %v6810_v52 = vld [vmem:[%s16660_s5 + $0xac0] sm:$0xff] }
 0x44a   : > { %v11616_v11 = vsel %vm10325_vm2, %v11615_v8, %v11611_v0  ;;  %8223 = vadd.xlane.f32.xlu1 %v8222_v2  ;;  %8220 = vadd.xlane.f32.xlu0 %v8219_v5  ;;  %v6804_v8 = vld [vmem:[%s16660_s5 + $0xa90] sm:$0xff] }
 0x44b   : > { %v8020_v41 = vpop.xlane.xlu1 %8019  ;;  %v11621_v13 = vsel %vm10332_vm3, %v11620_v34, %v11616_v11  ;;  %v8017_v14 = vpop.xlane.xlu0 %8016  ;;  %v6805_v34 = vld [vmem:[%s16660_s5 + $0xa98] sm:$0xff] }
 0x44c   : > { %v11630_v49 = vrot.slane %v8020_v41, %v16841_v43  ;;  %v11625_v21 = vrot.slane %v8017_v14, %v16844_v44  ;;  %v8249_v14 = vsel %vm7234_vm0, %v6804_v8, 0.0 }
 0x44e   : > { %v11626_v27 = vsel %vm10339_vm4, %v11625_v21, %v11621_v13  ;;  %8229 = vadd.xlane.f32.xlu1 %v8228_v16  ;;  %8226 = vadd.xlane.f32.xlu0 %v8225_v19  ;;  %v8252_v13 = vsel %vm7234_vm0, %v6805_v34, 0.0  ;;  %v6806_v21 = vld [vmem:[%s16660_s5 + $0xaa0] sm:$0xff] }
 0x44f   : > { %v8026_v12 = vpop.xlane.xlu1 %8025  ;;  %v11631_v29 = vsel %vm10346_vm5, %v11630_v49, %v11626_v27  ;;  %v8023_v30 = vpop.xlane.xlu0 %8022  ;;  %v6807_v49 = vld [vmem:[%s16660_s5 + $0xaa8] sm:$0xff] }
 0x450   : > { %v11640_v59 = vrot.slane %v8026_v12, %v16853_v53  ;;  %v11635_v37 = vrot.slane %v8023_v30, %v16856_v54  ;;  %v8255_v30 = vsel %vm7234_vm0, %v6806_v21, 0.0 }
 0x452   : > { %v11636_v45 = vsel %vm10353_vm6, %v11635_v37, %v11631_v29  ;;  %8235 = vadd.xlane.f32.xlu1 %v8234_v33  ;;  %8232 = vadd.xlane.f32.xlu0 %v8231_v36  ;;  %v8258_v29 = vsel %vm7234_vm0, %v6807_v49, 0.0  ;;  %v6808_v37 = vld [vmem:[%s16660_s5 + $0xab0] sm:$0xff] }
 0x453   : > { %v8032_v15 = vpop.xlane.xlu1 %8031  ;;  %v11641_v46 = vsel %vm10360_vm7, %v11640_v59, %v11636_v45  ;;  %v8029_v47 = vpop.xlane.xlu0 %8028  ;;  %v6809_v59 = vld [vmem:[%s16660_s5 + $0xab8] sm:$0xff] }
 0x454   : > { %v11650_v17 = vrot.slane %v8032_v15, %v16870_v4  ;;  %v11645_v51 = vrot.slane %v8029_v47, %v16878_v10  ;;  %v8261_v47 = vsel %vm7234_vm0, %v6808_v37, 0.0 }
 0x456   : > { %v11646_v35 = vsel %vm20346_vm8, %v11645_v51, %v11641_v46  ;;  %8241 = vadd.xlane.f32.xlu1 %v8240_v48  ;;  %8238 = vadd.xlane.f32.xlu0 %v8237_v50  ;;  %vm20347_vm8 = vcmask 786112   ;;  %v8264_v46 = vsel %vm7234_vm0, %v6809_v59, 0.0  ;;  %v6811_v51 = vld [vmem:[%s16660_s5 + $0xac8] sm:$0xff] }
 0x457   : > { %v8038_v61 = vpop.xlane.xlu1 %8037  ;;  %v11651_v62 = vsel %vm10374_vm9, %v11650_v17, %v11646_v35  ;;  %v8035_v0 = vpop.xlane.xlu0 %8034 }
 0x458   : > { %v11660_v2 = vrot.slane %v8038_v61, %v16886_v20  ;;  %v11655_v5 = vrot.slane %v8035_v0, %v16894_v28  ;;  %v8267_v0 = vsel %vm7234_vm0, %v6810_v52, 0.0 }
 0x45a   : > { %v11656_v6 = vsel %vm10381_vm10, %v11655_v5, %v11651_v62  ;;  %8247 = vadd.xlane.f32.xlu1 %v8246_v55  ;;  %8244 = vadd.xlane.f32.xlu0 %v8243_v1  ;;  %v8270_v62 = vsel %vm7234_vm0, %v6811_v51, 0.0  ;;  %v6813_v1 = vld [vmem:[%s16660_s5 + $0xad8] sm:$0xff] }
 0x45b   : > { %v8044_v7 = vpop.xlane.xlu1 %8043  ;;  %v11661_v11 = vsel %vm20347_vm8, %v11660_v2, %v11656_v6  ;;  %v8041_v41 = vpop.xlane.xlu0 %8040  ;;  %v6812_v2 = vld [vmem:[%s16660_s5 + $0xad0] sm:$0xff]  ;;  %vm20348_vm8 = vcmask 589312  }
 0x45c   : > { %v11670_v16 = vrot.slane %v8044_v7, %v16902_v38  ;;  %v11665_v19 = vrot.slane %v8041_v41, %v16908_v42  ;;  %v8276_v7 = vsel %vm7234_vm0, %v6813_v1, 0.0 }
 0x45e   : > { %v11666_v22 = vsel %vm10395_vm12, %v11665_v19, %v11661_v11  ;;  %8253 = vadd.xlane.f32.xlu1 %v8252_v13  ;;  %8250 = vadd.xlane.f32.xlu0 %v8249_v14  ;;  %v8273_v11 = vsel %vm7234_vm0, %v6812_v2, 0.0  ;;  %v6815_v14 = vld [vmem:[%s16660_s5 + $0xae8] sm:$0xff] }
 0x45f   : > { %v8050_v23 = vpop.xlane.xlu1 %8049  ;;  %v11671_v27 = vsel %vm10402_vm13, %v11670_v16, %v11666_v22  ;;  %v8047_v12 = vpop.xlane.xlu0 %8046  ;;  %v6814_v16 = vld [vmem:[%s16660_s5 + $0xae0] sm:$0xff] }
 0x460   : > { %v11680_v33 = vrot.slane %v8050_v23, %v16918_v56  ;;  %v11675_v36 = vrot.slane %v8047_v12, %v16923_v58  ;;  %v8282_v23 = vsel %vm7234_vm0, %v6815_v14, 0.0 }
 0x462   : > { %v11676_v39 = vsel %vm10409_vm14, %v11675_v36, %v11671_v27  ;;  %8259 = vadd.xlane.f32.xlu1 %v8258_v29  ;;  %8256 = vadd.xlane.f32.xlu0 %v8255_v30  ;;  %v8279_v27 = vsel %vm7234_vm0, %v6814_v16, 0.0  ;;  %v6817_v30 = vld [vmem:[%s16660_s5 + $0xaf8] sm:$0xff] }
 0x463   : > { %v11681_v40 = vsel %vm10416_vm15, %v11680_v33, %v11676_v39  ;;  %v8056_v45 = vpop.xlane.xlu1 %8055  ;;  %v8053_v15 = vpop.xlane.xlu0 %8052  ;;  %v6816_v33 = vld [vmem:[%s16660_s5 + $0xaf0] sm:$0xff] }
 0x464   : > { %v18001_v48 = vsel %vm14133_vm11, %v11681_v40, %v17599_v24  ;;  %v11689_v50 = vrot.slane %v8056_v45, %v16820_v26  ;;  %v11685_v17 = vrot.slane %v8053_v15, %v16817_v25  ;;  %v8288_v40 = vsel %vm7234_vm0, %v6817_v30, 0.0 }
 0x465   : > { %v8285_v45 = vsel %vm7234_vm0, %v6816_v33, 0.0 }
 0x466   : > { %v11690_v60 = vsel %vm10318_vm1, %v11689_v50, %v11685_v17  ;;  %8265 = vadd.xlane.f32.xlu1 %v8264_v46  ;;  %8262 = vadd.xlane.f32.xlu0 %v8261_v47  ;;  %v6819_v47 = vld [vmem:[%s16660_s5 + $0xb08] sm:$0xff]  ;;  %v6818_v50 = vld [vmem:[%s16660_s5 + $0xb00] sm:$0xff] }
 0x467   : > { %v8062_v35 = vpop.xlane.xlu1 %8061  ;;  %v8059_v61 = vpop.xlane.xlu0 %8058 }
 0x468   : > { %v11699_v24 = vrot.slane %v8062_v35, %v16830_v32  ;;  %v11694_v55 = vrot.slane %v8059_v61, %v16827_v31  ;;  %v8294_v35 = vsel %vm7234_vm0, %v6819_v47, 0.0  ;;  %v8291_v61 = vsel %vm7234_vm0, %v6818_v50, 0.0  ;;  %v6826_v47 = vld [vmem:[%s16660_s5 + $0xb40] sm:$0xff] }
 0x46a   : > { %v11695_v5 = vsel %vm10325_vm2, %v11694_v55, %v11690_v60  ;;  %8271 = vadd.xlane.f32.xlu1 %v8270_v62  ;;  %8268 = vadd.xlane.f32.xlu0 %v8267_v0  ;;  %v6820_v55 = vld [vmem:[%s16660_s5 + $0xb10] sm:$0xff] }
 0x46b   : > { %v8068_v34 = vpop.xlane.xlu1 %8067  ;;  %v11700_v8 = vsel %vm10332_vm3, %v11699_v24, %v11695_v5  ;;  %v8065_v6 = vpop.xlane.xlu0 %8064  ;;  %v6821_v24 = vld [vmem:[%s16660_s5 + $0xb18] sm:$0xff] }
 0x46c   : > { %v11709_v41 = vrot.slane %v8068_v34, %v16841_v43  ;;  %v11704_v13 = vrot.slane %v8065_v6, %v16844_v44  ;;  %v8297_v6 = vsel %vm7234_vm0, %v6820_v55, 0.0 }
 0x46e   : > { %v11705_v19 = vsel %vm10339_vm4, %v11704_v13, %v11700_v8  ;;  %8277 = vadd.xlane.f32.xlu1 %v8276_v7  ;;  %8274 = vadd.xlane.f32.xlu0 %v8273_v11  ;;  %v8300_v8 = vsel %vm7234_vm0, %v6821_v24, 0.0  ;;  %v6822_v13 = vld [vmem:[%s16660_s5 + $0xb20] sm:$0xff] }
 0x46f   : > { %v8074_v49 = vpop.xlane.xlu1 %8073  ;;  %v11710_v21 = vsel %vm10346_vm5, %v11709_v41, %v11705_v19  ;;  %v8071_v22 = vpop.xlane.xlu0 %8070  ;;  %v6823_v41 = vld [vmem:[%s16660_s5 + $0xb28] sm:$0xff] }
 0x470   : > { %v11719_v12 = vrot.slane %v8074_v49, %v16853_v53  ;;  %v11714_v29 = vrot.slane %v8071_v22, %v16856_v54  ;;  %v8303_v22 = vsel %vm7234_vm0, %v6822_v13, 0.0 }
 0x472   : > { %v11715_v36 = vsel %vm10353_vm6, %v11714_v29, %v11710_v21  ;;  %8283 = vadd.xlane.f32.xlu1 %v8282_v23  ;;  %8280 = vadd.xlane.f32.xlu0 %v8279_v27  ;;  %v8306_v21 = vsel %vm7234_vm0, %v6823_v41, 0.0  ;;  %v6824_v29 = vld [vmem:[%s16660_s5 + $0xb30] sm:$0xff] }
 0x473   : > { %v8080_v59 = vpop.xlane.xlu1 %8079  ;;  %v11720_v37 = vsel %vm10360_vm7, %v11719_v12, %v11715_v36  ;;  %v8077_v39 = vpop.xlane.xlu0 %8076  ;;  %v6825_v12 = vld [vmem:[%s16660_s5 + $0xb38] sm:$0xff] }
 0x474   : > { %v11729_v15 = vrot.slane %v8080_v59, %v16870_v4  ;;  %v11724_v46 = vrot.slane %v8077_v39, %v16878_v10  ;;  %v8309_v39 = vsel %vm7234_vm0, %v6824_v29, 0.0 }
 0x476   : > { %v11725_v17 = vsel %vm20348_vm8, %v11724_v46, %v11720_v37  ;;  %8289 = vadd.xlane.f32.xlu1 %v8288_v40  ;;  %8286 = vadd.xlane.f32.xlu0 %v8285_v45  ;;  %vm20349_vm8 = vcmask 786112   ;;  %v8312_v37 = vsel %vm7234_vm0, %v6825_v12, 0.0  ;;  %v6827_v46 = vld [vmem:[%s16660_s5 + $0xb48] sm:$0xff] }
 0x477   : > { %v8086_v51 = vpop.xlane.xlu1 %8085  ;;  %v11730_v52 = vsel %vm10374_vm9, %v11729_v15, %v11725_v17  ;;  %v8083_v60 = vpop.xlane.xlu0 %8082 }
 0x478   : > { %v11739_v62 = vrot.slane %v8086_v51, %v16886_v20  ;;  %v11734_v0 = vrot.slane %v8083_v60, %v16894_v28  ;;  %v8315_v60 = vsel %vm7234_vm0, %v6826_v47, 0.0 }
 0x47a   : > { %v11735_v1 = vsel %vm10381_vm10, %v11734_v0, %v11730_v52  ;;  %8295 = vadd.xlane.f32.xlu1 %v8294_v35  ;;  %8292 = vadd.xlane.f32.xlu0 %v8291_v61  ;;  %v8318_v52 = vsel %vm7234_vm0, %v6827_v46, 0.0  ;;  %v6829_v61 = vld [vmem:[%s16660_s5 + $0xb58] sm:$0xff] }
 0x47b   : > { %v8092_v2 = vpop.xlane.xlu1 %8091  ;;  %v11740_v5 = vsel %vm20349_vm8, %v11739_v62, %v11735_v1  ;;  %v8089_v34 = vpop.xlane.xlu0 %8088  ;;  %v6828_v62 = vld [vmem:[%s16660_s5 + $0xb50] sm:$0xff] }
 0x47c   : > { %v11749_v7 = vrot.slane %v8092_v2, %v16902_v38  ;;  %v11744_v11 = vrot.slane %v8089_v34, %v16908_v42  ;;  %v8324_v2 = vsel %vm7234_vm0, %v6829_v61, 0.0 }
 0x47e   : > { %v11745_v14 = vsel %vm10395_vm12, %v11744_v11, %v11740_v5  ;;  %8301 = vadd.xlane.f32.xlu1 %v8300_v8  ;;  %8298 = vadd.xlane.f32.xlu0 %v8297_v6  ;;  %v8321_v5 = vsel %vm7234_vm0, %v6828_v62, 0.0  ;;  %v6831_v6 = vld [vmem:[%s16660_s5 + $0xb68] sm:$0xff] }
 0x47f   : > { %v8098_v16 = vpop.xlane.xlu1 %8097  ;;  %v11750_v19 = vsel %vm10402_vm13, %v11749_v7, %v11745_v14  ;;  %v8095_v49 = vpop.xlane.xlu0 %8094  ;;  %v6830_v7 = vld [vmem:[%s16660_s5 + $0xb60] sm:$0xff] }
 0x480   : > { %v11759_v23 = vrot.slane %v8098_v16, %v16918_v56  ;;  %v11754_v27 = vrot.slane %v8095_v49, %v16923_v58  ;;  %v8330_v16 = vsel %vm7234_vm0, %v6831_v6, 0.0 }
 0x482   : > { %v11755_v30 = vsel %vm10409_vm14, %v11754_v27, %v11750_v19  ;;  %8307 = vadd.xlane.f32.xlu1 %v8306_v21  ;;  %8304 = vadd.xlane.f32.xlu0 %v8303_v22  ;;  %v8327_v19 = vsel %vm7234_vm0, %v6830_v7, 0.0  ;;  %v6833_v22 = vld [vmem:[%s16660_s5 + $0xb78] sm:$0xff] }
 0x483   : > { %v11760_v33 = vsel %vm10416_vm15, %v11759_v23, %v11755_v30  ;;  %v8104_v36 = vpop.xlane.xlu1 %8103  ;;  %v8101_v59 = vpop.xlane.xlu0 %8100  ;;  %v6832_v23 = vld [vmem:[%s16660_s5 + $0xb70] sm:$0xff] }
 0x484   : > { %v18068_v40 = vsel %vm14133_vm11, %v11760_v33, %v17666_v18  ;;  %v11768_v45 = vrot.slane %v8104_v36, %v16820_v26  ;;  %v11764_v15 = vrot.slane %v8101_v59, %v16817_v25  ;;  %v8336_v33 = vsel %vm7234_vm0, %v6833_v22, 0.0 }
 0x485   : > { %v8333_v36 = vsel %vm7234_vm0, %v6832_v23, 0.0  ;;  %vm20350_vm11 = vcmask 589312  }
 0x486   : > { %v11769_v50 = vsel %vm10318_vm1, %v11768_v45, %v11764_v15  ;;  %8313 = vadd.xlane.f32.xlu1 %v8312_v37  ;;  %8310 = vadd.xlane.f32.xlu0 %v8309_v39  ;;  %v6835_v39 = vld [vmem:[%s16660_s5 + $0xb88] sm:$0xff]  ;;  %v6834_v45 = vld [vmem:[%s16660_s5 + $0xb80] sm:$0xff] }
 0x487   : > { %v8110_v17 = vpop.xlane.xlu1 %8109  ;;  %v8107_v51 = vpop.xlane.xlu0 %8106 }
 0x488   : > { %v11778_v18 = vrot.slane %v8110_v17, %v16830_v32  ;;  %v11773_v35 = vrot.slane %v8107_v51, %v16827_v31  ;;  %v8342_v17 = vsel %vm7234_vm0, %v6835_v39, 0.0  ;;  %v8339_v51 = vsel %vm7234_vm0, %v6834_v45, 0.0  ;;  %v6842_v39 = vld [vmem:[%s16660_s5 + $0xbc0] sm:$0xff] }
 0x48a   : > { %v11774_v0 = vsel %vm10325_vm2, %v11773_v35, %v11769_v50  ;;  %8319 = vadd.xlane.f32.xlu1 %v8318_v52  ;;  %8316 = vadd.xlane.f32.xlu0 %v8315_v60  ;;  %v6836_v35 = vld [vmem:[%s16660_s5 + $0xb90] sm:$0xff] }
 0x48b   : > { %v8116_v24 = vpop.xlane.xlu1 %8115  ;;  %v11779_v55 = vsel %vm10332_vm3, %v11778_v18, %v11774_v0  ;;  %v8113_v1 = vpop.xlane.xlu0 %8112  ;;  %v6837_v18 = vld [vmem:[%s16660_s5 + $0xb98] sm:$0xff] }
 0x48c   : > { %v11788_v34 = vrot.slane %v8116_v24, %v16841_v43  ;;  %v11783_v8 = vrot.slane %v8113_v1, %v16844_v44  ;;  %v8345_v1 = vsel %vm7234_vm0, %v6836_v35, 0.0 }
 0x48e   : > { %v11784_v11 = vsel %vm10339_vm4, %v11783_v8, %v11779_v55  ;;  %8325 = vadd.xlane.f32.xlu1 %v8324_v2  ;;  %8322 = vadd.xlane.f32.xlu0 %v8321_v5  ;;  %v8348_v55 = vsel %vm7234_vm0, %v6837_v18, 0.0  ;;  %v6838_v8 = vld [vmem:[%s16660_s5 + $0xba0] sm:$0xff] }
 0x48f   : > { %v8122_v41 = vpop.xlane.xlu1 %8121  ;;  %v11789_v13 = vsel %vm10346_vm5, %v11788_v34, %v11784_v11  ;;  %v8119_v14 = vpop.xlane.xlu0 %8118  ;;  %v6839_v34 = vld [vmem:[%s16660_s5 + $0xba8] sm:$0xff] }
 0x490   : > { %v11798_v49 = vrot.slane %v8122_v41, %v16853_v53  ;;  %v11793_v21 = vrot.slane %v8119_v14, %v16856_v54  ;;  %v8351_v14 = vsel %vm7234_vm0, %v6838_v8, 0.0 }
 0x492   : > { %v11794_v27 = vsel %vm10353_vm6, %v11793_v21, %v11789_v13  ;;  %8331 = vadd.xlane.f32.xlu1 %v8330_v16  ;;  %8328 = vadd.xlane.f32.xlu0 %v8327_v19  ;;  %v8354_v13 = vsel %vm7234_vm0, %v6839_v34, 0.0  ;;  %v6840_v21 = vld [vmem:[%s16660_s5 + $0xbb0] sm:$0xff] }
 0x493   : > { %v8128_v12 = vpop.xlane.xlu1 %8127  ;;  %v11799_v29 = vsel %vm10360_vm7, %v11798_v49, %v11794_v27  ;;  %v8125_v30 = vpop.xlane.xlu0 %8124  ;;  %v6841_v49 = vld [vmem:[%s16660_s5 + $0xbb8] sm:$0xff] }
 0x494   : > { %v11808_v59 = vrot.slane %v8128_v12, %v16870_v4  ;;  %v11803_v37 = vrot.slane %v8125_v30, %v16878_v10  ;;  %v8357_v30 = vsel %vm7234_vm0, %v6840_v21, 0.0 }
 0x496   : > { %v11804_v15 = vsel %vm20350_vm11, %v11803_v37, %v11799_v29  ;;  %8337 = vadd.xlane.f32.xlu1 %v8336_v33  ;;  %8334 = vadd.xlane.f32.xlu0 %v8333_v36  ;;  %vm14135_vm11 = vcmask 1043459   ;;  %v8360_v29 = vsel %vm7234_vm0, %v6841_v49, 0.0  ;;  %v6843_v37 = vld [vmem:[%s16660_s5 + $0xbc8] sm:$0xff] }
 0x497   : > { %v8134_v46 = vpop.xlane.xlu1 %8133  ;;  %v11809_v47 = vsel %vm10374_vm9, %v11808_v59, %v11804_v15  ;;  %v8131_v50 = vpop.xlane.xlu0 %8130 }
 0x498   : > { %v11818_v52 = vrot.slane %v8134_v46, %v16886_v20  ;;  %v11813_v60 = vrot.slane %v8131_v50, %v16894_v28  ;;  %v8363_v50 = vsel %vm7234_vm0, %v6842_v39, 0.0 }
 0x49a   : > { %v11814_v61 = vsel %vm10381_vm10, %v11813_v60, %v11809_v47  ;;  %8343 = vadd.xlane.f32.xlu1 %v8342_v17  ;;  %8340 = vadd.xlane.f32.xlu0 %v8339_v51  ;;  %v8366_v47 = vsel %vm7234_vm0, %v6843_v37, 0.0  ;;  %v6845_v51 = vld [vmem:[%s16660_s5 + $0xbd8] sm:$0xff] }
 0x49b   : > { %v8140_v62 = vpop.xlane.xlu1 %8139  ;;  %v11819_v0 = vsel %vm20349_vm8, %v11818_v52, %v11814_v61  ;;  %v8137_v24 = vpop.xlane.xlu0 %8136  ;;  %v6844_v52 = vld [vmem:[%s16660_s5 + $0xbd0] sm:$0xff]  ;;  %vm20351_vm8 = vcmask 589312  }
 0x49c   : > { %v11828_v2 = vrot.slane %v8140_v62, %v16902_v38  ;;  %v11823_v5 = vrot.slane %v8137_v24, %v16908_v42  ;;  %v8372_v62 = vsel %vm7234_vm0, %v6845_v51, 0.0 }
 0x49e   : > { %v11824_v6 = vsel %vm10395_vm12, %v11823_v5, %v11819_v0  ;;  %8349 = vadd.xlane.f32.xlu1 %v8348_v55  ;;  %8346 = vadd.xlane.f32.xlu0 %v8345_v1  ;;  %v8369_v0 = vsel %vm7234_vm0, %v6844_v52, 0.0  ;;  %v6847_v1 = vld [vmem:[%s16660_s5 + $0xbe8] sm:$0xff] }
 0x49f   : > { %v8146_v7 = vpop.xlane.xlu1 %8145  ;;  %v11829_v11 = vsel %vm10402_vm13, %v11828_v2, %v11824_v6  ;;  %v8143_v41 = vpop.xlane.xlu0 %8142  ;;  %v6846_v2 = vld [vmem:[%s16660_s5 + $0xbe0] sm:$0xff] }
 0x4a0   : > { %v11838_v16 = vrot.slane %v8146_v7, %v16918_v56  ;;  %v11833_v19 = vrot.slane %v8143_v41, %v16923_v58  ;;  %v8378_v7 = vsel %vm7234_vm0, %v6847_v1, 0.0 }
 0x4a2   : > { %v11834_v22 = vsel %vm10409_vm14, %v11833_v19, %v11829_v11  ;;  %8355 = vadd.xlane.f32.xlu1 %v8354_v13  ;;  %8352 = vadd.xlane.f32.xlu0 %v8351_v14  ;;  %v8375_v11 = vsel %vm7234_vm0, %v6846_v2, 0.0  ;;  %v6849_v14 = vld [vmem:[%s16660_s5 + $0xbf8] sm:$0xff] }
 0x4a3   : > { %v11839_v23 = vsel %vm10416_vm15, %v11838_v16, %v11834_v22  ;;  %v8152_v27 = vpop.xlane.xlu1 %8151  ;;  %v8149_v12 = vpop.xlane.xlu0 %8148  ;;  %v6848_v16 = vld [vmem:[%s16660_s5 + $0xbf0] sm:$0xff] }
 0x4a4   : > { %v18135_v33 = vsel %vm14135_vm11, %v11839_v23, %v17733_v9  ;;  %v11847_v36 = vrot.slane %v8152_v27, %v16820_v26  ;;  %v11843_v59 = vrot.slane %v8149_v12, %v16817_v25  ;;  %v8384_v23 = vsel %vm7234_vm0, %v6849_v14, 0.0 }
 0x4a5   : > { %v8381_v27 = vsel %vm7234_vm0, %v6848_v16, 0.0 }
 0x4a6   : > { %v11848_v45 = vsel %vm10318_vm1, %v11847_v36, %v11843_v59  ;;  %8361 = vadd.xlane.f32.xlu1 %v8360_v29  ;;  %8358 = vadd.xlane.f32.xlu0 %v8357_v30  ;;  %v6851_v30 = vld [vmem:[%s16660_s5 + $0xc08] sm:$0xff]  ;;  %v6850_v36 = vld [vmem:[%s16660_s5 + $0xc00] sm:$0xff] }
 0x4a7   : > { %v8158_v15 = vpop.xlane.xlu1 %8157  ;;  %v8155_v46 = vpop.xlane.xlu0 %8154 }
 0x4a8   : > { %v11857_v9 = vrot.slane %v8158_v15, %v16830_v32  ;;  %v11852_v17 = vrot.slane %v8155_v46, %v16827_v31  ;;  %v8390_v15 = vsel %vm7234_vm0, %v6851_v30, 0.0  ;;  %v8387_v46 = vsel %vm7234_vm0, %v6850_v36, 0.0  ;;  %v6858_v30 = vld [vmem:[%s16660_s5 + $0xc40] sm:$0xff] }
 0x4aa   : > { %v11853_v60 = vsel %vm10325_vm2, %v11852_v17, %v11848_v45  ;;  %8367 = vadd.xlane.f32.xlu1 %v8366_v47  ;;  %8364 = vadd.xlane.f32.xlu0 %v8363_v50  ;;  %v6852_v17 = vld [vmem:[%s16660_s5 + $0xc10] sm:$0xff] }
 0x4ab   : > { %v8164_v18 = vpop.xlane.xlu1 %8163  ;;  %v11858_v35 = vsel %vm10332_vm3, %v11857_v9, %v11853_v60  ;;  %v8161_v61 = vpop.xlane.xlu0 %8160  ;;  %v6853_v9 = vld [vmem:[%s16660_s5 + $0xc18] sm:$0xff] }
 0x4ac   : > { %v11867_v24 = vrot.slane %v8164_v18, %v16841_v43  ;;  %v11862_v55 = vrot.slane %v8161_v61, %v16844_v44  ;;  %v8393_v61 = vsel %vm7234_vm0, %v6852_v17, 0.0 }
 0x4ae   : > { %v11863_v5 = vsel %vm10339_vm4, %v11862_v55, %v11858_v35  ;;  %8373 = vadd.xlane.f32.xlu1 %v8372_v62  ;;  %8370 = vadd.xlane.f32.xlu0 %v8369_v0  ;;  %v8396_v35 = vsel %vm7234_vm0, %v6853_v9, 0.0  ;;  %v6854_v55 = vld [vmem:[%s16660_s5 + $0xc20] sm:$0xff] }
 0x4af   : > { %v8170_v34 = vpop.xlane.xlu1 %8169  ;;  %v11868_v8 = vsel %vm10346_vm5, %v11867_v24, %v11863_v5  ;;  %v8167_v6 = vpop.xlane.xlu0 %8166  ;;  %v6855_v24 = vld [vmem:[%s16660_s5 + $0xc28] sm:$0xff] }
 0x4b0   : > { %v11877_v41 = vrot.slane %v8170_v34, %v16853_v53  ;;  %v11872_v13 = vrot.slane %v8167_v6, %v16856_v54  ;;  %v8399_v6 = vsel %vm7234_vm0, %v6854_v55, 0.0 }
 0x4b2   : > { %v11873_v19 = vsel %vm10353_vm6, %v11872_v13, %v11868_v8  ;;  %8379 = vadd.xlane.f32.xlu1 %v8378_v7  ;;  %8376 = vadd.xlane.f32.xlu0 %v8375_v11  ;;  %v8402_v8 = vsel %vm7234_vm0, %v6855_v24, 0.0  ;;  %v6856_v13 = vld [vmem:[%s16660_s5 + $0xc30] sm:$0xff] }
 0x4b3   : > { %v8176_v49 = vpop.xlane.xlu1 %8175  ;;  %v11878_v21 = vsel %vm10360_vm7, %v11877_v41, %v11873_v19  ;;  %v8173_v22 = vpop.xlane.xlu0 %8172  ;;  %v6857_v41 = vld [vmem:[%s16660_s5 + $0xc38] sm:$0xff] }
 0x4b4   : > { %v11887_v12 = vrot.slane %v8176_v49, %v16870_v4  ;;  %v11882_v29 = vrot.slane %v8173_v22, %v16878_v10  ;;  %v8405_v22 = vsel %vm7234_vm0, %v6856_v13, 0.0 }
 0x4b6   : > { %v11883_v59 = vsel %vm20351_vm8, %v11882_v29, %v11878_v21  ;;  %8385 = vadd.xlane.f32.xlu1 %v8384_v23  ;;  %8382 = vadd.xlane.f32.xlu0 %v8381_v27  ;;  %vm20352_vm8 = vcmask 786112   ;;  %v8408_v21 = vsel %vm7234_vm0, %v6857_v41, 0.0  ;;  %v6859_v29 = vld [vmem:[%s16660_s5 + $0xc48] sm:$0xff] }
 0x4b7   : > { %v8182_v37 = vpop.xlane.xlu1 %8181  ;;  %v11888_v39 = vsel %vm10374_vm9, %v11887_v12, %v11883_v59  ;;  %v8179_v45 = vpop.xlane.xlu0 %8178 }
 0x4b8   : > { %v11897_v47 = vrot.slane %v8182_v37, %v16886_v20  ;;  %v11892_v50 = vrot.slane %v8179_v45, %v16894_v28  ;;  %v8411_v45 = vsel %vm7234_vm0, %v6858_v30, 0.0 }
 0x4ba   : > { %v11893_v51 = vsel %vm10381_vm10, %v11892_v50, %v11888_v39  ;;  %8391 = vadd.xlane.f32.xlu1 %v8390_v15  ;;  %8388 = vadd.xlane.f32.xlu0 %v8387_v46  ;;  %v8414_v39 = vsel %vm7234_vm0, %v6859_v29, 0.0  ;;  %v6861_v46 = vld [vmem:[%s16660_s5 + $0xc58] sm:$0xff] }
 0x4bb   : > { %v8188_v52 = vpop.xlane.xlu1 %8187  ;;  %v11898_v60 = vsel %vm20352_vm8, %v11897_v47, %v11893_v51  ;;  %v8185_v18 = vpop.xlane.xlu0 %8184  ;;  %v6860_v47 = vld [vmem:[%s16660_s5 + $0xc50] sm:$0xff]  ;;  %vm20353_vm8 = vcmask 589312  }
 0x4bc   : > { %v11907_v62 = vrot.slane %v8188_v52, %v16902_v38  ;;  %v11902_v0 = vrot.slane %v8185_v18, %v16908_v42  ;;  %v8420_v52 = vsel %vm7234_vm0, %v6861_v46, 0.0 }
 0x4be   : > { %v11903_v1 = vsel %vm10395_vm12, %v11902_v0, %v11898_v60  ;;  %8397 = vadd.xlane.f32.xlu1 %v8396_v35  ;;  %8394 = vadd.xlane.f32.xlu0 %v8393_v61  ;;  %v8417_v60 = vsel %vm7234_vm0, %v6860_v47, 0.0  ;;  %v6863_v61 = vld [vmem:[%s16660_s5 + $0xc68] sm:$0xff] }
 0x4bf   : > { %v8194_v2 = vpop.xlane.xlu1 %8193  ;;  %v11908_v5 = vsel %vm10402_vm13, %v11907_v62, %v11903_v1  ;;  %v8191_v34 = vpop.xlane.xlu0 %8190  ;;  %v6862_v62 = vld [vmem:[%s16660_s5 + $0xc60] sm:$0xff] }
 0x4c0   : > { %v11917_v7 = vrot.slane %v8194_v2, %v16918_v56  ;;  %v11912_v11 = vrot.slane %v8191_v34, %v16923_v58  ;;  %v8426_v2 = vsel %vm7234_vm0, %v6863_v61, 0.0 }
 0x4c2   : > { %v11913_v14 = vsel %vm10409_vm14, %v11912_v11, %v11908_v5  ;;  %8403 = vadd.xlane.f32.xlu1 %v8402_v8  ;;  %8400 = vadd.xlane.f32.xlu0 %v8399_v6  ;;  %v8423_v5 = vsel %vm7234_vm0, %v6862_v62, 0.0  ;;  %v6865_v6 = vld [vmem:[%s16660_s5 + $0xc78] sm:$0xff] }
 0x4c3   : > { %v11918_v16 = vsel %vm10416_vm15, %v11917_v7, %v11913_v14  ;;  %v8200_v19 = vpop.xlane.xlu1 %8199  ;;  %v8197_v49 = vpop.xlane.xlu0 %8196  ;;  %v6864_v7 = vld [vmem:[%s16660_s5 + $0xc70] sm:$0xff] }
 0x4c4   : > { %v18202_v23 = vsel %vm14135_vm11, %v11918_v16, %v17800_v3  ;;  %v11926_v27 = vrot.slane %v8200_v19, %v16820_v26  ;;  %v11922_v12 = vrot.slane %v8197_v49, %v16817_v25  ;;  %v8432_v16 = vsel %vm7234_vm0, %v6865_v6, 0.0 }
 0x4c5   : > { %v8429_v19 = vsel %vm7234_vm0, %v6864_v7, 0.0 }
 0x4c6   : > { %v11927_v36 = vsel %vm10318_vm1, %v11926_v27, %v11922_v12  ;;  %8409 = vadd.xlane.f32.xlu1 %v8408_v21  ;;  %8406 = vadd.xlane.f32.xlu0 %v8405_v22  ;;  %v6867_v22 = vld [vmem:[%s16660_s5 + $0xc88] sm:$0xff]  ;;  %v6866_v27 = vld [vmem:[%s16660_s5 + $0xc80] sm:$0xff] }
 0x4c7   : > { %v8206_v59 = vpop.xlane.xlu1 %8205  ;;  %v8203_v37 = vpop.xlane.xlu0 %8202 }
 0x4c8   : > { %v11936_v3 = vrot.slane %v8206_v59, %v16830_v32  ;;  %v11931_v15 = vrot.slane %v8203_v37, %v16827_v31  ;;  %v8438_v59 = vsel %vm7234_vm0, %v6867_v22, 0.0  ;;  %v8435_v37 = vsel %vm7234_vm0, %v6866_v27, 0.0  ;;  %v6874_v22 = vld [vmem:[%s16660_s5 + $0xcc0] sm:$0xff] }
 0x4ca   : > { %v11932_v50 = vsel %vm10325_vm2, %v11931_v15, %v11927_v36  ;;  %8415 = vadd.xlane.f32.xlu1 %v8414_v39  ;;  %8412 = vadd.xlane.f32.xlu0 %v8411_v45  ;;  %v6868_v15 = vld [vmem:[%s16660_s5 + $0xc90] sm:$0xff] }
 0x4cb   : > { %v8212_v9 = vpop.xlane.xlu1 %8211  ;;  %v11937_v17 = vsel %vm10332_vm3, %v11936_v3, %v11932_v50  ;;  %v8209_v51 = vpop.xlane.xlu0 %8208  ;;  %v6869_v3 = vld [vmem:[%s16660_s5 + $0xc98] sm:$0xff] }
 0x4cc   : > { %v11946_v18 = vrot.slane %v8212_v9, %v16841_v43  ;;  %v11941_v35 = vrot.slane %v8209_v51, %v16844_v44  ;;  %v8441_v51 = vsel %vm7234_vm0, %v6868_v15, 0.0 }
 0x4ce   : > { %v11942_v0 = vsel %vm10339_vm4, %v11941_v35, %v11937_v17  ;;  %8421 = vadd.xlane.f32.xlu1 %v8420_v52  ;;  %8418 = vadd.xlane.f32.xlu0 %v8417_v60  ;;  %v8444_v17 = vsel %vm7234_vm0, %v6869_v3, 0.0  ;;  %v6870_v35 = vld [vmem:[%s16660_s5 + $0xca0] sm:$0xff] }
 0x4cf   : > { %v8218_v24 = vpop.xlane.xlu1 %8217  ;;  %v11947_v55 = vsel %vm10346_vm5, %v11946_v18, %v11942_v0  ;;  %v8215_v1 = vpop.xlane.xlu0 %8214  ;;  %v6871_v18 = vld [vmem:[%s16660_s5 + $0xca8] sm:$0xff] }
 0x4d0   : > { %v11956_v34 = vrot.slane %v8218_v24, %v16853_v53  ;;  %v11951_v8 = vrot.slane %v8215_v1, %v16856_v54  ;;  %v8447_v1 = vsel %vm7234_vm0, %v6870_v35, 0.0 }
 0x4d2   : > { %v11952_v11 = vsel %vm10353_vm6, %v11951_v8, %v11947_v55  ;;  %8427 = vadd.xlane.f32.xlu1 %v8426_v2  ;;  %8424 = vadd.xlane.f32.xlu0 %v8423_v5  ;;  %v8450_v55 = vsel %vm7234_vm0, %v6871_v18, 0.0  ;;  %v6872_v8 = vld [vmem:[%s16660_s5 + $0xcb0] sm:$0xff] }
 0x4d3   : > { %v8224_v41 = vpop.xlane.xlu1 %8223  ;;  %v11957_v13 = vsel %vm10360_vm7, %v11956_v34, %v11952_v11  ;;  %v8221_v14 = vpop.xlane.xlu0 %8220  ;;  %v6873_v34 = vld [vmem:[%s16660_s5 + $0xcb8] sm:$0xff] }
 0x4d4   : > { %v11966_v49 = vrot.slane %v8224_v41, %v16870_v4  ;;  %v11961_v21 = vrot.slane %v8221_v14, %v16878_v10  ;;  %v8453_v14 = vsel %vm7234_vm0, %v6872_v8, 0.0 }
 0x4d6   : > { %v11962_v12 = vsel %vm20353_vm8, %v11961_v21, %v11957_v13  ;;  %8433 = vadd.xlane.f32.xlu1 %v8432_v16  ;;  %8430 = vadd.xlane.f32.xlu0 %v8429_v19  ;;  %vm20354_vm8 = vcmask 786112   ;;  %v8456_v13 = vsel %vm7234_vm0, %v6873_v34, 0.0  ;;  %v6875_v21 = vld [vmem:[%s16660_s5 + $0xcc8] sm:$0xff] }
 0x4d7   : > { %v8230_v29 = vpop.xlane.xlu1 %8229  ;;  %v11967_v30 = vsel %vm10374_vm9, %v11966_v49, %v11962_v12  ;;  %v8227_v36 = vpop.xlane.xlu0 %8226 }
 0x4d8   : > { %v11976_v39 = vrot.slane %v8230_v29, %v16886_v20  ;;  %v11971_v45 = vrot.slane %v8227_v36, %v16894_v28  ;;  %v8459_v36 = vsel %vm7234_vm0, %v6874_v22, 0.0 }
 0x4da   : > { %v11972_v46 = vsel %vm10381_vm10, %v11971_v45, %v11967_v30  ;;  %8439 = vadd.xlane.f32.xlu1 %v8438_v59  ;;  %8436 = vadd.xlane.f32.xlu0 %v8435_v37  ;;  %v8462_v30 = vsel %vm7234_vm0, %v6875_v21, 0.0  ;;  %v6877_v37 = vld [vmem:[%s16660_s5 + $0xcd8] sm:$0xff] }
 0x4db   : > { %v8236_v47 = vpop.xlane.xlu1 %8235  ;;  %v11977_v50 = vsel %vm20354_vm8, %v11976_v39, %v11972_v46  ;;  %v8233_v9 = vpop.xlane.xlu0 %8232  ;;  %v6876_v39 = vld [vmem:[%s16660_s5 + $0xcd0] sm:$0xff]  ;;  %vm20355_vm8 = vcmask 589312  }
 0x4dc   : > { %v11986_v52 = vrot.slane %v8236_v47, %v16902_v38  ;;  %v11981_v60 = vrot.slane %v8233_v9, %v16908_v42  ;;  %v8468_v47 = vsel %vm7234_vm0, %v6877_v37, 0.0 }
 0x4de   : > { %v11982_v61 = vsel %vm10395_vm12, %v11981_v60, %v11977_v50  ;;  %8445 = vadd.xlane.f32.xlu1 %v8444_v17  ;;  %8442 = vadd.xlane.f32.xlu0 %v8441_v51  ;;  %v8465_v50 = vsel %vm7234_vm0, %v6876_v39, 0.0  ;;  %v6879_v51 = vld [vmem:[%s16660_s5 + $0xce8] sm:$0xff] }
 0x4df   : > { %v8242_v62 = vpop.xlane.xlu1 %8241  ;;  %v11987_v0 = vsel %vm10402_vm13, %v11986_v52, %v11982_v61  ;;  %v8239_v24 = vpop.xlane.xlu0 %8238  ;;  %v6878_v52 = vld [vmem:[%s16660_s5 + $0xce0] sm:$0xff] }
 0x4e0   : > { %v11996_v2 = vrot.slane %v8242_v62, %v16918_v56  ;;  %v11991_v5 = vrot.slane %v8239_v24, %v16923_v58  ;;  %v8474_v62 = vsel %vm7234_vm0, %v6879_v51, 0.0 }
 0x4e2   : > { %v11992_v6 = vsel %vm10409_vm14, %v11991_v5, %v11987_v0  ;;  %8451 = vadd.xlane.f32.xlu1 %v8450_v55  ;;  %8448 = vadd.xlane.f32.xlu0 %v8447_v1  ;;  %v8471_v0 = vsel %vm7234_vm0, %v6878_v52, 0.0  ;;  %v6881_v1 = vld [vmem:[%s16660_s5 + $0xcf8] sm:$0xff] }
 0x4e3   : > { %v11997_v7 = vsel %vm10416_vm15, %v11996_v2, %v11992_v6  ;;  %v8248_v11 = vpop.xlane.xlu1 %8247  ;;  %v8245_v41 = vpop.xlane.xlu0 %8244  ;;  %v6880_v2 = vld [vmem:[%s16660_s5 + $0xcf0] sm:$0xff] }
 0x4e4   : > { %v18269_v16 = vsel %vm14135_vm11, %v11997_v7, %v17867_v63  ;;  %v12005_v19 = vrot.slane %v8248_v11, %v16820_v26  ;;  %v12001_v49 = vrot.slane %v8245_v41, %v16817_v25  ;;  %v8480_v7 = vsel %vm7234_vm0, %v6881_v1, 0.0 }
 0x4e5   : > { %v8477_v11 = vsel %vm7234_vm0, %v6880_v2, 0.0 }
 0x4e6   : > { %v12006_v27 = vsel %vm10318_vm1, %v12005_v19, %v12001_v49  ;;  %8457 = vadd.xlane.f32.xlu1 %v8456_v13  ;;  %8454 = vadd.xlane.f32.xlu0 %v8453_v14  ;;  %v6883_v14 = vld [vmem:[%s16660_s5 + $0xd08] sm:$0xff]  ;;  %v6882_v19 = vld [vmem:[%s16660_s5 + $0xd00] sm:$0xff] }
 0x4e7   : > { %v8254_v12 = vpop.xlane.xlu1 %8253  ;;  %v8251_v29 = vpop.xlane.xlu0 %8250 }
 0x4e8   : > { %v12015_v63 = vrot.slane %v8254_v12, %v16830_v32  ;;  %v12010_v59 = vrot.slane %v8251_v29, %v16827_v31  ;;  %v8486_v12 = vsel %vm7234_vm0, %v6883_v14, 0.0  ;;  %v8483_v29 = vsel %vm7234_vm0, %v6882_v19, 0.0  ;;  %v6890_v14 = vld [vmem:[%s16660_s5 + $0xd40] sm:$0xff] }
 0x4ea   : > { %v12011_v45 = vsel %vm10325_vm2, %v12010_v59, %v12006_v27  ;;  %8463 = vadd.xlane.f32.xlu1 %v8462_v30  ;;  %8460 = vadd.xlane.f32.xlu0 %v8459_v36  ;;  %v6884_v59 = vld [vmem:[%s16660_s5 + $0xd10] sm:$0xff] }
 0x4eb   : > { %v8260_v3 = vpop.xlane.xlu1 %8259  ;;  %v12016_v15 = vsel %vm10332_vm3, %v12015_v63, %v12011_v45  ;;  %v8257_v46 = vpop.xlane.xlu0 %8256  ;;  %v6885_v63 = vld [vmem:[%s16660_s5 + $0xd18] sm:$0xff] }
 0x4ec   : > { %v12025_v9 = vrot.slane %v8260_v3, %v16841_v43  ;;  %v12020_v17 = vrot.slane %v8257_v46, %v16844_v44  ;;  %v8489_v46 = vsel %vm7234_vm0, %v6884_v59, 0.0 }
 0x4ee   : > { %v12021_v60 = vsel %vm10339_vm4, %v12020_v17, %v12016_v15  ;;  %8469 = vadd.xlane.f32.xlu1 %v8468_v47  ;;  %8466 = vadd.xlane.f32.xlu0 %v8465_v50  ;;  %v8492_v15 = vsel %vm7234_vm0, %v6885_v63, 0.0  ;;  %v6886_v17 = vld [vmem:[%s16660_s5 + $0xd20] sm:$0xff] }
 0x4ef   : > { %v8266_v18 = vpop.xlane.xlu1 %8265  ;;  %v12026_v35 = vsel %vm10346_vm5, %v12025_v9, %v12021_v60  ;;  %v8263_v61 = vpop.xlane.xlu0 %8262  ;;  %v6887_v9 = vld [vmem:[%s16660_s5 + $0xd28] sm:$0xff] }
 0x4f0   : > { %v12035_v24 = vrot.slane %v8266_v18, %v16853_v53  ;;  %v12030_v55 = vrot.slane %v8263_v61, %v16856_v54  ;;  %v8495_v61 = vsel %vm7234_vm0, %v6886_v17, 0.0 }
 0x4f2   : > { %v12031_v5 = vsel %vm10353_vm6, %v12030_v55, %v12026_v35  ;;  %8475 = vadd.xlane.f32.xlu1 %v8474_v62  ;;  %8472 = vadd.xlane.f32.xlu0 %v8471_v0  ;;  %v8498_v35 = vsel %vm7234_vm0, %v6887_v9, 0.0  ;;  %v6888_v55 = vld [vmem:[%s16660_s5 + $0xd30] sm:$0xff] }
 0x4f3   : > { %v8272_v34 = vpop.xlane.xlu1 %8271  ;;  %v12036_v8 = vsel %vm10360_vm7, %v12035_v24, %v12031_v5  ;;  %v8269_v6 = vpop.xlane.xlu0 %8268  ;;  %v6889_v24 = vld [vmem:[%s16660_s5 + $0xd38] sm:$0xff] }
 0x4f4   : > { %v12045_v41 = vrot.slane %v8272_v34, %v16870_v4  ;;  %v12040_v13 = vrot.slane %v8269_v6, %v16878_v10  ;;  %v8501_v6 = vsel %vm7234_vm0, %v6888_v55, 0.0 }
 0x4f6   : > { %v12041_v49 = vsel %vm20355_vm8, %v12040_v13, %v12036_v8  ;;  %8481 = vadd.xlane.f32.xlu1 %v8480_v7  ;;  %8478 = vadd.xlane.f32.xlu0 %v8477_v11  ;;  %vm20356_vm8 = vcmask 786112   ;;  %v8504_v8 = vsel %vm7234_vm0, %v6889_v24, 0.0  ;;  %v6891_v13 = vld [vmem:[%s16660_s5 + $0xd48] sm:$0xff] }
 0x4f7   : > { %v8278_v21 = vpop.xlane.xlu1 %8277  ;;  %v12046_v22 = vsel %vm10374_vm9, %v12045_v41, %v12041_v49  ;;  %v8275_v27 = vpop.xlane.xlu0 %8274 }
 0x4f8   : > { %v12055_v30 = vrot.slane %v8278_v21, %v16886_v20  ;;  %v12050_v36 = vrot.slane %v8275_v27, %v16894_v28  ;;  %v8507_v27 = vsel %vm7234_vm0, %v6890_v14, 0.0 }
 0x4fa   : > { %v12051_v37 = vsel %vm10381_vm10, %v12050_v36, %v12046_v22  ;;  %8487 = vadd.xlane.f32.xlu1 %v8486_v12  ;;  %8484 = vadd.xlane.f32.xlu0 %v8483_v29  ;;  %v8510_v22 = vsel %vm7234_vm0, %v6891_v13, 0.0  ;;  %v6893_v29 = vld [vmem:[%s16660_s5 + $0xd58] sm:$0xff] }
 0x4fb   : > { %v8284_v39 = vpop.xlane.xlu1 %8283  ;;  %v12056_v45 = vsel %vm20356_vm8, %v12055_v30, %v12051_v37  ;;  %v8281_v3 = vpop.xlane.xlu0 %8280  ;;  %v6892_v30 = vld [vmem:[%s16660_s5 + $0xd50] sm:$0xff]  ;;  %vm20357_vm8 = vcmask 589312  }
 0x4fc   : > { %v12065_v47 = vrot.slane %v8284_v39, %v16902_v38  ;;  %v12060_v50 = vrot.slane %v8281_v3, %v16908_v42  ;;  %v8516_v39 = vsel %vm7234_vm0, %v6893_v29, 0.0 }
 0x4fe   : > { %v12061_v51 = vsel %vm10395_vm12, %v12060_v50, %v12056_v45  ;;  %8493 = vadd.xlane.f32.xlu1 %v8492_v15  ;;  %8490 = vadd.xlane.f32.xlu0 %v8489_v46  ;;  %v8513_v45 = vsel %vm7234_vm0, %v6892_v30, 0.0  ;;  %v6895_v46 = vld [vmem:[%s16660_s5 + $0xd68] sm:$0xff] }
 0x4ff   : > { %v8290_v52 = vpop.xlane.xlu1 %8289  ;;  %v12066_v60 = vsel %vm10402_vm13, %v12065_v47, %v12061_v51  ;;  %v8287_v18 = vpop.xlane.xlu0 %8286  ;;  %v6894_v47 = vld [vmem:[%s16660_s5 + $0xd60] sm:$0xff] }
 0x500   : > { %v12075_v62 = vrot.slane %v8290_v52, %v16918_v56  ;;  %v12070_v0 = vrot.slane %v8287_v18, %v16923_v58  ;;  %v8522_v52 = vsel %vm7234_vm0, %v6895_v46, 0.0 }
 0x502   : > { %v12071_v1 = vsel %vm10409_vm14, %v12070_v0, %v12066_v60  ;;  %8499 = vadd.xlane.f32.xlu1 %v8498_v35  ;;  %8496 = vadd.xlane.f32.xlu0 %v8495_v61  ;;  %v8519_v60 = vsel %vm7234_vm0, %v6894_v47, 0.0  ;;  %v6897_v61 = vld [vmem:[%s16660_s5 + $0xd78] sm:$0xff] }
 0x503   : > { %v12076_v2 = vsel %vm10416_vm15, %v12075_v62, %v12071_v1  ;;  %v8296_v5 = vpop.xlane.xlu1 %8295  ;;  %v8293_v34 = vpop.xlane.xlu0 %8292  ;;  %v6896_v62 = vld [vmem:[%s16660_s5 + $0xd70] sm:$0xff] }
 0x504   : > { %v18336_v7 = vsel %vm14135_vm11, %v12076_v2, %v17934_v57  ;;  %v12084_v11 = vrot.slane %v8296_v5, %v16820_v26  ;;  %v12080_v41 = vrot.slane %v8293_v34, %v16817_v25  ;;  %v8528_v2 = vsel %vm7234_vm0, %v6897_v61, 0.0 }
 0x505   : > { %v8525_v5 = vsel %vm7234_vm0, %v6896_v62, 0.0 }
 0x506   : > { %v12085_v19 = vsel %vm10318_vm1, %v12084_v11, %v12080_v41  ;;  %8505 = vadd.xlane.f32.xlu1 %v8504_v8  ;;  %8502 = vadd.xlane.f32.xlu0 %v8501_v6  ;;  %v6899_v6 = vld [vmem:[%s16660_s5 + $0xd88] sm:$0xff]  ;;  %v6898_v11 = vld [vmem:[%s16660_s5 + $0xd80] sm:$0xff] }
 0x507   : > { %v8302_v49 = vpop.xlane.xlu1 %8301  ;;  %v8299_v21 = vpop.xlane.xlu0 %8298 }
 0x508   : > { %v12094_v57 = vrot.slane %v8302_v49, %v16830_v32  ;;  %v12089_v12 = vrot.slane %v8299_v21, %v16827_v31  ;;  %v8534_v49 = vsel %vm7234_vm0, %v6899_v6, 0.0  ;;  %v8531_v21 = vsel %vm7234_vm0, %v6898_v11, 0.0  ;;  %v6906_v6 = vld [vmem:[%s16660_s5 + $0xdc0] sm:$0xff] }
 0x50a   : > { %v12090_v36 = vsel %vm10325_vm2, %v12089_v12, %v12085_v19  ;;  %8511 = vadd.xlane.f32.xlu1 %v8510_v22  ;;  %8508 = vadd.xlane.f32.xlu0 %v8507_v27  ;;  %v6900_v12 = vld [vmem:[%s16660_s5 + $0xd90] sm:$0xff] }
 0x50b   : > { %v8308_v63 = vpop.xlane.xlu1 %8307  ;;  %v12095_v59 = vsel %vm10332_vm3, %v12094_v57, %v12090_v36  ;;  %v8305_v37 = vpop.xlane.xlu0 %8304  ;;  %v6901_v57 = vld [vmem:[%s16660_s5 + $0xd98] sm:$0xff] }
 0x50c   : > { %v12104_v3 = vrot.slane %v8308_v63, %v16841_v43  ;;  %v12099_v15 = vrot.slane %v8305_v37, %v16844_v44  ;;  %v8537_v37 = vsel %vm7234_vm0, %v6900_v12, 0.0 }
 0x50e   : > { %v12100_v50 = vsel %vm10339_vm4, %v12099_v15, %v12095_v59  ;;  %8517 = vadd.xlane.f32.xlu1 %v8516_v39  ;;  %8514 = vadd.xlane.f32.xlu0 %v8513_v45  ;;  %v8540_v59 = vsel %vm7234_vm0, %v6901_v57, 0.0  ;;  %v6902_v15 = vld [vmem:[%s16660_s5 + $0xda0] sm:$0xff] }
 0x50f   : > { %v8314_v9 = vpop.xlane.xlu1 %8313  ;;  %v12105_v17 = vsel %vm10346_vm5, %v12104_v3, %v12100_v50  ;;  %v8311_v51 = vpop.xlane.xlu0 %8310  ;;  %v6903_v3 = vld [vmem:[%s16660_s5 + $0xda8] sm:$0xff] }
 0x510   : > { %v12114_v18 = vrot.slane %v8314_v9, %v16853_v53  ;;  %v12109_v35 = vrot.slane %v8311_v51, %v16856_v54  ;;  %v8543_v51 = vsel %vm7234_vm0, %v6902_v15, 0.0 }
 0x512   : > { %v12110_v0 = vsel %vm10353_vm6, %v12109_v35, %v12105_v17  ;;  %8523 = vadd.xlane.f32.xlu1 %v8522_v52  ;;  %8520 = vadd.xlane.f32.xlu0 %v8519_v60  ;;  %v8546_v17 = vsel %vm7234_vm0, %v6903_v3, 0.0  ;;  %v6904_v35 = vld [vmem:[%s16660_s5 + $0xdb0] sm:$0xff] }
 0x513   : > { %v8320_v24 = vpop.xlane.xlu1 %8319  ;;  %v12115_v55 = vsel %vm10360_vm7, %v12114_v18, %v12110_v0  ;;  %v8317_v1 = vpop.xlane.xlu0 %8316  ;;  %v6905_v18 = vld [vmem:[%s16660_s5 + $0xdb8] sm:$0xff] }
 0x514   : > { %v12124_v34 = vrot.slane %v8320_v24, %v16870_v4  ;;  %v12119_v8 = vrot.slane %v8317_v1, %v16878_v10  ;;  %v8549_v1 = vsel %vm7234_vm0, %v6904_v35, 0.0 }
 0x516   : > { %v12120_v41 = vsel %vm20357_vm8, %v12119_v8, %v12115_v55  ;;  %8529 = vadd.xlane.f32.xlu1 %v8528_v2  ;;  %8526 = vadd.xlane.f32.xlu0 %v8525_v5  ;;  %vm20358_vm8 = vcmask 786112   ;;  %v8552_v55 = vsel %vm7234_vm0, %v6905_v18, 0.0  ;;  %v6907_v8 = vld [vmem:[%s16660_s5 + $0xdc8] sm:$0xff] }
 0x517   : > { %v8326_v13 = vpop.xlane.xlu1 %8325  ;;  %v12125_v14 = vsel %vm10374_vm9, %v12124_v34, %v12120_v41  ;;  %v8323_v19 = vpop.xlane.xlu0 %8322 }
 0x518   : > { %v12134_v22 = vrot.slane %v8326_v13, %v16886_v20  ;;  %v12129_v27 = vrot.slane %v8323_v19, %v16894_v28  ;;  %v8555_v19 = vsel %vm7234_vm0, %v6906_v6, 0.0 }
 0x51a   : > { %v12130_v29 = vsel %vm10381_vm10, %v12129_v27, %v12125_v14  ;;  %8535 = vadd.xlane.f32.xlu1 %v8534_v49  ;;  %8532 = vadd.xlane.f32.xlu0 %v8531_v21  ;;  %v8558_v14 = vsel %vm7234_vm0, %v6907_v8, 0.0  ;;  %v6909_v21 = vld [vmem:[%s16660_s5 + $0xdd8] sm:$0xff] }
 0x51b   : > { %v8332_v30 = vpop.xlane.xlu1 %8331  ;;  %v12135_v36 = vsel %vm20358_vm8, %v12134_v22, %v12130_v29  ;;  %v8329_v63 = vpop.xlane.xlu0 %8328  ;;  %v6908_v22 = vld [vmem:[%s16660_s5 + $0xdd0] sm:$0xff]  ;;  %vm20359_vm8 = vcmask 589312  }
 0x51c   : > { %v12144_v39 = vrot.slane %v8332_v30, %v16902_v38  ;;  %v12139_v45 = vrot.slane %v8329_v63, %v16908_v42  ;;  %v8564_v30 = vsel %vm7234_vm0, %v6909_v21, 0.0 }
 0x51e   : > { %v12140_v46 = vsel %vm10395_vm12, %v12139_v45, %v12135_v36  ;;  %8541 = vadd.xlane.f32.xlu1 %v8540_v59  ;;  %8538 = vadd.xlane.f32.xlu0 %v8537_v37  ;;  %v8561_v36 = vsel %vm7234_vm0, %v6908_v22, 0.0  ;;  %v6911_v37 = vld [vmem:[%s16660_s5 + $0xde8] sm:$0xff] }
 0x51f   : > { %v8338_v47 = vpop.xlane.xlu1 %8337  ;;  %v12145_v50 = vsel %vm10402_vm13, %v12144_v39, %v12140_v46  ;;  %v8335_v9 = vpop.xlane.xlu0 %8334  ;;  %v6910_v39 = vld [vmem:[%s16660_s5 + $0xde0] sm:$0xff] }
 0x520   : > { %v12154_v52 = vrot.slane %v8338_v47, %v16918_v56  ;;  %v12149_v60 = vrot.slane %v8335_v9, %v16923_v58  ;;  %v8570_v47 = vsel %vm7234_vm0, %v6911_v37, 0.0 }
 0x522   : > { %v12150_v61 = vsel %vm10409_vm14, %v12149_v60, %v12145_v50  ;;  %8547 = vadd.xlane.f32.xlu1 %v8546_v17  ;;  %8544 = vadd.xlane.f32.xlu0 %v8543_v51  ;;  %v8567_v50 = vsel %vm7234_vm0, %v6910_v39, 0.0  ;;  %v6913_v51 = vld [vmem:[%s16660_s5 + $0xdf8] sm:$0xff] }
 0x523   : > { %v12155_v62 = vsel %vm10416_vm15, %v12154_v52, %v12150_v61  ;;  %v8344_v0 = vpop.xlane.xlu1 %8343  ;;  %v8341_v24 = vpop.xlane.xlu0 %8340  ;;  %v6912_v52 = vld [vmem:[%s16660_s5 + $0xdf0] sm:$0xff] }
 0x524   : > { %v18403_v2 = vsel %vm14135_vm11, %v12155_v62, %v18001_v48  ;;  %v12163_v5 = vrot.slane %v8344_v0, %v16820_v26  ;;  %v12159_v34 = vrot.slane %v8341_v24, %v16817_v25  ;;  %v8576_v62 = vsel %vm7234_vm0, %v6913_v51, 0.0 }
 0x525   : > { %v8573_v0 = vsel %vm7234_vm0, %v6912_v52, 0.0 }
 0x526   : > { %v12164_v11 = vsel %vm10318_vm1, %v12163_v5, %v12159_v34  ;;  %8553 = vadd.xlane.f32.xlu1 %v8552_v55  ;;  %8550 = vadd.xlane.f32.xlu0 %v8549_v1  ;;  %v6915_v1 = vld [vmem:[%s16660_s5 + $0xe08] sm:$0xff]  ;;  %v6914_v5 = vld [vmem:[%s16660_s5 + $0xe00] sm:$0xff] }
 0x527   : > { %v8350_v41 = vpop.xlane.xlu1 %8349  ;;  %v8347_v13 = vpop.xlane.xlu0 %8346 }
 0x528   : > { %v12173_v48 = vrot.slane %v8350_v41, %v16830_v32  ;;  %v12168_v49 = vrot.slane %v8347_v13, %v16827_v31  ;;  %v8582_v41 = vsel %vm7234_vm0, %v6915_v1, 0.0  ;;  %v8579_v13 = vsel %vm7234_vm0, %v6914_v5, 0.0  ;;  %v6922_v1 = vld [vmem:[%s16660_s5 + $0xe40] sm:$0xff] }
 0x52a   : > { %v12169_v27 = vsel %vm10325_vm2, %v12168_v49, %v12164_v11  ;;  %8559 = vadd.xlane.f32.xlu1 %v8558_v14  ;;  %8556 = vadd.xlane.f32.xlu0 %v8555_v19  ;;  %v6916_v49 = vld [vmem:[%s16660_s5 + $0xe10] sm:$0xff] }
 0x52b   : > { %v8356_v57 = vpop.xlane.xlu1 %8355  ;;  %v12174_v12 = vsel %vm10332_vm3, %v12173_v48, %v12169_v27  ;;  %v8353_v29 = vpop.xlane.xlu0 %8352  ;;  %v6917_v48 = vld [vmem:[%s16660_s5 + $0xe18] sm:$0xff] }
 0x52c   : > { %v12183_v63 = vrot.slane %v8356_v57, %v16841_v43  ;;  %v12178_v59 = vrot.slane %v8353_v29, %v16844_v44  ;;  %v8585_v29 = vsel %vm7234_vm0, %v6916_v49, 0.0 }
 0x52e   : > { %v12179_v45 = vsel %vm10339_vm4, %v12178_v59, %v12174_v12  ;;  %8565 = vadd.xlane.f32.xlu1 %v8564_v30  ;;  %8562 = vadd.xlane.f32.xlu0 %v8561_v36  ;;  %v8588_v12 = vsel %vm7234_vm0, %v6917_v48, 0.0  ;;  %v6918_v59 = vld [vmem:[%s16660_s5 + $0xe20] sm:$0xff] }
 0x52f   : > { %v8362_v3 = vpop.xlane.xlu1 %8361  ;;  %v12184_v15 = vsel %vm10346_vm5, %v12183_v63, %v12179_v45  ;;  %v8359_v46 = vpop.xlane.xlu0 %8358  ;;  %v6919_v63 = vld [vmem:[%s16660_s5 + $0xe28] sm:$0xff] }
 0x530   : > { %v12193_v9 = vrot.slane %v8362_v3, %v16853_v53  ;;  %v12188_v17 = vrot.slane %v8359_v46, %v16856_v54  ;;  %v8591_v46 = vsel %vm7234_vm0, %v6918_v59, 0.0 }
 0x532   : > { %v12189_v60 = vsel %vm10353_vm6, %v12188_v17, %v12184_v15  ;;  %8571 = vadd.xlane.f32.xlu1 %v8570_v47  ;;  %8568 = vadd.xlane.f32.xlu0 %v8567_v50  ;;  %v8594_v15 = vsel %vm7234_vm0, %v6919_v63, 0.0  ;;  %v6920_v17 = vld [vmem:[%s16660_s5 + $0xe30] sm:$0xff] }
 0x533   : > { %v8368_v18 = vpop.xlane.xlu1 %8367  ;;  %v12194_v35 = vsel %vm10360_vm7, %v12193_v9, %v12189_v60  ;;  %v8365_v61 = vpop.xlane.xlu0 %8364  ;;  %v6921_v9 = vld [vmem:[%s16660_s5 + $0xe38] sm:$0xff] }
 0x534   : > { %v12203_v24 = vrot.slane %v8368_v18, %v16870_v4  ;;  %v12198_v55 = vrot.slane %v8365_v61, %v16878_v10  ;;  %v8597_v61 = vsel %vm7234_vm0, %v6920_v17, 0.0 }
 0x536   : > { %v12199_v34 = vsel %vm20359_vm8, %v12198_v55, %v12194_v35  ;;  %8577 = vadd.xlane.f32.xlu1 %v8576_v62  ;;  %8574 = vadd.xlane.f32.xlu0 %v8573_v0  ;;  %vm20360_vm8 = vcmask 786112   ;;  %v8600_v35 = vsel %vm7234_vm0, %v6921_v9, 0.0  ;;  %v6923_v55 = vld [vmem:[%s16660_s5 + $0xe48] sm:$0xff] }
 0x537   : > { %v8374_v8 = vpop.xlane.xlu1 %8373  ;;  %v12204_v6 = vsel %vm10374_vm9, %v12203_v24, %v12199_v34  ;;  %v8371_v11 = vpop.xlane.xlu0 %8370 }
 0x538   : > { %v12213_v14 = vrot.slane %v8374_v8, %v16886_v20  ;;  %v12208_v19 = vrot.slane %v8371_v11, %v16894_v28  ;;  %v8603_v11 = vsel %vm7234_vm0, %v6922_v1, 0.0 }
 0x53a   : > { %v12209_v21 = vsel %vm10381_vm10, %v12208_v19, %v12204_v6  ;;  %8583 = vadd.xlane.f32.xlu1 %v8582_v41  ;;  %8580 = vadd.xlane.f32.xlu0 %v8579_v13  ;;  %v8606_v6 = vsel %vm7234_vm0, %v6923_v55, 0.0  ;;  %v6925_v13 = vld [vmem:[%s16660_s5 + $0xe58] sm:$0xff] }
 0x53b   : > { %v8380_v22 = vpop.xlane.xlu1 %8379  ;;  %v12214_v27 = vsel %vm20360_vm8, %v12213_v14, %v12209_v21  ;;  %v8377_v57 = vpop.xlane.xlu0 %8376  ;;  %v6924_v14 = vld [vmem:[%s16660_s5 + $0xe50] sm:$0xff] }
 0x53c   : > { %v12223_v30 = vrot.slane %v8380_v22, %v16902_v38  ;;  %v12218_v36 = vrot.slane %v8377_v57, %v16908_v42  ;;  %v8612_v22 = vsel %vm7234_vm0, %v6925_v13, 0.0 }
 0x53e   : > { %v12219_v37 = vsel %vm10395_vm12, %v12218_v36, %v12214_v27  ;;  %8589 = vadd.xlane.f32.xlu1 %v8588_v12  ;;  %8586 = vadd.xlane.f32.xlu0 %v8585_v29  ;;  %v8609_v27 = vsel %vm7234_vm0, %v6924_v14, 0.0  ;;  %v6927_v29 = vld [vmem:[%s16660_s5 + $0xe68] sm:$0xff] }
 0x53f   : > { %v8386_v39 = vpop.xlane.xlu1 %8385  ;;  %v12224_v45 = vsel %vm10402_vm13, %v12223_v30, %v12219_v37  ;;  %v8383_v3 = vpop.xlane.xlu0 %8382  ;;  %v6926_v30 = vld [vmem:[%s16660_s5 + $0xe60] sm:$0xff] }
 0x540   : > { %v12233_v47 = vrot.slane %v8386_v39, %v16918_v56  ;;  %v12228_v50 = vrot.slane %v8383_v3, %v16923_v58  ;;  %v8618_v39 = vsel %vm7234_vm0, %v6927_v29, 0.0 }
 0x542   : > { %v12229_v51 = vsel %vm10409_vm14, %v12228_v50, %v12224_v45  ;;  %8595 = vadd.xlane.f32.xlu1 %v8594_v15  ;;  %8592 = vadd.xlane.f32.xlu0 %v8591_v46  ;;  %v8615_v45 = vsel %vm7234_vm0, %v6926_v30, 0.0  ;;  %v6929_v46 = vld [vmem:[%s16660_s5 + $0xe78] sm:$0xff] }
 0x543   : > { %v12234_v52 = vsel %vm10416_vm15, %v12233_v47, %v12229_v51  ;;  %v8392_v60 = vpop.xlane.xlu1 %8391  ;;  %v8389_v18 = vpop.xlane.xlu0 %8388  ;;  %v6928_v47 = vld [vmem:[%s16660_s5 + $0xe70] sm:$0xff] }
 0x544   : > { %v18470_v62 = vsel %vm14135_vm11, %v12234_v52, %v18068_v40  ;;  %v12242_v0 = vrot.slane %v8392_v60, %v16820_v26  ;;  %v12238_v24 = vrot.slane %v8389_v18, %v16817_v25  ;;  %v8624_v52 = vsel %vm7234_vm0, %v6929_v46, 0.0 }
 0x545   : > { %v8621_v60 = vsel %vm7234_vm0, %v6928_v47, 0.0  ;;  %vm20361_vm11 = vcmask 589312  }
 0x546   : > { %v12243_v5 = vsel %vm10318_vm1, %v12242_v0, %v12238_v24  ;;  %8601 = vadd.xlane.f32.xlu1 %v8600_v35  ;;  %8598 = vadd.xlane.f32.xlu0 %v8597_v61  ;;  %v6931_v61 = vld [vmem:[%s16660_s5 + $0xe88] sm:$0xff]  ;;  %v6930_v0 = vld [vmem:[%s16660_s5 + $0xe80] sm:$0xff] }
 0x547   : > { %v8398_v34 = vpop.xlane.xlu1 %8397  ;;  %v8395_v8 = vpop.xlane.xlu0 %8394 }
 0x548   : > { %v12252_v40 = vrot.slane %v8398_v34, %v16830_v32  ;;  %v12247_v41 = vrot.slane %v8395_v8, %v16827_v31  ;;  %v8630_v34 = vsel %vm7234_vm0, %v6931_v61, 0.0  ;;  %v8627_v8 = vsel %vm7234_vm0, %v6930_v0, 0.0  ;;  %v6938_v61 = vld [vmem:[%s16660_s5 + $0xec0] sm:$0xff] }
 0x54a   : > { %v12248_v19 = vsel %vm10325_vm2, %v12247_v41, %v12243_v5  ;;  %8607 = vadd.xlane.f32.xlu1 %v8606_v6  ;;  %8604 = vadd.xlane.f32.xlu0 %v8603_v11  ;;  %v6932_v41 = vld [vmem:[%s16660_s5 + $0xe90] sm:$0xff] }
 0x54b   : > { %v8404_v48 = vpop.xlane.xlu1 %8403  ;;  %v12253_v49 = vsel %vm10332_vm3, %v12252_v40, %v12248_v19  ;;  %v8401_v21 = vpop.xlane.xlu0 %8400  ;;  %v6933_v40 = vld [vmem:[%s16660_s5 + $0xe98] sm:$0xff] }
 0x54c   : > { %v12262_v57 = vrot.slane %v8404_v48, %v16841_v43  ;;  %v12257_v12 = vrot.slane %v8401_v21, %v16844_v44  ;;  %v8633_v21 = vsel %vm7234_vm0, %v6932_v41, 0.0 }
 0x54e   : > { %v12258_v36 = vsel %vm10339_vm4, %v12257_v12, %v12253_v49  ;;  %8613 = vadd.xlane.f32.xlu1 %v8612_v22  ;;  %8610 = vadd.xlane.f32.xlu0 %v8609_v27  ;;  %v8636_v49 = vsel %vm7234_vm0, %v6933_v40, 0.0  ;;  %v6934_v12 = vld [vmem:[%s16660_s5 + $0xea0] sm:$0xff] }
 0x54f   : > { %v8410_v63 = vpop.xlane.xlu1 %8409  ;;  %v12263_v59 = vsel %vm10346_vm5, %v12262_v57, %v12258_v36  ;;  %v8407_v37 = vpop.xlane.xlu0 %8406  ;;  %v6935_v57 = vld [vmem:[%s16660_s5 + $0xea8] sm:$0xff] }
 0x550   : > { %v12272_v3 = vrot.slane %v8410_v63, %v16853_v53  ;;  %v12267_v15 = vrot.slane %v8407_v37, %v16856_v54  ;;  %v8639_v37 = vsel %vm7234_vm0, %v6934_v12, 0.0 }
 0x552   : > { %v12268_v50 = vsel %vm10353_vm6, %v12267_v15, %v12263_v59  ;;  %8619 = vadd.xlane.f32.xlu1 %v8618_v39  ;;  %8616 = vadd.xlane.f32.xlu0 %v8615_v45  ;;  %v8642_v59 = vsel %vm7234_vm0, %v6935_v57, 0.0  ;;  %v6936_v15 = vld [vmem:[%s16660_s5 + $0xeb0] sm:$0xff] }
 0x553   : > { %v8416_v9 = vpop.xlane.xlu1 %8415  ;;  %v12273_v17 = vsel %vm10360_vm7, %v12272_v3, %v12268_v50  ;;  %v8413_v51 = vpop.xlane.xlu0 %8412  ;;  %v6937_v3 = vld [vmem:[%s16660_s5 + $0xeb8] sm:$0xff] }
 0x554   : > { %v12282_v18 = vrot.slane %v8416_v9, %v16870_v4  ;;  %v12277_v35 = vrot.slane %v8413_v51, %v16878_v10  ;;  %v8645_v51 = vsel %vm7234_vm0, %v6936_v15, 0.0 }
 0x556   : > { %v12278_v24 = vsel %vm20361_vm11, %v12277_v35, %v12273_v17  ;;  %8625 = vadd.xlane.f32.xlu1 %v8624_v52  ;;  %8622 = vadd.xlane.f32.xlu0 %v8621_v60  ;;  %vm14137_vm11 = vcmask 1044484   ;;  %v8648_v17 = vsel %vm7234_vm0, %v6937_v3, 0.0  ;;  %v6939_v35 = vld [vmem:[%s16660_s5 + $0xec8] sm:$0xff] }
 0x557   : > { %v8422_v55 = vpop.xlane.xlu1 %8421  ;;  %v12283_v1 = vsel %vm10374_vm9, %v12282_v18, %v12278_v24  ;;  %v8419_v5 = vpop.xlane.xlu0 %8418 }
 0x558   : > { %v12292_v6 = vrot.slane %v8422_v55, %v16886_v20  ;;  %v12287_v11 = vrot.slane %v8419_v5, %v16894_v28  ;;  %v8651_v5 = vsel %vm7234_vm0, %v6938_v61, 0.0 }
 0x55a   : > { %v12288_v13 = vsel %vm10381_vm10, %v12287_v11, %v12283_v1  ;;  %8631 = vadd.xlane.f32.xlu1 %v8630_v34  ;;  %8628 = vadd.xlane.f32.xlu0 %v8627_v8  ;;  %v8654_v1 = vsel %vm7234_vm0, %v6939_v35, 0.0  ;;  %v6941_v8 = vld [vmem:[%s16660_s5 + $0xed8] sm:$0xff] }
 0x55b   : > { %v8428_v14 = vpop.xlane.xlu1 %8427  ;;  %v12293_v19 = vsel %vm20360_vm8, %v12292_v6, %v12288_v13  ;;  %v8425_v48 = vpop.xlane.xlu0 %8424  ;;  %v6940_v6 = vld [vmem:[%s16660_s5 + $0xed0] sm:$0xff]  ;;  %vm20362_vm8 = vcmask 589312  }
 0x55c   : > { %v12302_v22 = vrot.slane %v8428_v14, %v16902_v38  ;;  %v12297_v27 = vrot.slane %v8425_v48, %v16908_v42  ;;  %v8660_v14 = vsel %vm7234_vm0, %v6941_v8, 0.0 }
 0x55e   : > { %v12298_v29 = vsel %vm10395_vm12, %v12297_v27, %v12293_v19  ;;  %8637 = vadd.xlane.f32.xlu1 %v8636_v49  ;;  %8634 = vadd.xlane.f32.xlu0 %v8633_v21  ;;  %v8657_v19 = vsel %vm7234_vm0, %v6940_v6, 0.0  ;;  %v6943_v21 = vld [vmem:[%s16660_s5 + $0xee8] sm:$0xff] }
 0x55f   : > { %v8434_v30 = vpop.xlane.xlu1 %8433  ;;  %v12303_v36 = vsel %vm10402_vm13, %v12302_v22, %v12298_v29  ;;  %v8431_v63 = vpop.xlane.xlu0 %8430  ;;  %v6942_v22 = vld [vmem:[%s16660_s5 + $0xee0] sm:$0xff] }
 0x560   : > { %v12312_v39 = vrot.slane %v8434_v30, %v16918_v56  ;;  %v12307_v45 = vrot.slane %v8431_v63, %v16923_v58  ;;  %v8666_v30 = vsel %vm7234_vm0, %v6943_v21, 0.0 }
 0x562   : > { %v12308_v46 = vsel %vm10409_vm14, %v12307_v45, %v12303_v36  ;;  %8643 = vadd.xlane.f32.xlu1 %v8642_v59  ;;  %8640 = vadd.xlane.f32.xlu0 %v8639_v37  ;;  %v8663_v36 = vsel %vm7234_vm0, %v6942_v22, 0.0  ;;  %v6945_v37 = vld [vmem:[%s16660_s5 + $0xef8] sm:$0xff] }
 0x563   : > { %v12313_v47 = vsel %vm10416_vm15, %v12312_v39, %v12308_v46  ;;  %v8440_v50 = vpop.xlane.xlu1 %8439  ;;  %v8437_v9 = vpop.xlane.xlu0 %8436  ;;  %v6944_v39 = vld [vmem:[%s16660_s5 + $0xef0] sm:$0xff] }
 0x564   : > { %v18537_v52 = vsel %vm14137_vm11, %v12313_v47, %v18135_v33  ;;  %v12321_v60 = vrot.slane %v8440_v50, %v16820_v26  ;;  %v12317_v18 = vrot.slane %v8437_v9, %v16817_v25  ;;  %v8672_v47 = vsel %vm7234_vm0, %v6945_v37, 0.0 }
 0x565   : > { %v8669_v50 = vsel %vm7234_vm0, %v6944_v39, 0.0 }
 0x566   : > { %v12322_v0 = vsel %vm10318_vm1, %v12321_v60, %v12317_v18  ;;  %8649 = vadd.xlane.f32.xlu1 %v8648_v17  ;;  %8646 = vadd.xlane.f32.xlu0 %v8645_v51  ;;  %v6947_v51 = vld [vmem:[%s16660_s5 + $0xf08] sm:$0xff]  ;;  %v6946_v60 = vld [vmem:[%s16660_s5 + $0xf00] sm:$0xff] }
 0x567   : > { %v8446_v24 = vpop.xlane.xlu1 %8445  ;;  %v8443_v55 = vpop.xlane.xlu0 %8442 }
 0x568   : > { %v12331_v33 = vrot.slane %v8446_v24, %v16830_v32  ;;  %v12326_v34 = vrot.slane %v8443_v55, %v16827_v31  ;;  %v8678_v24 = vsel %vm7234_vm0, %v6947_v51, 0.0  ;;  %v8675_v55 = vsel %vm7234_vm0, %v6946_v60, 0.0  ;;  %v6954_v51 = vld [vmem:[%s16660_s5 + $0xf40] sm:$0xff] }
 0x56a   : > { %v12327_v11 = vsel %vm10325_vm2, %v12326_v34, %v12322_v0  ;;  %8655 = vadd.xlane.f32.xlu1 %v8654_v1  ;;  %8652 = vadd.xlane.f32.xlu0 %v8651_v5  ;;  %v6948_v34 = vld [vmem:[%s16660_s5 + $0xf10] sm:$0xff] }
 0x56b   : > { %v8452_v40 = vpop.xlane.xlu1 %8451  ;;  %v12332_v41 = vsel %vm10332_vm3, %v12331_v33, %v12327_v11  ;;  %v8449_v13 = vpop.xlane.xlu0 %8448  ;;  %v6949_v33 = vld [vmem:[%s16660_s5 + $0xf18] sm:$0xff] }
 0x56c   : > { %v12341_v48 = vrot.slane %v8452_v40, %v16841_v43  ;;  %v12336_v49 = vrot.slane %v8449_v13, %v16844_v44  ;;  %v8681_v13 = vsel %vm7234_vm0, %v6948_v34, 0.0 }
 0x56e   : > { %v12337_v27 = vsel %vm10339_vm4, %v12336_v49, %v12332_v41  ;;  %8661 = vadd.xlane.f32.xlu1 %v8660_v14  ;;  %8658 = vadd.xlane.f32.xlu0 %v8657_v19  ;;  %v8684_v41 = vsel %vm7234_vm0, %v6949_v33, 0.0  ;;  %v6950_v49 = vld [vmem:[%s16660_s5 + $0xf20] sm:$0xff] }
 0x56f   : > { %v8458_v57 = vpop.xlane.xlu1 %8457  ;;  %v12342_v12 = vsel %vm10346_vm5, %v12341_v48, %v12337_v27  ;;  %v8455_v29 = vpop.xlane.xlu0 %8454  ;;  %v6951_v48 = vld [vmem:[%s16660_s5 + $0xf28] sm:$0xff] }
 0x570   : > { %v12351_v63 = vrot.slane %v8458_v57, %v16853_v53  ;;  %v12346_v59 = vrot.slane %v8455_v29, %v16856_v54  ;;  %v8687_v29 = vsel %vm7234_vm0, %v6950_v49, 0.0 }
 0x572   : > { %v12347_v45 = vsel %vm10353_vm6, %v12346_v59, %v12342_v12  ;;  %8667 = vadd.xlane.f32.xlu1 %v8666_v30  ;;  %8664 = vadd.xlane.f32.xlu0 %v8663_v36  ;;  %v8690_v12 = vsel %vm7234_vm0, %v6951_v48, 0.0  ;;  %v6952_v59 = vld [vmem:[%s16660_s5 + $0xf30] sm:$0xff] }
 0x573   : > { %v8464_v3 = vpop.xlane.xlu1 %8463  ;;  %v12352_v15 = vsel %vm10360_vm7, %v12351_v63, %v12347_v45  ;;  %v8461_v46 = vpop.xlane.xlu0 %8460  ;;  %v6953_v63 = vld [vmem:[%s16660_s5 + $0xf38] sm:$0xff] }
 0x574   : > { %v12361_v9 = vrot.slane %v8464_v3, %v16870_v4  ;;  %v12356_v17 = vrot.slane %v8461_v46, %v16878_v10  ;;  %v8693_v46 = vsel %vm7234_vm0, %v6952_v59, 0.0 }
 0x576   : > { %v12357_v18 = vsel %vm20362_vm8, %v12356_v17, %v12352_v15  ;;  %8673 = vadd.xlane.f32.xlu1 %v8672_v47  ;;  %8670 = vadd.xlane.f32.xlu0 %v8669_v50  ;;  %vm20363_vm8 = vcmask 786112   ;;  %v8696_v15 = vsel %vm7234_vm0, %v6953_v63, 0.0  ;;  %v6955_v17 = vld [vmem:[%s16660_s5 + $0xf48] sm:$0xff] }
 0x577   : > { %v8470_v35 = vpop.xlane.xlu1 %8469  ;;  %v12362_v61 = vsel %vm10374_vm9, %v12361_v9, %v12357_v18  ;;  %v8467_v0 = vpop.xlane.xlu0 %8466 }
 0x578   : > { %v12371_v1 = vrot.slane %v8470_v35, %v16886_v20  ;;  %v12366_v5 = vrot.slane %v8467_v0, %v16894_v28  ;;  %v8699_v0 = vsel %vm7234_vm0, %v6954_v51, 0.0 }
 0x57a   : > { %v12367_v8 = vsel %vm10381_vm10, %v12366_v5, %v12362_v61  ;;  %8679 = vadd.xlane.f32.xlu1 %v8678_v24  ;;  %8676 = vadd.xlane.f32.xlu0 %v8675_v55  ;;  %v8702_v61 = vsel %vm7234_vm0, %v6955_v17, 0.0  ;;  %v6957_v55 = vld [vmem:[%s16660_s5 + $0xf58] sm:$0xff] }
 0x57b   : > { %v8476_v6 = vpop.xlane.xlu1 %8475  ;;  %v12372_v11 = vsel %vm20363_vm8, %v12371_v1, %v12367_v8  ;;  %v8473_v40 = vpop.xlane.xlu0 %8472  ;;  %v6956_v1 = vld [vmem:[%s16660_s5 + $0xf50] sm:$0xff]  ;;  %vm20364_vm8 = vcmask 589312  }
 0x57c   : > { %v12381_v14 = vrot.slane %v8476_v6, %v16902_v38  ;;  %v12376_v19 = vrot.slane %v8473_v40, %v16908_v42  ;;  %v8708_v6 = vsel %vm7234_vm0, %v6957_v55, 0.0 }
 0x57e   : > { %v12377_v21 = vsel %vm10395_vm12, %v12376_v19, %v12372_v11  ;;  %8685 = vadd.xlane.f32.xlu1 %v8684_v41  ;;  %8682 = vadd.xlane.f32.xlu0 %v8681_v13  ;;  %v8705_v11 = vsel %vm7234_vm0, %v6956_v1, 0.0  ;;  %v6959_v13 = vld [vmem:[%s16660_s5 + $0xf68] sm:$0xff] }
 0x57f   : > { %v8482_v22 = vpop.xlane.xlu1 %8481  ;;  %v12382_v27 = vsel %vm10402_vm13, %v12381_v14, %v12377_v21  ;;  %v8479_v57 = vpop.xlane.xlu0 %8478  ;;  %v6958_v14 = vld [vmem:[%s16660_s5 + $0xf60] sm:$0xff] }
 0x580   : > { %v12391_v30 = vrot.slane %v8482_v22, %v16918_v56  ;;  %v12386_v36 = vrot.slane %v8479_v57, %v16923_v58  ;;  %v8714_v22 = vsel %vm7234_vm0, %v6959_v13, 0.0 }
 0x582   : > { %v12387_v37 = vsel %vm10409_vm14, %v12386_v36, %v12382_v27  ;;  %8691 = vadd.xlane.f32.xlu1 %v8690_v12  ;;  %8688 = vadd.xlane.f32.xlu0 %v8687_v29  ;;  %v8711_v27 = vsel %vm7234_vm0, %v6958_v14, 0.0  ;;  %v6961_v29 = vld [vmem:[%s16660_s5 + $0xf78] sm:$0xff] }
 0x583   : > { %v12392_v39 = vsel %vm10416_vm15, %v12391_v30, %v12387_v37  ;;  %v8488_v45 = vpop.xlane.xlu1 %8487  ;;  %v8485_v3 = vpop.xlane.xlu0 %8484  ;;  %v6960_v30 = vld [vmem:[%s16660_s5 + $0xf70] sm:$0xff] }
 0x584   : > { %v18604_v47 = vsel %vm14137_vm11, %v12392_v39, %v18202_v23  ;;  %v12400_v50 = vrot.slane %v8488_v45, %v16820_v26  ;;  %v12396_v9 = vrot.slane %v8485_v3, %v16817_v25  ;;  %v8720_v39 = vsel %vm7234_vm0, %v6961_v29, 0.0 }
 0x585   : > { %v8717_v45 = vsel %vm7234_vm0, %v6960_v30, 0.0 }
 0x586   : > { %v12401_v60 = vsel %vm10318_vm1, %v12400_v50, %v12396_v9  ;;  %8697 = vadd.xlane.f32.xlu1 %v8696_v15  ;;  %8694 = vadd.xlane.f32.xlu0 %v8693_v46  ;;  %v6963_v46 = vld [vmem:[%s16660_s5 + $0xf88] sm:$0xff]  ;;  %v6962_v50 = vld [vmem:[%s16660_s5 + $0xf80] sm:$0xff] }
 0x587   : > { %v8494_v18 = vpop.xlane.xlu1 %8493  ;;  %v8491_v35 = vpop.xlane.xlu0 %8490 }
 0x588   : > { %v12410_v23 = vrot.slane %v8494_v18, %v16830_v32  ;;  %v12405_v24 = vrot.slane %v8491_v35, %v16827_v31  ;;  %v8726_v18 = vsel %vm7234_vm0, %v6963_v46, 0.0  ;;  %v8723_v35 = vsel %vm7234_vm0, %v6962_v50, 0.0  ;;  %v6970_v46 = vld [vmem:[%s16660_s5 + $0xfc0] sm:$0xff] }
 0x58a   : > { %v12406_v5 = vsel %vm10325_vm2, %v12405_v24, %v12401_v60  ;;  %8703 = vadd.xlane.f32.xlu1 %v8702_v61  ;;  %8700 = vadd.xlane.f32.xlu0 %v8699_v0  ;;  %v6964_v24 = vld [vmem:[%s16660_s5 + $0xf90] sm:$0xff] }
 0x58b   : > { %v8500_v33 = vpop.xlane.xlu1 %8499  ;;  %v12411_v34 = vsel %vm10332_vm3, %v12410_v23, %v12406_v5  ;;  %v8497_v8 = vpop.xlane.xlu0 %8496  ;;  %v6965_v23 = vld [vmem:[%s16660_s5 + $0xf98] sm:$0xff] }
 0x58c   : > { %v12420_v40 = vrot.slane %v8500_v33, %v16841_v43  ;;  %v12415_v41 = vrot.slane %v8497_v8, %v16844_v44  ;;  %v8729_v8 = vsel %vm7234_vm0, %v6964_v24, 0.0 }
 0x58e   : > { %v12416_v19 = vsel %vm10339_vm4, %v12415_v41, %v12411_v34  ;;  %8709 = vadd.xlane.f32.xlu1 %v8708_v6  ;;  %8706 = vadd.xlane.f32.xlu0 %v8705_v11  ;;  %v8732_v34 = vsel %vm7234_vm0, %v6965_v23, 0.0  ;;  %v6966_v41 = vld [vmem:[%s16660_s5 + $0xfa0] sm:$0xff] }
 0x58f   : > { %v8506_v48 = vpop.xlane.xlu1 %8505  ;;  %v12421_v49 = vsel %vm10346_vm5, %v12420_v40, %v12416_v19  ;;  %v8503_v21 = vpop.xlane.xlu0 %8502  ;;  %v6967_v40 = vld [vmem:[%s16660_s5 + $0xfa8] sm:$0xff] }
 0x590   : > { %v12430_v57 = vrot.slane %v8506_v48, %v16853_v53  ;;  %v12425_v12 = vrot.slane %v8503_v21, %v16856_v54  ;;  %v8735_v21 = vsel %vm7234_vm0, %v6966_v41, 0.0 }
 0x592   : > { %v12426_v36 = vsel %vm10353_vm6, %v12425_v12, %v12421_v49  ;;  %8715 = vadd.xlane.f32.xlu1 %v8714_v22  ;;  %8712 = vadd.xlane.f32.xlu0 %v8711_v27  ;;  %v8738_v49 = vsel %vm7234_vm0, %v6967_v40, 0.0  ;;  %v6968_v12 = vld [vmem:[%s16660_s5 + $0xfb0] sm:$0xff] }
 0x593   : > { %v8512_v63 = vpop.xlane.xlu1 %8511  ;;  %v12431_v59 = vsel %vm10360_vm7, %v12430_v57, %v12426_v36  ;;  %v8509_v37 = vpop.xlane.xlu0 %8508  ;;  %v6969_v57 = vld [vmem:[%s16660_s5 + $0xfb8] sm:$0xff] }
 0x594   : > { %v12440_v3 = vrot.slane %v8512_v63, %v16870_v4  ;;  %v12435_v15 = vrot.slane %v8509_v37, %v16878_v10  ;;  %v8741_v37 = vsel %vm7234_vm0, %v6968_v12, 0.0 }
 0x596   : > { %v12436_v9 = vsel %vm20364_vm8, %v12435_v15, %v12431_v59  ;;  %8721 = vadd.xlane.f32.xlu1 %v8720_v39  ;;  %8718 = vadd.xlane.f32.xlu0 %v8717_v45  ;;  %vm20365_vm8 = vcmask 786112   ;;  %v8744_v59 = vsel %vm7234_vm0, %v6969_v57, 0.0  ;;  %v6971_v15 = vld [vmem:[%s16660_s5 + $0xfc8] sm:$0xff] }
 0x597   : > { %v8518_v17 = vpop.xlane.xlu1 %8517  ;;  %v12441_v51 = vsel %vm10374_vm9, %v12440_v3, %v12436_v9  ;;  %v8515_v60 = vpop.xlane.xlu0 %8514 }
 0x598   : > { %v12450_v61 = vrot.slane %v8518_v17, %v16886_v20  ;;  %v12445_v0 = vrot.slane %v8515_v60, %v16894_v28  ;;  %v8747_v60 = vsel %vm7234_vm0, %v6970_v46, 0.0 }
 0x59a   : > { %v12446_v55 = vsel %vm10381_vm10, %v12445_v0, %v12441_v51  ;;  %8727 = vadd.xlane.f32.xlu1 %v8726_v18  ;;  %8724 = vadd.xlane.f32.xlu0 %v8723_v35  ;;  %v8750_v51 = vsel %vm7234_vm0, %v6971_v15, 0.0  ;;  %v6973_v35 = vld [vmem:[%s16660_s5 + $0xfd8] sm:$0xff] }
 0x59b   : > { %v8524_v1 = vpop.xlane.xlu1 %8523  ;;  %v12451_v5 = vsel %vm20365_vm8, %v12450_v61, %v12446_v55  ;;  %v8521_v33 = vpop.xlane.xlu0 %8520  ;;  %v6972_v61 = vld [vmem:[%s16660_s5 + $0xfd0] sm:$0xff]  ;;  %vm20366_vm8 = vcmask 589312  }
 0x59c   : > { %v12460_v6 = vrot.slane %v8524_v1, %v16902_v38  ;;  %v12455_v11 = vrot.slane %v8521_v33, %v16908_v42  ;;  %v8756_v1 = vsel %vm7234_vm0, %v6973_v35, 0.0 }
 0x59e   : > { %v12456_v13 = vsel %vm10395_vm12, %v12455_v11, %v12451_v5  ;;  %8733 = vadd.xlane.f32.xlu1 %v8732_v34  ;;  %8730 = vadd.xlane.f32.xlu0 %v8729_v8  ;;  %v8753_v5 = vsel %vm7234_vm0, %v6972_v61, 0.0  ;;  %v6975_v8 = vld [vmem:[%s16660_s5 + $0xfe8] sm:$0xff] }
 0x59f   : > { %v8530_v14 = vpop.xlane.xlu1 %8529  ;;  %v12461_v19 = vsel %vm10402_vm13, %v12460_v6, %v12456_v13  ;;  %v8527_v48 = vpop.xlane.xlu0 %8526  ;;  %v6974_v6 = vld [vmem:[%s16660_s5 + $0xfe0] sm:$0xff] }
 0x5a0   : > { %v12470_v22 = vrot.slane %v8530_v14, %v16918_v56  ;;  %v12465_v27 = vrot.slane %v8527_v48, %v16923_v58  ;;  %v8762_v14 = vsel %vm7234_vm0, %v6975_v8, 0.0 }
 0x5a2   : > { %v12466_v29 = vsel %vm10409_vm14, %v12465_v27, %v12461_v19  ;;  %8739 = vadd.xlane.f32.xlu1 %v8738_v49  ;;  %8736 = vadd.xlane.f32.xlu0 %v8735_v21  ;;  %v8759_v19 = vsel %vm7234_vm0, %v6974_v6, 0.0  ;;  %v6977_v21 = vld [vmem:[%s16660_s5 + $0xff8] sm:$0xff] }
 0x5a3   : > { %v12471_v30 = vsel %vm10416_vm15, %v12470_v22, %v12466_v29  ;;  %v8536_v36 = vpop.xlane.xlu1 %8535  ;;  %v8533_v63 = vpop.xlane.xlu0 %8532  ;;  %v6976_v22 = vld [vmem:[%s16660_s5 + $0xff0] sm:$0xff] }
 0x5a4   : > { %v18671_v39 = vsel %vm14137_vm11, %v12471_v30, %v18269_v16  ;;  %v12479_v45 = vrot.slane %v8536_v36, %v16820_v26  ;;  %v12475_v3 = vrot.slane %v8533_v63, %v16817_v25  ;;  %v8768_v30 = vsel %vm7234_vm0, %v6977_v21, 0.0 }
 0x5a5   : > { %v8765_v36 = vsel %vm7234_vm0, %v6976_v22, 0.0 }
 0x5a6   : > { %v12480_v50 = vsel %vm10318_vm1, %v12479_v45, %v12475_v3  ;;  %8745 = vadd.xlane.f32.xlu1 %v8744_v59  ;;  %8742 = vadd.xlane.f32.xlu0 %v8741_v37  ;;  %v6979_v37 = vld [vmem:[%s16660_s5 + $0x1008] sm:$0xff]  ;;  %v6978_v45 = vld [vmem:[%s16660_s5 + $0x1000] sm:$0xff] }
 0x5a7   : > { %v8542_v9 = vpop.xlane.xlu1 %8541  ;;  %v8539_v17 = vpop.xlane.xlu0 %8538 }
 0x5a8   : > { %v12489_v16 = vrot.slane %v8542_v9, %v16830_v32  ;;  %v12484_v18 = vrot.slane %v8539_v17, %v16827_v31  ;;  %v8774_v9 = vsel %vm7234_vm0, %v6979_v37, 0.0  ;;  %v8771_v17 = vsel %vm7234_vm0, %v6978_v45, 0.0  ;;  %v6986_v37 = vld [vmem:[%s16660_s5 + $0x1040] sm:$0xff] }
 0x5aa   : > { %v12485_v0 = vsel %vm10325_vm2, %v12484_v18, %v12480_v50  ;;  %8751 = vadd.xlane.f32.xlu1 %v8750_v51  ;;  %8748 = vadd.xlane.f32.xlu0 %v8747_v60  ;;  %v6980_v18 = vld [vmem:[%s16660_s5 + $0x1010] sm:$0xff] }
 0x5ab   : > { %v8548_v23 = vpop.xlane.xlu1 %8547  ;;  %v12490_v24 = vsel %vm10332_vm3, %v12489_v16, %v12485_v0  ;;  %v8545_v55 = vpop.xlane.xlu0 %8544  ;;  %v6981_v16 = vld [vmem:[%s16660_s5 + $0x1018] sm:$0xff] }
 0x5ac   : > { %v12499_v33 = vrot.slane %v8548_v23, %v16841_v43  ;;  %v12494_v34 = vrot.slane %v8545_v55, %v16844_v44  ;;  %v8777_v55 = vsel %vm7234_vm0, %v6980_v18, 0.0 }
 0x5ae   : > { %v12495_v11 = vsel %vm10339_vm4, %v12494_v34, %v12490_v24  ;;  %8757 = vadd.xlane.f32.xlu1 %v8756_v1  ;;  %8754 = vadd.xlane.f32.xlu0 %v8753_v5  ;;  %v8780_v24 = vsel %vm7234_vm0, %v6981_v16, 0.0  ;;  %v6982_v34 = vld [vmem:[%s16660_s5 + $0x1020] sm:$0xff] }
 0x5af   : > { %v8554_v40 = vpop.xlane.xlu1 %8553  ;;  %v12500_v41 = vsel %vm10346_vm5, %v12499_v33, %v12495_v11  ;;  %v8551_v13 = vpop.xlane.xlu0 %8550  ;;  %v6983_v33 = vld [vmem:[%s16660_s5 + $0x1028] sm:$0xff] }
 0x5b0   : > { %v12509_v48 = vrot.slane %v8554_v40, %v16853_v53  ;;  %v12504_v49 = vrot.slane %v8551_v13, %v16856_v54  ;;  %v8783_v13 = vsel %vm7234_vm0, %v6982_v34, 0.0 }
 0x5b2   : > { %v12505_v27 = vsel %vm10353_vm6, %v12504_v49, %v12500_v41  ;;  %8763 = vadd.xlane.f32.xlu1 %v8762_v14  ;;  %8760 = vadd.xlane.f32.xlu0 %v8759_v19  ;;  %v8786_v41 = vsel %vm7234_vm0, %v6983_v33, 0.0  ;;  %v6984_v49 = vld [vmem:[%s16660_s5 + $0x1030] sm:$0xff] }
 0x5b3   : > { %v8560_v57 = vpop.xlane.xlu1 %8559  ;;  %v12510_v12 = vsel %vm10360_vm7, %v12509_v48, %v12505_v27  ;;  %v8557_v29 = vpop.xlane.xlu0 %8556  ;;  %v6985_v48 = vld [vmem:[%s16660_s5 + $0x1038] sm:$0xff] }
 0x5b4   : > { %v12519_v63 = vrot.slane %v8560_v57, %v16870_v4  ;;  %v12514_v59 = vrot.slane %v8557_v29, %v16878_v10  ;;  %v8789_v29 = vsel %vm7234_vm0, %v6984_v49, 0.0 }
 0x5b6   : > { %v12515_v3 = vsel %vm20366_vm8, %v12514_v59, %v12510_v12  ;;  %8769 = vadd.xlane.f32.xlu1 %v8768_v30  ;;  %8766 = vadd.xlane.f32.xlu0 %v8765_v36  ;;  %vm20367_vm8 = vcmask 786112   ;;  %v8792_v12 = vsel %vm7234_vm0, %v6985_v48, 0.0  ;;  %v6987_v59 = vld [vmem:[%s16660_s5 + $0x1048] sm:$0xff] }
 0x5b7   : > { %v8566_v15 = vpop.xlane.xlu1 %8565  ;;  %v12520_v46 = vsel %vm10374_vm9, %v12519_v63, %v12515_v3  ;;  %v8563_v50 = vpop.xlane.xlu0 %8562 }
 0x5b8   : > { %v12529_v51 = vrot.slane %v8566_v15, %v16886_v20  ;;  %v12524_v60 = vrot.slane %v8563_v50, %v16894_v28  ;;  %v8795_v50 = vsel %vm7234_vm0, %v6986_v37, 0.0 }
 0x5ba   : > { %v12525_v35 = vsel %vm10381_vm10, %v12524_v60, %v12520_v46  ;;  %8775 = vadd.xlane.f32.xlu1 %v8774_v9  ;;  %8772 = vadd.xlane.f32.xlu0 %v8771_v17  ;;  %v8798_v46 = vsel %vm7234_vm0, %v6987_v59, 0.0  ;;  %v6989_v17 = vld [vmem:[%s16660_s5 + $0x1058] sm:$0xff] }
 0x5bb   : > { %v8572_v61 = vpop.xlane.xlu1 %8571  ;;  %v12530_v0 = vsel %vm20367_vm8, %v12529_v51, %v12525_v35  ;;  %v8569_v23 = vpop.xlane.xlu0 %8568  ;;  %v6988_v51 = vld [vmem:[%s16660_s5 + $0x1050] sm:$0xff]  ;;  %vm20368_vm8 = vcmask 589312  }
 0x5bc   : > { %v12539_v1 = vrot.slane %v8572_v61, %v16902_v38  ;;  %v12534_v5 = vrot.slane %v8569_v23, %v16908_v42  ;;  %v8804_v61 = vsel %vm7234_vm0, %v6989_v17, 0.0 }
 0x5be   : > { %v12535_v8 = vsel %vm10395_vm12, %v12534_v5, %v12530_v0  ;;  %8781 = vadd.xlane.f32.xlu1 %v8780_v24  ;;  %8778 = vadd.xlane.f32.xlu0 %v8777_v55  ;;  %v8801_v0 = vsel %vm7234_vm0, %v6988_v51, 0.0  ;;  %v6991_v55 = vld [vmem:[%s16660_s5 + $0x1068] sm:$0xff] }
 0x5bf   : > { %v8578_v6 = vpop.xlane.xlu1 %8577  ;;  %v12540_v11 = vsel %vm10402_vm13, %v12539_v1, %v12535_v8  ;;  %v8575_v40 = vpop.xlane.xlu0 %8574  ;;  %v6990_v1 = vld [vmem:[%s16660_s5 + $0x1060] sm:$0xff] }
 0x5c0   : > { %v12549_v14 = vrot.slane %v8578_v6, %v16918_v56  ;;  %v12544_v19 = vrot.slane %v8575_v40, %v16923_v58  ;;  %v8810_v6 = vsel %vm7234_vm0, %v6991_v55, 0.0 }
 0x5c2   : > { %v12545_v21 = vsel %vm10409_vm14, %v12544_v19, %v12540_v11  ;;  %8787 = vadd.xlane.f32.xlu1 %v8786_v41  ;;  %8784 = vadd.xlane.f32.xlu0 %v8783_v13  ;;  %v8807_v11 = vsel %vm7234_vm0, %v6990_v1, 0.0  ;;  %v6993_v13 = vld [vmem:[%s16660_s5 + $0x1078] sm:$0xff] }
 0x5c3   : > { %v12550_v22 = vsel %vm10416_vm15, %v12549_v14, %v12545_v21  ;;  %v8584_v27 = vpop.xlane.xlu1 %8583  ;;  %v8581_v57 = vpop.xlane.xlu0 %8580  ;;  %v6992_v14 = vld [vmem:[%s16660_s5 + $0x1070] sm:$0xff] }
 0x5c4   : > { %v18738_v30 = vsel %vm14137_vm11, %v12550_v22, %v18336_v7  ;;  %v12558_v36 = vrot.slane %v8584_v27, %v16820_v26  ;;  %v12554_v63 = vrot.slane %v8581_v57, %v16817_v25  ;;  %v8816_v22 = vsel %vm7234_vm0, %v6993_v13, 0.0 }
 0x5c5   : > { %v8813_v27 = vsel %vm7234_vm0, %v6992_v14, 0.0 }
 0x5c6   : > { %v12559_v45 = vsel %vm10318_vm1, %v12558_v36, %v12554_v63  ;;  %8793 = vadd.xlane.f32.xlu1 %v8792_v12  ;;  %8790 = vadd.xlane.f32.xlu0 %v8789_v29  ;;  %v6995_v29 = vld [vmem:[%s16660_s5 + $0x1088] sm:$0xff]  ;;  %v6994_v36 = vld [vmem:[%s16660_s5 + $0x1080] sm:$0xff] }
 0x5c7   : > { %v8590_v3 = vpop.xlane.xlu1 %8589  ;;  %v8587_v15 = vpop.xlane.xlu0 %8586 }
 0x5c8   : > { %v12568_v7 = vrot.slane %v8590_v3, %v16830_v32  ;;  %v12563_v9 = vrot.slane %v8587_v15, %v16827_v31  ;;  %v8822_v3 = vsel %vm7234_vm0, %v6995_v29, 0.0  ;;  %v8819_v15 = vsel %vm7234_vm0, %v6994_v36, 0.0  ;;  %v7002_v29 = vld [vmem:[%s16660_s5 + $0x10c0] sm:$0xff] }
 0x5ca   : > { %v12564_v60 = vsel %vm10325_vm2, %v12563_v9, %v12559_v45  ;;  %8799 = vadd.xlane.f32.xlu1 %v8798_v46  ;;  %8796 = vadd.xlane.f32.xlu0 %v8795_v50  ;;  %v6996_v9 = vld [vmem:[%s16660_s5 + $0x1090] sm:$0xff] }
 0x5cb   : > { %v8596_v16 = vpop.xlane.xlu1 %8595  ;;  %v12569_v18 = vsel %vm10332_vm3, %v12568_v7, %v12564_v60  ;;  %v8593_v35 = vpop.xlane.xlu0 %8592  ;;  %v6997_v7 = vld [vmem:[%s16660_s5 + $0x1098] sm:$0xff] }
 0x5cc   : > { %v12578_v23 = vrot.slane %v8596_v16, %v16841_v43  ;;  %v12573_v24 = vrot.slane %v8593_v35, %v16844_v44  ;;  %v8825_v35 = vsel %vm7234_vm0, %v6996_v9, 0.0 }
 0x5ce   : > { %v12574_v5 = vsel %vm10339_vm4, %v12573_v24, %v12569_v18  ;;  %8805 = vadd.xlane.f32.xlu1 %v8804_v61  ;;  %8802 = vadd.xlane.f32.xlu0 %v8801_v0  ;;  %v8828_v18 = vsel %vm7234_vm0, %v6997_v7, 0.0  ;;  %v6998_v24 = vld [vmem:[%s16660_s5 + $0x10a0] sm:$0xff] }
 0x5cf   : > { %v8602_v33 = vpop.xlane.xlu1 %8601  ;;  %v12579_v34 = vsel %vm10346_vm5, %v12578_v23, %v12574_v5  ;;  %v8599_v8 = vpop.xlane.xlu0 %8598  ;;  %v6999_v23 = vld [vmem:[%s16660_s5 + $0x10a8] sm:$0xff] }
 0x5d0   : > { %v12588_v40 = vrot.slane %v8602_v33, %v16853_v53  ;;  %v12583_v41 = vrot.slane %v8599_v8, %v16856_v54  ;;  %v8831_v8 = vsel %vm7234_vm0, %v6998_v24, 0.0 }
 0x5d2   : > { %v12584_v19 = vsel %vm10353_vm6, %v12583_v41, %v12579_v34  ;;  %8811 = vadd.xlane.f32.xlu1 %v8810_v6  ;;  %8808 = vadd.xlane.f32.xlu0 %v8807_v11  ;;  %v8834_v34 = vsel %vm7234_vm0, %v6999_v23, 0.0  ;;  %v7000_v41 = vld [vmem:[%s16660_s5 + $0x10b0] sm:$0xff] }
 0x5d3   : > { %v8608_v48 = vpop.xlane.xlu1 %8607  ;;  %v12589_v49 = vsel %vm10360_vm7, %v12588_v40, %v12584_v19  ;;  %v8605_v21 = vpop.xlane.xlu0 %8604  ;;  %v7001_v40 = vld [vmem:[%s16660_s5 + $0x10b8] sm:$0xff] }
 0x5d4   : > { %v12598_v57 = vrot.slane %v8608_v48, %v16870_v4  ;;  %v12593_v12 = vrot.slane %v8605_v21, %v16878_v10  ;;  %v8837_v21 = vsel %vm7234_vm0, %v7000_v41, 0.0 }
 0x5d6   : > { %v12594_v63 = vsel %vm20368_vm8, %v12593_v12, %v12589_v49  ;;  %8817 = vadd.xlane.f32.xlu1 %v8816_v22  ;;  %8814 = vadd.xlane.f32.xlu0 %v8813_v27  ;;  %vm20369_vm8 = vcmask 786112   ;;  %v8840_v49 = vsel %vm7234_vm0, %v7001_v40, 0.0  ;;  %v7003_v12 = vld [vmem:[%s16660_s5 + $0x10c8] sm:$0xff] }
 0x5d7   : > { %v8614_v59 = vpop.xlane.xlu1 %8613  ;;  %v12599_v37 = vsel %vm10374_vm9, %v12598_v57, %v12594_v63  ;;  %v8611_v45 = vpop.xlane.xlu0 %8610 }
 0x5d8   : > { %v12608_v46 = vrot.slane %v8614_v59, %v16886_v20  ;;  %v12603_v50 = vrot.slane %v8611_v45, %v16894_v28  ;;  %v8843_v45 = vsel %vm7234_vm0, %v7002_v29, 0.0 }
 0x5da   : > { %v12604_v17 = vsel %vm10381_vm10, %v12603_v50, %v12599_v37  ;;  %8823 = vadd.xlane.f32.xlu1 %v8822_v3  ;;  %8820 = vadd.xlane.f32.xlu0 %v8819_v15  ;;  %v8846_v37 = vsel %vm7234_vm0, %v7003_v12, 0.0  ;;  %v7005_v15 = vld [vmem:[%s16660_s5 + $0x10d8] sm:$0xff] }
 0x5db   : > { %v8620_v51 = vpop.xlane.xlu1 %8619  ;;  %v12609_v60 = vsel %vm20369_vm8, %v12608_v46, %v12604_v17  ;;  %v8617_v16 = vpop.xlane.xlu0 %8616  ;;  %v7004_v46 = vld [vmem:[%s16660_s5 + $0x10d0] sm:$0xff]  ;;  %vm20370_vm8 = vcmask 589312  }
 0x5dc   : > { %v12618_v61 = vrot.slane %v8620_v51, %v16902_v38  ;;  %v12613_v0 = vrot.slane %v8617_v16, %v16908_v42  ;;  %v8852_v51 = vsel %vm7234_vm0, %v7005_v15, 0.0 }
 0x5de   : > { %v12614_v55 = vsel %vm10395_vm12, %v12613_v0, %v12609_v60  ;;  %8829 = vadd.xlane.f32.xlu1 %v8828_v18  ;;  %8826 = vadd.xlane.f32.xlu0 %v8825_v35  ;;  %v8849_v60 = vsel %vm7234_vm0, %v7004_v46, 0.0  ;;  %v7007_v35 = vld [vmem:[%s16660_s5 + $0x10e8] sm:$0xff] }
 0x5df   : > { %v8626_v1 = vpop.xlane.xlu1 %8625  ;;  %v12619_v5 = vsel %vm10402_vm13, %v12618_v61, %v12614_v55  ;;  %v8623_v33 = vpop.xlane.xlu0 %8622  ;;  %v7006_v61 = vld [vmem:[%s16660_s5 + $0x10e0] sm:$0xff] }
 0x5e0   : > { %v12628_v6 = vrot.slane %v8626_v1, %v16918_v56  ;;  %v12623_v11 = vrot.slane %v8623_v33, %v16923_v58  ;;  %v8858_v1 = vsel %vm7234_vm0, %v7007_v35, 0.0 }
 0x5e2   : > { %v12624_v13 = vsel %vm10409_vm14, %v12623_v11, %v12619_v5  ;;  %8835 = vadd.xlane.f32.xlu1 %v8834_v34  ;;  %8832 = vadd.xlane.f32.xlu0 %v8831_v8  ;;  %v8855_v5 = vsel %vm7234_vm0, %v7006_v61, 0.0  ;;  %v7009_v8 = vld [vmem:[%s16660_s5 + $0x10f8] sm:$0xff] }
 0x5e3   : > { %v12629_v14 = vsel %vm10416_vm15, %v12628_v6, %v12624_v13  ;;  %v8632_v19 = vpop.xlane.xlu1 %8631  ;;  %v8629_v48 = vpop.xlane.xlu0 %8628  ;;  %v7008_v6 = vld [vmem:[%s16660_s5 + $0x10f0] sm:$0xff] }
 0x5e4   : > { %v18805_v22 = vsel %vm14137_vm11, %v12629_v14, %v18403_v2  ;;  %v12637_v27 = vrot.slane %v8632_v19, %v16820_v26  ;;  %v12633_v57 = vrot.slane %v8629_v48, %v16817_v25  ;;  %v8864_v14 = vsel %vm7234_vm0, %v7009_v8, 0.0 }
 0x5e5   : > { %v8861_v19 = vsel %vm7234_vm0, %v7008_v6, 0.0 }
 0x5e6   : > { %v12638_v36 = vsel %vm10318_vm1, %v12637_v27, %v12633_v57  ;;  %8841 = vadd.xlane.f32.xlu1 %v8840_v49  ;;  %8838 = vadd.xlane.f32.xlu0 %v8837_v21  ;;  %v7011_v21 = vld [vmem:[%s16660_s5 + $0x1108] sm:$0xff]  ;;  %v7010_v27 = vld [vmem:[%s16660_s5 + $0x1100] sm:$0xff] }
 0x5e7   : > { %v8638_v63 = vpop.xlane.xlu1 %8637  ;;  %v8635_v59 = vpop.xlane.xlu0 %8634 }
 0x5e8   : > { %v12647_v2 = vrot.slane %v8638_v63, %v16830_v32  ;;  %v12642_v3 = vrot.slane %v8635_v59, %v16827_v31  ;;  %v8870_v63 = vsel %vm7234_vm0, %v7011_v21, 0.0  ;;  %v8867_v59 = vsel %vm7234_vm0, %v7010_v27, 0.0  ;;  %v7018_v21 = vld [vmem:[%s16660_s5 + $0x1140] sm:$0xff] }
 0x5ea   : > { %v12643_v50 = vsel %vm10325_vm2, %v12642_v3, %v12638_v36  ;;  %8847 = vadd.xlane.f32.xlu1 %v8846_v37  ;;  %8844 = vadd.xlane.f32.xlu0 %v8843_v45  ;;  %v7012_v3 = vld [vmem:[%s16660_s5 + $0x1110] sm:$0xff] }
 0x5eb   : > { %v8644_v7 = vpop.xlane.xlu1 %8643  ;;  %v12648_v9 = vsel %vm10332_vm3, %v12647_v2, %v12643_v50  ;;  %v8641_v17 = vpop.xlane.xlu0 %8640  ;;  %v7013_v2 = vld [vmem:[%s16660_s5 + $0x1118] sm:$0xff] }
 0x5ec   : > { %v12657_v16 = vrot.slane %v8644_v7, %v16841_v43  ;;  %v12652_v18 = vrot.slane %v8641_v17, %v16844_v44  ;;  %v8873_v17 = vsel %vm7234_vm0, %v7012_v3, 0.0 }
 0x5ee   : > { %v12653_v0 = vsel %vm10339_vm4, %v12652_v18, %v12648_v9  ;;  %8853 = vadd.xlane.f32.xlu1 %v8852_v51  ;;  %8850 = vadd.xlane.f32.xlu0 %v8849_v60  ;;  %v8876_v9 = vsel %vm7234_vm0, %v7013_v2, 0.0  ;;  %v7014_v18 = vld [vmem:[%s16660_s5 + $0x1120] sm:$0xff] }
 0x5ef   : > { %v8650_v23 = vpop.xlane.xlu1 %8649  ;;  %v12658_v24 = vsel %vm10346_vm5, %v12657_v16, %v12653_v0  ;;  %v8647_v55 = vpop.xlane.xlu0 %8646  ;;  %v7015_v16 = vld [vmem:[%s16660_s5 + $0x1128] sm:$0xff] }
 0x5f0   : > { %v12667_v33 = vrot.slane %v8650_v23, %v16853_v53  ;;  %v12662_v34 = vrot.slane %v8647_v55, %v16856_v54  ;;  %v8879_v55 = vsel %vm7234_vm0, %v7014_v18, 0.0 }
 0x5f2   : > { %v12663_v11 = vsel %vm10353_vm6, %v12662_v34, %v12658_v24  ;;  %8859 = vadd.xlane.f32.xlu1 %v8858_v1  ;;  %8856 = vadd.xlane.f32.xlu0 %v8855_v5  ;;  %v8882_v24 = vsel %vm7234_vm0, %v7015_v16, 0.0  ;;  %v7016_v34 = vld [vmem:[%s16660_s5 + $0x1130] sm:$0xff] }
 0x5f3   : > { %v8656_v40 = vpop.xlane.xlu1 %8655  ;;  %v12668_v41 = vsel %vm10360_vm7, %v12667_v33, %v12663_v11  ;;  %v8653_v13 = vpop.xlane.xlu0 %8652  ;;  %v7017_v33 = vld [vmem:[%s16660_s5 + $0x1138] sm:$0xff] }
 0x5f4   : > { %v12677_v48 = vrot.slane %v8656_v40, %v16870_v4  ;;  %v12672_v49 = vrot.slane %v8653_v13, %v16878_v10  ;;  %v8885_v13 = vsel %vm7234_vm0, %v7016_v34, 0.0 }
 0x5f6   : > { %v12673_v57 = vsel %vm20370_vm8, %v12672_v49, %v12668_v41  ;;  %8865 = vadd.xlane.f32.xlu1 %v8864_v14  ;;  %8862 = vadd.xlane.f32.xlu0 %v8861_v19  ;;  %vm20371_vm8 = vcmask 786112   ;;  %v8888_v41 = vsel %vm7234_vm0, %v7017_v33, 0.0  ;;  %v7019_v49 = vld [vmem:[%s16660_s5 + $0x1148] sm:$0xff] }
 0x5f7   : > { %v8662_v12 = vpop.xlane.xlu1 %8661  ;;  %v12678_v29 = vsel %vm10374_vm9, %v12677_v48, %v12673_v57  ;;  %v8659_v36 = vpop.xlane.xlu0 %8658 }
 0x5f8   : > { %v12687_v37 = vrot.slane %v8662_v12, %v16886_v20  ;;  %v12682_v45 = vrot.slane %v8659_v36, %v16894_v28  ;;  %v8891_v36 = vsel %vm7234_vm0, %v7018_v21, 0.0 }
 0x5fa   : > { %v12683_v15 = vsel %vm10381_vm10, %v12682_v45, %v12678_v29  ;;  %8871 = vadd.xlane.f32.xlu1 %v8870_v63  ;;  %8868 = vadd.xlane.f32.xlu0 %v8867_v59  ;;  %v8894_v29 = vsel %vm7234_vm0, %v7019_v49, 0.0  ;;  %v7021_v59 = vld [vmem:[%s16660_s5 + $0x1158] sm:$0xff] }
 0x5fb   : > { %v8668_v46 = vpop.xlane.xlu1 %8667  ;;  %v12688_v50 = vsel %vm20371_vm8, %v12687_v37, %v12683_v15  ;;  %v8665_v7 = vpop.xlane.xlu0 %8664  ;;  %v7020_v37 = vld [vmem:[%s16660_s5 + $0x1150] sm:$0xff] }
 0x5fc   : > { %v12697_v51 = vrot.slane %v8668_v46, %v16902_v38  ;;  %v12692_v60 = vrot.slane %v8665_v7, %v16908_v42  ;;  %v8900_v46 = vsel %vm7234_vm0, %v7021_v59, 0.0 }
 0x5fe   : > { %v12693_v35 = vsel %vm10395_vm12, %v12692_v60, %v12688_v50  ;;  %8877 = vadd.xlane.f32.xlu1 %v8876_v9  ;;  %8874 = vadd.xlane.f32.xlu0 %v8873_v17  ;;  %v8897_v50 = vsel %vm7234_vm0, %v7020_v37, 0.0  ;;  %v7023_v17 = vld [vmem:[%s16660_s5 + $0x1168] sm:$0xff] }
 0x5ff   : > { %v8674_v61 = vpop.xlane.xlu1 %8673  ;;  %v12698_v0 = vsel %vm10402_vm13, %v12697_v51, %v12693_v35  ;;  %v8671_v23 = vpop.xlane.xlu0 %8670  ;;  %v7022_v51 = vld [vmem:[%s16660_s5 + $0x1160] sm:$0xff] }
 0x600   : > { %v12707_v1 = vrot.slane %v8674_v61, %v16918_v56  ;;  %v12702_v5 = vrot.slane %v8671_v23, %v16923_v58  ;;  %v8906_v61 = vsel %vm7234_vm0, %v7023_v17, 0.0 }
 0x602   : > { %v12703_v8 = vsel %vm10409_vm14, %v12702_v5, %v12698_v0  ;;  %8883 = vadd.xlane.f32.xlu1 %v8882_v24  ;;  %8880 = vadd.xlane.f32.xlu0 %v8879_v55  ;;  %v8903_v0 = vsel %vm7234_vm0, %v7022_v51, 0.0  ;;  %v7025_v55 = vld [vmem:[%s16660_s5 + $0x1178] sm:$0xff] }
 0x603   : > { %v12708_v6 = vsel %vm10416_vm15, %v12707_v1, %v12703_v8  ;;  %v8680_v11 = vpop.xlane.xlu1 %8679  ;;  %v8677_v40 = vpop.xlane.xlu0 %8676  ;;  %v7024_v1 = vld [vmem:[%s16660_s5 + $0x1170] sm:$0xff] }
 0x604   : > { %v18872_v14 = vsel %vm14137_vm11, %v12708_v6, %v18470_v62  ;;  %v12716_v19 = vrot.slane %v8680_v11, %v16820_v26  ;;  %v12712_v48 = vrot.slane %v8677_v40, %v16817_v25  ;;  %v8912_v6 = vsel %vm7234_vm0, %v7025_v55, 0.0 }
 0x605   : > { %v8909_v11 = vsel %vm7234_vm0, %v7024_v1, 0.0  ;;  %vm20372_vm11 = vcmask 589312  }
 0x606   : > { %v12717_v27 = vsel %vm10318_vm1, %v12716_v19, %v12712_v48  ;;  %8889 = vadd.xlane.f32.xlu1 %v8888_v41  ;;  %8886 = vadd.xlane.f32.xlu0 %v8885_v13  ;;  %v7027_v13 = vld [vmem:[%s16660_s5 + $0x1188] sm:$0xff]  ;;  %v7026_v19 = vld [vmem:[%s16660_s5 + $0x1180] sm:$0xff] }
 0x607   : > { %v8686_v57 = vpop.xlane.xlu1 %8685  ;;  %v8683_v12 = vpop.xlane.xlu0 %8682 }
 0x608   : > { %v12726_v62 = vrot.slane %v8686_v57, %v16830_v32  ;;  %v12721_v63 = vrot.slane %v8683_v12, %v16827_v31  ;;  %v8918_v57 = vsel %vm7234_vm0, %v7027_v13, 0.0  ;;  %v8915_v12 = vsel %vm7234_vm0, %v7026_v19, 0.0  ;;  %v7034_v13 = vld [vmem:[%s16660_s5 + $0x11c0] sm:$0xff] }
 0x60a   : > { %v12722_v45 = vsel %vm10325_vm2, %v12721_v63, %v12717_v27  ;;  %8895 = vadd.xlane.f32.xlu1 %v8894_v29  ;;  %8892 = vadd.xlane.f32.xlu0 %v8891_v36  ;;  %v7028_v63 = vld [vmem:[%s16660_s5 + $0x1190] sm:$0xff] }
 0x60b   : > { %v8692_v2 = vpop.xlane.xlu1 %8691  ;;  %v12727_v3 = vsel %vm10332_vm3, %v12726_v62, %v12722_v45  ;;  %v8689_v15 = vpop.xlane.xlu0 %8688  ;;  %v7029_v62 = vld [vmem:[%s16660_s5 + $0x1198] sm:$0xff] }
 0x60c   : > { %v12736_v7 = vrot.slane %v8692_v2, %v16841_v43  ;;  %v12731_v9 = vrot.slane %v8689_v15, %v16844_v44  ;;  %v8921_v15 = vsel %vm7234_vm0, %v7028_v63, 0.0 }
 0x60e   : > { %v12732_v60 = vsel %vm10339_vm4, %v12731_v9, %v12727_v3  ;;  %8901 = vadd.xlane.f32.xlu1 %v8900_v46  ;;  %8898 = vadd.xlane.f32.xlu0 %v8897_v50  ;;  %v8924_v3 = vsel %vm7234_vm0, %v7029_v62, 0.0  ;;  %v7030_v9 = vld [vmem:[%s16660_s5 + $0x11a0] sm:$0xff] }
 0x60f   : > { %v8698_v16 = vpop.xlane.xlu1 %8697  ;;  %v12737_v18 = vsel %vm10346_vm5, %v12736_v7, %v12732_v60  ;;  %v8695_v35 = vpop.xlane.xlu0 %8694  ;;  %v7031_v7 = vld [vmem:[%s16660_s5 + $0x11a8] sm:$0xff] }
 0x610   : > { %v12746_v23 = vrot.slane %v8698_v16, %v16853_v53  ;;  %v12741_v24 = vrot.slane %v8695_v35, %v16856_v54  ;;  %v8927_v35 = vsel %vm7234_vm0, %v7030_v9, 0.0 }
 0x612   : > { %v12742_v5 = vsel %vm10353_vm6, %v12741_v24, %v12737_v18  ;;  %8907 = vadd.xlane.f32.xlu1 %v8906_v61  ;;  %8904 = vadd.xlane.f32.xlu0 %v8903_v0  ;;  %v8930_v18 = vsel %vm7234_vm0, %v7031_v7, 0.0  ;;  %v7032_v24 = vld [vmem:[%s16660_s5 + $0x11b0] sm:$0xff] }
 0x613   : > { %v8704_v33 = vpop.xlane.xlu1 %8703  ;;  %v12747_v34 = vsel %vm10360_vm7, %v12746_v23, %v12742_v5  ;;  %v8701_v8 = vpop.xlane.xlu0 %8700  ;;  %v7033_v23 = vld [vmem:[%s16660_s5 + $0x11b8] sm:$0xff] }
 0x614   : > { %v12756_v40 = vrot.slane %v8704_v33, %v16870_v4  ;;  %v12751_v41 = vrot.slane %v8701_v8, %v16878_v10  ;;  %v8933_v8 = vsel %vm7234_vm0, %v7032_v24, 0.0 }
 0x616   : > { %v12752_v48 = vsel %vm20372_vm11, %v12751_v41, %v12747_v34  ;;  %8913 = vadd.xlane.f32.xlu1 %v8912_v6  ;;  %8910 = vadd.xlane.f32.xlu0 %v8909_v11  ;;  %vm14139_vm11 = vcmask 1045509   ;;  %v8936_v34 = vsel %vm7234_vm0, %v7033_v23, 0.0  ;;  %v7035_v41 = vld [vmem:[%s16660_s5 + $0x11c8] sm:$0xff] }
 0x617   : > { %v8710_v49 = vpop.xlane.xlu1 %8709  ;;  %v12757_v21 = vsel %vm10374_vm9, %v12756_v40, %v12752_v48  ;;  %v8707_v27 = vpop.xlane.xlu0 %8706 }
 0x618   : > { %v12766_v29 = vrot.slane %v8710_v49, %v16886_v20  ;;  %v12761_v36 = vrot.slane %v8707_v27, %v16894_v28  ;;  %v8939_v27 = vsel %vm7234_vm0, %v7034_v13, 0.0 }
 0x61a   : > { %v12762_v59 = vsel %vm10381_vm10, %v12761_v36, %v12757_v21  ;;  %8919 = vadd.xlane.f32.xlu1 %v8918_v57  ;;  %8916 = vadd.xlane.f32.xlu0 %v8915_v12  ;;  %v8942_v21 = vsel %vm7234_vm0, %v7035_v41, 0.0  ;;  %v7037_v12 = vld [vmem:[%s16660_s5 + $0x11d8] sm:$0xff] }
 0x61b   : > { %v8716_v37 = vpop.xlane.xlu1 %8715  ;;  %v12767_v45 = vsel %vm20371_vm8, %v12766_v29, %v12762_v59  ;;  %v8713_v2 = vpop.xlane.xlu0 %8712  ;;  %v7036_v29 = vld [vmem:[%s16660_s5 + $0x11d0] sm:$0xff]  ;;  %vm20373_vm8 = vcmask 589312  }
 0x61c   : > { %v12776_v46 = vrot.slane %v8716_v37, %v16902_v38  ;;  %v12771_v50 = vrot.slane %v8713_v2, %v16908_v42  ;;  %v8948_v37 = vsel %vm7234_vm0, %v7037_v12, 0.0 }
 0x61e   : > { %v12772_v17 = vsel %vm10395_vm12, %v12771_v50, %v12767_v45  ;;  %8925 = vadd.xlane.f32.xlu1 %v8924_v3  ;;  %8922 = vadd.xlane.f32.xlu0 %v8921_v15  ;;  %v8945_v45 = vsel %vm7234_vm0, %v7036_v29, 0.0  ;;  %v7039_v15 = vld [vmem:[%s16660_s5 + $0x11e8] sm:$0xff] }
 0x61f   : > { %v8722_v51 = vpop.xlane.xlu1 %8721  ;;  %v12777_v60 = vsel %vm10402_vm13, %v12776_v46, %v12772_v17  ;;  %v8719_v16 = vpop.xlane.xlu0 %8718  ;;  %v7038_v46 = vld [vmem:[%s16660_s5 + $0x11e0] sm:$0xff] }
 0x620   : > { %v12786_v61 = vrot.slane %v8722_v51, %v16918_v56  ;;  %v12781_v0 = vrot.slane %v8719_v16, %v16923_v58  ;;  %v8954_v51 = vsel %vm7234_vm0, %v7039_v15, 0.0 }
 0x622   : > { %v12782_v55 = vsel %vm10409_vm14, %v12781_v0, %v12777_v60  ;;  %8931 = vadd.xlane.f32.xlu1 %v8930_v18  ;;  %8928 = vadd.xlane.f32.xlu0 %v8927_v35  ;;  %v8951_v60 = vsel %vm7234_vm0, %v7038_v46, 0.0  ;;  %v7041_v35 = vld [vmem:[%s16660_s5 + $0x11f8] sm:$0xff] }
 0x623   : > { %v12787_v1 = vsel %vm10416_vm15, %v12786_v61, %v12782_v55  ;;  %v8728_v5 = vpop.xlane.xlu1 %8727  ;;  %v8725_v33 = vpop.xlane.xlu0 %8724  ;;  %v7040_v61 = vld [vmem:[%s16660_s5 + $0x11f0] sm:$0xff] }
 0x624   : > { %v18939_v6 = vsel %vm14139_vm11, %v12787_v1, %v18537_v52  ;;  %v12795_v11 = vrot.slane %v8728_v5, %v16820_v26  ;;  %v12791_v40 = vrot.slane %v8725_v33, %v16817_v25  ;;  %v8960_v1 = vsel %vm7234_vm0, %v7041_v35, 0.0 }
 0x625   : > { %v8957_v5 = vsel %vm7234_vm0, %v7040_v61, 0.0 }
 0x626   : > { %v12796_v19 = vsel %vm10318_vm1, %v12795_v11, %v12791_v40  ;;  %8937 = vadd.xlane.f32.xlu1 %v8936_v34  ;;  %8934 = vadd.xlane.f32.xlu0 %v8933_v8  ;;  %v7043_v8 = vld [vmem:[%s16660_s5 + $0x1208] sm:$0xff]  ;;  %v7042_v11 = vld [vmem:[%s16660_s5 + $0x1200] sm:$0xff] }
 0x627   : > { %v8734_v48 = vpop.xlane.xlu1 %8733  ;;  %v8731_v49 = vpop.xlane.xlu0 %8730 }
 0x628   : > { %v12805_v52 = vrot.slane %v8734_v48, %v16830_v32  ;;  %v12800_v57 = vrot.slane %v8731_v49, %v16827_v31  ;;  %v8966_v48 = vsel %vm7234_vm0, %v7043_v8, 0.0  ;;  %v8963_v49 = vsel %vm7234_vm0, %v7042_v11, 0.0  ;;  %v7050_v8 = vld [vmem:[%s16660_s5 + $0x1240] sm:$0xff] }
 0x62a   : > { %v12801_v36 = vsel %vm10325_vm2, %v12800_v57, %v12796_v19  ;;  %8943 = vadd.xlane.f32.xlu1 %v8942_v21  ;;  %8940 = vadd.xlane.f32.xlu0 %v8939_v27  ;;  %v7044_v57 = vld [vmem:[%s16660_s5 + $0x1210] sm:$0xff] }
 0x62b   : > { %v8740_v62 = vpop.xlane.xlu1 %8739  ;;  %v12806_v63 = vsel %vm10332_vm3, %v12805_v52, %v12801_v36  ;;  %v8737_v59 = vpop.xlane.xlu0 %8736  ;;  %v7045_v52 = vld [vmem:[%s16660_s5 + $0x1218] sm:$0xff] }
 0x62c   : > { %v12815_v2 = vrot.slane %v8740_v62, %v16841_v43  ;;  %v12810_v3 = vrot.slane %v8737_v59, %v16844_v44  ;;  %v8969_v59 = vsel %vm7234_vm0, %v7044_v57, 0.0 }
 0x62e   : > { %v12811_v50 = vsel %vm10339_vm4, %v12810_v3, %v12806_v63  ;;  %8949 = vadd.xlane.f32.xlu1 %v8948_v37  ;;  %8946 = vadd.xlane.f32.xlu0 %v8945_v45  ;;  %v8972_v63 = vsel %vm7234_vm0, %v7045_v52, 0.0  ;;  %v7046_v3 = vld [vmem:[%s16660_s5 + $0x1220] sm:$0xff] }
 0x62f   : > { %v8746_v7 = vpop.xlane.xlu1 %8745  ;;  %v12816_v9 = vsel %vm10346_vm5, %v12815_v2, %v12811_v50  ;;  %v8743_v17 = vpop.xlane.xlu0 %8742  ;;  %v7047_v2 = vld [vmem:[%s16660_s5 + $0x1228] sm:$0xff] }
 0x630   : > { %v12825_v16 = vrot.slane %v8746_v7, %v16853_v53  ;;  %v12820_v18 = vrot.slane %v8743_v17, %v16856_v54  ;;  %v8975_v17 = vsel %vm7234_vm0, %v7046_v3, 0.0 }
 0x632   : > { %v12821_v0 = vsel %vm10353_vm6, %v12820_v18, %v12816_v9  ;;  %8955 = vadd.xlane.f32.xlu1 %v8954_v51  ;;  %8952 = vadd.xlane.f32.xlu0 %v8951_v60  ;;  %v8978_v9 = vsel %vm7234_vm0, %v7047_v2, 0.0  ;;  %v7048_v18 = vld [vmem:[%s16660_s5 + $0x1230] sm:$0xff] }
 0x633   : > { %v8752_v23 = vpop.xlane.xlu1 %8751  ;;  %v12826_v24 = vsel %vm10360_vm7, %v12825_v16, %v12821_v0  ;;  %v8749_v55 = vpop.xlane.xlu0 %8748  ;;  %v7049_v16 = vld [vmem:[%s16660_s5 + $0x1238] sm:$0xff] }
 0x634   : > { %v12835_v33 = vrot.slane %v8752_v23, %v16870_v4  ;;  %v12830_v34 = vrot.slane %v8749_v55, %v16878_v10  ;;  %v8981_v55 = vsel %vm7234_vm0, %v7048_v18, 0.0 }
 0x636   : > { %v12831_v40 = vsel %vm20373_vm8, %v12830_v34, %v12826_v24  ;;  %8961 = vadd.xlane.f32.xlu1 %v8960_v1  ;;  %8958 = vadd.xlane.f32.xlu0 %v8957_v5  ;;  %vm20374_vm8 = vcmask 786112   ;;  %v8984_v24 = vsel %vm7234_vm0, %v7049_v16, 0.0  ;;  %v7051_v34 = vld [vmem:[%s16660_s5 + $0x1248] sm:$0xff] }
 0x637   : > { %v8758_v41 = vpop.xlane.xlu1 %8757  ;;  %v12836_v13 = vsel %vm10374_vm9, %v12835_v33, %v12831_v40  ;;  %v8755_v19 = vpop.xlane.xlu0 %8754 }
 0x638   : > { %v12845_v21 = vrot.slane %v8758_v41, %v16886_v20  ;;  %v12840_v27 = vrot.slane %v8755_v19, %v16894_v28  ;;  %v8987_v19 = vsel %vm7234_vm0, %v7050_v8, 0.0 }
 0x63a   : > { %v12841_v12 = vsel %vm10381_vm10, %v12840_v27, %v12836_v13  ;;  %8967 = vadd.xlane.f32.xlu1 %v8966_v48  ;;  %8964 = vadd.xlane.f32.xlu0 %v8963_v49  ;;  %v8990_v13 = vsel %vm7234_vm0, %v7051_v34, 0.0  ;;  %v7053_v49 = vld [vmem:[%s16660_s5 + $0x1258] sm:$0xff] }
 0x63b   : > { %v8764_v29 = vpop.xlane.xlu1 %8763  ;;  %v12846_v36 = vsel %vm20374_vm8, %v12845_v21, %v12841_v12  ;;  %v8761_v62 = vpop.xlane.xlu0 %8760  ;;  %v7052_v21 = vld [vmem:[%s16660_s5 + $0x1250] sm:$0xff]  ;;  %vm20375_vm8 = vcmask 589312  }
 0x63c   : > { %v12855_v37 = vrot.slane %v8764_v29, %v16902_v38  ;;  %v12850_v45 = vrot.slane %v8761_v62, %v16908_v42  ;;  %v8996_v29 = vsel %vm7234_vm0, %v7053_v49, 0.0 }
 0x63e   : > { %v12851_v15 = vsel %vm10395_vm12, %v12850_v45, %v12846_v36  ;;  %8973 = vadd.xlane.f32.xlu1 %v8972_v63  ;;  %8970 = vadd.xlane.f32.xlu0 %v8969_v59  ;;  %v8993_v36 = vsel %vm7234_vm0, %v7052_v21, 0.0  ;;  %v7055_v59 = vld [vmem:[%s16660_s5 + $0x1268] sm:$0xff] }
 0x63f   : > { %v8770_v46 = vpop.xlane.xlu1 %8769  ;;  %v12856_v50 = vsel %vm10402_vm13, %v12855_v37, %v12851_v15  ;;  %v8767_v7 = vpop.xlane.xlu0 %8766  ;;  %v7054_v37 = vld [vmem:[%s16660_s5 + $0x1260] sm:$0xff] }
 0x640   : > { %v12865_v51 = vrot.slane %v8770_v46, %v16918_v56  ;;  %v12860_v60 = vrot.slane %v8767_v7, %v16923_v58  ;;  %v9002_v46 = vsel %vm7234_vm0, %v7055_v59, 0.0 }
 0x642   : > { %v12861_v35 = vsel %vm10409_vm14, %v12860_v60, %v12856_v50  ;;  %8979 = vadd.xlane.f32.xlu1 %v8978_v9  ;;  %8976 = vadd.xlane.f32.xlu0 %v8975_v17  ;;  %v8999_v50 = vsel %vm7234_vm0, %v7054_v37, 0.0  ;;  %v7057_v17 = vld [vmem:[%s16660_s5 + $0x1278] sm:$0xff] }
 0x643   : > { %v12866_v61 = vsel %vm10416_vm15, %v12865_v51, %v12861_v35  ;;  %v8776_v0 = vpop.xlane.xlu1 %8775  ;;  %v8773_v23 = vpop.xlane.xlu0 %8772  ;;  %v7056_v51 = vld [vmem:[%s16660_s5 + $0x1270] sm:$0xff] }
 0x644   : > { %v19006_v1 = vsel %vm14139_vm11, %v12866_v61, %v18604_v47  ;;  %v12874_v5 = vrot.slane %v8776_v0, %v16820_v26  ;;  %v12870_v33 = vrot.slane %v8773_v23, %v16817_v25  ;;  %v9008_v61 = vsel %vm7234_vm0, %v7057_v17, 0.0 }
 0x645   : > { %v9005_v0 = vsel %vm7234_vm0, %v7056_v51, 0.0 }
 0x646   : > { %v12875_v11 = vsel %vm10318_vm1, %v12874_v5, %v12870_v33  ;;  %8985 = vadd.xlane.f32.xlu1 %v8984_v24  ;;  %8982 = vadd.xlane.f32.xlu0 %v8981_v55  ;;  %v7059_v55 = vld [vmem:[%s16660_s5 + $0x1288] sm:$0xff]  ;;  %v7058_v5 = vld [vmem:[%s16660_s5 + $0x1280] sm:$0xff] }
 0x647   : > { %v8782_v40 = vpop.xlane.xlu1 %8781  ;;  %v8779_v41 = vpop.xlane.xlu0 %8778 }
 0x648   : > { %v12884_v47 = vrot.slane %v8782_v40, %v16830_v32  ;;  %v12879_v48 = vrot.slane %v8779_v41, %v16827_v31  ;;  %v9014_v40 = vsel %vm7234_vm0, %v7059_v55, 0.0  ;;  %v9011_v41 = vsel %vm7234_vm0, %v7058_v5, 0.0  ;;  %v7066_v55 = vld [vmem:[%s16660_s5 + $0x12c0] sm:$0xff] }
 0x64a   : > { %v12880_v27 = vsel %vm10325_vm2, %v12879_v48, %v12875_v11  ;;  %8991 = vadd.xlane.f32.xlu1 %v8990_v13  ;;  %8988 = vadd.xlane.f32.xlu0 %v8987_v19  ;;  %v7060_v48 = vld [vmem:[%s16660_s5 + $0x1290] sm:$0xff] }
 0x64b   : > { %v8788_v52 = vpop.xlane.xlu1 %8787  ;;  %v12885_v57 = vsel %vm10332_vm3, %v12884_v47, %v12880_v27  ;;  %v8785_v12 = vpop.xlane.xlu0 %8784  ;;  %v7061_v47 = vld [vmem:[%s16660_s5 + $0x1298] sm:$0xff] }
 0x64c   : > { %v12894_v62 = vrot.slane %v8788_v52, %v16841_v43  ;;  %v12889_v63 = vrot.slane %v8785_v12, %v16844_v44  ;;  %v9017_v12 = vsel %vm7234_vm0, %v7060_v48, 0.0 }
 0x64e   : > { %v12890_v45 = vsel %vm10339_vm4, %v12889_v63, %v12885_v57  ;;  %8997 = vadd.xlane.f32.xlu1 %v8996_v29  ;;  %8994 = vadd.xlane.f32.xlu0 %v8993_v36  ;;  %v9020_v57 = vsel %vm7234_vm0, %v7061_v47, 0.0  ;;  %v7062_v63 = vld [vmem:[%s16660_s5 + $0x12a0] sm:$0xff] }
 0x64f   : > { %v8794_v2 = vpop.xlane.xlu1 %8793  ;;  %v12895_v3 = vsel %vm10346_vm5, %v12894_v62, %v12890_v45  ;;  %v8791_v15 = vpop.xlane.xlu0 %8790  ;;  %v7063_v62 = vld [vmem:[%s16660_s5 + $0x12a8] sm:$0xff] }
 0x650   : > { %v12904_v7 = vrot.slane %v8794_v2, %v16853_v53  ;;  %v12899_v9 = vrot.slane %v8791_v15, %v16856_v54  ;;  %v9023_v15 = vsel %vm7234_vm0, %v7062_v63, 0.0 }
 0x652   : > { %v12900_v60 = vsel %vm10353_vm6, %v12899_v9, %v12895_v3  ;;  %9003 = vadd.xlane.f32.xlu1 %v9002_v46  ;;  %9000 = vadd.xlane.f32.xlu0 %v8999_v50  ;;  %v9026_v3 = vsel %vm7234_vm0, %v7063_v62, 0.0  ;;  %v7064_v9 = vld [vmem:[%s16660_s5 + $0x12b0] sm:$0xff] }
 0x653   : > { %v8800_v16 = vpop.xlane.xlu1 %8799  ;;  %v12905_v18 = vsel %vm10360_vm7, %v12904_v7, %v12900_v60  ;;  %v8797_v35 = vpop.xlane.xlu0 %8796  ;;  %v7065_v7 = vld [vmem:[%s16660_s5 + $0x12b8] sm:$0xff] }
 0x654   : > { %v12914_v23 = vrot.slane %v8800_v16, %v16870_v4  ;;  %v12909_v24 = vrot.slane %v8797_v35, %v16878_v10  ;;  %v9029_v35 = vsel %vm7234_vm0, %v7064_v9, 0.0 }
 0x656   : > { %v12910_v33 = vsel %vm20375_vm8, %v12909_v24, %v12905_v18  ;;  %9009 = vadd.xlane.f32.xlu1 %v9008_v61  ;;  %9006 = vadd.xlane.f32.xlu0 %v9005_v0  ;;  %vm20376_vm8 = vcmask 786112   ;;  %v9032_v18 = vsel %vm7234_vm0, %v7065_v7, 0.0  ;;  %v7067_v24 = vld [vmem:[%s16660_s5 + $0x12c8] sm:$0xff] }
 0x657   : > { %v8806_v34 = vpop.xlane.xlu1 %8805  ;;  %v12915_v8 = vsel %vm10374_vm9, %v12914_v23, %v12910_v33  ;;  %v8803_v11 = vpop.xlane.xlu0 %8802 }
 0x658   : > { %v12924_v13 = vrot.slane %v8806_v34, %v16886_v20  ;;  %v12919_v19 = vrot.slane %v8803_v11, %v16894_v28  ;;  %v9035_v11 = vsel %vm7234_vm0, %v7066_v55, 0.0 }
 0x65a   : > { %v12920_v49 = vsel %vm10381_vm10, %v12919_v19, %v12915_v8  ;;  %9015 = vadd.xlane.f32.xlu1 %v9014_v40  ;;  %9012 = vadd.xlane.f32.xlu0 %v9011_v41  ;;  %v9038_v8 = vsel %vm7234_vm0, %v7067_v24, 0.0  ;;  %v7069_v41 = vld [vmem:[%s16660_s5 + $0x12d8] sm:$0xff] }
 0x65b   : > { %v8812_v21 = vpop.xlane.xlu1 %8811  ;;  %v12925_v27 = vsel %vm20376_vm8, %v12924_v13, %v12920_v49  ;;  %v8809_v52 = vpop.xlane.xlu0 %8808  ;;  %v7068_v13 = vld [vmem:[%s16660_s5 + $0x12d0] sm:$0xff]  ;;  %vm20377_vm8 = vcmask 589312  }
 0x65c   : > { %v12934_v29 = vrot.slane %v8812_v21, %v16902_v38  ;;  %v12929_v36 = vrot.slane %v8809_v52, %v16908_v42  ;;  %v9044_v21 = vsel %vm7234_vm0, %v7069_v41, 0.0 }
 0x65e   : > { %v12930_v59 = vsel %vm10395_vm12, %v12929_v36, %v12925_v27  ;;  %9021 = vadd.xlane.f32.xlu1 %v9020_v57  ;;  %9018 = vadd.xlane.f32.xlu0 %v9017_v12  ;;  %v9041_v27 = vsel %vm7234_vm0, %v7068_v13, 0.0  ;;  %v7071_v12 = vld [vmem:[%s16660_s5 + $0x12e8] sm:$0xff] }
 0x65f   : > { %v8818_v37 = vpop.xlane.xlu1 %8817  ;;  %v12935_v45 = vsel %vm10402_vm13, %v12934_v29, %v12930_v59  ;;  %v8815_v2 = vpop.xlane.xlu0 %8814  ;;  %v7070_v29 = vld [vmem:[%s16660_s5 + $0x12e0] sm:$0xff] }
 0x660   : > { %v12944_v46 = vrot.slane %v8818_v37, %v16918_v56  ;;  %v12939_v50 = vrot.slane %v8815_v2, %v16923_v58  ;;  %v9050_v37 = vsel %vm7234_vm0, %v7071_v12, 0.0 }
 0x662   : > { %v12940_v17 = vsel %vm10409_vm14, %v12939_v50, %v12935_v45  ;;  %9027 = vadd.xlane.f32.xlu1 %v9026_v3  ;;  %9024 = vadd.xlane.f32.xlu0 %v9023_v15  ;;  %v9047_v45 = vsel %vm7234_vm0, %v7070_v29, 0.0  ;;  %v7073_v15 = vld [vmem:[%s16660_s5 + $0x12f8] sm:$0xff] }
 0x663   : > { %v12945_v51 = vsel %vm10416_vm15, %v12944_v46, %v12940_v17  ;;  %v8824_v60 = vpop.xlane.xlu1 %8823  ;;  %v8821_v16 = vpop.xlane.xlu0 %8820  ;;  %v7072_v46 = vld [vmem:[%s16660_s5 + $0x12f0] sm:$0xff] }
 0x664   : > { %v19073_v61 = vsel %vm14139_vm11, %v12945_v51, %v18671_v39  ;;  %v12953_v0 = vrot.slane %v8824_v60, %v16820_v26  ;;  %v12949_v23 = vrot.slane %v8821_v16, %v16817_v25  ;;  %v9056_v51 = vsel %vm7234_vm0, %v7073_v15, 0.0 }
 0x665   : > { %v9053_v60 = vsel %vm7234_vm0, %v7072_v46, 0.0 }
 0x666   : > { %v12954_v5 = vsel %vm10318_vm1, %v12953_v0, %v12949_v23  ;;  %9033 = vadd.xlane.f32.xlu1 %v9032_v18  ;;  %9030 = vadd.xlane.f32.xlu0 %v9029_v35  ;;  %v7075_v35 = vld [vmem:[%s16660_s5 + $0x1308] sm:$0xff]  ;;  %v7074_v0 = vld [vmem:[%s16660_s5 + $0x1300] sm:$0xff] }
 0x667   : > { %v8830_v33 = vpop.xlane.xlu1 %8829  ;;  %v8827_v34 = vpop.xlane.xlu0 %8826 }
 0x668   : > { %v12963_v39 = vrot.slane %v8830_v33, %v16830_v32  ;;  %v12958_v40 = vrot.slane %v8827_v34, %v16827_v31  ;;  %v9062_v33 = vsel %vm7234_vm0, %v7075_v35, 0.0  ;;  %v9059_v34 = vsel %vm7234_vm0, %v7074_v0, 0.0  ;;  %v7082_v35 = vld [vmem:[%s16660_s5 + $0x1340] sm:$0xff] }
 0x66a   : > { %v12959_v19 = vsel %vm10325_vm2, %v12958_v40, %v12954_v5  ;;  %9039 = vadd.xlane.f32.xlu1 %v9038_v8  ;;  %9036 = vadd.xlane.f32.xlu0 %v9035_v11  ;;  %v7076_v40 = vld [vmem:[%s16660_s5 + $0x1310] sm:$0xff] }
 0x66b   : > { %v8836_v47 = vpop.xlane.xlu1 %8835  ;;  %v12964_v48 = vsel %vm10332_vm3, %v12963_v39, %v12959_v19  ;;  %v8833_v49 = vpop.xlane.xlu0 %8832  ;;  %v7077_v39 = vld [vmem:[%s16660_s5 + $0x1318] sm:$0xff] }
 0x66c   : > { %v12973_v52 = vrot.slane %v8836_v47, %v16841_v43  ;;  %v12968_v57 = vrot.slane %v8833_v49, %v16844_v44  ;;  %v9065_v49 = vsel %vm7234_vm0, %v7076_v40, 0.0 }
 0x66e   : > { %v12969_v36 = vsel %vm10339_vm4, %v12968_v57, %v12964_v48  ;;  %9045 = vadd.xlane.f32.xlu1 %v9044_v21  ;;  %9042 = vadd.xlane.f32.xlu0 %v9041_v27  ;;  %v9068_v48 = vsel %vm7234_vm0, %v7077_v39, 0.0  ;;  %v7078_v57 = vld [vmem:[%s16660_s5 + $0x1320] sm:$0xff] }
 0x66f   : > { %v8842_v62 = vpop.xlane.xlu1 %8841  ;;  %v12974_v63 = vsel %vm10346_vm5, %v12973_v52, %v12969_v36  ;;  %v8839_v59 = vpop.xlane.xlu0 %8838  ;;  %v7079_v52 = vld [vmem:[%s16660_s5 + $0x1328] sm:$0xff] }
 0x670   : > { %v12983_v2 = vrot.slane %v8842_v62, %v16853_v53  ;;  %v12978_v3 = vrot.slane %v8839_v59, %v16856_v54  ;;  %v9071_v59 = vsel %vm7234_vm0, %v7078_v57, 0.0 }
 0x672   : > { %v12979_v50 = vsel %vm10353_vm6, %v12978_v3, %v12974_v63  ;;  %9051 = vadd.xlane.f32.xlu1 %v9050_v37  ;;  %9048 = vadd.xlane.f32.xlu0 %v9047_v45  ;;  %v9074_v63 = vsel %vm7234_vm0, %v7079_v52, 0.0  ;;  %v7080_v3 = vld [vmem:[%s16660_s5 + $0x1330] sm:$0xff] }
 0x673   : > { %v8848_v7 = vpop.xlane.xlu1 %8847  ;;  %v12984_v9 = vsel %vm10360_vm7, %v12983_v2, %v12979_v50  ;;  %v8845_v17 = vpop.xlane.xlu0 %8844  ;;  %v7081_v2 = vld [vmem:[%s16660_s5 + $0x1338] sm:$0xff] }
 0x674   : > { %v12993_v16 = vrot.slane %v8848_v7, %v16870_v4  ;;  %v12988_v18 = vrot.slane %v8845_v17, %v16878_v10  ;;  %v9077_v17 = vsel %vm7234_vm0, %v7080_v3, 0.0 }
 0x676   : > { %v12989_v23 = vsel %vm20377_vm8, %v12988_v18, %v12984_v9  ;;  %9057 = vadd.xlane.f32.xlu1 %v9056_v51  ;;  %9054 = vadd.xlane.f32.xlu0 %v9053_v60  ;;  %vm20378_vm8 = vcmask 786112   ;;  %v9080_v9 = vsel %vm7234_vm0, %v7081_v2, 0.0  ;;  %v7083_v18 = vld [vmem:[%s16660_s5 + $0x1348] sm:$0xff] }
 0x677   : > { %v8854_v24 = vpop.xlane.xlu1 %8853  ;;  %v12994_v55 = vsel %vm10374_vm9, %v12993_v16, %v12989_v23  ;;  %v8851_v5 = vpop.xlane.xlu0 %8850 }
 0x678   : > { %v13003_v8 = vrot.slane %v8854_v24, %v16886_v20  ;;  %v12998_v11 = vrot.slane %v8851_v5, %v16894_v28  ;;  %v9083_v5 = vsel %vm7234_vm0, %v7082_v35, 0.0 }
 0x67a   : > { %v12999_v41 = vsel %vm10381_vm10, %v12998_v11, %v12994_v55  ;;  %9063 = vadd.xlane.f32.xlu1 %v9062_v33  ;;  %9060 = vadd.xlane.f32.xlu0 %v9059_v34  ;;  %v9086_v55 = vsel %vm7234_vm0, %v7083_v18, 0.0  ;;  %v7085_v34 = vld [vmem:[%s16660_s5 + $0x1358] sm:$0xff] }
 0x67b   : > { %v8860_v13 = vpop.xlane.xlu1 %8859  ;;  %v13004_v19 = vsel %vm20378_vm8, %v13003_v8, %v12999_v41  ;;  %v8857_v47 = vpop.xlane.xlu0 %8856  ;;  %v7084_v8 = vld [vmem:[%s16660_s5 + $0x1350] sm:$0xff]  ;;  %vm20379_vm8 = vcmask 589312  }
 0x67c   : > { %v13013_v21 = vrot.slane %v8860_v13, %v16902_v38  ;;  %v13008_v27 = vrot.slane %v8857_v47, %v16908_v42  ;;  %v9092_v13 = vsel %vm7234_vm0, %v7085_v34, 0.0 }
 0x67e   : > { %v13009_v12 = vsel %vm10395_vm12, %v13008_v27, %v13004_v19  ;;  %9069 = vadd.xlane.f32.xlu1 %v9068_v48  ;;  %9066 = vadd.xlane.f32.xlu0 %v9065_v49  ;;  %v9089_v19 = vsel %vm7234_vm0, %v7084_v8, 0.0  ;;  %v7087_v49 = vld [vmem:[%s16660_s5 + $0x1368] sm:$0xff] }
 0x67f   : > { %v8866_v29 = vpop.xlane.xlu1 %8865  ;;  %v13014_v36 = vsel %vm10402_vm13, %v13013_v21, %v13009_v12  ;;  %v8863_v62 = vpop.xlane.xlu0 %8862  ;;  %v7086_v21 = vld [vmem:[%s16660_s5 + $0x1360] sm:$0xff] }
 0x680   : > { %v13023_v37 = vrot.slane %v8866_v29, %v16918_v56  ;;  %v13018_v45 = vrot.slane %v8863_v62, %v16923_v58  ;;  %v9098_v29 = vsel %vm7234_vm0, %v7087_v49, 0.0 }
 0x682   : > { %v13019_v15 = vsel %vm10409_vm14, %v13018_v45, %v13014_v36  ;;  %9075 = vadd.xlane.f32.xlu1 %v9074_v63  ;;  %9072 = vadd.xlane.f32.xlu0 %v9071_v59  ;;  %v9095_v36 = vsel %vm7234_vm0, %v7086_v21, 0.0  ;;  %v7089_v59 = vld [vmem:[%s16660_s5 + $0x1378] sm:$0xff] }
 0x683   : > { %v13024_v46 = vsel %vm10416_vm15, %v13023_v37, %v13019_v15  ;;  %v8872_v50 = vpop.xlane.xlu1 %8871  ;;  %v8869_v7 = vpop.xlane.xlu0 %8868  ;;  %v7088_v37 = vld [vmem:[%s16660_s5 + $0x1370] sm:$0xff] }
 0x684   : > { %v19140_v51 = vsel %vm14139_vm11, %v13024_v46, %v18738_v30  ;;  %v13032_v60 = vrot.slane %v8872_v50, %v16820_v26  ;;  %v13028_v16 = vrot.slane %v8869_v7, %v16817_v25  ;;  %v9104_v46 = vsel %vm7234_vm0, %v7089_v59, 0.0 }
 0x685   : > { %v9101_v50 = vsel %vm7234_vm0, %v7088_v37, 0.0 }
 0x686   : > { %v13033_v0 = vsel %vm10318_vm1, %v13032_v60, %v13028_v16  ;;  %9081 = vadd.xlane.f32.xlu1 %v9080_v9  ;;  %9078 = vadd.xlane.f32.xlu0 %v9077_v17  ;;  %v7091_v17 = vld [vmem:[%s16660_s5 + $0x1388] sm:$0xff]  ;;  %v7090_v60 = vld [vmem:[%s16660_s5 + $0x1380] sm:$0xff] }
 0x687   : > { %v8878_v23 = vpop.xlane.xlu1 %8877  ;;  %v8875_v24 = vpop.xlane.xlu0 %8874 }
 0x688   : > { %v13042_v30 = vrot.slane %v8878_v23, %v16830_v32  ;;  %v13037_v33 = vrot.slane %v8875_v24, %v16827_v31  ;;  %v9110_v23 = vsel %vm7234_vm0, %v7091_v17, 0.0  ;;  %v9107_v24 = vsel %vm7234_vm0, %v7090_v60, 0.0  ;;  %v7098_v17 = vld [vmem:[%s16660_s5 + $0x13c0] sm:$0xff] }
 0x68a   : > { %v13038_v11 = vsel %vm10325_vm2, %v13037_v33, %v13033_v0  ;;  %9087 = vadd.xlane.f32.xlu1 %v9086_v55  ;;  %9084 = vadd.xlane.f32.xlu0 %v9083_v5  ;;  %v7092_v33 = vld [vmem:[%s16660_s5 + $0x1390] sm:$0xff] }
 0x68b   : > { %v8884_v39 = vpop.xlane.xlu1 %8883  ;;  %v13043_v40 = vsel %vm10332_vm3, %v13042_v30, %v13038_v11  ;;  %v8881_v41 = vpop.xlane.xlu0 %8880  ;;  %v7093_v30 = vld [vmem:[%s16660_s5 + $0x1398] sm:$0xff] }
 0x68c   : > { %v13052_v47 = vrot.slane %v8884_v39, %v16841_v43  ;;  %v13047_v48 = vrot.slane %v8881_v41, %v16844_v44  ;;  %v9113_v41 = vsel %vm7234_vm0, %v7092_v33, 0.0 }
 0x68e   : > { %v13048_v27 = vsel %vm10339_vm4, %v13047_v48, %v13043_v40  ;;  %9093 = vadd.xlane.f32.xlu1 %v9092_v13  ;;  %9090 = vadd.xlane.f32.xlu0 %v9089_v19  ;;  %v9116_v40 = vsel %vm7234_vm0, %v7093_v30, 0.0  ;;  %v7094_v48 = vld [vmem:[%s16660_s5 + $0x13a0] sm:$0xff] }
 0x68f   : > { %v8890_v52 = vpop.xlane.xlu1 %8889  ;;  %v13053_v57 = vsel %vm10346_vm5, %v13052_v47, %v13048_v27  ;;  %v8887_v12 = vpop.xlane.xlu0 %8886  ;;  %v7095_v47 = vld [vmem:[%s16660_s5 + $0x13a8] sm:$0xff] }
 0x690   : > { %v13062_v62 = vrot.slane %v8890_v52, %v16853_v53  ;;  %v13057_v63 = vrot.slane %v8887_v12, %v16856_v54  ;;  %v9119_v12 = vsel %vm7234_vm0, %v7094_v48, 0.0 }
 0x692   : > { %v13058_v45 = vsel %vm10353_vm6, %v13057_v63, %v13053_v57  ;;  %9099 = vadd.xlane.f32.xlu1 %v9098_v29  ;;  %9096 = vadd.xlane.f32.xlu0 %v9095_v36  ;;  %v9122_v57 = vsel %vm7234_vm0, %v7095_v47, 0.0  ;;  %v7096_v63 = vld [vmem:[%s16660_s5 + $0x13b0] sm:$0xff] }
 0x693   : > { %v8896_v2 = vpop.xlane.xlu1 %8895  ;;  %v13063_v3 = vsel %vm10360_vm7, %v13062_v62, %v13058_v45  ;;  %v8893_v15 = vpop.xlane.xlu0 %8892  ;;  %v7097_v62 = vld [vmem:[%s16660_s5 + $0x13b8] sm:$0xff] }
 0x694   : > { %v13072_v7 = vrot.slane %v8896_v2, %v16870_v4  ;;  %v13067_v9 = vrot.slane %v8893_v15, %v16878_v10  ;;  %v9125_v15 = vsel %vm7234_vm0, %v7096_v63, 0.0 }
 0x696   : > { %v13068_v16 = vsel %vm20379_vm8, %v13067_v9, %v13063_v3  ;;  %9105 = vadd.xlane.f32.xlu1 %v9104_v46  ;;  %9102 = vadd.xlane.f32.xlu0 %v9101_v50  ;;  %vm20380_vm8 = vcmask 786112   ;;  %v9128_v3 = vsel %vm7234_vm0, %v7097_v62, 0.0  ;;  %v7099_v9 = vld [vmem:[%s16660_s5 + $0x13c8] sm:$0xff] }
 0x697   : > { %v8902_v18 = vpop.xlane.xlu1 %8901  ;;  %v13073_v35 = vsel %vm10374_vm9, %v13072_v7, %v13068_v16  ;;  %v8899_v0 = vpop.xlane.xlu0 %8898 }
 0x698   : > { %v13082_v55 = vrot.slane %v8902_v18, %v16886_v20  ;;  %v13077_v5 = vrot.slane %v8899_v0, %v16894_v28  ;;  %v9131_v0 = vsel %vm7234_vm0, %v7098_v17, 0.0 }
 0x69a   : > { %v13078_v34 = vsel %vm10381_vm10, %v13077_v5, %v13073_v35  ;;  %9111 = vadd.xlane.f32.xlu1 %v9110_v23  ;;  %9108 = vadd.xlane.f32.xlu0 %v9107_v24  ;;  %v9134_v35 = vsel %vm7234_vm0, %v7099_v9, 0.0  ;;  %v7101_v24 = vld [vmem:[%s16660_s5 + $0x13d8] sm:$0xff] }
 0x69b   : > { %v8908_v8 = vpop.xlane.xlu1 %8907  ;;  %v13083_v11 = vsel %vm20380_vm8, %v13082_v55, %v13078_v34  ;;  %v8905_v39 = vpop.xlane.xlu0 %8904  ;;  %v7100_v55 = vld [vmem:[%s16660_s5 + $0x13d0] sm:$0xff]  ;;  %vm20381_vm8 = vcmask 589312  }
 0x69c   : > { %v13092_v13 = vrot.slane %v8908_v8, %v16902_v38  ;;  %v13087_v19 = vrot.slane %v8905_v39, %v16908_v42  ;;  %v9140_v8 = vsel %vm7234_vm0, %v7101_v24, 0.0 }
 0x69e   : > { %v13088_v49 = vsel %vm10395_vm12, %v13087_v19, %v13083_v11  ;;  %9117 = vadd.xlane.f32.xlu1 %v9116_v40  ;;  %9114 = vadd.xlane.f32.xlu0 %v9113_v41  ;;  %v9137_v11 = vsel %vm7234_vm0, %v7100_v55, 0.0  ;;  %v7103_v41 = vld [vmem:[%s16660_s5 + $0x13e8] sm:$0xff] }
 0x69f   : > { %v8914_v21 = vpop.xlane.xlu1 %8913  ;;  %v13093_v27 = vsel %vm10402_vm13, %v13092_v13, %v13088_v49  ;;  %v8911_v52 = vpop.xlane.xlu0 %8910  ;;  %v7102_v13 = vld [vmem:[%s16660_s5 + $0x13e0] sm:$0xff] }
 0x6a0   : > { %v13102_v29 = vrot.slane %v8914_v21, %v16918_v56  ;;  %v13097_v36 = vrot.slane %v8911_v52, %v16923_v58  ;;  %v9146_v21 = vsel %vm7234_vm0, %v7103_v41, 0.0 }
 0x6a2   : > { %v13098_v59 = vsel %vm10409_vm14, %v13097_v36, %v13093_v27  ;;  %9123 = vadd.xlane.f32.xlu1 %v9122_v57  ;;  %9120 = vadd.xlane.f32.xlu0 %v9119_v12  ;;  %v9143_v27 = vsel %vm7234_vm0, %v7102_v13, 0.0  ;;  %v7105_v12 = vld [vmem:[%s16660_s5 + $0x13f8] sm:$0xff] }
 0x6a3   : > { %v13103_v37 = vsel %vm10416_vm15, %v13102_v29, %v13098_v59  ;;  %v8920_v45 = vpop.xlane.xlu1 %8919  ;;  %v8917_v2 = vpop.xlane.xlu0 %8916  ;;  %v7104_v29 = vld [vmem:[%s16660_s5 + $0x13f0] sm:$0xff] }
 0x6a4   : > { %v19207_v46 = vsel %vm14139_vm11, %v13103_v37, %v18805_v22  ;;  %v13111_v50 = vrot.slane %v8920_v45, %v16820_v26  ;;  %v13107_v7 = vrot.slane %v8917_v2, %v16817_v25  ;;  %v9152_v37 = vsel %vm7234_vm0, %v7105_v12, 0.0 }
 0x6a5   : > { %v9149_v45 = vsel %vm7234_vm0, %v7104_v29, 0.0 }
 0x6a6   : > { %v13112_v60 = vsel %vm10318_vm1, %v13111_v50, %v13107_v7  ;;  %9129 = vadd.xlane.f32.xlu1 %v9128_v3  ;;  %9126 = vadd.xlane.f32.xlu0 %v9125_v15  ;;  %v7107_v15 = vld [vmem:[%s16660_s5 + $0x1408] sm:$0xff]  ;;  %v7106_v50 = vld [vmem:[%s16660_s5 + $0x1400] sm:$0xff] }
 0x6a7   : > { %v8926_v16 = vpop.xlane.xlu1 %8925  ;;  %v8923_v18 = vpop.xlane.xlu0 %8922 }
 0x6a8   : > { %v13121_v22 = vrot.slane %v8926_v16, %v16830_v32  ;;  %v13116_v23 = vrot.slane %v8923_v18, %v16827_v31  ;;  %v9158_v16 = vsel %vm7234_vm0, %v7107_v15, 0.0  ;;  %v9155_v18 = vsel %vm7234_vm0, %v7106_v50, 0.0  ;;  %v7114_v15 = vld [vmem:[%s16660_s5 + $0x1440] sm:$0xff] }
 0x6aa   : > { %v13117_v5 = vsel %vm10325_vm2, %v13116_v23, %v13112_v60  ;;  %9135 = vadd.xlane.f32.xlu1 %v9134_v35  ;;  %9132 = vadd.xlane.f32.xlu0 %v9131_v0  ;;  %v7108_v23 = vld [vmem:[%s16660_s5 + $0x1410] sm:$0xff] }
 0x6ab   : > { %v8932_v30 = vpop.xlane.xlu1 %8931  ;;  %v13122_v33 = vsel %vm10332_vm3, %v13121_v22, %v13117_v5  ;;  %v8929_v34 = vpop.xlane.xlu0 %8928  ;;  %v7109_v22 = vld [vmem:[%s16660_s5 + $0x1418] sm:$0xff] }
 0x6ac   : > { %v13131_v39 = vrot.slane %v8932_v30, %v16841_v43  ;;  %v13126_v40 = vrot.slane %v8929_v34, %v16844_v44  ;;  %v9161_v34 = vsel %vm7234_vm0, %v7108_v23, 0.0 }
 0x6ae   : > { %v13127_v19 = vsel %vm10339_vm4, %v13126_v40, %v13122_v33  ;;  %9141 = vadd.xlane.f32.xlu1 %v9140_v8  ;;  %9138 = vadd.xlane.f32.xlu0 %v9137_v11  ;;  %v9164_v33 = vsel %vm7234_vm0, %v7109_v22, 0.0  ;;  %v7110_v40 = vld [vmem:[%s16660_s5 + $0x1420] sm:$0xff] }
 0x6af   : > { %v8938_v47 = vpop.xlane.xlu1 %8937  ;;  %v13132_v48 = vsel %vm10346_vm5, %v13131_v39, %v13127_v19  ;;  %v8935_v49 = vpop.xlane.xlu0 %8934  ;;  %v7111_v39 = vld [vmem:[%s16660_s5 + $0x1428] sm:$0xff] }
 0x6b0   : > { %v13141_v52 = vrot.slane %v8938_v47, %v16853_v53  ;;  %v13136_v57 = vrot.slane %v8935_v49, %v16856_v54  ;;  %v9167_v49 = vsel %vm7234_vm0, %v7110_v40, 0.0 }
 0x6b2   : > { %v13137_v36 = vsel %vm10353_vm6, %v13136_v57, %v13132_v48  ;;  %9147 = vadd.xlane.f32.xlu1 %v9146_v21  ;;  %9144 = vadd.xlane.f32.xlu0 %v9143_v27  ;;  %v9170_v48 = vsel %vm7234_vm0, %v7111_v39, 0.0  ;;  %v7112_v57 = vld [vmem:[%s16660_s5 + $0x1430] sm:$0xff] }
 0x6b3   : > { %v8944_v62 = vpop.xlane.xlu1 %8943  ;;  %v13142_v63 = vsel %vm10360_vm7, %v13141_v52, %v13137_v36  ;;  %v8941_v59 = vpop.xlane.xlu0 %8940  ;;  %v7113_v52 = vld [vmem:[%s16660_s5 + $0x1438] sm:$0xff] }
 0x6b4   : > { %v13151_v2 = vrot.slane %v8944_v62, %v16870_v4  ;;  %v13146_v3 = vrot.slane %v8941_v59, %v16878_v10  ;;  %v9173_v59 = vsel %vm7234_vm0, %v7112_v57, 0.0 }
 0x6b6   : > { %v13147_v7 = vsel %vm20381_vm8, %v13146_v3, %v13142_v63  ;;  %9153 = vadd.xlane.f32.xlu1 %v9152_v37  ;;  %9150 = vadd.xlane.f32.xlu0 %v9149_v45  ;;  %vm20382_vm8 = vcmask 786112   ;;  %v9176_v63 = vsel %vm7234_vm0, %v7113_v52, 0.0  ;;  %v7115_v3 = vld [vmem:[%s16660_s5 + $0x1448] sm:$0xff] }
 0x6b7   : > { %v8950_v9 = vpop.xlane.xlu1 %8949  ;;  %v13152_v17 = vsel %vm10374_vm9, %v13151_v2, %v13147_v7  ;;  %v8947_v60 = vpop.xlane.xlu0 %8946 }
 0x6b8   : > { %v13161_v35 = vrot.slane %v8950_v9, %v16886_v20  ;;  %v13156_v0 = vrot.slane %v8947_v60, %v16894_v28  ;;  %v9179_v60 = vsel %vm7234_vm0, %v7114_v15, 0.0 }
 0x6ba   : > { %v13157_v24 = vsel %vm10381_vm10, %v13156_v0, %v13152_v17  ;;  %9159 = vadd.xlane.f32.xlu1 %v9158_v16  ;;  %9156 = vadd.xlane.f32.xlu0 %v9155_v18  ;;  %v9182_v17 = vsel %vm7234_vm0, %v7115_v3, 0.0  ;;  %v7117_v18 = vld [vmem:[%s16660_s5 + $0x1458] sm:$0xff] }
 0x6bb   : > { %v8956_v55 = vpop.xlane.xlu1 %8955  ;;  %v13162_v5 = vsel %vm20382_vm8, %v13161_v35, %v13157_v24  ;;  %v8953_v30 = vpop.xlane.xlu0 %8952  ;;  %v7116_v35 = vld [vmem:[%s16660_s5 + $0x1450] sm:$0xff] }
 0x6bc   : > { %v13171_v8 = vrot.slane %v8956_v55, %v16902_v38  ;;  %v13166_v11 = vrot.slane %v8953_v30, %v16908_v42  ;;  %v9188_v55 = vsel %vm7234_vm0, %v7117_v18, 0.0 }
 0x6be   : > { %v13167_v41 = vsel %vm10395_vm12, %v13166_v11, %v13162_v5  ;;  %9165 = vadd.xlane.f32.xlu1 %v9164_v33  ;;  %9162 = vadd.xlane.f32.xlu0 %v9161_v34  ;;  %v9185_v5 = vsel %vm7234_vm0, %v7116_v35, 0.0  ;;  %v7119_v34 = vld [vmem:[%s16660_s5 + $0x1468] sm:$0xff] }
 0x6bf   : > { %v8962_v13 = vpop.xlane.xlu1 %8961  ;;  %v13172_v19 = vsel %vm10402_vm13, %v13171_v8, %v13167_v41  ;;  %v8959_v47 = vpop.xlane.xlu0 %8958  ;;  %v7118_v8 = vld [vmem:[%s16660_s5 + $0x1460] sm:$0xff] }
 0x6c0   : > { %v13181_v21 = vrot.slane %v8962_v13, %v16918_v56  ;;  %v13176_v27 = vrot.slane %v8959_v47, %v16923_v58  ;;  %v9194_v13 = vsel %vm7234_vm0, %v7119_v34, 0.0 }
 0x6c2   : > { %v13177_v12 = vsel %vm10409_vm14, %v13176_v27, %v13172_v19  ;;  %9171 = vadd.xlane.f32.xlu1 %v9170_v48  ;;  %9168 = vadd.xlane.f32.xlu0 %v9167_v49  ;;  %v9191_v19 = vsel %vm7234_vm0, %v7118_v8, 0.0  ;;  %v7121_v49 = vld [vmem:[%s16660_s5 + $0x1478] sm:$0xff] }
 0x6c3   : > { %v13182_v29 = vsel %vm10416_vm15, %v13181_v21, %v13177_v12  ;;  %v8968_v36 = vpop.xlane.xlu1 %8967  ;;  %v8965_v62 = vpop.xlane.xlu0 %8964  ;;  %v7120_v21 = vld [vmem:[%s16660_s5 + $0x1470] sm:$0xff] }
 0x6c4   : > { %v19274_v37 = vsel %vm14139_vm11, %v13182_v29, %v18872_v14  ;;  %v13190_v45 = vrot.slane %v8968_v36, %v16820_v26  ;;  %v13186_v2 = vrot.slane %v8965_v62, %v16817_v25  ;;  %v9200_v29 = vsel %vm7234_vm0, %v7121_v49, 0.0 }
 0x6c5   : > { %v9197_v36 = vsel %vm7234_vm0, %v7120_v21, 0.0  ;;  %vm20383_vm11 = vcmask 589312  }
 0x6c6   : > { %v13191_v50 = vsel %vm10318_vm1, %v13190_v45, %v13186_v2  ;;  %9177 = vadd.xlane.f32.xlu1 %v9176_v63  ;;  %9174 = vadd.xlane.f32.xlu0 %v9173_v59  ;;  %v7123_v59 = vld [vmem:[%s16660_s5 + $0x1488] sm:$0xff]  ;;  %v7122_v45 = vld [vmem:[%s16660_s5 + $0x1480] sm:$0xff] }
 0x6c7   : > { %v8974_v7 = vpop.xlane.xlu1 %8973  ;;  %v8971_v9 = vpop.xlane.xlu0 %8970 }
 0x6c8   : > { %v13200_v14 = vrot.slane %v8974_v7, %v16830_v32  ;;  %v13195_v16 = vrot.slane %v8971_v9, %v16827_v31  ;;  %v9206_v7 = vsel %vm7234_vm0, %v7123_v59, 0.0  ;;  %v9203_v9 = vsel %vm7234_vm0, %v7122_v45, 0.0  ;;  %v7130_v59 = vld [vmem:[%s16660_s5 + $0x14c0] sm:$0xff] }
 0x6ca   : > { %v13196_v0 = vsel %vm10325_vm2, %v13195_v16, %v13191_v50  ;;  %9183 = vadd.xlane.f32.xlu1 %v9182_v17  ;;  %9180 = vadd.xlane.f32.xlu0 %v9179_v60  ;;  %v7124_v16 = vld [vmem:[%s16660_s5 + $0x1490] sm:$0xff] }
 0x6cb   : > { %v8980_v22 = vpop.xlane.xlu1 %8979  ;;  %v13201_v23 = vsel %vm10332_vm3, %v13200_v14, %v13196_v0  ;;  %v8977_v24 = vpop.xlane.xlu0 %8976  ;;  %v7125_v14 = vld [vmem:[%s16660_s5 + $0x1498] sm:$0xff] }
 0x6cc   : > { %v13210_v30 = vrot.slane %v8980_v22, %v16841_v43  ;;  %v13205_v33 = vrot.slane %v8977_v24, %v16844_v44  ;;  %v9209_v24 = vsel %vm7234_vm0, %v7124_v16, 0.0 }
 0x6ce   : > { %v13206_v11 = vsel %vm10339_vm4, %v13205_v33, %v13201_v23  ;;  %9189 = vadd.xlane.f32.xlu1 %v9188_v55  ;;  %9186 = vadd.xlane.f32.xlu0 %v9185_v5  ;;  %v9212_v23 = vsel %vm7234_vm0, %v7125_v14, 0.0  ;;  %v7126_v33 = vld [vmem:[%s16660_s5 + $0x14a0] sm:$0xff] }
 0x6cf   : > { %v8986_v39 = vpop.xlane.xlu1 %8985  ;;  %v13211_v40 = vsel %vm10346_vm5, %v13210_v30, %v13206_v11  ;;  %v8983_v41 = vpop.xlane.xlu0 %8982  ;;  %v7127_v30 = vld [vmem:[%s16660_s5 + $0x14a8] sm:$0xff] }
 0x6d0   : > { %v13220_v47 = vrot.slane %v8986_v39, %v16853_v53  ;;  %v13215_v48 = vrot.slane %v8983_v41, %v16856_v54  ;;  %v9215_v41 = vsel %vm7234_vm0, %v7126_v33, 0.0 }
 0x6d2   : > { %v13216_v27 = vsel %vm10353_vm6, %v13215_v48, %v13211_v40  ;;  %9195 = vadd.xlane.f32.xlu1 %v9194_v13  ;;  %9192 = vadd.xlane.f32.xlu0 %v9191_v19  ;;  %v9218_v40 = vsel %vm7234_vm0, %v7127_v30, 0.0  ;;  %v7128_v48 = vld [vmem:[%s16660_s5 + $0x14b0] sm:$0xff] }
 0x6d3   : > { %v8992_v52 = vpop.xlane.xlu1 %8991  ;;  %v13221_v57 = vsel %vm10360_vm7, %v13220_v47, %v13216_v27  ;;  %v8989_v12 = vpop.xlane.xlu0 %8988  ;;  %v7129_v47 = vld [vmem:[%s16660_s5 + $0x14b8] sm:$0xff] }
 0x6d4   : > { %v13230_v62 = vrot.slane %v8992_v52, %v16870_v4  ;;  %v13225_v63 = vrot.slane %v8989_v12, %v16878_v10  ;;  %v9221_v12 = vsel %vm7234_vm0, %v7128_v48, 0.0 }
 0x6d6   : > { %v13226_v2 = vsel %vm20383_vm11, %v13225_v63, %v13221_v57  ;;  %9201 = vadd.xlane.f32.xlu1 %v9200_v29  ;;  %9198 = vadd.xlane.f32.xlu0 %v9197_v36  ;;  %vm14141_vm11 = vcmask 1046534   ;;  %v9224_v57 = vsel %vm7234_vm0, %v7129_v47, 0.0  ;;  %v7131_v63 = vld [vmem:[%s16660_s5 + $0x14c8] sm:$0xff] }
 0x6d7   : > { %v8998_v3 = vpop.xlane.xlu1 %8997  ;;  %v13231_v15 = vsel %vm10374_vm9, %v13230_v62, %v13226_v2  ;;  %v8995_v50 = vpop.xlane.xlu0 %8994 }
 0x6d8   : > { %v13240_v17 = vrot.slane %v8998_v3, %v16886_v20  ;;  %v13235_v60 = vrot.slane %v8995_v50, %v16894_v28  ;;  %v9227_v50 = vsel %vm7234_vm0, %v7130_v59, 0.0 }
 0x6da   : > { %v13236_v18 = vsel %vm10381_vm10, %v13235_v60, %v13231_v15  ;;  %9207 = vadd.xlane.f32.xlu1 %v9206_v7  ;;  %9204 = vadd.xlane.f32.xlu0 %v9203_v9  ;;  %v9230_v15 = vsel %vm7234_vm0, %v7131_v63, 0.0  ;;  %v7133_v9 = vld [vmem:[%s16660_s5 + $0x14d8] sm:$0xff] }
 0x6db   : > { %v9004_v35 = vpop.xlane.xlu1 %9003  ;;  %v13241_v0 = vsel %vm20382_vm8, %v13240_v17, %v13236_v18  ;;  %v9001_v22 = vpop.xlane.xlu0 %9000  ;;  %v7132_v17 = vld [vmem:[%s16660_s5 + $0x14d0] sm:$0xff]  ;;  %vm20384_vm8 = vcmask 589312  }
 0x6dc   : > { %v13250_v55 = vrot.slane %v9004_v35, %v16902_v38  ;;  %v13245_v5 = vrot.slane %v9001_v22, %v16908_v42  ;;  %v9236_v35 = vsel %vm7234_vm0, %v7133_v9, 0.0 }
 0x6de   : > { %v13246_v34 = vsel %vm10395_vm12, %v13245_v5, %v13241_v0  ;;  %9213 = vadd.xlane.f32.xlu1 %v9212_v23  ;;  %9210 = vadd.xlane.f32.xlu0 %v9209_v24  ;;  %v9233_v0 = vsel %vm7234_vm0, %v7132_v17, 0.0  ;;  %v7135_v24 = vld [vmem:[%s16660_s5 + $0x14e8] sm:$0xff] }
 0x6df   : > { %v9010_v8 = vpop.xlane.xlu1 %9009  ;;  %v13251_v11 = vsel %vm10402_vm13, %v13250_v55, %v13246_v34  ;;  %v9007_v39 = vpop.xlane.xlu0 %9006  ;;  %v7134_v55 = vld [vmem:[%s16660_s5 + $0x14e0] sm:$0xff] }
 0x6e0   : > { %v13260_v13 = vrot.slane %v9010_v8, %v16918_v56  ;;  %v13255_v19 = vrot.slane %v9007_v39, %v16923_v58  ;;  %v9242_v8 = vsel %vm7234_vm0, %v7135_v24, 0.0 }
 0x6e2   : > { %v13256_v49 = vsel %vm10409_vm14, %v13255_v19, %v13251_v11  ;;  %9219 = vadd.xlane.f32.xlu1 %v9218_v40  ;;  %9216 = vadd.xlane.f32.xlu0 %v9215_v41  ;;  %v9239_v11 = vsel %vm7234_vm0, %v7134_v55, 0.0  ;;  %v7137_v41 = vld [vmem:[%s16660_s5 + $0x14f8] sm:$0xff] }
 0x6e3   : > { %v13261_v21 = vsel %vm10416_vm15, %v13260_v13, %v13256_v49  ;;  %v9016_v27 = vpop.xlane.xlu1 %9015  ;;  %v9013_v52 = vpop.xlane.xlu0 %9012  ;;  %v7136_v13 = vld [vmem:[%s16660_s5 + $0x14f0] sm:$0xff] }
 0x6e4   : > { %v19341_v29 = vsel %vm14141_vm11, %v13261_v21, %v18939_v6  ;;  %v13269_v36 = vrot.slane %v9016_v27, %v16820_v26  ;;  %v13265_v62 = vrot.slane %v9013_v52, %v16817_v25  ;;  %v9248_v21 = vsel %vm7234_vm0, %v7137_v41, 0.0 }
 0x6e5   : > { %v9245_v27 = vsel %vm7234_vm0, %v7136_v13, 0.0 }
 0x6e6   : > { %v13270_v45 = vsel %vm10318_vm1, %v13269_v36, %v13265_v62  ;;  %9225 = vadd.xlane.f32.xlu1 %v9224_v57  ;;  %9222 = vadd.xlane.f32.xlu0 %v9221_v12  ;;  %v7139_v12 = vld [vmem:[%s16660_s5 + $0x1508] sm:$0xff]  ;;  %v7138_v36 = vld [vmem:[%s16660_s5 + $0x1500] sm:$0xff] }
 0x6e7   : > { %v9022_v2 = vpop.xlane.xlu1 %9021  ;;  %v9019_v3 = vpop.xlane.xlu0 %9018 }
 0x6e8   : > { %v13279_v6 = vrot.slane %v9022_v2, %v16830_v32  ;;  %v13274_v7 = vrot.slane %v9019_v3, %v16827_v31  ;;  %v9254_v2 = vsel %vm7234_vm0, %v7139_v12, 0.0  ;;  %v9251_v3 = vsel %vm7234_vm0, %v7138_v36, 0.0  ;;  %v7146_v12 = vld [vmem:[%s16660_s5 + $0x1540] sm:$0xff] }
 0x6ea   : > { %v13275_v60 = vsel %vm10325_vm2, %v13274_v7, %v13270_v45  ;;  %9231 = vadd.xlane.f32.xlu1 %v9230_v15  ;;  %9228 = vadd.xlane.f32.xlu0 %v9227_v50  ;;  %v7140_v7 = vld [vmem:[%s16660_s5 + $0x1510] sm:$0xff] }
 0x6eb   : > { %v9028_v14 = vpop.xlane.xlu1 %9027  ;;  %v13280_v16 = vsel %vm10332_vm3, %v13279_v6, %v13275_v60  ;;  %v9025_v18 = vpop.xlane.xlu0 %9024  ;;  %v7141_v6 = vld [vmem:[%s16660_s5 + $0x1518] sm:$0xff] }
 0x6ec   : > { %v13289_v22 = vrot.slane %v9028_v14, %v16841_v43  ;;  %v13284_v23 = vrot.slane %v9025_v18, %v16844_v44  ;;  %v9257_v18 = vsel %vm7234_vm0, %v7140_v7, 0.0 }
 0x6ee   : > { %v13285_v5 = vsel %vm10339_vm4, %v13284_v23, %v13280_v16  ;;  %9237 = vadd.xlane.f32.xlu1 %v9236_v35  ;;  %9234 = vadd.xlane.f32.xlu0 %v9233_v0  ;;  %v9260_v16 = vsel %vm7234_vm0, %v7141_v6, 0.0  ;;  %v7142_v23 = vld [vmem:[%s16660_s5 + $0x1520] sm:$0xff] }
 0x6ef   : > { %v9034_v30 = vpop.xlane.xlu1 %9033  ;;  %v13290_v33 = vsel %vm10346_vm5, %v13289_v22, %v13285_v5  ;;  %v9031_v34 = vpop.xlane.xlu0 %9030  ;;  %v7143_v22 = vld [vmem:[%s16660_s5 + $0x1528] sm:$0xff] }
 0x6f0   : > { %v13299_v39 = vrot.slane %v9034_v30, %v16853_v53  ;;  %v13294_v40 = vrot.slane %v9031_v34, %v16856_v54  ;;  %v9263_v34 = vsel %vm7234_vm0, %v7142_v23, 0.0 }
 0x6f2   : > { %v13295_v19 = vsel %vm10353_vm6, %v13294_v40, %v13290_v33  ;;  %9243 = vadd.xlane.f32.xlu1 %v9242_v8  ;;  %9240 = vadd.xlane.f32.xlu0 %v9239_v11  ;;  %v9266_v33 = vsel %vm7234_vm0, %v7143_v22, 0.0  ;;  %v7144_v40 = vld [vmem:[%s16660_s5 + $0x1530] sm:$0xff] }
 0x6f3   : > { %v9040_v47 = vpop.xlane.xlu1 %9039  ;;  %v13300_v48 = vsel %vm10360_vm7, %v13299_v39, %v13295_v19  ;;  %v9037_v49 = vpop.xlane.xlu0 %9036  ;;  %v7145_v39 = vld [vmem:[%s16660_s5 + $0x1538] sm:$0xff] }
 0x6f4   : > { %v13309_v52 = vrot.slane %v9040_v47, %v16870_v4  ;;  %v13304_v57 = vrot.slane %v9037_v49, %v16878_v10  ;;  %v9269_v49 = vsel %vm7234_vm0, %v7144_v40, 0.0 }
 0x6f6   : > { %v13305_v62 = vsel %vm20384_vm8, %v13304_v57, %v13300_v48  ;;  %9249 = vadd.xlane.f32.xlu1 %v9248_v21  ;;  %9246 = vadd.xlane.f32.xlu0 %v9245_v27  ;;  %vm20385_vm8 = vcmask 786112   ;;  %v9272_v48 = vsel %vm7234_vm0, %v7145_v39, 0.0  ;;  %v7147_v57 = vld [vmem:[%s16660_s5 + $0x1548] sm:$0xff] }
 0x6f7   : > { %v9046_v63 = vpop.xlane.xlu1 %9045  ;;  %v13310_v59 = vsel %vm10374_vm9, %v13309_v52, %v13305_v62  ;;  %v9043_v45 = vpop.xlane.xlu0 %9042 }
 0x6f8   : > { %v13319_v15 = vrot.slane %v9046_v63, %v16886_v20  ;;  %v13314_v50 = vrot.slane %v9043_v45, %v16894_v28  ;;  %v9275_v45 = vsel %vm7234_vm0, %v7146_v12, 0.0 }
 0x6fa   : > { %v13315_v9 = vsel %vm10381_vm10, %v13314_v50, %v13310_v59  ;;  %9255 = vadd.xlane.f32.xlu1 %v9254_v2  ;;  %9252 = vadd.xlane.f32.xlu0 %v9251_v3  ;;  %v9278_v59 = vsel %vm7234_vm0, %v7147_v57, 0.0  ;;  %v7149_v3 = vld [vmem:[%s16660_s5 + $0x1558] sm:$0xff] }
 0x6fb   : > { %v9052_v17 = vpop.xlane.xlu1 %9051  ;;  %v13320_v60 = vsel %vm20385_vm8, %v13319_v15, %v13315_v9  ;;  %v9049_v14 = vpop.xlane.xlu0 %9048  ;;  %v7148_v15 = vld [vmem:[%s16660_s5 + $0x1550] sm:$0xff]  ;;  %vm20386_vm8 = vcmask 589312  }
 0x6fc   : > { %v13329_v35 = vrot.slane %v9052_v17, %v16902_v38  ;;  %v13324_v0 = vrot.slane %v9049_v14, %v16908_v42  ;;  %v9284_v17 = vsel %vm7234_vm0, %v7149_v3, 0.0 }
 0x6fe   : > { %v13325_v24 = vsel %vm10395_vm12, %v13324_v0, %v13320_v60  ;;  %9261 = vadd.xlane.f32.xlu1 %v9260_v16  ;;  %9258 = vadd.xlane.f32.xlu0 %v9257_v18  ;;  %v9281_v60 = vsel %vm7234_vm0, %v7148_v15, 0.0  ;;  %v7151_v18 = vld [vmem:[%s16660_s5 + $0x1568] sm:$0xff] }
 0x6ff   : > { %v9058_v55 = vpop.xlane.xlu1 %9057  ;;  %v13330_v5 = vsel %vm10402_vm13, %v13329_v35, %v13325_v24  ;;  %v9055_v30 = vpop.xlane.xlu0 %9054  ;;  %v7150_v35 = vld [vmem:[%s16660_s5 + $0x1560] sm:$0xff] }
 0x700   : > { %v13339_v8 = vrot.slane %v9058_v55, %v16918_v56  ;;  %v13334_v11 = vrot.slane %v9055_v30, %v16923_v58  ;;  %v9290_v55 = vsel %vm7234_vm0, %v7151_v18, 0.0 }
 0x702   : > { %v13335_v41 = vsel %vm10409_vm14, %v13334_v11, %v13330_v5  ;;  %9267 = vadd.xlane.f32.xlu1 %v9266_v33  ;;  %9264 = vadd.xlane.f32.xlu0 %v9263_v34  ;;  %v9287_v5 = vsel %vm7234_vm0, %v7150_v35, 0.0  ;;  %v7153_v34 = vld [vmem:[%s16660_s5 + $0x1578] sm:$0xff] }
 0x703   : > { %v13340_v13 = vsel %vm10416_vm15, %v13339_v8, %v13335_v41  ;;  %v9064_v19 = vpop.xlane.xlu1 %9063  ;;  %v9061_v47 = vpop.xlane.xlu0 %9060  ;;  %v7152_v8 = vld [vmem:[%s16660_s5 + $0x1570] sm:$0xff] }
 0x704   : > { %v19408_v21 = vsel %vm14141_vm11, %v13340_v13, %v19006_v1  ;;  %v13348_v27 = vrot.slane %v9064_v19, %v16820_v26  ;;  %v13344_v52 = vrot.slane %v9061_v47, %v16817_v25  ;;  %v9296_v13 = vsel %vm7234_vm0, %v7153_v34, 0.0 }
 0x705   : > { %v9293_v19 = vsel %vm7234_vm0, %v7152_v8, 0.0 }
 0x706   : > { %v13349_v36 = vsel %vm10318_vm1, %v13348_v27, %v13344_v52  ;;  %9273 = vadd.xlane.f32.xlu1 %v9272_v48  ;;  %9270 = vadd.xlane.f32.xlu0 %v9269_v49  ;;  %v7155_v49 = vld [vmem:[%s16660_s5 + $0x1588] sm:$0xff]  ;;  %v7154_v27 = vld [vmem:[%s16660_s5 + $0x1580] sm:$0xff] }
 0x707   : > { %v9070_v62 = vpop.xlane.xlu1 %9069  ;;  %v9067_v63 = vpop.xlane.xlu0 %9066 }
 0x708   : > { %v13358_v1 = vrot.slane %v9070_v62, %v16830_v32  ;;  %v13353_v2 = vrot.slane %v9067_v63, %v16827_v31  ;;  %v9302_v62 = vsel %vm7234_vm0, %v7155_v49, 0.0  ;;  %v9299_v63 = vsel %vm7234_vm0, %v7154_v27, 0.0  ;;  %v7162_v49 = vld [vmem:[%s16660_s5 + $0x15c0] sm:$0xff] }
 0x70a   : > { %v13354_v50 = vsel %vm10325_vm2, %v13353_v2, %v13349_v36  ;;  %9279 = vadd.xlane.f32.xlu1 %v9278_v59  ;;  %9276 = vadd.xlane.f32.xlu0 %v9275_v45  ;;  %v7156_v2 = vld [vmem:[%s16660_s5 + $0x1590] sm:$0xff] }
 0x70b   : > { %v9076_v6 = vpop.xlane.xlu1 %9075  ;;  %v13359_v7 = vsel %vm10332_vm3, %v13358_v1, %v13354_v50  ;;  %v9073_v9 = vpop.xlane.xlu0 %9072  ;;  %v7157_v1 = vld [vmem:[%s16660_s5 + $0x1598] sm:$0xff] }
 0x70c   : > { %v13368_v14 = vrot.slane %v9076_v6, %v16841_v43  ;;  %v13363_v16 = vrot.slane %v9073_v9, %v16844_v44  ;;  %v9305_v9 = vsel %vm7234_vm0, %v7156_v2, 0.0 }
 0x70e   : > { %v13364_v0 = vsel %vm10339_vm4, %v13363_v16, %v13359_v7  ;;  %9285 = vadd.xlane.f32.xlu1 %v9284_v17  ;;  %9282 = vadd.xlane.f32.xlu0 %v9281_v60  ;;  %v9308_v7 = vsel %vm7234_vm0, %v7157_v1, 0.0  ;;  %v7158_v16 = vld [vmem:[%s16660_s5 + $0x15a0] sm:$0xff] }
 0x70f   : > { %v9082_v22 = vpop.xlane.xlu1 %9081  ;;  %v13369_v23 = vsel %vm10346_vm5, %v13368_v14, %v13364_v0  ;;  %v9079_v24 = vpop.xlane.xlu0 %9078  ;;  %v7159_v14 = vld [vmem:[%s16660_s5 + $0x15a8] sm:$0xff] }
 0x710   : > { %v13378_v30 = vrot.slane %v9082_v22, %v16853_v53  ;;  %v13373_v33 = vrot.slane %v9079_v24, %v16856_v54  ;;  %v9311_v24 = vsel %vm7234_vm0, %v7158_v16, 0.0 }
 0x712   : > { %v13374_v11 = vsel %vm10353_vm6, %v13373_v33, %v13369_v23  ;;  %9291 = vadd.xlane.f32.xlu1 %v9290_v55  ;;  %9288 = vadd.xlane.f32.xlu0 %v9287_v5  ;;  %v9314_v23 = vsel %vm7234_vm0, %v7159_v14, 0.0  ;;  %v7160_v33 = vld [vmem:[%s16660_s5 + $0x15b0] sm:$0xff] }
 0x713   : > { %v9088_v39 = vpop.xlane.xlu1 %9087  ;;  %v13379_v40 = vsel %vm10360_vm7, %v13378_v30, %v13374_v11  ;;  %v9085_v41 = vpop.xlane.xlu0 %9084  ;;  %v7161_v30 = vld [vmem:[%s16660_s5 + $0x15b8] sm:$0xff] }
 0x714   : > { %v13388_v47 = vrot.slane %v9088_v39, %v16870_v4  ;;  %v13383_v48 = vrot.slane %v9085_v41, %v16878_v10  ;;  %v9317_v41 = vsel %vm7234_vm0, %v7160_v33, 0.0 }
 0x716   : > { %v13384_v52 = vsel %vm20386_vm8, %v13383_v48, %v13379_v40  ;;  %9297 = vadd.xlane.f32.xlu1 %v9296_v13  ;;  %9294 = vadd.xlane.f32.xlu0 %v9293_v19  ;;  %vm20387_vm8 = vcmask 786112   ;;  %v9320_v40 = vsel %vm7234_vm0, %v7161_v30, 0.0  ;;  %v7163_v48 = vld [vmem:[%s16660_s5 + $0x15c8] sm:$0xff] }
 0x717   : > { %v9094_v57 = vpop.xlane.xlu1 %9093  ;;  %v13389_v12 = vsel %vm10374_vm9, %v13388_v47, %v13384_v52  ;;  %v9091_v36 = vpop.xlane.xlu0 %9090 }
 0x718   : > { %v13398_v59 = vrot.slane %v9094_v57, %v16886_v20  ;;  %v13393_v45 = vrot.slane %v9091_v36, %v16894_v28  ;;  %v9323_v36 = vsel %vm7234_vm0, %v7162_v49, 0.0 }
 0x71a   : > { %v13394_v3 = vsel %vm10381_vm10, %v13393_v45, %v13389_v12  ;;  %9303 = vadd.xlane.f32.xlu1 %v9302_v62  ;;  %9300 = vadd.xlane.f32.xlu0 %v9299_v63  ;;  %v9326_v12 = vsel %vm7234_vm0, %v7163_v48, 0.0  ;;  %v7165_v63 = vld [vmem:[%s16660_s5 + $0x15d8] sm:$0xff] }
 0x71b   : > { %v9100_v15 = vpop.xlane.xlu1 %9099  ;;  %v13399_v50 = vsel %vm20387_vm8, %v13398_v59, %v13394_v3  ;;  %v9097_v6 = vpop.xlane.xlu0 %9096  ;;  %v7164_v59 = vld [vmem:[%s16660_s5 + $0x15d0] sm:$0xff]  ;;  %vm20388_vm8 = vcmask 589312  }
 0x71c   : > { %v13408_v17 = vrot.slane %v9100_v15, %v16902_v38  ;;  %v13403_v60 = vrot.slane %v9097_v6, %v16908_v42  ;;  %v9332_v15 = vsel %vm7234_vm0, %v7165_v63, 0.0 }
 0x71e   : > { %v13404_v18 = vsel %vm10395_vm12, %v13403_v60, %v13399_v50  ;;  %9309 = vadd.xlane.f32.xlu1 %v9308_v7  ;;  %9306 = vadd.xlane.f32.xlu0 %v9305_v9  ;;  %v9329_v50 = vsel %vm7234_vm0, %v7164_v59, 0.0  ;;  %v7167_v9 = vld [vmem:[%s16660_s5 + $0x15e8] sm:$0xff] }
 0x71f   : > { %v9106_v35 = vpop.xlane.xlu1 %9105  ;;  %v13409_v0 = vsel %vm10402_vm13, %v13408_v17, %v13404_v18  ;;  %v9103_v22 = vpop.xlane.xlu0 %9102  ;;  %v7166_v17 = vld [vmem:[%s16660_s5 + $0x15e0] sm:$0xff] }
 0x720   : > { %v13418_v55 = vrot.slane %v9106_v35, %v16918_v56  ;;  %v13413_v5 = vrot.slane %v9103_v22, %v16923_v58  ;;  %v9338_v35 = vsel %vm7234_vm0, %v7167_v9, 0.0 }
 0x722   : > { %v13414_v34 = vsel %vm10409_vm14, %v13413_v5, %v13409_v0  ;;  %9315 = vadd.xlane.f32.xlu1 %v9314_v23  ;;  %9312 = vadd.xlane.f32.xlu0 %v9311_v24  ;;  %v9335_v0 = vsel %vm7234_vm0, %v7166_v17, 0.0  ;;  %v7169_v24 = vld [vmem:[%s16660_s5 + $0x15f8] sm:$0xff] }
 0x723   : > { %v13419_v8 = vsel %vm10416_vm15, %v13418_v55, %v13414_v34  ;;  %v9112_v11 = vpop.xlane.xlu1 %9111  ;;  %v9109_v39 = vpop.xlane.xlu0 %9108  ;;  %v7168_v55 = vld [vmem:[%s16660_s5 + $0x15f0] sm:$0xff] }
 0x724   : > { %v19475_v13 = vsel %vm14141_vm11, %v13419_v8, %v19073_v61  ;;  %v13427_v19 = vrot.slane %v9112_v11, %v16820_v26  ;;  %v13423_v47 = vrot.slane %v9109_v39, %v16817_v25  ;;  %v9344_v8 = vsel %vm7234_vm0, %v7169_v24, 0.0 }
 0x725   : > { %v9341_v11 = vsel %vm7234_vm0, %v7168_v55, 0.0 }
 0x726   : > { %v13428_v27 = vsel %vm10318_vm1, %v13427_v19, %v13423_v47  ;;  %9321 = vadd.xlane.f32.xlu1 %v9320_v40  ;;  %9318 = vadd.xlane.f32.xlu0 %v9317_v41  ;;  %v7171_v41 = vld [vmem:[%s16660_s5 + $0x1608] sm:$0xff]  ;;  %v7170_v19 = vld [vmem:[%s16660_s5 + $0x1600] sm:$0xff] }
 0x727   : > { %v9118_v52 = vpop.xlane.xlu1 %9117  ;;  %v9115_v57 = vpop.xlane.xlu0 %9114 }
 0x728   : > { %v13437_v61 = vrot.slane %v9118_v52, %v16830_v32  ;;  %v13432_v62 = vrot.slane %v9115_v57, %v16827_v31  ;;  %v9350_v52 = vsel %vm7234_vm0, %v7171_v41, 0.0  ;;  %v9347_v57 = vsel %vm7234_vm0, %v7170_v19, 0.0 }
 0x72a   : > { %v13433_v45 = vsel %vm10325_vm2, %v13432_v62, %v13428_v27  ;;  %9327 = vadd.xlane.f32.xlu1 %v9326_v12  ;;  %9324 = vadd.xlane.f32.xlu0 %v9323_v36  ;;  %v7172_v62 = vld [vmem:[%s16660_s5 + $0x1610] sm:$0xff] }
 0x72b   : > { %v9124_v1 = vpop.xlane.xlu1 %9123  ;;  %v13438_v2 = vsel %vm10332_vm3, %v13437_v61, %v13433_v45  ;;  %v9121_v3 = vpop.xlane.xlu0 %9120  ;;  %v7173_v61 = vld [vmem:[%s16660_s5 + $0x1618] sm:$0xff] }
 0x72c   : > { %v13447_v6 = vrot.slane %v9124_v1, %v16841_v43  ;;  %v13442_v7 = vrot.slane %v9121_v3, %v16844_v44  ;;  %v9353_v3 = vsel %vm7234_vm0, %v7172_v62, 0.0 }
 0x72e   : > { %v13443_v60 = vsel %vm10339_vm4, %v13442_v7, %v13438_v2  ;;  %9333 = vadd.xlane.f32.xlu1 %v9332_v15  ;;  %9330 = vadd.xlane.f32.xlu0 %v9329_v50  ;;  %v9356_v2 = vsel %vm7234_vm0, %v7173_v61, 0.0  ;;  %v7174_v7 = vld [vmem:[%s16660_s5 + $0x1620] sm:$0xff] }
 0x72f   : > { %v9130_v14 = vpop.xlane.xlu1 %9129  ;;  %v13448_v16 = vsel %vm10346_vm5, %v13447_v6, %v13443_v60  ;;  %v9127_v18 = vpop.xlane.xlu0 %9126  ;;  %v7175_v6 = vld [vmem:[%s16660_s5 + $0x1628] sm:$0xff] }
 0x730   : > { %v13457_v22 = vrot.slane %v9130_v14, %v16853_v53  ;;  %v13452_v23 = vrot.slane %v9127_v18, %v16856_v54  ;;  %v9359_v18 = vsel %vm7234_vm0, %v7174_v7, 0.0 }
 0x732   : > { %v13453_v5 = vsel %vm10353_vm6, %v13452_v23, %v13448_v16  ;;  %9339 = vadd.xlane.f32.xlu1 %v9338_v35  ;;  %9336 = vadd.xlane.f32.xlu0 %v9335_v0  ;;  %v9362_v16 = vsel %vm7234_vm0, %v7175_v6, 0.0  ;;  %v7176_v23 = vld [vmem:[%s16660_s5 + $0x1630] sm:$0xff] }
 0x733   : > { %v9136_v30 = vpop.xlane.xlu1 %9135  ;;  %v13458_v33 = vsel %vm10360_vm7, %v13457_v22, %v13453_v5  ;;  %v9133_v34 = vpop.xlane.xlu0 %9132  ;;  %v7177_v22 = vld [vmem:[%s16660_s5 + $0x1638] sm:$0xff] }
 0x734   : > { %v13467_v39 = vrot.slane %v9136_v30, %v16870_v4  ;;  %v13462_v40 = vrot.slane %v9133_v34, %v16878_v10  ;;  %v9365_v34 = vsel %vm7234_vm0, %v7176_v23, 0.0 }
 0x736   : > { %v13463_v47 = vsel %vm20388_vm8, %v13462_v40, %v13458_v33  ;;  %9345 = vadd.xlane.f32.xlu1 %v9344_v8  ;;  %9342 = vadd.xlane.f32.xlu0 %v9341_v11  ;;  %vm20389_vm8 = vcmask 786112   ;;  %v9368_v33 = vsel %vm7234_vm0, %v7177_v22, 0.0  ;;  %v7178_v40 = vld [vmem:[%s16660_s5 + $0x1640] sm:$0xff] }
 0x737   : > { %v9142_v48 = vpop.xlane.xlu1 %9141  ;;  %v13468_v49 = vsel %vm10374_vm9, %v13467_v39, %v13463_v47  ;;  %v9139_v27 = vpop.xlane.xlu0 %9138  ;;  %v7179_v39 = vld [vmem:[%s16660_s5 + $0x1648] sm:$0xff] }
 0x738   : > { %v13477_v12 = vrot.slane %v9142_v48, %v16886_v20  ;;  %v13472_v36 = vrot.slane %v9139_v27, %v16894_v28  ;;  %v9371_v27 = vsel %vm7234_vm0, %v7178_v40, 0.0 }
 0x73a   : > { %v13473_v63 = vsel %vm10381_vm10, %v13472_v36, %v13468_v49  ;;  %9351 = vadd.xlane.f32.xlu1 %v9350_v52  ;;  %9348 = vadd.xlane.f32.xlu0 %v9347_v57  ;;  %v9374_v49 = vsel %vm7234_vm0, %v7179_v39, 0.0  ;;  %v7180_v36 = vld [vmem:[%s16660_s5 + $0x1650] sm:$0xff] }
 0x73b   : > { %v9148_v59 = vpop.xlane.xlu1 %9147  ;;  %v13478_v45 = vsel %vm20389_vm8, %v13477_v12, %v13473_v63  ;;  %v9145_v1 = vpop.xlane.xlu0 %9144  ;;  %v7181_v12 = vld [vmem:[%s16660_s5 + $0x1658] sm:$0xff]  ;;  %vm20390_vm8 = vcmask 589312  }
 0x73c   : > { %v13487_v15 = vrot.slane %v9148_v59, %v16902_v38  ;;  %v13482_v50 = vrot.slane %v9145_v1, %v16908_v42  ;;  %v9380_v59 = vsel %vm7234_vm0, %v7181_v12, 0.0 }
 0x73e   : > { %v13483_v9 = vsel %vm10395_vm12, %v13482_v50, %v13478_v45  ;;  %9357 = vadd.xlane.f32.xlu1 %v9356_v2  ;;  %9354 = vadd.xlane.f32.xlu0 %v9353_v3  ;;  %v9377_v45 = vsel %vm7234_vm0, %v7180_v36, 0.0  ;;  %v7183_v3 = vld [vmem:[%s16660_s5 + $0x1668] sm:$0xff] }
 0x73f   : > { %v9154_v17 = vpop.xlane.xlu1 %9153  ;;  %v13488_v60 = vsel %vm10402_vm13, %v13487_v15, %v13483_v9  ;;  %v9151_v14 = vpop.xlane.xlu0 %9150  ;;  %v7182_v15 = vld [vmem:[%s16660_s5 + $0x1660] sm:$0xff] }
 0x740   : > { %v13497_v35 = vrot.slane %v9154_v17, %v16918_v56  ;;  %v13492_v0 = vrot.slane %v9151_v14, %v16923_v58  ;;  %v9386_v17 = vsel %vm7234_vm0, %v7183_v3, 0.0 }
 0x742   : > { %v13493_v24 = vsel %vm10409_vm14, %v13492_v0, %v13488_v60  ;;  %9363 = vadd.xlane.f32.xlu1 %v9362_v16  ;;  %9360 = vadd.xlane.f32.xlu0 %v9359_v18  ;;  %v9383_v60 = vsel %vm7234_vm0, %v7182_v15, 0.0  ;;  %v7185_v18 = vld [vmem:[%s16660_s5 + $0x1678] sm:$0xff] }
 0x743   : > { %v13498_v55 = vsel %vm10416_vm15, %v13497_v35, %v13493_v24  ;;  %v9160_v5 = vpop.xlane.xlu1 %9159  ;;  %v9157_v30 = vpop.xlane.xlu0 %9156  ;;  %v7184_v35 = vld [vmem:[%s16660_s5 + $0x1670] sm:$0xff] }
 0x744   : > { %v13506_v8 = vrot.slane %v9160_v5, %v16820_v26  ;;  %v13502_v11 = vrot.slane %v9157_v30, %v16817_v25  ;;  %v19546_v41 = vsel %vm14141_vm11, %v13498_v55, %v19140_v51  ;;  %v9392_v55 = vsel %vm7234_vm0, %v7185_v18, 0.0 }
 0x745   : > { %v9389_v5 = vsel %vm7234_vm0, %v7184_v35, 0.0 }
 0x746   : > { %v13507_v19 = vsel %vm10318_vm1, %v13506_v8, %v13502_v11  ;;  %9369 = vadd.xlane.f32.xlu1 %v9368_v33  ;;  %9366 = vadd.xlane.f32.xlu0 %v9365_v34  ;;  %v7187_v34 = vld [vmem:[%s16660_s5 + $0x1688] sm:$0xff]  ;;  %v7186_v8 = vld [vmem:[%s16660_s5 + $0x1680] sm:$0xff] }
 0x747   : > { %v9166_v47 = vpop.xlane.xlu1 %9165  ;;  %v9163_v48 = vpop.xlane.xlu0 %9162 }
 0x748   : > { %v13516_v52 = vrot.slane %v9166_v47, %v16830_v32  ;;  %v13511_v57 = vrot.slane %v9163_v48, %v16827_v31  ;;  %v9398_v47 = vsel %vm7234_vm0, %v7187_v34, 0.0  ;;  %v9395_v48 = vsel %vm7234_vm0, %v7186_v8, 0.0 }
 0x74a   : > { %v13512_v51 = vsel %vm10325_vm2, %v13511_v57, %v13507_v19  ;;  %9375 = vadd.xlane.f32.xlu1 %v9374_v49  ;;  %9372 = vadd.xlane.f32.xlu0 %v9371_v27  ;;  %v7188_v57 = vld [vmem:[%s16660_s5 + $0x1690] sm:$0xff] }
 0x74b   : > { %v9172_v61 = vpop.xlane.xlu1 %9171  ;;  %v13517_v62 = vsel %vm10332_vm3, %v13516_v52, %v13512_v51  ;;  %v9169_v63 = vpop.xlane.xlu0 %9168  ;;  %v7202_v52 = vld [vmem:[%s16660_s5 + $0x1700] sm:$0xff] }
 0x74c   : > { %v13526_v1 = vrot.slane %v9172_v61, %v16841_v43  ;;  %v13521_v2 = vrot.slane %v9169_v63, %v16844_v44  ;;  %v9401_v63 = vsel %vm7234_vm0, %v7188_v57, 0.0 }
 0x74e   : > { %v13522_v50 = vsel %vm10339_vm4, %v13521_v2, %v13517_v62  ;;  %9381 = vadd.xlane.f32.xlu1 %v9380_v59  ;;  %9378 = vadd.xlane.f32.xlu0 %v9377_v45  ;;  %v9443_v62 = vsel %vm7234_vm0, %v7202_v52, 0.0  ;;  %v7203_v2 = vld [vmem:[%s16660_s5 + $0x1708] sm:$0xff] }
 0x74f   : > { %v9178_v6 = vpop.xlane.xlu1 %9177  ;;  %v13527_v7 = vsel %vm10346_vm5, %v13526_v1, %v13522_v50  ;;  %v9175_v9 = vpop.xlane.xlu0 %9174  ;;  %v7218_v1 = vld [vmem:[%s16660_s5 + $0x1780] sm:$0xff] }
 0x750   : > { %v13536_v14 = vrot.slane %v9178_v6, %v16853_v53  ;;  %v13531_v16 = vrot.slane %v9175_v9, %v16856_v54  ;;  %v9446_v9 = vsel %vm7234_vm0, %v7203_v2, 0.0 }
 0x752   : > { %v13532_v0 = vsel %vm10353_vm6, %v13531_v16, %v13527_v7  ;;  %9387 = vadd.xlane.f32.xlu1 %v9386_v17  ;;  %9384 = vadd.xlane.f32.xlu0 %v9383_v60  ;;  %v9491_v7 = vsel %vm7234_vm0, %v7218_v1, 0.0  ;;  %v7219_v16 = vld [vmem:[%s16660_s5 + $0x1788] sm:$0xff] }
 0x753   : > { %v9184_v22 = vpop.xlane.xlu1 %9183  ;;  %v13537_v23 = vsel %vm10360_vm7, %v13536_v14, %v13532_v0  ;;  %v9181_v24 = vpop.xlane.xlu0 %9180  ;;  %v7204_v14 = vld [vmem:[%s16660_s5 + $0x1710] sm:$0xff] }
 0x754   : > { %v13546_v30 = vrot.slane %v9184_v22, %v16870_v4  ;;  %v13541_v33 = vrot.slane %v9181_v24, %v16878_v10  ;;  %v9494_v24 = vsel %vm7234_vm0, %v7219_v16, 0.0 }
 0x756   : > { %v13542_v11 = vsel %vm20390_vm8, %v13541_v33, %v13537_v23  ;;  %9393 = vadd.xlane.f32.xlu1 %v9392_v55  ;;  %9390 = vadd.xlane.f32.xlu0 %v9389_v5  ;;  %vm20391_vm8 = vcmask 786112   ;;  %v9449_v23 = vsel %vm7234_vm0, %v7204_v14, 0.0  ;;  %v7220_v33 = vld [vmem:[%s16660_s5 + $0x1790] sm:$0xff] }
 0x757   : > { %v9190_v39 = vpop.xlane.xlu1 %9189  ;;  %v13547_v40 = vsel %vm10374_vm9, %v13546_v30, %v13542_v11  ;;  %v9187_v19 = vpop.xlane.xlu0 %9186  ;;  %v7189_v30 = vld [vmem:[%s16660_s5 + $0x1698] sm:$0xff] }
 0x758   : > { %v13556_v49 = vrot.slane %v9190_v39, %v16886_v20  ;;  %v13551_v27 = vrot.slane %v9187_v19, %v16894_v28  ;;  %v9497_v19 = vsel %vm7234_vm0, %v7220_v33, 0.0 }
 0x75a   : > { %v13552_v12 = vsel %vm10381_vm10, %v13551_v27, %v13547_v40  ;;  %9399 = vadd.xlane.f32.xlu1 %v9398_v47  ;;  %9396 = vadd.xlane.f32.xlu0 %v9395_v48  ;;  %v9404_v40 = vsel %vm7234_vm0, %v7189_v30, 0.0  ;;  %v7205_v27 = vld [vmem:[%s16660_s5 + $0x1718] sm:$0xff] }
 0x75b   : > { %v9196_v36 = vpop.xlane.xlu1 %9195  ;;  %v13557_v51 = vsel %vm20391_vm8, %v13556_v49, %v13552_v12  ;;  %v9193_v61 = vpop.xlane.xlu0 %9192  ;;  %v7221_v49 = vld [vmem:[%s16660_s5 + $0x1798] sm:$0xff]  ;;  %vm20392_vm8 = vcmask 589312  }
 0x75c   : > { %v13566_v59 = vrot.slane %v9196_v36, %v16902_v38  ;;  %v13561_v45 = vrot.slane %v9193_v61, %v16908_v42  ;;  %v9500_v36 = vsel %vm7234_vm0, %v7221_v49, 0.0 }
 0x75e   : > { %v13562_v3 = vsel %vm10395_vm12, %v13561_v45, %v13557_v51  ;;  %9444 = vadd.xlane.f32.xlu1 %v9443_v62  ;;  %9402 = vadd.xlane.f32.xlu0 %v9401_v63  ;;  %v9452_v51 = vsel %vm7234_vm0, %v7205_v27, 0.0  ;;  %v7206_v63 = vld [vmem:[%s16660_s5 + $0x1720] sm:$0xff] }
 0x75f   : > { %v9202_v15 = vpop.xlane.xlu1 %9201  ;;  %v13567_v50 = vsel %vm10402_vm13, %v13566_v59, %v13562_v3  ;;  %v9199_v6 = vpop.xlane.xlu0 %9198  ;;  %v7190_v59 = vld [vmem:[%s16660_s5 + $0x16a0] sm:$0xff] }
 0x760   : > { %v13576_v17 = vrot.slane %v9202_v15, %v16918_v56  ;;  %v13571_v60 = vrot.slane %v9199_v6, %v16923_v58  ;;  %v9455_v15 = vsel %vm7234_vm0, %v7206_v63, 0.0 }
 0x762   : > { %v13572_v18 = vsel %vm10409_vm14, %v13571_v60, %v13567_v50  ;;  %9492 = vadd.xlane.f32.xlu1 %v9491_v7  ;;  %9447 = vadd.xlane.f32.xlu0 %v9446_v9  ;;  %v9407_v50 = vsel %vm7234_vm0, %v7190_v59, 0.0  ;;  %v7191_v9 = vld [vmem:[%s16660_s5 + $0x16a8] sm:$0xff] }
 0x763   : > { %v13577_v35 = vsel %vm10416_vm15, %v13576_v17, %v13572_v18  ;;  %v9208_v0 = vpop.xlane.xlu1 %9207  ;;  %v9205_v22 = vpop.xlane.xlu0 %9204  ;;  %v7222_v17 = vld [vmem:[%s16660_s5 + $0x17a0] sm:$0xff] }
 0x764   : > { %v13585_v55 = vrot.slane %v9208_v0, %v16820_v26  ;;  %v13581_v5 = vrot.slane %v9205_v22, %v16817_v25  ;;  %v19613_v34 = vsel %vm14141_vm11, %v13577_v35, %v19207_v46  ;;  %v9410_v35 = vsel %vm7234_vm0, %v7191_v9, 0.0 }
 0x765   : > { %v9503_v0 = vsel %vm7234_vm0, %v7222_v17, 0.0 }
 0x766   : > { %v13586_v8 = vsel %vm10318_vm1, %v13585_v55, %v13581_v5  ;;  %9450 = vadd.xlane.f32.xlu1 %v9449_v23  ;;  %9495 = vadd.xlane.f32.xlu0 %v9494_v24  ;;  %v7223_v24 = vld [vmem:[%s16660_s5 + $0x17a8] sm:$0xff] }
 0x767   : > { %v9214_v11 = vpop.xlane.xlu1 %9213  ;;  %v9211_v39 = vpop.xlane.xlu0 %9210  ;;  %v7207_v55 = vld [vmem:[%s16660_s5 + $0x1728] sm:$0xff] }
 0x768   : > { %v13595_v47 = vrot.slane %v9214_v11, %v16830_v32  ;;  %v13590_v48 = vrot.slane %v9211_v39, %v16827_v31  ;;  %v9506_v11 = vsel %vm7234_vm0, %v7223_v24, 0.0  ;;  %v9458_v39 = vsel %vm7234_vm0, %v7207_v55, 0.0 }
 0x76a   : > { %v13591_v46 = vsel %vm10325_vm2, %v13590_v48, %v13586_v8  ;;  %9405 = vadd.xlane.f32.xlu1 %v9404_v40  ;;  %9498 = vadd.xlane.f32.xlu0 %v9497_v19  ;;  %v7192_v48 = vld [vmem:[%s16660_s5 + $0x16b0] sm:$0xff] }
 0x76b   : > { %v9220_v52 = vpop.xlane.xlu1 %9219  ;;  %v13596_v57 = vsel %vm10332_vm3, %v13595_v47, %v13591_v46  ;;  %v9217_v12 = vpop.xlane.xlu0 %9216  ;;  %v7208_v47 = vld [vmem:[%s16660_s5 + $0x1730] sm:$0xff] }
 0x76c   : > { %v13605_v61 = vrot.slane %v9220_v52, %v16841_v43  ;;  %v13600_v62 = vrot.slane %v9217_v12, %v16844_v44  ;;  %v9413_v12 = vsel %vm7234_vm0, %v7192_v48, 0.0 }
 0x76e   : > { %v13601_v45 = vsel %vm10339_vm4, %v13600_v62, %v13596_v57  ;;  %9501 = vadd.xlane.f32.xlu1 %v9500_v36  ;;  %9453 = vadd.xlane.f32.xlu0 %v9452_v51  ;;  %v9461_v57 = vsel %vm7234_vm0, %v7208_v47, 0.0  ;;  %v7224_v62 = vld [vmem:[%s16660_s5 + $0x17b0] sm:$0xff] }
 0x76f   : > { %v9226_v1 = vpop.xlane.xlu1 %9225  ;;  %v13606_v2 = vsel %vm10346_vm5, %v13605_v61, %v13601_v45  ;;  %v9223_v3 = vpop.xlane.xlu0 %9222  ;;  %v7193_v61 = vld [vmem:[%s16660_s5 + $0x16b8] sm:$0xff] }
 0x770   : > { %v13615_v6 = vrot.slane %v9226_v1, %v16853_v53  ;;  %v13610_v7 = vrot.slane %v9223_v3, %v16856_v54  ;;  %v9509_v3 = vsel %vm7234_vm0, %v7224_v62, 0.0 }
 0x772   : > { %v13611_v60 = vsel %vm10353_vm6, %v13610_v7, %v13606_v2  ;;  %9456 = vadd.xlane.f32.xlu1 %v9455_v15  ;;  %9408 = vadd.xlane.f32.xlu0 %v9407_v50  ;;  %v9416_v2 = vsel %vm7234_vm0, %v7193_v61, 0.0  ;;  %v7209_v7 = vld [vmem:[%s16660_s5 + $0x1738] sm:$0xff] }
 0x773   : > { %v9232_v14 = vpop.xlane.xlu1 %9231  ;;  %v13616_v16 = vsel %vm10360_vm7, %v13615_v6, %v13611_v60  ;;  %v9229_v18 = vpop.xlane.xlu0 %9228  ;;  %v7225_v6 = vld [vmem:[%s16660_s5 + $0x17b8] sm:$0xff] }
 0x774   : > { %v13625_v22 = vrot.slane %v9232_v14, %v16870_v4  ;;  %v13620_v23 = vrot.slane %v9229_v18, %v16878_v10  ;;  %v9464_v18 = vsel %vm7234_vm0, %v7209_v7, 0.0 }
 0x776   : > { %v13621_v5 = vsel %vm20392_vm8, %v13620_v23, %v13616_v16  ;;  %9411 = vadd.xlane.f32.xlu1 %v9410_v35  ;;  %9504 = vadd.xlane.f32.xlu0 %v9503_v0  ;;  %vm20393_vm8 = vcmask 786112   ;;  %v9512_v16 = vsel %vm7234_vm0, %v7225_v6, 0.0  ;;  %v7210_v35 = vld [vmem:[%s16660_s5 + $0x1740] sm:$0xff] }
 0x777   : > { %v9238_v30 = vpop.xlane.xlu1 %9237  ;;  %v13626_v33 = vsel %vm10374_vm9, %v13625_v22, %v13621_v5  ;;  %v9235_v8 = vpop.xlane.xlu0 %9234  ;;  %v7194_v0 = vld [vmem:[%s16660_s5 + $0x16c0] sm:$0xff] }
 0x778   : > { %v13635_v40 = vrot.slane %v9238_v30, %v16886_v20  ;;  %v13630_v19 = vrot.slane %v9235_v8, %v16894_v28  ;;  %v9467_v30 = vsel %vm7234_vm0, %v7210_v35, 0.0 }
 0x77a   : > { %v13631_v49 = vsel %vm10381_vm10, %v13630_v19, %v13626_v33  ;;  %9507 = vadd.xlane.f32.xlu1 %v9506_v11  ;;  %9459 = vadd.xlane.f32.xlu0 %v9458_v39  ;;  %v9419_v33 = vsel %vm7234_vm0, %v7194_v0, 0.0  ;;  %v7195_v11 = vld [vmem:[%s16660_s5 + $0x16c8] sm:$0xff]  ;;  %v7226_v39 = vld [vmem:[%s16660_s5 + $0x17c0] sm:$0xff] }
 0x77b   : > { %v9244_v27 = vpop.xlane.xlu1 %9243  ;;  %v13636_v46 = vsel %vm20393_vm8, %v13635_v40, %v13631_v49  ;;  %v9241_v52 = vpop.xlane.xlu0 %9240  ;;  %v9422_v49 = vsel %vm7234_vm0, %v7195_v11, 0.0 }
 0x77c   : > { %v13645_v36 = vrot.slane %v9244_v27, %v16902_v38  ;;  %v13640_v51 = vrot.slane %v9241_v52, %v16908_v42  ;;  %v9515_v27 = vsel %vm7234_vm0, %v7226_v39, 0.0  ;;  %v7227_v52 = vld [vmem:[%s16660_s5 + $0x17c8] sm:$0xff] }
 0x77e   : > { %v13641_v63 = vsel %vm10395_vm12, %v13640_v51, %v13636_v46  ;;  %9462 = vadd.xlane.f32.xlu1 %v9461_v57  ;;  %9414 = vadd.xlane.f32.xlu0 %v9413_v12  ;;  %v7211_v57 = vld [vmem:[%s16660_s5 + $0x1748] sm:$0xff] }
 0x77f   : > { %v9250_v59 = vpop.xlane.xlu1 %9249  ;;  %v13646_v45 = vsel %vm10402_vm13, %v13645_v36, %v13641_v63  ;;  %v9247_v1 = vpop.xlane.xlu0 %9246  ;;  %v9518_v63 = vsel %vm7234_vm0, %v7227_v52, 0.0 }
 0x780   : > { %v13655_v15 = vrot.slane %v9250_v59, %v16918_v56  ;;  %v13650_v50 = vrot.slane %v9247_v1, %v16923_v58  ;;  %v9470_v59 = vsel %vm7234_vm0, %v7211_v57, 0.0  ;;  %v7212_v1 = vld [vmem:[%s16660_s5 + $0x1750] sm:$0xff] }
 0x782   : > { %v13651_v9 = vsel %vm10409_vm14, %v13650_v50, %v13646_v45  ;;  %9417 = vadd.xlane.f32.xlu1 %v9416_v2  ;;  %9510 = vadd.xlane.f32.xlu0 %v9509_v3  ;;  %v7196_v2 = vld [vmem:[%s16660_s5 + $0x16d0] sm:$0xff] }
 0x783   : > { %v13656_v17 = vsel %vm10416_vm15, %v13655_v15, %v13651_v9  ;;  %v9256_v60 = vpop.xlane.xlu1 %9255  ;;  %v9253_v14 = vpop.xlane.xlu0 %9252  ;;  %v9473_v9 = vsel %vm7234_vm0, %v7212_v1, 0.0  ;;  %v7230_v1 = vld [vmem:[%s16660_s5 + $0x17e0] sm:$0xff] }
 0x784   : > { %v19678_v22 = vsel %vm14141_vm11, %v13656_v17, %v19274_v37  ;;  %v13664_v23 = vrot.slane %v9256_v60, %v16820_v26  ;;  %v13660_v24 = vrot.slane %v9253_v14, %v16817_v25  ;;  %v9425_v17 = vsel %vm7234_vm0, %v7196_v2, 0.0  ;;  %v7197_v14 = vld [vmem:[%s16660_s5 + $0x16d8] sm:$0xff] }
 0x785   : > { %vm20394_vm11 = vcmask 589312  }
 0x786   : > { %9513 = vadd.xlane.f32.xlu1 %v9512_v16  ;;  %9465 = vadd.xlane.f32.xlu0 %v9464_v18  ;;  %v13665_v37 = vsel %vm10318_vm1, %v13664_v23, %v13660_v24  ;;  %v7228_v16 = vld [vmem:[%s16660_s5 + $0x17d0] sm:$0xff] }
 0x787   : > { %v9262_v55 = vpop.xlane.xlu1 %9261  ;;  %v9259_v5 = vpop.xlane.xlu0 %9258 }
 0x788   : > { %v13669_v8 = vrot.slane %v9259_v5, %v16827_v31  ;;  %v13674_v40 = vrot.slane %v9262_v55, %v16830_v32  ;;  %v9428_v55 = vsel %vm7234_vm0, %v7197_v14, 0.0  ;;  %v9521_v5 = vsel %vm7234_vm0, %v7228_v16, 0.0  ;;  %v7231_v14 = vld [vmem:[%s16660_s5 + $0x17e8] sm:$0xff] }
 0x789   : > { %v7215_v16 = vld [vmem:[%s16660_s5 + $0x1768] sm:$0xff] }
 0x78a   : > { %v13670_v19 = vsel %vm10325_vm2, %v13669_v8, %v13665_v37  ;;  %9468 = vadd.xlane.f32.xlu1 %v9467_v30  ;;  %9420 = vadd.xlane.f32.xlu0 %v9419_v33  ;;  %v7229_v33 = vld [vmem:[%s16660_s5 + $0x17d8] sm:$0xff] }
 0x78b   : > { %v9268_v47 = vpop.xlane.xlu1 %9267  ;;  %v9265_v48 = vpop.xlane.xlu0 %9264  ;;  %v13675_v36 = vsel %vm10332_vm3, %v13674_v40, %v13670_v19  ;;  %v7213_v8 = vld [vmem:[%s16660_s5 + $0x1758] sm:$0xff] }
 0x78c   : > { %v13679_v46 = vrot.slane %v9265_v48, %v16844_v44  ;;  %v13684_v12 = vrot.slane %v9268_v47, %v16841_v43  ;;  %v9524_v47 = vsel %vm7234_vm0, %v7229_v33, 0.0  ;;  %v9476_v48 = vsel %vm7234_vm0, %v7213_v8, 0.0  ;;  %v7200_v33 = vld [vmem:[%s16660_s5 + $0x16f0] sm:$0xff] }
 0x78e   : > { %v13680_v51 = vsel %vm10339_vm4, %v13679_v46, %v13675_v36  ;;  %9423 = vadd.xlane.f32.xlu1 %v9422_v49  ;;  %9516 = vadd.xlane.f32.xlu0 %v9515_v27  ;;  %v7214_v27 = vld [vmem:[%s16660_s5 + $0x1760] sm:$0xff] }
 0x78f   : > { %v9274_v61 = vpop.xlane.xlu1 %9273  ;;  %v9271_v62 = vpop.xlane.xlu0 %9270  ;;  %v13685_v15 = vsel %vm10346_vm5, %v13684_v12, %v13680_v51  ;;  %v7198_v46 = vld [vmem:[%s16660_s5 + $0x16e0] sm:$0xff] }
 0x790   : > { %v13689_v45 = vrot.slane %v9271_v62, %v16856_v54  ;;  %v13694_v3 = vrot.slane %v9274_v61, %v16853_v53  ;;  %v9479_v61 = vsel %vm7234_vm0, %v7214_v27, 0.0  ;;  %v9431_v62 = vsel %vm7234_vm0, %v7198_v46, 0.0  ;;  %v7232_v27 = vld [vmem:[%s16660_s5 + $0x17f0] sm:$0xff] }
 0x792   : > { %v13690_v50 = vsel %vm10353_vm6, %v13689_v45, %v13685_v15  ;;  %9519 = vadd.xlane.f32.xlu1 %v9518_v63  ;;  %9471 = vadd.xlane.f32.xlu0 %v9470_v59  ;;  %v7199_v45 = vld [vmem:[%s16660_s5 + $0x16e8] sm:$0xff] }
 0x793   : > { %v9280_v6 = vpop.xlane.xlu1 %9279  ;;  %v9277_v7 = vpop.xlane.xlu0 %9276  ;;  %v13695_v35 = vsel %vm10360_vm7, %v13694_v3, %v13690_v50  ;;  %v6460_v3 = vld [vmem:[#allocation2 + $0x28] sm:$0xff] }
 0x794   : > { %v13699_v60 = vrot.slane %v9277_v7, %v16878_v10  ;;  %v13704_v18 = vrot.slane %v9280_v6, %v16870_v4 }
 0x796   : > { %v13700_v0 = vsel %vm20394_vm11, %v13699_v60, %v13695_v35  ;;  %9474 = vadd.xlane.f32.xlu1 %v9473_v9  ;;  %9426 = vadd.xlane.f32.xlu0 %v9425_v17  ;;  %vm14143_vm11 = vcmask 1047559   ;;  %v9434_v9 = vsel %vm7234_vm0, %v7199_v45, 0.0  ;;  %v9527_v17 = vsel %vm7234_vm0, %v7230_v1, 0.0 }
 0x797   : > { %v9286_v23 = vpop.xlane.xlu1 %9285  ;;  %v9283_v24 = vpop.xlane.xlu0 %9282  ;;  %v13705_v39 = vsel %vm10374_vm9, %v13704_v18, %v13700_v0 }
 0x798   : > { %v13709_v30 = vrot.slane %v9283_v24, %v16894_v28  ;;  %v13714_v11 = vrot.slane %v9286_v23, %v16886_v20 }
 0x79a   : > { %v13710_v37 = vsel %vm10381_vm10, %v13709_v30, %v13705_v39  ;;  %9429 = vadd.xlane.f32.xlu1 %v9428_v55  ;;  %9522 = vadd.xlane.f32.xlu0 %v9521_v5  ;;  %v9530_v55 = vsel %vm7234_vm0, %v7231_v14, 0.0  ;;  %v9482_v5 = vsel %vm7234_vm0, %v7215_v16, 0.0  ;;  %v7216_v30 = vld [vmem:[%s16660_s5 + $0x1770] sm:$0xff] }
 0x79b   : > { %v9292_v40 = vpop.xlane.xlu1 %9291  ;;  %v9289_v19 = vpop.xlane.xlu0 %9288  ;;  %v13715_v57 = vsel %vm20393_vm8, %v13714_v11, %v13710_v37  ;;  %vm20395_vm8 = vcmask 589312  }
 0x79c   : > { %v13719_v49 = vrot.slane %v9289_v19, %v16908_v42  ;;  %v13724_v52 = vrot.slane %v9292_v40, %v16902_v38  ;;  %v9485_v19 = vsel %vm7234_vm0, %v7216_v30, 0.0 }
 0x79e   : > { %v13720_v12 = vsel %vm10395_vm12, %v13719_v49, %v13715_v57  ;;  %9525 = vadd.xlane.f32.xlu1 %v9524_v47  ;;  %9477 = vadd.xlane.f32.xlu0 %v9476_v48  ;;  %v9437_v47 = vsel %vm7234_vm0, %v7200_v33, 0.0  ;;  %v7201_v49 = vld [vmem:[%s16660_s5 + $0x16f8] sm:$0xff] }
 0x79f   : > { %v9298_v36 = vpop.xlane.xlu1 %9297  ;;  %v9295_v51 = vpop.xlane.xlu0 %9294  ;;  %v13725_v2 = vsel %vm10402_vm13, %v13724_v52, %v13720_v12 }
 0x7a0   : > { %v13734_v63 = vrot.slane %v9298_v36, %v16918_v56  ;;  %v13729_v59 = vrot.slane %v9295_v51, %v16923_v58  ;;  %v9440_v51 = vsel %vm7234_vm0, %v7201_v49, 0.0 }
 0x7a2   : > { %v13730_v15 = vsel %vm10409_vm14, %v13729_v59, %v13725_v2  ;;  %9480 = vadd.xlane.f32.xlu1 %v9479_v61  ;;  %9432 = vadd.xlane.f32.xlu0 %v9431_v62  ;;  %v9533_v61 = vsel %vm7234_vm0, %v7232_v27, 0.0  ;;  %v7217_v59 = vld [vmem:[%s16660_s5 + $0x1778] sm:$0xff] }
 0x7a3   : > { %v13735_v50 = vsel %vm10416_vm15, %v13734_v63, %v13730_v15  ;;  %v9304_v6 = vpop.xlane.xlu1 %9303  ;;  %v9301_v7 = vpop.xlane.xlu0 %9300  ;;  %v7233_v63 = vld [vmem:[%s16660_s5 + $0x17f8] sm:$0xff] }
 0x7a4   : > { %v14144_v60 = vsel %vm14143_vm11, %v13735_v50, %v19341_v29  ;;  %v13743_v35 = vrot.slane %v9304_v6, %v16820_v26  ;;  %v13739_v0 = vrot.slane %v9301_v7, %v16817_v25  ;;  %v9536_v50 = vsel %vm7234_vm0, %v7233_v63, 0.0 }
 0x7a5   : > { %v14186_v18 = vadd.f32 %v14144_v60, %v6460_v3  ;;  %v9488_v6 = vsel %vm7234_vm0, %v7217_v59, 0.0  ;;  %vm20396_vm0 = vcmask 786112  }
 0x7a6   : > { %9435 = vadd.xlane.f32.xlu1 %v9434_v9  ;;  %9528 = vadd.xlane.f32.xlu0 %v9527_v17  ;;  %v13744_v8 = vsel %vm10318_vm1, %v13743_v35, %v13739_v0 }
 0x7a7   : > { %14192 = vst [vmem:[#allocation2 + $0x28] sm:$0xff] %v14186_v18  ;;  %v9310_v23 = vpop.xlane.xlu1 %9309  ;;  %v9307_v24 = vpop.xlane.xlu0 %9306 }
 0x7a8   : > { %v13748_v29 = vrot.slane %v9307_v24, %v16827_v31  ;;  %v13753_v11 = vrot.slane %v9310_v23, %v16830_v32 }
 0x7aa   : > { %v13749_v39 = vsel %vm10325_vm2, %v13748_v29, %v13744_v8  ;;  %9531 = vadd.xlane.f32.xlu1 %v9530_v55  ;;  %9483 = vadd.xlane.f32.xlu0 %v9482_v5 }
 0x7ab   : > { %v9316_v37 = vpop.xlane.xlu1 %9315  ;;  %v9313_v40 = vpop.xlane.xlu0 %9312  ;;  %v13754_v52 = vsel %vm10332_vm3, %v13753_v11, %v13749_v39 }
 0x7ac   : > { %v13758_v48 = vrot.slane %v9313_v40, %v16844_v44  ;;  %v13763_v46 = vrot.slane %v9316_v37, %v16841_v43 }
 0x7ae   : > { %v13759_v57 = vsel %vm10339_vm4, %v13758_v48, %v13754_v52  ;;  %9486 = vadd.xlane.f32.xlu1 %v9485_v19  ;;  %9438 = vadd.xlane.f32.xlu0 %v9437_v47  ;;  %v6461_v19 = vld [vmem:[#allocation2 + $0x10] sm:$0xff] }
 0x7af   : > { %v9322_v12 = vpop.xlane.xlu1 %9321  ;;  %v9319_v36 = vpop.xlane.xlu0 %9318  ;;  %v13764_v1 = vsel %vm10346_vm5, %v13763_v46, %v13759_v57 }
 0x7b0   : > { %v13768_v62 = vrot.slane %v9319_v36, %v16856_v54  ;;  %v13773_v45 = vrot.slane %v9322_v12, %v16853_v53 }
 0x7b2   : > { %v13769_v2 = vsel %vm10353_vm6, %v13768_v62, %v13764_v1  ;;  %9441 = vadd.xlane.f32.xlu1 %v9440_v51  ;;  %9534 = vadd.xlane.f32.xlu0 %v9533_v61 }
 0x7b3   : > { %v9328_v3 = vpop.xlane.xlu1 %9327  ;;  %v9325_v15 = vpop.xlane.xlu0 %9324  ;;  %v13774_v17 = vsel %vm10360_vm7, %v13773_v45, %v13769_v2 }
 0x7b4   : > { %v13778_v7 = vrot.slane %v9325_v15, %v16878_v10  ;;  %v13783_v9 = vrot.slane %v9328_v3, %v16870_v4 }
 0x7b6   : > { %v13779_v60 = vsel %vm20395_vm8, %v13778_v7, %v13774_v17  ;;  %9537 = vadd.xlane.f32.xlu1 %v9536_v50  ;;  %9489 = vadd.xlane.f32.xlu0 %v9488_v6 }
 0x7b7   : > { %v9334_v14 = vpop.xlane.xlu1 %9333  ;;  %v9331_v16 = vpop.xlane.xlu0 %9330  ;;  %v13784_v0 = vsel %vm10374_vm9, %v13783_v9, %v13779_v60 }
 0x7b8   : > { %v13788_v18 = vrot.slane %v9331_v16, %v16894_v28  ;;  %v13793_v35 = vrot.slane %v9334_v14, %v16886_v20 }
 0x7ba   : > { %v13789_v23 = vsel %vm10381_vm10, %v13788_v18, %v13784_v0 }
 0x7bb   : > { %v9340_v24 = vpop.xlane.xlu1 %9339  ;;  %v9337_v55 = vpop.xlane.xlu0 %9336  ;;  %v13794_v30 = vsel %vm20396_vm0, %v13793_v35, %v13789_v23 }
 0x7bc   : > { %v13798_v5 = vrot.slane %v9337_v55, %v16908_v42  ;;  %v13803_v29 = vrot.slane %v9340_v24, %v16902_v38 }
 0x7be   : > { %v13799_v33 = vsel %vm10395_vm12, %v13798_v5, %v13794_v30 }
 0x7bf   : > { %v9346_v8 = vpop.xlane.xlu1 %9345  ;;  %v9343_v11 = vpop.xlane.xlu0 %9342  ;;  %v13804_v40 = vsel %vm10402_vm13, %v13803_v29, %v13799_v33 }
 0x7c0   : > { %v13813_v39 = vrot.slane %v9346_v8, %v16918_v56  ;;  %v13808_v37 = vrot.slane %v9343_v11, %v16923_v58 }
 0x7c2   : > { %v13809_v47 = vsel %vm10409_vm14, %v13808_v37, %v13804_v40 }
 0x7c3   : > { %v13814_v48 = vsel %vm10416_vm15, %v13813_v39, %v13809_v47  ;;  %v9352_v49 = vpop.xlane.xlu1 %9351  ;;  %v9349_v27 = vpop.xlane.xlu0 %9348 }
 0x7c4   : > { %v14151_v46 = vsel %vm14143_vm11, %v13814_v48, %v19408_v21  ;;  %v13822_v57 = vrot.slane %v9352_v49, %v16820_v26  ;;  %v13818_v12 = vrot.slane %v9349_v27, %v16817_v25 }
 0x7c5   : > { %v14187_v52 = vadd.f32 %v14151_v46, %v6461_v19 }
 0x7c6   : > { %v13823_v62 = vsel %vm10318_vm1, %v13822_v57, %v13818_v12 }
 0x7c7   : > { %14193 = vst [vmem:[#allocation2 + $0x10] sm:$0xff] %v14187_v52  ;;  %v9358_v36 = vpop.xlane.xlu1 %9357  ;;  %v9355_v51 = vpop.xlane.xlu0 %9354  ;;  %v6462_v52 = vld [vmem:[#allocation2 + $0x8] sm:$0xff] }
 0x7c8   : > { %v13827_v61 = vrot.slane %v9355_v51, %v16827_v31  ;;  %v13832_v63 = vrot.slane %v9358_v36, %v16830_v32 }
 0x7ca   : > { %v13828_v59 = vsel %vm10325_vm2, %v13827_v61, %v13823_v62 }
 0x7cb   : > { %v9364_v45 = vpop.xlane.xlu1 %9363  ;;  %v9361_v1 = vpop.xlane.xlu0 %9360  ;;  %v13833_v3 = vsel %vm10332_vm3, %v13832_v63, %v13828_v59 }
 0x7cc   : > { %v13837_v21 = vrot.slane %v9361_v1, %v16844_v44  ;;  %v13842_v2 = vrot.slane %v9364_v45, %v16841_v43 }
 0x7ce   : > { %v13838_v15 = vsel %vm10339_vm4, %v13837_v21, %v13833_v3 }
 0x7cf   : > { %v9370_v50 = vpop.xlane.xlu1 %9369  ;;  %v9367_v6 = vpop.xlane.xlu0 %9366  ;;  %v13843_v17 = vsel %vm10346_vm5, %v13842_v2, %v13838_v15 }
 0x7d0   : > { %v13847_v7 = vrot.slane %v9367_v6, %v16856_v54  ;;  %v13852_v9 = vrot.slane %v9370_v50, %v16853_v53 }
 0x7d2   : > { %v13848_v60 = vsel %vm10353_vm6, %v13847_v7, %v13843_v17 }
 0x7d3   : > { %v9376_v14 = vpop.xlane.xlu1 %9375  ;;  %v9373_v16 = vpop.xlane.xlu0 %9372  ;;  %v13853_v0 = vsel %vm10360_vm7, %v13852_v9, %v13848_v60 }
 0x7d4   : > { %v13857_v18 = vrot.slane %v9373_v16, %v16878_v10  ;;  %v13862_v35 = vrot.slane %v9376_v14, %v16870_v4 }
 0x7d6   : > { %v13858_v23 = vsel %vm20395_vm8, %v13857_v18, %v13853_v0 }
 0x7d7   : > { %v9382_v24 = vpop.xlane.xlu1 %9381  ;;  %v9379_v55 = vpop.xlane.xlu0 %9378  ;;  %v13863_v30 = vsel %vm10374_vm9, %v13862_v35, %v13858_v23 }
 0x7d8   : > { %v13867_v5 = vrot.slane %v9379_v55, %v16894_v28  ;;  %v13872_v29 = vrot.slane %v9382_v24, %v16886_v20 }
 0x7da   : > { %v13868_v33 = vsel %vm10381_vm10, %v13867_v5, %v13863_v30 }
 0x7db   : > { %v9388_v8 = vpop.xlane.xlu1 %9387  ;;  %v9385_v11 = vpop.xlane.xlu0 %9384  ;;  %v13873_v40 = vsel %vm20396_vm0, %v13872_v29, %v13868_v33 }
 0x7dc   : > { %v13877_v39 = vrot.slane %v9385_v11, %v16908_v42  ;;  %v13882_v37 = vrot.slane %v9388_v8, %v16902_v38 }
 0x7de   : > { %v13878_v19 = vsel %vm10395_vm12, %v13877_v39, %v13873_v40 }
 0x7df   : > { %v9394_v47 = vpop.xlane.xlu1 %9393  ;;  %v9391_v48 = vpop.xlane.xlu0 %9390  ;;  %v13883_v46 = vsel %vm10402_vm13, %v13882_v37, %v13878_v19 }
 0x7e0   : > { %v13892_v49 = vrot.slane %v9394_v47, %v16918_v56  ;;  %v13887_v27 = vrot.slane %v9391_v48, %v16923_v58 }
 0x7e2   : > { %v13888_v57 = vsel %vm10409_vm14, %v13887_v27, %v13883_v46 }
 0x7e3   : > { %v13893_v12 = vsel %vm10416_vm15, %v13892_v49, %v13888_v57  ;;  %v9400_v36 = vpop.xlane.xlu1 %9399  ;;  %v9397_v51 = vpop.xlane.xlu0 %9396 }
 0x7e4   : > { %v14158_v61 = vsel %vm14143_vm11, %v13893_v12, %v19475_v13  ;;  %v13901_v62 = vrot.slane %v9400_v36, %v16820_v26  ;;  %v13897_v63 = vrot.slane %v9397_v51, %v16817_v25 }
 0x7e5   : > { %v14188_v59 = vadd.f32 %v14158_v61, %v6462_v52 }
 0x7e6   : > { %v13902_v45 = vsel %vm10318_vm1, %v13901_v62, %v13897_v63 }
 0x7e7   : > { %14194 = vst [vmem:[#allocation2 + $0x8] sm:$0xff] %v14188_v59  ;;  %v9445_v1 = vpop.xlane.xlu1 %9444  ;;  %v9403_v21 = vpop.xlane.xlu0 %9402 }
 0x7e8   : > { %v13906_v2 = vrot.slane %v9403_v21, %v16827_v31  ;;  %v13976_v6 = vrot.slane %v9445_v1, %v16817_v25 }
 0x7ea   : > { %v13907_v3 = vsel %vm10325_vm2, %v13906_v2, %v13902_v45 }
 0x7eb   : > { %v9493_v15 = vpop.xlane.xlu1 %9492  ;;  %v9448_v50 = vpop.xlane.xlu0 %9447 }
 0x7ec   : > { %v13980_v13 = vrot.slane %v9448_v50, %v16820_v26  ;;  %v14055_v60 = vrot.slane %v9493_v15, %v16817_v25 }
 0x7ee   : > { %v13981_v7 = vsel %vm10318_vm1, %v13980_v13, %v13976_v6 }
 0x7ef   : > { %v9451_v9 = vpop.xlane.xlu1 %9450  ;;  %v9496_v17 = vpop.xlane.xlu0 %9495 }
 0x7f0   : > { %v13985_v14 = vrot.slane %v9451_v9, %v16827_v31  ;;  %v14059_v16 = vrot.slane %v9496_v17, %v16820_v26 }
 0x7f2   : > { %v13986_v18 = vsel %vm10325_vm2, %v13985_v14, %v13981_v7  ;;  %v14060_v35 = vsel %vm10318_vm1, %v14059_v16, %v14055_v60  ;;  %vm20397_vm1 = vmmov %vm20395_vm8 }
 0x7f3   : > { %v9406_v0 = vpop.xlane.xlu1 %9405  ;;  %v9499_v23 = vpop.xlane.xlu0 %9498 }
 0x7f4   : > { %v13911_v63 = vrot.slane %v9406_v0, %v16830_v32  ;;  %v14064_v59 = vrot.slane %v9499_v23, %v16827_v31 }
 0x7f6   : > { %v13912_v7 = vsel %vm10332_vm3, %v13911_v63, %v13907_v3  ;;  %v14065_v31 = vsel %vm10325_vm2, %v14064_v59, %v14060_v35  ;;  %vm20398_vm2 = vmmov %vm20397_vm1 }
 0x7f7   : > { %v9502_v24 = vpop.xlane.xlu1 %9501  ;;  %v9454_v55 = vpop.xlane.xlu0 %9453 }
 0x7f8   : > { %v14069_v21 = vrot.slane %v9502_v24, %v16830_v32  ;;  %v13990_v2 = vrot.slane %v9454_v55, %v16830_v32 }
 0x7fa   : > { %v14070_v32 = vsel %vm10332_vm3, %v14069_v21, %v14065_v31  ;;  %v13991_v16 = vsel %vm10332_vm3, %v13990_v2, %v13986_v18  ;;  %vm20399_vm3 = vmmov %vm20397_vm1 }
 0x7fb   : > { %v9457_v5 = vpop.xlane.xlu1 %9456  ;;  %v9409_v29 = vpop.xlane.xlu0 %9408 }
 0x7fc   : > { %v13995_v15 = vrot.slane %v9457_v5, %v16844_v44  ;;  %v13916_v50 = vrot.slane %v9409_v29, %v16844_v44 }
 0x7fe   : > { %v13917_v3 = vsel %vm10339_vm4, %v13916_v50, %v13912_v7 }
 0x7ff   : > { %v9412_v30 = vpop.xlane.xlu1 %9411  ;;  %v9505_v33 = vpop.xlane.xlu0 %9504 }
 0x800   : > { %v13921_v6 = vrot.slane %v9412_v30, %v16841_v43  ;;  %v14074_v13 = vrot.slane %v9505_v33, %v16844_v44  ;;  %v13996_v44 = vsel %vm10339_vm4, %v13995_v15, %v13991_v16 }
 0x802   : > { %v14075_v55 = vsel %vm10339_vm4, %v14074_v13, %v14070_v32  ;;  %vm20400_vm4 = vmmov %vm20396_vm0 }
 0x803   : > { %v9508_v8 = vpop.xlane.xlu1 %9507  ;;  %v9460_v11 = vpop.xlane.xlu0 %9459 }
 0x804   : > { %v14079_v9 = vrot.slane %v9508_v8, %v16841_v43  ;;  %v14000_v17 = vrot.slane %v9460_v11, %v16841_v43  ;;  %v13922_v43 = vsel %vm10346_vm5, %v13921_v6, %v13917_v3 }
 0x806   : > { %v14080_v29 = vsel %vm10346_vm5, %v14079_v9, %v14075_v55  ;;  %v14001_v30 = vsel %vm10346_vm5, %v14000_v17, %v13996_v44  ;;  %vm20401_vm5 = vmmov %vm20396_vm0 }
 0x807   : > { %v9463_v39 = vpop.xlane.xlu1 %9462  ;;  %v9415_v25 = vpop.xlane.xlu0 %9414 }
 0x808   : > { %v14005_v0 = vrot.slane %v9463_v39, %v16856_v54  ;;  %v13926_v23 = vrot.slane %v9415_v25, %v16856_v54 }
 0x80a   : > { %v13927_v25 = vsel %vm10353_vm6, %v13926_v23, %v13922_v43 }
 0x80b   : > { %v9418_v37 = vpop.xlane.xlu1 %9417  ;;  %v9511_v40 = vpop.xlane.xlu0 %9510 }
 0x80c   : > { %v13931_v35 = vrot.slane %v9418_v37, %v16853_v53  ;;  %v14084_v24 = vrot.slane %v9511_v40, %v16856_v54  ;;  %v14006_v54 = vsel %vm10353_vm6, %v14005_v0, %v14001_v30 }
 0x80e   : > { %v13932_v40 = vsel %vm10360_vm7, %v13931_v35, %v13927_v25 }
 0x80f   : > { %v9514_v19 = vpop.xlane.xlu1 %9513  ;;  %v9466_v26 = vpop.xlane.xlu0 %9465 }
 0x810   : > { %v14089_v5 = vrot.slane %v9514_v19, %v16853_v53  ;;  %v14010_v18 = vrot.slane %v9466_v26, %v16853_v53  ;;  %v14085_v19 = vsel %vm10353_vm6, %v14084_v24, %v14080_v29  ;;  %vm20402_vm6 = vmmov %vm20396_vm0 }
 0x812   : > { %v14011_v63 = vsel %vm10360_vm7, %v14010_v18, %v14006_v54  ;;  %v6464_v54 = vld [vmem:[#allocation2 + $0x18] sm:$0xff] }
 0x813   : > { %v9469_v47 = vpop.xlane.xlu1 %9468  ;;  %v9421_v48 = vpop.xlane.xlu0 %9420 }
 0x814   : > { %v14015_v33 = vrot.slane %v9469_v47, %v16878_v10  ;;  %v13936_v8 = vrot.slane %v9421_v48, %v16878_v10  ;;  %v14090_v48 = vsel %vm10360_vm7, %v14089_v5, %v14085_v19 }
 0x816   : > { %v13937_v59 = vsel %vm20398_vm2, %v13936_v8, %v13932_v40 }
 0x817   : > { %v19838_v49 = vpop.xlane.xlu1 %9423  ;;  %v19840_v27 = vpop.xlane.xlu0 %9516 }
 0x818   : > { %v13941_v37 = vrot.slane %v19838_v49, %v16870_v4  ;;  %v14094_v53 = vrot.slane %v19840_v27, %v16878_v10  ;;  %v14016_v27 = vsel %vm20397_vm1, %v14015_v33, %v14011_v63 }
 0x81a   : > { %v13942_v15 = vsel %vm10374_vm9, %v13941_v37, %v13937_v59  ;;  %v14095_v50 = vsel %vm20399_vm3, %v14094_v53, %v14090_v48 }
 0x81b   : > { %v19842_v46 = vpop.xlane.xlu1 %9519  ;;  %v19844_v52 = vpop.xlane.xlu0 %9471 }
 0x81c   : > { %v14099_v26 = vrot.slane %v19842_v46, %v16870_v4  ;;  %v14020_v49 = vrot.slane %v19844_v52, %v16870_v4 }
 0x81e   : > { %v14021_v13 = vsel %vm10374_vm9, %v14020_v49, %v14016_v27 }
 0x81f   : > { %v19846_v57 = vpop.xlane.xlu1 %9474  ;;  %v19848_v12 = vpop.xlane.xlu0 %9426 }
 0x820   : > { %v13946_v47 = vrot.slane %v19848_v12, %v16894_v28  ;;  %v14025_v46 = vrot.slane %v19846_v57, %v16894_v28 }
 0x822   : > { %v13947_v6 = vsel %vm10381_vm10, %v13946_v47, %v13942_v15 }
 0x823   : > { %v19850_v36 = vpop.xlane.xlu1 %9429  ;;  %v19852_v51 = vpop.xlane.xlu0 %9522 }
 0x824   : > { %v13951_v10 = vrot.slane %v19850_v36, %v16886_v20  ;;  %v14104_v4 = vrot.slane %v19852_v51, %v16894_v28  ;;  %v14100_v36 = vsel %vm10374_vm9, %v14099_v26, %v14095_v50  ;;  %v14026_v51 = vsel %vm10381_vm10, %v14025_v46, %v14021_v13 }
 0x826   : > { %v13952_v7 = vsel %vm20400_vm4, %v13951_v10, %v13947_v6  ;;  %v14105_v16 = vsel %vm10381_vm10, %v14104_v4, %v14100_v36 }
 0x827   : > { %v19854_v61 = vpop.xlane.xlu1 %9525  ;;  %v19856_v62 = vpop.xlane.xlu0 %9477 }
 0x828   : > { %v14109_v57 = vrot.slane %v19854_v61, %v16886_v20  ;;  %v14030_v31 = vrot.slane %v19856_v62, %v16886_v20 }
 0x82a   : > { %v14031_v3 = vsel %vm20402_vm6, %v14030_v31, %v14026_v51 }
 0x82b   : > { %v19860_v45 = vpop.xlane.xlu1 %9480  ;;  %v19862_v1 = vpop.xlane.xlu0 %9432 }
 0x82c   : > { %v13956_v12 = vrot.slane %v19862_v1, %v16908_v42  ;;  %v14035_v9 = vrot.slane %v19860_v45, %v16908_v42  ;;  %v6463_v45 = vld [vmem:[#allocation2] sm:$0xff] }
 0x82e   : > { %v13957_v17 = vsel %vm10395_vm12, %v13956_v12, %v13952_v7  ;;  %v14036_v43 = vsel %vm10395_vm12, %v14035_v9, %v14031_v3 }
 0x82f   : > { %v9436_v60 = vpop.xlane.xlu1 %9435  ;;  %v19874_v14 = vpop.xlane.xlu0 %9528 }
 0x830   : > { %v13961_v52 = vrot.slane %v9436_v60, %v16902_v38  ;;  %v14114_v28 = vrot.slane %v19874_v14, %v16908_v42  ;;  %v14110_v14 = vsel %vm20401_vm5, %v14109_v57, %v14105_v16 }
 0x832   : > { %v13962_v0 = vsel %vm10402_vm13, %v13961_v52, %v13957_v17  ;;  %v14115_v35 = vsel %vm10395_vm12, %v14114_v28, %v14110_v14 }
 0x833   : > { %v9532_v11 = vpop.xlane.xlu1 %9531  ;;  %v9484_v39 = vpop.xlane.xlu0 %9483 }
 0x834   : > { %v14119_v61 = vrot.slane %v9532_v11, %v16902_v38  ;;  %v14040_v20 = vrot.slane %v9484_v39, %v16902_v38  ;;  %v6465_v39 = vld [vmem:[#allocation2 + $0x20] sm:$0xff] }
 0x836   : > { %v14120_v38 = vsel %vm10402_vm13, %v14119_v61, %v14115_v35  ;;  %v14041_v29 = vsel %vm10402_vm13, %v14040_v20, %v14036_v43 }
 0x837   : > { %v9487_v21 = vpop.xlane.xlu1 %9486  ;;  %v9439_v2 = vpop.xlane.xlu0 %9438 }
 0x838   : > { %v13966_v1 = vrot.slane %v9439_v2, %v16923_v58  ;;  %v14045_v23 = vrot.slane %v9487_v21, %v16923_v58 }
 0x83a   : > { %v13967_v42 = vsel %vm10409_vm14, %v13966_v1, %v13962_v0  ;;  %v14046_v8 = vsel %vm10409_vm14, %v14045_v23, %v14041_v29 }
 0x83b   : > { %v9442_v60 = vpop.xlane.xlu1 %9441  ;;  %v9535_v32 = vpop.xlane.xlu0 %9534 }
 0x83c   : > { %v13971_v62 = vrot.slane %v9442_v60, %v16918_v56  ;;  %v14124_v44 = vrot.slane %v9535_v32, %v16923_v58 }
 0x83e   : > { %v13972_v24 = vsel %vm10416_vm15, %v13971_v62, %v13967_v42  ;;  %v14125_v11 = vsel %vm10409_vm14, %v14124_v44, %v14120_v38 }
 0x83f   : > { %v14165_v55 = vsel %vm14143_vm11, %v13972_v24, %v19546_v41  ;;  %v9538_v5 = vpop.xlane.xlu1 %9537  ;;  %v9490_v18 = vpop.xlane.xlu0 %9489 }
 0x840   : > { %v14189_v30 = vadd.f32 %v14165_v55, %v6463_v45  ;;  %v14129_v58 = vrot.slane %v9538_v5, %v16918_v56  ;;  %v14050_v33 = vrot.slane %v9490_v18, %v16918_v56 }
 0x842   : > { %14195 = vst [vmem:[#allocation2] sm:$0xff] %v14189_v30  ;;  %v14130_v25 = vsel %vm10416_vm15, %v14129_v58, %v14125_v11  ;;  %v14051_v41 = vsel %vm10416_vm15, %v14050_v33, %v14046_v8  ;;  %14201 = sbr.rel (%p14665_p5) target bundleno = 2386 (0x952), region = 96 }
 0x843   : > { %v14179_v37 = vsel %vm14143_vm11, %v14130_v25, %v19678_v22  ;;  %v14172_v53 = vsel %vm14143_vm11, %v14051_v41, %v19613_v34 }
 0x844   : > { %v14191_v40 = vadd.f32 %v14179_v37, %v6465_v39  ;;  %v14190_v19 = vadd.f32 %v14172_v53, %v6464_v54 }
 0x846   : > { %14197 = vst [vmem:[#allocation2 + $0x20] sm:$0xff] %v14191_v40  ;;  %14196 = vst [vmem:[#allocation2 + $0x18] sm:$0xff] %v14190_v19 }
 0x847   : > { %v14257_v56 = vld [vmem:[%s20319_s2 + $0xf8] sm:$0xff]  ;;  %v14256_v22 = vld [vmem:[%s20319_s2 + $0xf0] sm:$0xff]  ;;  %v14255_v63 = vld [vmem:[%s20319_s2 + $0xe8] sm:$0xff] }
 0x848   : > { %v14241_v26 = vld [vmem:[%s20319_s2 + $0x78] sm:$0xff]  ;;  %14671 = vmatprep.subr.mxu0 %v14257_v56  ;;  %v14240_v47 = vld [vmem:[%s20319_s2 + $0x70] sm:$0xff]  ;;  %v14239_v10 = vld [vmem:[%s20319_s2 + $0x68] sm:$0xff] }
 0x849   : > { %v14289_v34 = vld [vmem:[%s20319_s2 + $0x1f8] sm:$0xff]  ;;  %14672 = vmatpush3.msra.mxu0 %v14241_v26  ;;  %v14288_v49 = vld [vmem:[%s20319_s2 + $0x1f0] sm:$0xff]  ;;  %v14287_v59 = vld [vmem:[%s20319_s2 + $0x1e8] sm:$0xff] }
 0x84a   : > { %v14273_v48 = vld [vmem:[%s20319_s2 + $0x178] sm:$0xff]  ;;  %14706 = vmatprep.subr.mxu1 %v14289_v34  ;;  %14673 = vmatprep.subr.mxu0 %v14256_v22  ;;  %v14272_v27 = vld [vmem:[%s20319_s2 + $0x170] sm:$0xff]  ;;  %v14254_v46 = vld [vmem:[%s20319_s2 + $0xe0] sm:$0xff] }
 0x84b   : > { %14707 = vmatpush3.msra.mxu1 %v14273_v48  ;;  %14674 = vmatpush3.msra.mxu0 %v14240_v47  ;;  %v14271_v12 = vld [vmem:[%s20319_s2 + $0x168] sm:$0xff]  ;;  %v14238_v21 = vld [vmem:[%s20319_s2 + $0x60] sm:$0xff]  ;;  %v14253_v15 = vld [vmem:[%s20319_s2 + $0xd8] sm:$0xff] }
 0x84c   : > { %14708 = vmatprep.subr.mxu1 %v14288_v49  ;;  %14675 = vmatprep.subr.mxu0 %v14255_v63  ;;  %v14286_v2 = vld [vmem:[%s20319_s2 + $0x1e0] sm:$0xff]  ;;  %v14237_v4 = vld [vmem:[%s20319_s2 + $0x58] sm:$0xff]  ;;  %v14252_v36 = vld [vmem:[%s20319_s2 + $0xd0] sm:$0xff] }
 0x84d   : > { %14709 = vmatpush3.msra.mxu1 %v14272_v27  ;;  %14676 = vmatpush3.msra.mxu0 %v14239_v10  ;;  %v14270_v50 = vld [vmem:[%s20319_s2 + $0x160] sm:$0xff]  ;;  %v14285_v52 = vld [vmem:[%s20319_s2 + $0x1d8] sm:$0xff]  ;;  %v14236_v57 = vld [vmem:[%s20319_s2 + $0x50] sm:$0xff] }
 0x84e   : > { %14710 = vmatprep.subr.mxu1 %v14287_v59  ;;  %14677 = vmatprep.subr.mxu0 %v14254_v46  ;;  %v14269_v6 = vld [vmem:[%s20319_s2 + $0x158] sm:$0xff]  ;;  %v14284_v1 = vld [vmem:[%s20319_s2 + $0x1d0] sm:$0xff]  ;;  %v14251_v13 = vld [vmem:[%s20319_s2 + $0xc8] sm:$0xff] }
 0x84f   : > { %14711 = vmatpush3.msra.mxu1 %v14271_v12  ;;  %14678 = vmatpush3.msra.mxu0 %v14238_v21  ;;  %v14268_v7 = vld [vmem:[%s20319_s2 + $0x150] sm:$0xff]  ;;  %v14235_v31 = vld [vmem:[%s20319_s2 + $0x48] sm:$0xff]  ;;  %v14250_v51 = vld [vmem:[%s20319_s2 + $0xc0] sm:$0xff] }
 0x850   : > { %14712 = vmatprep.subr.mxu1 %v14286_v2  ;;  %14679 = vmatprep.subr.mxu0 %v14253_v15  ;;  %v14283_v28 = vld [vmem:[%s20319_s2 + $0x1c8] sm:$0xff]  ;;  %v14234_v17 = vld [vmem:[%s20319_s2 + $0x40] sm:$0xff]  ;;  %v14249_v60 = vld [vmem:[%s20319_s2 + $0xb8] sm:$0xff] }
 0x851   : > { %14713 = vmatpush3.msra.mxu1 %v14270_v50  ;;  %14680 = vmatpush3.msra.mxu0 %v14237_v4  ;;  %v14267_v9 = vld [vmem:[%s20319_s2 + $0x148] sm:$0xff]  ;;  %v14282_v61 = vld [vmem:[%s20319_s2 + $0x1c0] sm:$0xff]  ;;  %v14233_v16 = vld [vmem:[%s20319_s2 + $0x38] sm:$0xff] }
 0x852   : > { %14714 = vmatprep.subr.mxu1 %v14285_v52  ;;  %14681 = vmatprep.subr.mxu0 %v14252_v36  ;;  %v14266_v32 = vld [vmem:[%s20319_s2 + $0x140] sm:$0xff]  ;;  %v14281_v0 = vld [vmem:[%s20319_s2 + $0x1b8] sm:$0xff]  ;;  %v14248_v20 = vld [vmem:[%s20319_s2 + $0xb0] sm:$0xff] }
 0x853   : > { %14715 = vmatpush3.msra.mxu1 %v14269_v6  ;;  %14682 = vmatpush3.msra.mxu0 %v14236_v57  ;;  %v14265_v62 = vld [vmem:[%s20319_s2 + $0x138] sm:$0xff]  ;;  %v14232_v14 = vld [vmem:[%s20319_s2 + $0x30] sm:$0xff]  ;;  %v14247_v42 = vld [vmem:[%s20319_s2 + $0xa8] sm:$0xff] }
 0x854   : > { %14716 = vmatprep.subr.mxu1 %v14284_v1  ;;  %14683 = vmatprep.subr.mxu0 %v14251_v13  ;;  %v14280_v23 = vld [vmem:[%s20319_s2 + $0x1b0] sm:$0xff]  ;;  %v14231_v44 = vld [vmem:[%s20319_s2 + $0x28] sm:$0xff]  ;;  %v14246_v35 = vld [vmem:[%s20319_s2 + $0xa0] sm:$0xff] }
 0x855   : > { %14717 = vmatpush3.msra.mxu1 %v14268_v7  ;;  %14684 = vmatpush3.msra.mxu0 %v14235_v31  ;;  %v14264_v45 = vld [vmem:[%s20319_s2 + $0x130] sm:$0xff]  ;;  %v14279_v3 = vld [vmem:[%s20319_s2 + $0x1a8] sm:$0xff]  ;;  %v14230_v38 = vld [vmem:[%s20319_s2 + $0x20] sm:$0xff] }
 0x856   : > { %14718 = vmatprep.subr.mxu1 %v14283_v28  ;;  %14685 = vmatprep.subr.mxu0 %v14250_v51  ;;  %v14263_v24 = vld [vmem:[%s20319_s2 + $0x128] sm:$0xff]  ;;  %v14203_v43 = vld [vmem:[#allocation2 + $0x10] sm:$0xff]  ;;  %v14278_v55 = vld [vmem:[%s20319_s2 + $0x1a0] sm:$0xff] }
 0x857   : > { %14719 = vmatpush3.msra.mxu1 %v14267_v9  ;;  %14686 = vmatpush3.msra.mxu0 %v14234_v17  ;;  %v14245_v5 = vld [vmem:[%s20319_s2 + $0x98] sm:$0xff]  ;;  %v14262_v18 = vld [vmem:[%s20319_s2 + $0x120] sm:$0xff]  ;;  %v14202_v29 = vld [vmem:[#allocation2 + $0x28] sm:$0xff]  ;;  %v14209_v8 = vmul.f32 0.010204081, %v14203_v43 }
 0x858   : > { %14720 = vmatprep.subr.mxu1 %v14282_v61  ;;  %14687 = vmatprep.subr.mxu0 %v14249_v60  ;;  %v14229_v30 = vld [vmem:[%s20319_s2 + $0x18] sm:$0xff]  ;;  %v14244_v58 = vld [vmem:[%s20319_s2 + $0x90] sm:$0xff]  ;;  %v14215_v39 = vld [vmem:[%s16658_s29 + $0x8] sm:$0xff]  ;;  %v14208_v37 = vmul.f32 0.010204081, %v14202_v29 }
 0x859   : > { %14721 = vmatpush3.msra.mxu1 %v14266_v32  ;;  %14688 = vmatpush3.msra.mxu0 %v14233_v16  ;;  %v14277_v33 = vld [vmem:[%s20319_s2 + $0x198] sm:$0xff]  ;;  %v14205_v54 = vld [vmem:[#allocation2] sm:$0xff]  ;;  %v14228_v25 = vld [vmem:[%s20319_s2 + $0x10] sm:$0xff]  ;;  %v14221_v34 = vadd.f32 %v14215_v39, %v14209_v8 }
 0x85a   : > { %14722 = vmatprep.subr.mxu1 %v14281_v0  ;;  %14689 = vmatprep.subr.mxu0 %v14248_v20  ;;  %v14261_v11 = vld [vmem:[%s20319_s2 + $0x118] sm:$0xff]  ;;  %v14276_v41 = vld [vmem:[%s20319_s2 + $0x190] sm:$0xff]  ;;  %v14204_v53 = vld [vmem:[#allocation2 + $0x8] sm:$0xff]  ;;  %v14211_v47 = vmul.f32 0.010204081, %v14205_v54 }
 0x85b   : > { %14723 = vmatpush3.msra.mxu1 %v14265_v62  ;;  %14690 = vmatpush3.msra.mxu0 %v14232_v14  ;;  %v14243_v40 = vld [vmem:[%s20319_s2 + $0x88] sm:$0xff]  ;;  %v14260_v19 = vld [vmem:[%s20319_s2 + $0x110] sm:$0xff]  ;;  %v14214_v56 = vld [vmem:[%s16658_s29] sm:$0xff]  ;;  %v14210_v49 = vmul.f32 0.010204081, %v14204_v53 }
 0x85c   : > { %14724 = vmatprep.subr.mxu1 %v14280_v23  ;;  %14691 = vmatprep.subr.mxu0 %v14247_v42  ;;  %v14227_v26 = vld [vmem:[%s20319_s2 + $0x8] sm:$0xff]  ;;  %v14242_v48 = vld [vmem:[%s20319_s2 + $0x80] sm:$0xff]  ;;  %v14217_v63 = vld [vmem:[%s16658_s29 + $0x18] sm:$0xff]  ;;  %v14220_v59 = vadd.f32 %v14214_v56, %v14208_v37 }
 0x85d   : > { %14725 = vmatpush3.msra.mxu1 %v14264_v45  ;;  %14692 = vmatpush3.msra.mxu0 %v14231_v44  ;;  %v14275_v22 = vld [vmem:[%s20319_s2 + $0x188] sm:$0xff]  ;;  %v14226_v10 = vld [vmem:[%s20319_s2] sm:$0xff]  ;;  %v14216_v46 = vld [vmem:[%s16658_s29 + $0x10] sm:$0xff]  ;;  %v14223_v15 = vadd.f32 %v14217_v63, %v14211_v47 }
 0x85e   : > { %14726 = vmatprep.subr.mxu1 %v14279_v3  ;;  %14693 = vmatprep.subr.mxu0 %v14246_v35  ;;  %v14259_v27 = vld [vmem:[%s20319_s2 + $0x108] sm:$0xff]  ;;  %v14274_v12 = vld [vmem:[%s20319_s2 + $0x180] sm:$0xff]  ;;  %v14321_v21 = vld [vmem:[%s20319_s2 + $0x2f8] sm:$0xff]  ;;  %v14222_v4 = vadd.f32 %v14216_v46, %v14210_v49 }
 0x85f   : > { %14727 = vmatpush3.msra.mxu1 %v14263_v24  ;;  %14694 = vmatpush3.msra.mxu0 %v14230_v38  ;;  %v14258_v2 = vld [vmem:[%s20319_s2 + $0x100] sm:$0xff]  ;;  %v14305_v50 = vld [vmem:[%s20319_s2 + $0x278] sm:$0xff]  ;;  %v14320_v52 = vld [vmem:[%s20319_s2 + $0x2f0] sm:$0xff] }
 0x860   : > { %14728 = vmatprep.subr.mxu1 %v14278_v55  ;;  %14695 = vmatprep.subr.mxu0 %v14245_v5  ;;  %v14304_v36 = vld [vmem:[%s20319_s2 + $0x270] sm:$0xff]  ;;  %v14207_v6 = vld [vmem:[#allocation2 + $0x20] sm:$0xff]  ;;  %v14319_v57 = vld [vmem:[%s20319_s2 + $0x2e8] sm:$0xff] }
 0x861   : > { %14729 = vmatpush3.msra.mxu1 %v14262_v18  ;;  %14696 = vmatpush3.msra.mxu0 %v14229_v30  ;;  %v14213_v1 = vmul.f32 0.010204081, %v14207_v6  ;;  %v14219_v13 = vld [vmem:[%s16658_s29 + $0x28] sm:$0xff]  ;;  %v14318_v31 = vld [vmem:[%s20319_s2 + $0x2e0] sm:$0xff]  ;;  %v14317_v9 = vld [vmem:[%s20319_s2 + $0x2d8] sm:$0xff] }
 0x862   : > { %14730 = vmatprep.subr.mxu1 %v14277_v33  ;;  %14697 = vmatprep.subr.mxu0 %v14244_v58  ;;  %v14303_v7 = vld [vmem:[%s20319_s2 + $0x268] sm:$0xff]  ;;  %v14302_v51 = vld [vmem:[%s20319_s2 + $0x260] sm:$0xff]  ;;  %v14301_v17 = vld [vmem:[%s20319_s2 + $0x258] sm:$0xff] }
 0x863   : > { %14731 = vmatpush3.msra.mxu1 %v14261_v11  ;;  %14698 = vmatpush3.msra.mxu0 %v14228_v25  ;;  %v14225_v28 = vadd.f32 %v14219_v13, %v14213_v1  ;;  %v14316_v61 = vld [vmem:[%s20319_s2 + $0x2d0] sm:$0xff]  ;;  %v14315_v32 = vld [vmem:[%s20319_s2 + $0x2c8] sm:$0xff]  ;;  %v14314_v0 = vld [vmem:[%s20319_s2 + $0x2c0] sm:$0xff] }
 0x864   : > { %14732 = vmatprep.subr.mxu1 %v14276_v41  ;;  %14699 = vmatprep.subr.mxu0 %v14243_v40  ;;  %v14300_v60 = vld [vmem:[%s20319_s2 + $0x250] sm:$0xff]  ;;  %v14299_v16 = vld [vmem:[%s20319_s2 + $0x248] sm:$0xff]  ;;  %v14298_v20 = vld [vmem:[%s20319_s2 + $0x240] sm:$0xff] }
 0x865   : > { %14733 = vmatpush3.msra.mxu1 %v14260_v19  ;;  %14700 = vmatpush3.msra.mxu0 %v14227_v26  ;;  %v14313_v62 = vld [vmem:[%s20319_s2 + $0x2b8] sm:$0xff]  ;;  %v14312_v23 = vld [vmem:[%s20319_s2 + $0x2b0] sm:$0xff]  ;;  %v14311_v45 = vld [vmem:[%s20319_s2 + $0x2a8] sm:$0xff] }
 0x866   : > { %14734 = vmatprep.subr.mxu1 %v14275_v22  ;;  %14701 = vmatprep.subr.mxu0 %v14242_v48  ;;  %v14297_v14 = vld [vmem:[%s20319_s2 + $0x238] sm:$0xff]  ;;  %v14296_v42 = vld [vmem:[%s20319_s2 + $0x230] sm:$0xff]  ;;  %v14295_v44 = vld [vmem:[%s20319_s2 + $0x228] sm:$0xff] }
 0x867   : > { %14393 = vmatprep.mubr.f32.mxu0 %v14221_v34  ;;  %14702 = vmatpush3.msra.mxu0 %v14226_v10  ;;  %v14310_v3 = vld [vmem:[%s20319_s2 + $0x2a0] sm:$0xff]  ;;  %v14309_v24 = vld [vmem:[%s20319_s2 + $0x298] sm:$0xff]  ;;  %v14308_v55 = vld [vmem:[%s20319_s2 + $0x290] sm:$0xff] }
 0x868   : > { %14735 = vmatpush3.msra.mxu1 %v14259_v27  ;;  %14394 = vmatmul.mubr.f32.vlgmr.msra.gmra.mxu0 %v14220_v59  ;;  %v14294_v35 = vld [vmem:[%s20319_s2 + $0x220] sm:$0xff]  ;;  %v14206_v43 = vld [vmem:[#allocation2 + $0x18] sm:$0xff]  ;;  %v14292_v5 = vld [vmem:[%s20319_s2 + $0x210] sm:$0xff] }
 0x869   : > { %14736 = vmatprep.subr.mxu1 %v14274_v12  ;;  %14741 = vmatprep.subr.mxu0 %v14321_v21  ;;  %v14293_v38 = vld [vmem:[%s20319_s2 + $0x218] sm:$0xff]  ;;  %v14212_v18 = vmul.f32 0.010204081, %v14206_v43  ;;  %v14307_v29 = vld [vmem:[%s20319_s2 + $0x288] sm:$0xff]  ;;  %v14218_v30 = vld [vmem:[%s16658_s29 + $0x20] sm:$0xff] }
 0x86a   : > { %14737 = vmatpush3.msra.mxu1 %v14258_v2  ;;  %14463 = vmatprep.mubr.f32.mxu1 %v14223_v15  ;;  %v14291_v58 = vld [vmem:[%s20319_s2 + $0x208] sm:$0xff]  ;;  %v14306_v33 = vld [vmem:[%s20319_s2 + $0x280] sm:$0xff] }
 0x86b   : > { %14742 = vmatpush3.msra.mxu0 %v14305_v50  ;;  %14464 = vmatmul.mubr.f32.vlgmr.msra.gmra.mxu1 %v14222_v4  ;;  %v14290_v8 = vld [vmem:[%s20319_s2 + $0x200] sm:$0xff]  ;;  %v14224_v11 = vadd.f32 %v14218_v30, %v14212_v18 }
 0x86c   : > { %14743 = vmatprep.subr.mxu0 %v14320_v52  ;;  %14533 = vmatprep.mubr.f32.mxu0 %v14225_v28  ;;  %v14666_v37 = vld [vmem:[%s20320_s3] ss:$0 sm:$0xff] }
 0x86d   : > { %14744 = vmatpush3.msra.mxu0 %v14304_v36 }
 0x86e   : > { %14745 = vmatprep.subr.mxu0 %v14319_v57 }
 0x86f   : > { %14746 = vmatpush3.msra.mxu0 %v14303_v7 }
 0x870   : > { %14747 = vmatprep.subr.mxu0 %v14318_v31 }
 0x871   : > { %14748 = vmatpush3.msra.mxu0 %v14302_v51 }
 0x872   : > { %14749 = vmatprep.subr.mxu0 %v14317_v9 }
 0x873   : > { %14750 = vmatpush3.msra.mxu0 %v14301_v17 }
 0x874   : > { %14751 = vmatprep.subr.mxu0 %v14316_v61 }
 0x875   : > { %14752 = vmatpush3.msra.mxu0 %v14300_v60 }
 0x876   : > { %14753 = vmatprep.subr.mxu0 %v14315_v32 }
 0x877   : > { %14754 = vmatpush3.msra.mxu0 %v14299_v16 }
 0x878   : > { %14755 = vmatprep.subr.mxu0 %v14314_v0 }
 0x879   : > { %14756 = vmatpush3.msra.mxu0 %v14298_v20 }
 0x87a   : > { %14757 = vmatprep.subr.mxu0 %v14313_v62 }
 0x87b   : > { %14758 = vmatpush3.msra.mxu0 %v14297_v14 }
 0x87c   : > { %14759 = vmatprep.subr.mxu0 %v14312_v23 }
 0x87d   : > { %14760 = vmatpush3.msra.mxu0 %v14296_v42 }
 0x87e   : > { %14761 = vmatprep.subr.mxu0 %v14311_v45 }
 0x87f   : > { %14762 = vmatpush3.msra.mxu0 %v14295_v44 }
 0x880   : > { %14763 = vmatprep.subr.mxu0 %v14310_v3 }
 0x881   : > { %14764 = vmatpush3.msra.mxu0 %v14294_v35 }
 0x882   : > { %14765 = vmatprep.subr.mxu0 %v14309_v24 }
 0x883   : > { %14766 = vmatpush3.msra.mxu0 %v14293_v38 }
 0x884   : > { %14767 = vmatprep.subr.mxu0 %v14308_v55 }
 0x885   : > { %14768 = vmatpush3.msra.mxu0 %v14292_v5 }
 0x886   : > { %14769 = vmatprep.subr.mxu0 %v14307_v29 }
 0x887   : > { %14770 = vmatpush3.msra.mxu0 %v14291_v58 }
 0x888   : > { %14771 = vmatprep.subr.mxu0 %v14306_v33 }
 0x889   : > { %14772 = vmatpush3.msra.mxu0 %v14290_v8 }
 0x88a   : > { %14534 = vmatmul.mubr.f32.vlgmr.msra.gmra.mxu0 %v14224_v11 }
 0x928   : > { %v14703_v39 = vpop.f32.mrf.mxu0 }
 0x92a   : > { %v14704_v54 = vpop.f32.mrf.mxu0 }
 0x92b   : > { %v14738_v25 = vpop.f32.mrf.mxu1  ;;  %v14705_v41 = vadd.f32 %v14704_v54, %v14703_v39 }
 0x92d   : > { %v14739_v53 = vpop.f32.mrf.mxu1  ;;  %v14396_v40 = vadd.f32 %v14705_v41, %v14666_v37 }
 0x92e   : > { %v14740_v19 = vadd.f32 %v14739_v53, %v14738_v25 }
 0x930   : > { %v14466_v22 = vadd.f32 %v14740_v19, %v14396_v40 }
 0x94a   : > { %v14773_v56 = vpop.f32.mrf.mxu0 }
 0x94c   : > { %v14774_v26 = vpop.f32.mrf.mxu0 }
 0x94d   : > { %v14775_v34 = vadd.f32 %v14774_v26, %v14773_v56 }
 0x94f   : > { %v14536_v47 = vadd.f32 %v14775_v34, %v14466_v22 }
 0x951   : > { %14539 = vst [vmem:[%s20403_s6] sm:$0xff] %v14536_v47 }
 0x952 PF: > { %s14668_s14 = sshll.u32 %s14965_s21, 7  ;;  %s20404_s18 = scalar_lea.vmem [#allocation4], %s16651_s26 }
 0x953   : > { %s14552_s20 = scalar_lea.hbm %s20321_s4, %s14668_s14  ;;  %s14554_s13 = sshll.u32 %s20404_s18, 4  ;;  %s14555_s13 = int_to_ptr.vmem [resolvable:$true] %s14554_s13 }
 0x954   : > { %s20405_s25 = sand.u32 1, %s14945_s16   ;;  %s14869_s8 = scalar_lea.vmem %s14555_s13, 128 }
 0x955   : > { %s14541_s30 = scalar_lea.sflag [#allocation5], %s20405_s25  ;;  %p14870_p6 = scmp.ne.s32.totalorder %s14555_s13, %s14869_s8 }
 0x956   : > { %s14980_s29 = smov [#allocation4]  }
 0x957   : > { %p14871_p8 = pnand %p14870_p6, %p15078_p7  ;;  %s14873_s9 = sshll.u32 %s14980_s29, 4  ;;  %s14874_s9 = int_to_ptr.vmem [resolvable:$false] %s14873_s9 }
 0x958   : > { %s14875_s6 = scalar_lea.vmem %s14874_s9, 256  ;;  %p14876_p10 = scmp.lt.s32.totalorder %s14555_s13, %s14874_s9 }
 0x959   : > { %p14872_p9 = pneg %p14871_p8  ;;  %p14877_p11 = scmp.lt.s32.totalorder %s14875_s6, %s14869_s8 }
 0x95b   : > { %p14878_p13 = por %p14877_p11, %p14876_p10 }
 0x95d   : > { %p14879_p0 = pnand %p14878_p13, %p14872_p9 }
 0x95f   : > { %14882 = shalt.err (!%p14879_p0)
}
 0x960   : > { %s14883_s21 = scalar_lea.hbm %s14552_s20, 128  ;;  %s14887_s5 = scalar_lea.hbm %s20321_s4, 256 }
 0x961   : > { %p14884_p1 = scmp.ne.s32.totalorder %s14552_s20, %s14883_s21  ;;  %p14888_p4 = scmp.lt.s32.totalorder %s14552_s20, %s20321_s4 }
 0x962   : > { %p14889_p5 = scmp.lt.s32.totalorder %s14887_s5, %s14883_s21 }
 0x963   : > { %p14885_p2 = pnand %p14884_p1, %p15078_p7 }
 0x964   : > { %p14890_p6 = por %p14889_p5, %p14888_p4 }
 0x965   : > { %p14886_p3 = pneg %p14885_p2 }
 0x967   : > { %p14891_p8 = pnand %p14890_p6, %p14886_p3 }
 0x969   : > { %14894 = shalt.err (!%p14891_p8)
}
 0x96a   : > { %14781 = dma.vmem_to_hbm [thread:$0]  (%p15078_p7), %s14555_s13, 128, %s14552_s20, %s14541_s30  }
 0x96b PF: > { %p14787_p9 = scmp.ge.s32.totalorder %s14977_s24, 2  ;;  %s14566_s25 = sand.u32 1, %s14941_s15  }
 0x96c   : > { %s14567_s8 = scalar_lea.sflag [#allocation5], %s14566_s25 }
 0x96d   : > { %p14784_p10 = pnand %p14787_p9, %p15086_p12 }
 0x96f   : > { %p14785_p11 = pneg %p14784_p10 }
 0x971   : > { %14936 = dma.done.wait (%p14785_p11), %s14567_s8, 128  }
 0x972   : > { %14938 = vsyncadd (%p14785_p11), %s14567_s8, 4294967168  ;;  %s17_s24 = sadd.s32 1, %s14977_s24   ;;  %s20406_s15 = smov %s14945_s16 }
 0x973   : > { %p14_p13 = scmp.ge.s32.totalorder %s17_s24, 6   ;;  %s20407_s16 = smov %s14949_s17 }
 0x974   : > { %s20408_s17 = smov %s15091_s11  ;;  %s20409_s18 = smov %s14957_s19 }
 0x975   : > { %s20410_s19 = smov %s15094_s12  ;;  %s20411_s20 = smov %s14969_s22 }
 0x976   : > { %s20412_s21 = smov %s14973_s23  ;;  %s20413_s22 = smov %s20416_s27 }
 0x977   : > { %s20414_s23 = smov %s20420_s28  ;;  %16 = sbr.rel (!%p14_p13) target bundleno = 8 (0x8), region = 145 }
 0x97c   :  { %14572 = vsyncpa [#allocation5], 1 }
 0x97d   :  { %14574 = vsyncpa [#allocation5 + $0x1], 1 }

</bundles_post_ra>
